<compile_context>
chip_gen: v5e
topology: v5e:2x2
jax: 0.10.0
libtpu: 0.0.40
codegen_flags: <defaults>
</compile_context>

<pallas_src>
import jax
import jax.numpy as jnp
from jax import lax
from jax.experimental import pallas as pl
from jax.experimental.pallas import tpu as pltpu

HIDDEN = 32            # GRU / LSTM hidden size
F_IN = 4               # GCN input feature dim
F_HID = 16             # GCN hidden feature dim
F_OUT = 5              # GCN output feature dim
MLP_HID = 32           # MLP hidden dim
MLP_IN = 3 + F_OUT     # MLP input features (3 RNN heads + GCN features)
G = (3 + 3 + 4) * HIDDEN   # packed gate width: gru1(3H) | gru2(3H) | lstm(4H)


def _vmem_spec():
    return pl.BlockSpec(memory_space=pltpu.MemorySpace.VMEM)


# ----------------------------------------------------------------------------
# Fused Generator kernel.
# ----------------------------------------------------------------------------
def generator_kernel(x_ts_ref, x_f_ref, a1_ref, a2_ref,
                     w_ih_ref, w_hh_ref, b_gx_ref, b_hn_ref,
                     w_out_ref, b_out_ref,
                     gw1_ref, gb1_ref, gw2_ref, gb2_ref,
                     mw1_ref, mb1_ref, mw2_ref, mb2_ref,
                     out_ref, cat_ref):
    B, T, _ = x_ts_ref.shape
    H = HIDDEN

    for b in range(B):                       # tiny static batch -> unrolled
        # ------------- fused GRU + GRU + LSTM recurrence -------------------
        # input_size == 1: the input projection for every timestep and all
        # three RNNs is a single (T, 3) @ (3, G) matmul; b_ih (+ foldable
        # parts of b_hh) are already baked into b_gx.
        gx_all = (jnp.dot(x_ts_ref[b], w_ih_ref[...],
                          preferred_element_type=jnp.float32)
                  + b_gx_ref[...])                               # (T, G)

        h = jnp.zeros((1, 3 * H), jnp.float32)                   # [h1|h2|hL]
        c = jnp.zeros((1, H), jnp.float32)                       # LSTM cell
        for t in range(T):                                       # static unroll
            gx = gx_all[t:t + 1, :]                              # (1, G)
            # one block-diagonal hidden matmul drives all three RNNs
            gh = jnp.dot(h, w_hh_ref[...],
                         preferred_element_type=jnp.float32)     # (1, G)

            new_h = []
            for k in range(2):                                   # the two GRUs
                o = 3 * H * k
                h_k = h[:, k * H:(k + 1) * H]
                r = jax.nn.sigmoid(gx[:, o:o + H] + gh[:, o:o + H])
                z = jax.nn.sigmoid(gx[:, o + H:o + 2 * H]
                                   + gh[:, o + H:o + 2 * H])
                n = jnp.tanh(gx[:, o + 2 * H:o + 3 * H]
                             + r * (gh[:, o + 2 * H:o + 3 * H]
                                    + b_hn_ref[:, k * H:(k + 1) * H]))
                new_h.append((1.0 - z) * n + z * h_k)

            o = 6 * H                                            # LSTM head
            g = gx[:, o:o + 4 * H] + gh[:, o:o + 4 * H]
            i_g = jax.nn.sigmoid(g[:, 0:H])
            f_g = jax.nn.sigmoid(g[:, H:2 * H])
            g_g = jnp.tanh(g[:, 2 * H:3 * H])
            o_g = jax.nn.sigmoid(g[:, 3 * H:4 * H])
            c = f_g * c + i_g * g_g
            new_h.append(o_g * jnp.tanh(c))

            h = jnp.concatenate(new_h, axis=1)                   # (1, 3H)
            # all three per-timestep Linear(32 -> 1) heads in one matmul
            cat_ref[b, t:t + 1, 0:3] = (
                jnp.dot(h, w_out_ref[...],
                        preferred_element_type=jnp.float32) + b_out_ref[...])

        # ------------- two-layer GCN as plain 2-D matmuls ------------------
        xg = x_f_ref[b]                                          # (N, F_IN)
        h1 = jax.nn.relu(
            jnp.dot(jnp.dot(a1_ref[...], xg,
                            preferred_element_type=jnp.float32),
                    gw1_ref[...], preferred_element_type=jnp.float32)
            + gb1_ref[...])                                      # (N, F_HID)
        cat_ref[b, :, 3:3 + F_OUT] = (
            jnp.dot(jnp.dot(a2_ref[...], h1,
                            preferred_element_type=jnp.float32),
                    gw2_ref[...], preferred_element_type=jnp.float32)
            + gb2_ref[...])                                      # (N, F_OUT)

        # ------------- MLP head --------------------------------------------
        xm = cat_ref[b]                                          # (T, MLP_IN)
        hm = jax.nn.relu(jnp.dot(xm, mw1_ref[...],
                                 preferred_element_type=jnp.float32)
                         + mb1_ref[...])
        out_ref[b] = (jnp.dot(hm, mw2_ref[...],
                              preferred_element_type=jnp.float32)
                      + mb2_ref[...])                            # (T, 1)


def _generator_forward(packed, x_ts, x_f, kg_1, kg_2):
    B, T, _ = x_ts.shape
    gcn, mlp = packed['gcn'], packed['mlp']
    return pl.pallas_call(
        generator_kernel,
        out_shape=jax.ShapeDtypeStruct((B, T, 1), jnp.float32),
        in_specs=[_vmem_spec()] * 18,
        out_specs=_vmem_spec(),
        scratch_shapes=[pltpu.VMEM((B, T, MLP_IN), jnp.float32)],
    )(x_ts, x_f, kg_1, kg_2,
      packed['w_ih'], packed['w_hh'], packed['b_gx'], packed['b_hn'],
      packed['w_out'], packed['b_out'],
      gcn['w1'], gcn['b1'], gcn['w2'], gcn['b2'],
      mlp['w1'], mlp['b1'], mlp['w2'], mlp['b2'])


generator_forward = jax.jit(_generator_forward)


# ----------------------------------------------------------------------------
# Deterministic raw parameters (same layout as the reference modules).
# ----------------------------------------------------------------------------
def init_params(key):
    ks = iter(jax.random.split(key, 32))

    def nrm(shape, scale=0.1):
        return (scale * jax.random.normal(next(ks), shape)).astype(jnp.float32)

    def rnn_params(gates):
        gh = gates * HIDDEN
        return {
            'w_ih': nrm((1, gh)),
            'w_hh': nrm((HIDDEN, gh)),
            'b_ih': nrm((1, gh)),
            'b_hh': nrm((1, gh)),
            'w_out': nrm((HIDDEN, 1)),
            'b_out': nrm((1, 1)),
        }

    return {
        'gru1': rnn_params(3),
        'gru2': rnn_params(3),
        'lstm': rnn_params(4),
        'gcn': {
            'w1': nrm((F_IN, F_HID)),
            'b1': nrm((1, F_HID)),
            'w2': nrm((F_HID, F_OUT)),
            'b2': nrm((1, F_OUT)),
        },
        'mlp': {
            'w1': nrm((MLP_IN, MLP_HID)),
            'b1': nrm((1, MLP_HID)),
            'w2': nrm((MLP_HID, 1)),
            'b2': nrm((1, 1)),
        },
    }


# ----------------------------------------------------------------------------
# Pack the three RNNs into block-diagonal weights + folded biases (one-time).
# Gate column layout: [gru1 r,z,n | gru2 r,z,n | lstm i,f,g,o]  (G = 320)
# Hidden row layout:  [h_gru1 | h_gru2 | h_lstm]                (3H = 96)
# ----------------------------------------------------------------------------
def pack_params(raw):
    H = HIDDEN
    g1, g2, ls = raw['gru1'], raw['gru2'], raw['lstm']

    w_ih_p = jnp.zeros((3, G), jnp.float32)
    w_ih_p = w_ih_p.at[0, 0:3 * H].set(g1['w_ih'][0])
    w_ih_p = w_ih_p.at[1, 3 * H:6 * H].set(g2['w_ih'][0])
    w_ih_p = w_ih_p.at[2, 6 * H:10 * H].set(ls['w_ih'][0])

    w_hh_p = jnp.zeros((3 * H, G), jnp.float32)
    w_hh_p = w_hh_p.at[0:H, 0:3 * H].set(g1['w_hh'])
    w_hh_p = w_hh_p.at[H:2 * H, 3 * H:6 * H].set(g2['w_hh'])
    w_hh_p = w_hh_p.at[2 * H:3 * H, 6 * H:10 * H].set(ls['w_hh'])

    def gru_bgx(p):
        # r,z gates: b_ih + b_hh can be folded; n gate keeps only b_ih
        # (its b_hh sits inside r * (h@W_hn + b_hn)).
        b = p['b_ih'][0] + p['b_hh'][0]
        return b.at[2 * H:3 * H].set(p['b_ih'][0, 2 * H:3 * H])

    b_gx_p = jnp.concatenate(
        [gru_bgx(g1), gru_bgx(g2), ls['b_ih'][0] + ls['b_hh'][0]])[None, :]
    b_hn_p = jnp.concatenate(
        [g1['b_hh'][0, 2 * H:3 * H], g2['b_hh'][0, 2 * H:3 * H]])[None, :]

    w_out_p = jnp.zeros((3 * H, 3), jnp.float32)
    w_out_p = w_out_p.at[0:H, 0].set(g1['w_out'][:, 0])
    w_out_p = w_out_p.at[H:2 * H, 1].set(g2['w_out'][:, 0])
    w_out_p = w_out_p.at[2 * H:3 * H, 2].set(ls['w_out'][:, 0])
    b_out_p = jnp.concatenate(
        [g1['b_out'][0], g2['b_out'][0], ls['b_out'][0]])[None, :]

    return {
        'w_ih': w_ih_p, 'w_hh': w_hh_p, 'b_gx': b_gx_p, 'b_hn': b_hn_p,
        'w_out': w_out_p, 'b_out': b_out_p,
        'gcn': raw['gcn'], 'mlp': raw['mlp'],
    }


# ----------------------------------------------------------------------------
# Pure-JAX reference (for a self-check against the fused kernel).
# ----------------------------------------------------------------------------
def _rnn_ref(x, p, kind):
    B, _ = x.shape
    H = HIDDEN
    w_ih, w_hh = p['w_ih'], p['w_hh']
    b_ih, b_hh = p['b_ih'], p['b_hh']

    def gru_step(h, x_t):
        gx = x_t[:, None] * w_ih + b_ih
        gh = h @ w_hh + b_hh
        r = jax.nn.sigmoid(gx[:, :H] + gh[:, :H])
        z = jax.nn.sigmoid(gx[:, H:2 * H] + gh[:, H:2 * H])
        n = jnp.tanh(gx[:, 2 * H:] + r * gh[:, 2 * H:])
        h = (1.0 - z) * n + z * h
        return h, h

    def lstm_step(carry, x_t):
        h, c = carry
        g = x_t[:, None] * w_ih + b_ih + h @ w_hh + b_hh
        i = jax.nn.sigmoid(g[:, :H])
        f = jax.nn.sigmoid(g[:, H:2 * H])
        gg = jnp.tanh(g[:, 2 * H:3 * H])
        o = jax.nn.sigmoid(g[:, 3 * H:])
        c = f * c + i * gg
        h = o * jnp.tanh(c)
        return (h, c), h

    xs = jnp.transpose(x)                                  # (T, B)
    if kind == 'gru':
        _, hs = lax.scan(gru_step, jnp.zeros((B, H), jnp.float32), xs)
    else:
        z0 = jnp.zeros((B, H), jnp.float32)
        _, hs = lax.scan(lstm_step, (z0, z0), xs)
    out = jnp.einsum('tbh,ho->tbo', hs, p['w_out']) + p['b_out'][None]
    return jnp.transpose(out, (1, 0, 2))                   # (B, T, 1)


def generator_reference(raw, x_ts, x_f, kg_1, kg_2):
    out1 = _rnn_ref(x_ts[:, :, 0], raw['gru1'], 'gru')
    out2 = _rnn_ref(x_ts[:, :, 1], raw['gru2'], 'gru')
    out3 = _rnn_ref(x_ts[:, :, 2], raw['lstm'], 'lstm')
    out_gru = jnp.concatenate([out1, out2, out3], axis=2)
    g = raw['gcn']
    h = jax.nn.relu(jnp.einsum('nm,bmf,fg->bng', kg_1, x_f, g['w1'])
                    + g['b1'][None])
    out_gcn = jnp.einsum('nm,bmg,go->bno', kg_2, h, g['w2']) + g['b2'][None]
    m = raw['mlp']
    cat = jnp.concatenate([out_gru, out_gcn], axis=2)
    hm = jax.nn.relu(jnp.einsum('btf,fk->btk', cat, m['w1']) + m['b1'][None])
    return jnp.einsum('btk,ko->bto', hm, m['w2']) + m['b2'][None]


if __name__ == "__main__":
    step = 8      # sequence length / number of graph nodes
    batch = 2

    key = jax.random.PRNGKey(0)
    k_ts, k_f, k_g1, k_g2, k_par = jax.random.split(key, 5)

    x_ts = jax.random.normal(k_ts, (batch, step, 3), dtype=jnp.float32)
    x_f = jax.random.normal(k_f, (batch, step, F_IN), dtype=jnp.float32)
    kg_1 = jax.random.uniform(k_g1, (step, step), dtype=jnp.float32)
    kg_2 = jax.random.uniform(k_g2, (step, step), dtype=jnp.float32)

    raw_params = init_params(k_par)
    packed_params = pack_params(raw_params)

    out = generator_forward(packed_params, x_ts, x_f, kg_1, kg_2)
    jax.block_until_ready(out)

    assert out.shape == (batch, step, 1)
    assert bool(jnp.all(jnp.isfinite(out)))

    ref = generator_reference(raw_params, x_ts, x_f, kg_1, kg_2)
    err = float(jnp.max(jnp.abs(out - ref)))
    assert err < 5e-2, f"kernel/reference mismatch, max abs err = {err}"

    print("KERNEL_OK")
</pallas_src>

<mosaic_0001>
module attributes {stable_mosaic.version = 11 : i64} {
  func.func @generator_kernel(%arg0: memref<2x8x3xf32, #tpu.memory_space<vmem>>, %arg1: memref<2x8x4xf32, #tpu.memory_space<vmem>>, %arg2: memref<8x8xf32, #tpu.memory_space<vmem>>, %arg3: memref<8x8xf32, #tpu.memory_space<vmem>>, %arg4: memref<3x320xf32, #tpu.memory_space<vmem>>, %arg5: memref<96x320xf32, #tpu.memory_space<vmem>>, %arg6: memref<1x320xf32, #tpu.memory_space<vmem>>, %arg7: memref<1x64xf32, #tpu.memory_space<vmem>>, %arg8: memref<96x3xf32, #tpu.memory_space<vmem>>, %arg9: memref<1x3xf32, #tpu.memory_space<vmem>>, %arg10: memref<4x16xf32, #tpu.memory_space<vmem>>, %arg11: memref<1x16xf32, #tpu.memory_space<vmem>>, %arg12: memref<16x5xf32, #tpu.memory_space<vmem>>, %arg13: memref<1x5xf32, #tpu.memory_space<vmem>>, %arg14: memref<8x32xf32, #tpu.memory_space<vmem>>, %arg15: memref<1x32xf32, #tpu.memory_space<vmem>>, %arg16: memref<32x1xf32, #tpu.memory_space<vmem>>, %arg17: memref<1x1xf32, #tpu.memory_space<vmem>>, %arg18: memref<2x8x1xf32, #tpu.memory_space<vmem>>, %arg19: memref<2x8x8xf32, #tpu.memory_space<vmem>>) attributes {dimension_semantics = [], scalar_prefetch = 0 : i64, scratch_operands = 1 : i64, tpu.core_type = #tpu.core_type<tc>} {
    %c0 = arith.constant 0 : index
    %c0_0 = arith.constant 0 : index
    %c0_1 = arith.constant 0 : index
    %0 = vector.load %arg0[%c0, %c0_0, %c0_1] : memref<2x8x3xf32, #tpu.memory_space<vmem>>, vector<1x8x3xf32>
    %1 = vector.shape_cast %0 : vector<1x8x3xf32> to vector<8x3xf32>
    %c0_2 = arith.constant 0 : index
    %c0_3 = arith.constant 0 : index
    %2 = vector.load %arg4[%c0_2, %c0_3] : memref<3x320xf32, #tpu.memory_space<vmem>>, vector<3x320xf32>
    %cst = arith.constant dense<0.000000e+00> : vector<8x320xf32>
    %3 = tpu.matmul %1, %2, %cst {dimension_numbers = #tpu.dot_dimension_numbers<[1], [0], [0], [1], [0, 0, 1, 1], [], []>} : vector<8x3xf32>, vector<3x320xf32>, vector<8x320xf32> -> vector<8x320xf32>
    %c0_4 = arith.constant 0 : index
    %c0_5 = arith.constant 0 : index
    %4 = vector.load %arg6[%c0_4, %c0_5] : memref<1x320xf32, #tpu.memory_space<vmem>>, vector<1x320xf32>
    %5 = vector.broadcast %4 : vector<1x320xf32> to vector<8x320xf32>
    %6 = arith.addf %3, %5 : vector<8x320xf32>
    %cst_6 = arith.constant 0.000000e+00 : f32
    %7 = vector.broadcast %cst_6 : f32 to vector<1x96xf32>
    %cst_7 = arith.constant 0.000000e+00 : f32
    %8 = vector.broadcast %cst_7 : f32 to vector<1x32xf32>
    %9 = vector.extract_strided_slice %6 {offsets = [0, 0], sizes = [1, 320], strides = [1, 1]} : vector<8x320xf32> to vector<1x320xf32>
    %c0_8 = arith.constant 0 : index
    %c0_9 = arith.constant 0 : index
    %10 = vector.load %arg5[%c0_8, %c0_9] : memref<96x320xf32, #tpu.memory_space<vmem>>, vector<96x320xf32>
    %cst_10 = arith.constant dense<0.000000e+00> : vector<1x320xf32>
    %11 = tpu.matmul %7, %10, %cst_10 {dimension_numbers = #tpu.dot_dimension_numbers<[1], [0], [0], [1], [0, 0, 1, 1], [], []>} : vector<1x96xf32>, vector<96x320xf32>, vector<1x320xf32> -> vector<1x320xf32>
    %12 = vector.extract_strided_slice %7 {offsets = [0, 0], sizes = [1, 32], strides = [1, 1]} : vector<1x96xf32> to vector<1x32xf32>
    %13 = vector.extract_strided_slice %9 {offsets = [0, 0], sizes = [1, 32], strides = [1, 1]} : vector<1x320xf32> to vector<1x32xf32>
    %14 = vector.extract_strided_slice %11 {offsets = [0, 0], sizes = [1, 32], strides = [1, 1]} : vector<1x320xf32> to vector<1x32xf32>
    %15 = arith.addf %13, %14 : vector<1x32xf32>
    %16 = arith.negf %15 : vector<1x32xf32>
    %17 = math.exp %16 : vector<1x32xf32>
    %cst_11 = arith.constant 1.000000e+00 : f32
    %18 = vector.broadcast %cst_11 : f32 to vector<1x32xf32>
    %19 = arith.addf %18, %17 : vector<1x32xf32>
    %20 = arith.divf %18, %19 : vector<1x32xf32>
    %21 = vector.extract_strided_slice %9 {offsets = [0, 32], sizes = [1, 32], strides = [1, 1]} : vector<1x320xf32> to vector<1x32xf32>
    %22 = vector.extract_strided_slice %11 {offsets = [0, 32], sizes = [1, 32], strides = [1, 1]} : vector<1x320xf32> to vector<1x32xf32>
    %23 = arith.addf %21, %22 : vector<1x32xf32>
    %24 = arith.negf %23 : vector<1x32xf32>
    %25 = math.exp %24 : vector<1x32xf32>
    %cst_12 = arith.constant 1.000000e+00 : f32
    %26 = vector.broadcast %cst_12 : f32 to vector<1x32xf32>
    %27 = arith.addf %26, %25 : vector<1x32xf32>
    %28 = arith.divf %26, %27 : vector<1x32xf32>
    %29 = vector.extract_strided_slice %9 {offsets = [0, 64], sizes = [1, 32], strides = [1, 1]} : vector<1x320xf32> to vector<1x32xf32>
    %30 = vector.extract_strided_slice %11 {offsets = [0, 64], sizes = [1, 32], strides = [1, 1]} : vector<1x320xf32> to vector<1x32xf32>
    %c0_13 = arith.constant 0 : index
    %c0_14 = arith.constant 0 : index
    %31 = vector.load %arg7[%c0_13, %c0_14] : memref<1x64xf32, #tpu.memory_space<vmem>>, vector<1x32xf32>
    %32 = arith.addf %30, %31 : vector<1x32xf32>
    %33 = arith.mulf %20, %32 : vector<1x32xf32>
    %34 = arith.addf %29, %33 : vector<1x32xf32>
    %35 = math.tanh %34 : vector<1x32xf32>
    %cst_15 = arith.constant 1.000000e+00 : f32
    %36 = vector.broadcast %cst_15 : f32 to vector<1x32xf32>
    %37 = arith.subf %36, %28 : vector<1x32xf32>
    %38 = arith.mulf %37, %35 : vector<1x32xf32>
    %39 = arith.mulf %28, %12 : vector<1x32xf32>
    %40 = arith.addf %38, %39 : vector<1x32xf32>
    %41 = vector.extract_strided_slice %7 {offsets = [0, 32], sizes = [1, 32], strides = [1, 1]} : vector<1x96xf32> to vector<1x32xf32>
    %42 = vector.extract_strided_slice %9 {offsets = [0, 96], sizes = [1, 32], strides = [1, 1]} : vector<1x320xf32> to vector<1x32xf32>
    %43 = vector.extract_strided_slice %11 {offsets = [0, 96], sizes = [1, 32], strides = [1, 1]} : vector<1x320xf32> to vector<1x32xf32>
    %44 = arith.addf %42, %43 : vector<1x32xf32>
    %45 = arith.negf %44 : vector<1x32xf32>
    %46 = math.exp %45 : vector<1x32xf32>
    %cst_16 = arith.constant 1.000000e+00 : f32
    %47 = vector.broadcast %cst_16 : f32 to vector<1x32xf32>
    %48 = arith.addf %47, %46 : vector<1x32xf32>
    %49 = arith.divf %47, %48 : vector<1x32xf32>
    %50 = vector.extract_strided_slice %9 {offsets = [0, 128], sizes = [1, 32], strides = [1, 1]} : vector<1x320xf32> to vector<1x32xf32>
    %51 = vector.extract_strided_slice %11 {offsets = [0, 128], sizes = [1, 32], strides = [1, 1]} : vector<1x320xf32> to vector<1x32xf32>
    %52 = arith.addf %50, %51 : vector<1x32xf32>
    %53 = arith.negf %52 : vector<1x32xf32>
    %54 = math.exp %53 : vector<1x32xf32>
    %cst_17 = arith.constant 1.000000e+00 : f32
    %55 = vector.broadcast %cst_17 : f32 to vector<1x32xf32>
    %56 = arith.addf %55, %54 : vector<1x32xf32>
    %57 = arith.divf %55, %56 : vector<1x32xf32>
    %58 = vector.extract_strided_slice %9 {offsets = [0, 160], sizes = [1, 32], strides = [1, 1]} : vector<1x320xf32> to vector<1x32xf32>
    %59 = vector.extract_strided_slice %11 {offsets = [0, 160], sizes = [1, 32], strides = [1, 1]} : vector<1x320xf32> to vector<1x32xf32>
    %c0_18 = arith.constant 0 : index
    %c32 = arith.constant 32 : index
    %60 = vector.load %arg7[%c0_18, %c32] : memref<1x64xf32, #tpu.memory_space<vmem>>, vector<1x32xf32>
    %61 = arith.addf %59, %60 : vector<1x32xf32>
    %62 = arith.mulf %49, %61 : vector<1x32xf32>
    %63 = arith.addf %58, %62 : vector<1x32xf32>
    %64 = math.tanh %63 : vector<1x32xf32>
    %cst_19 = arith.constant 1.000000e+00 : f32
    %65 = vector.broadcast %cst_19 : f32 to vector<1x32xf32>
    %66 = arith.subf %65, %57 : vector<1x32xf32>
    %67 = arith.mulf %66, %64 : vector<1x32xf32>
    %68 = arith.mulf %57, %41 : vector<1x32xf32>
    %69 = arith.addf %67, %68 : vector<1x32xf32>
    %70 = vector.extract_strided_slice %9 {offsets = [0, 192], sizes = [1, 128], strides = [1, 1]} : vector<1x320xf32> to vector<1x128xf32>
    %71 = vector.extract_strided_slice %11 {offsets = [0, 192], sizes = [1, 128], strides = [1, 1]} : vector<1x320xf32> to vector<1x128xf32>
    %72 = arith.addf %70, %71 : vector<1x128xf32>
    %73 = vector.extract_strided_slice %72 {offsets = [0, 0], sizes = [1, 32], strides = [1, 1]} : vector<1x128xf32> to vector<1x32xf32>
    %74 = arith.negf %73 : vector<1x32xf32>
    %75 = math.exp %74 : vector<1x32xf32>
    %cst_20 = arith.constant 1.000000e+00 : f32
    %76 = vector.broadcast %cst_20 : f32 to vector<1x32xf32>
    %77 = arith.addf %76, %75 : vector<1x32xf32>
    %78 = arith.divf %76, %77 : vector<1x32xf32>
    %79 = vector.extract_strided_slice %72 {offsets = [0, 32], sizes = [1, 32], strides = [1, 1]} : vector<1x128xf32> to vector<1x32xf32>
    %80 = arith.negf %79 : vector<1x32xf32>
    %81 = math.exp %80 : vector<1x32xf32>
    %cst_21 = arith.constant 1.000000e+00 : f32
    %82 = vector.broadcast %cst_21 : f32 to vector<1x32xf32>
    %83 = arith.addf %82, %81 : vector<1x32xf32>
    %84 = arith.divf %82, %83 : vector<1x32xf32>
    %85 = vector.extract_strided_slice %72 {offsets = [0, 64], sizes = [1, 32], strides = [1, 1]} : vector<1x128xf32> to vector<1x32xf32>
    %86 = math.tanh %85 : vector<1x32xf32>
    %87 = vector.extract_strided_slice %72 {offsets = [0, 96], sizes = [1, 32], strides = [1, 1]} : vector<1x128xf32> to vector<1x32xf32>
    %88 = arith.negf %87 : vector<1x32xf32>
    %89 = math.exp %88 : vector<1x32xf32>
    %cst_22 = arith.constant 1.000000e+00 : f32
    %90 = vector.broadcast %cst_22 : f32 to vector<1x32xf32>
    %91 = arith.addf %90, %89 : vector<1x32xf32>
    %92 = arith.divf %90, %91 : vector<1x32xf32>
    %93 = arith.mulf %84, %8 : vector<1x32xf32>
    %94 = arith.mulf %78, %86 : vector<1x32xf32>
    %95 = arith.addf %93, %94 : vector<1x32xf32>
    %96 = math.tanh %95 : vector<1x32xf32>
    %97 = arith.mulf %92, %96 : vector<1x32xf32>
    %98 = tpu.concatenate %40, %69, %97 in 1 : vector<1x32xf32>, vector<1x32xf32>, vector<1x32xf32> -> vector<1x96xf32>
    %c0_23 = arith.constant 0 : index
    %c0_24 = arith.constant 0 : index
    %99 = vector.load %arg8[%c0_23, %c0_24] : memref<96x3xf32, #tpu.memory_space<vmem>>, vector<96x3xf32>
    %cst_25 = arith.constant dense<0.000000e+00> : vector<1x3xf32>
    %100 = tpu.matmul %98, %99, %cst_25 {dimension_numbers = #tpu.dot_dimension_numbers<[1], [0], [0], [1], [0, 0, 1, 1], [], []>} : vector<1x96xf32>, vector<96x3xf32>, vector<1x3xf32> -> vector<1x3xf32>
    %c0_26 = arith.constant 0 : index
    %c0_27 = arith.constant 0 : index
    %101 = vector.load %arg9[%c0_26, %c0_27] : memref<1x3xf32, #tpu.memory_space<vmem>>, vector<1x3xf32>
    %102 = arith.addf %100, %101 : vector<1x3xf32>
    %c0_28 = arith.constant 0 : index
    %c0_29 = arith.constant 0 : index
    %c0_30 = arith.constant 0 : index
    %103 = vector.load %arg19[%c0_28, %c0_29, %c0_30] : memref<2x8x8xf32, #tpu.memory_space<vmem>>, vector<1x1x3xf32>
    %104 = vector.shape_cast %103 : vector<1x1x3xf32> to vector<1x3xf32>
    %105 = vector.shape_cast %102 : vector<1x3xf32> to vector<1x1x3xf32>
    tpu.vector_store %arg19[%c0_28, %c0_29, %c0_30], %105 {strides = array<i32>} : memref<2x8x8xf32, #tpu.memory_space<vmem>>, vector<1x1x3xf32>,
    %106 = vector.extract_strided_slice %6 {offsets = [1, 0], sizes = [1, 320], strides = [1, 1]} : vector<8x320xf32> to vector<1x320xf32>
    %c0_31 = arith.constant 0 : index
    %c0_32 = arith.constant 0 : index
    %107 = vector.load %arg5[%c0_31, %c0_32] : memref<96x320xf32, #tpu.memory_space<vmem>>, vector<96x320xf32>
    %cst_33 = arith.constant dense<0.000000e+00> : vector<1x320xf32>
    %108 = tpu.matmul %98, %107, %cst_33 {dimension_numbers = #tpu.dot_dimension_numbers<[1], [0], [0], [1], [0, 0, 1, 1], [], []>} : vector<1x96xf32>, vector<96x320xf32>, vector<1x320xf32> -> vector<1x320xf32>
    %109 = vector.extract_strided_slice %98 {offsets = [0, 0], sizes = [1, 32], strides = [1, 1]} : vector<1x96xf32> to vector<1x32xf32>
    %110 = vector.extract_strided_slice %106 {offsets = [0, 0], sizes = [1, 32], strides = [1, 1]} : vector<1x320xf32> to vector<1x32xf32>
    %111 = vector.extract_strided_slice %108 {offsets = [0, 0], sizes = [1, 32], strides = [1, 1]} : vector<1x320xf32> to vector<1x32xf32>
    %112 = arith.addf %110, %111 : vector<1x32xf32>
    %113 = arith.negf %112 : vector<1x32xf32>
    %114 = math.exp %113 : vector<1x32xf32>
    %cst_34 = arith.constant 1.000000e+00 : f32
    %115 = vector.broadcast %cst_34 : f32 to vector<1x32xf32>
    %116 = arith.addf %115, %114 : vector<1x32xf32>
    %117 = arith.divf %115, %116 : vector<1x32xf32>
    %118 = vector.extract_strided_slice %106 {offsets = [0, 32], sizes = [1, 32], strides = [1, 1]} : vector<1x320xf32> to vector<1x32xf32>
    %119 = vector.extract_strided_slice %108 {offsets = [0, 32], sizes = [1, 32], strides = [1, 1]} : vector<1x320xf32> to vector<1x32xf32>
    %120 = arith.addf %118, %119 : vector<1x32xf32>
    %121 = arith.negf %120 : vector<1x32xf32>
    %122 = math.exp %121 : vector<1x32xf32>
    %cst_35 = arith.constant 1.000000e+00 : f32
    %123 = vector.broadcast %cst_35 : f32 to vector<1x32xf32>
    %124 = arith.addf %123, %122 : vector<1x32xf32>
    %125 = arith.divf %123, %124 : vector<1x32xf32>
    %126 = vector.extract_strided_slice %106 {offsets = [0, 64], sizes = [1, 32], strides = [1, 1]} : vector<1x320xf32> to vector<1x32xf32>
    %127 = vector.extract_strided_slice %108 {offsets = [0, 64], sizes = [1, 32], strides = [1, 1]} : vector<1x320xf32> to vector<1x32xf32>
    %c0_36 = arith.constant 0 : index
    %c0_37 = arith.constant 0 : index
    %128 = vector.load %arg7[%c0_36, %c0_37] : memref<1x64xf32, #tpu.memory_space<vmem>>, vector<1x32xf32>
    %129 = arith.addf %127, %128 : vector<1x32xf32>
    %130 = arith.mulf %117, %129 : vector<1x32xf32>
    %131 = arith.addf %126, %130 : vector<1x32xf32>
    %132 = math.tanh %131 : vector<1x32xf32>
    %cst_38 = arith.constant 1.000000e+00 : f32
    %133 = vector.broadcast %cst_38 : f32 to vector<1x32xf32>
    %134 = arith.subf %133, %125 : vector<1x32xf32>
    %135 = arith.mulf %134, %132 : vector<1x32xf32>
    %136 = arith.mulf %125, %109 : vector<1x32xf32>
    %137 = arith.addf %135, %136 : vector<1x32xf32>
    %138 = vector.extract_strided_slice %98 {offsets = [0, 32], sizes = [1, 32], strides = [1, 1]} : vector<1x96xf32> to vector<1x32xf32>
    %139 = vector.extract_strided_slice %106 {offsets = [0, 96], sizes = [1, 32], strides = [1, 1]} : vector<1x320xf32> to vector<1x32xf32>
    %140 = vector.extract_strided_slice %108 {offsets = [0, 96], sizes = [1, 32], strides = [1, 1]} : vector<1x320xf32> to vector<1x32xf32>
    %141 = arith.addf %139, %140 : vector<1x32xf32>
    %142 = arith.negf %141 : vector<1x32xf32>
    %143 = math.exp %142 : vector<1x32xf32>
    %cst_39 = arith.constant 1.000000e+00 : f32
    %144 = vector.broadcast %cst_39 : f32 to vector<1x32xf32>
    %145 = arith.addf %144, %143 : vector<1x32xf32>
    %146 = arith.divf %144, %145 : vector<1x32xf32>
    %147 = vector.extract_strided_slice %106 {offsets = [0, 128], sizes = [1, 32], strides = [1, 1]} : vector<1x320xf32> to vector<1x32xf32>
    %148 = vector.extract_strided_slice %108 {offsets = [0, 128], sizes = [1, 32], strides = [1, 1]} : vector<1x320xf32> to vector<1x32xf32>
    %149 = arith.addf %147, %148 : vector<1x32xf32>
    %150 = arith.negf %149 : vector<1x32xf32>
    %151 = math.exp %150 : vector<1x32xf32>
    %cst_40 = arith.constant 1.000000e+00 : f32
    %152 = vector.broadcast %cst_40 : f32 to vector<1x32xf32>
    %153 = arith.addf %152, %151 : vector<1x32xf32>
    %154 = arith.divf %152, %153 : vector<1x32xf32>
    %155 = vector.extract_strided_slice %106 {offsets = [0, 160], sizes = [1, 32], strides = [1, 1]} : vector<1x320xf32> to vector<1x32xf32>
    %156 = vector.extract_strided_slice %108 {offsets = [0, 160], sizes = [1, 32], strides = [1, 1]} : vector<1x320xf32> to vector<1x32xf32>
    %c0_41 = arith.constant 0 : index
    %c32_42 = arith.constant 32 : index
    %157 = vector.load %arg7[%c0_41, %c32_42] : memref<1x64xf32, #tpu.memory_space<vmem>>, vector<1x32xf32>
    %158 = arith.addf %156, %157 : vector<1x32xf32>
    %159 = arith.mulf %146, %158 : vector<1x32xf32>
    %160 = arith.addf %155, %159 : vector<1x32xf32>
    %161 = math.tanh %160 : vector<1x32xf32>
    %cst_43 = arith.constant 1.000000e+00 : f32
    %162 = vector.broadcast %cst_43 : f32 to vector<1x32xf32>
    %163 = arith.subf %162, %154 : vector<1x32xf32>
    %164 = arith.mulf %163, %161 : vector<1x32xf32>
    %165 = arith.mulf %154, %138 : vector<1x32xf32>
    %166 = arith.addf %164, %165 : vector<1x32xf32>
    %167 = vector.extract_strided_slice %106 {offsets = [0, 192], sizes = [1, 128], strides = [1, 1]} : vector<1x320xf32> to vector<1x128xf32>
    %168 = vector.extract_strided_slice %108 {offsets = [0, 192], sizes = [1, 128], strides = [1, 1]} : vector<1x320xf32> to vector<1x128xf32>
    %169 = arith.addf %167, %168 : vector<1x128xf32>
    %170 = vector.extract_strided_slice %169 {offsets = [0, 0], sizes = [1, 32], strides = [1, 1]} : vector<1x128xf32> to vector<1x32xf32>
    %171 = arith.negf %170 : vector<1x32xf32>
    %172 = math.exp %171 : vector<1x32xf32>
    %cst_44 = arith.constant 1.000000e+00 : f32
    %173 = vector.broadcast %cst_44 : f32 to vector<1x32xf32>
    %174 = arith.addf %173, %172 : vector<1x32xf32>
    %175 = arith.divf %173, %174 : vector<1x32xf32>
    %176 = vector.extract_strided_slice %169 {offsets = [0, 32], sizes = [1, 32], strides = [1, 1]} : vector<1x128xf32> to vector<1x32xf32>
    %177 = arith.negf %176 : vector<1x32xf32>
    %178 = math.exp %177 : vector<1x32xf32>
    %cst_45 = arith.constant 1.000000e+00 : f32
    %179 = vector.broadcast %cst_45 : f32 to vector<1x32xf32>
    %180 = arith.addf %179, %178 : vector<1x32xf32>
    %181 = arith.divf %179, %180 : vector<1x32xf32>
    %182 = vector.extract_strided_slice %169 {offsets = [0, 64], sizes = [1, 32], strides = [1, 1]} : vector<1x128xf32> to vector<1x32xf32>
    %183 = math.tanh %182 : vector<1x32xf32>
    %184 = vector.extract_strided_slice %169 {offsets = [0, 96], sizes = [1, 32], strides = [1, 1]} : vector<1x128xf32> to vector<1x32xf32>
    %185 = arith.negf %184 : vector<1x32xf32>
    %186 = math.exp %185 : vector<1x32xf32>
    %cst_46 = arith.constant 1.000000e+00 : f32
    %187 = vector.broadcast %cst_46 : f32 to vector<1x32xf32>
    %188 = arith.addf %187, %186 : vector<1x32xf32>
    %189 = arith.divf %187, %188 : vector<1x32xf32>
    %190 = arith.mulf %181, %95 : vector<1x32xf32>
    %191 = arith.mulf %175, %183 : vector<1x32xf32>
    %192 = arith.addf %190, %191 : vector<1x32xf32>
    %193 = math.tanh %192 : vector<1x32xf32>
    %194 = arith.mulf %189, %193 : vector<1x32xf32>
    %195 = tpu.concatenate %137, %166, %194 in 1 : vector<1x32xf32>, vector<1x32xf32>, vector<1x32xf32> -> vector<1x96xf32>
    %c0_47 = arith.constant 0 : index
    %c0_48 = arith.constant 0 : index
    %196 = vector.load %arg8[%c0_47, %c0_48] : memref<96x3xf32, #tpu.memory_space<vmem>>, vector<96x3xf32>
    %cst_49 = arith.constant dense<0.000000e+00> : vector<1x3xf32>
    %197 = tpu.matmul %195, %196, %cst_49 {dimension_numbers = #tpu.dot_dimension_numbers<[1], [0], [0], [1], [0, 0, 1, 1], [], []>} : vector<1x96xf32>, vector<96x3xf32>, vector<1x3xf32> -> vector<1x3xf32>
    %c0_50 = arith.constant 0 : index
    %c0_51 = arith.constant 0 : index
    %198 = vector.load %arg9[%c0_50, %c0_51] : memref<1x3xf32, #tpu.memory_space<vmem>>, vector<1x3xf32>
    %199 = arith.addf %197, %198 : vector<1x3xf32>
    %c0_52 = arith.constant 0 : index
    %c1 = arith.constant 1 : index
    %c0_53 = arith.constant 0 : index
    %200 = vector.load %arg19[%c0_52, %c1, %c0_53] : memref<2x8x8xf32, #tpu.memory_space<vmem>>, vector<1x1x3xf32>
    %201 = vector.shape_cast %200 : vector<1x1x3xf32> to vector<1x3xf32>
    %202 = vector.shape_cast %199 : vector<1x3xf32> to vector<1x1x3xf32>
    tpu.vector_store %arg19[%c0_52, %c1, %c0_53], %202 {strides = array<i32>} : memref<2x8x8xf32, #tpu.memory_space<vmem>>, vector<1x1x3xf32>,
    %203 = vector.extract_strided_slice %6 {offsets = [2, 0], sizes = [1, 320], strides = [1, 1]} : vector<8x320xf32> to vector<1x320xf32>
    %c0_54 = arith.constant 0 : index
    %c0_55 = arith.constant 0 : index
    %204 = vector.load %arg5[%c0_54, %c0_55] : memref<96x320xf32, #tpu.memory_space<vmem>>, vector<96x320xf32>
    %cst_56 = arith.constant dense<0.000000e+00> : vector<1x320xf32>
    %205 = tpu.matmul %195, %204, %cst_56 {dimension_numbers = #tpu.dot_dimension_numbers<[1], [0], [0], [1], [0, 0, 1, 1], [], []>} : vector<1x96xf32>, vector<96x320xf32>, vector<1x320xf32> -> vector<1x320xf32>
    %206 = vector.extract_strided_slice %195 {offsets = [0, 0], sizes = [1, 32], strides = [1, 1]} : vector<1x96xf32> to vector<1x32xf32>
    %207 = vector.extract_strided_slice %203 {offsets = [0, 0], sizes = [1, 32], strides = [1, 1]} : vector<1x320xf32> to vector<1x32xf32>
    %208 = vector.extract_strided_slice %205 {offsets = [0, 0], sizes = [1, 32], strides = [1, 1]} : vector<1x320xf32> to vector<1x32xf32>
    %209 = arith.addf %207, %208 : vector<1x32xf32>
    %210 = arith.negf %209 : vector<1x32xf32>
    %211 = math.exp %210 : vector<1x32xf32>
    %cst_57 = arith.constant 1.000000e+00 : f32
    %212 = vector.broadcast %cst_57 : f32 to vector<1x32xf32>
    %213 = arith.addf %212, %211 : vector<1x32xf32>
    %214 = arith.divf %212, %213 : vector<1x32xf32>
    %215 = vector.extract_strided_slice %203 {offsets = [0, 32], sizes = [1, 32], strides = [1, 1]} : vector<1x320xf32> to vector<1x32xf32>
    %216 = vector.extract_strided_slice %205 {offsets = [0, 32], sizes = [1, 32], strides = [1, 1]} : vector<1x320xf32> to vector<1x32xf32>
    %217 = arith.addf %215, %216 : vector<1x32xf32>
    %218 = arith.negf %217 : vector<1x32xf32>
    %219 = math.exp %218 : vector<1x32xf32>
    %cst_58 = arith.constant 1.000000e+00 : f32
    %220 = vector.broadcast %cst_58 : f32 to vector<1x32xf32>
    %221 = arith.addf %220, %219 : vector<1x32xf32>
    %222 = arith.divf %220, %221 : vector<1x32xf32>
    %223 = vector.extract_strided_slice %203 {offsets = [0, 64], sizes = [1, 32], strides = [1, 1]} : vector<1x320xf32> to vector<1x32xf32>
    %224 = vector.extract_strided_slice %205 {offsets = [0, 64], sizes = [1, 32], strides = [1, 1]} : vector<1x320xf32> to vector<1x32xf32>
    %c0_59 = arith.constant 0 : index
    %c0_60 = arith.constant 0 : index
    %225 = vector.load %arg7[%c0_59, %c0_60] : memref<1x64xf32, #tpu.memory_space<vmem>>, vector<1x32xf32>
    %226 = arith.addf %224, %225 : vector<1x32xf32>
    %227 = arith.mulf %214, %226 : vector<1x32xf32>
    %228 = arith.addf %223, %227 : vector<1x32xf32>
    %229 = math.tanh %228 : vector<1x32xf32>
    %cst_61 = arith.constant 1.000000e+00 : f32
    %230 = vector.broadcast %cst_61 : f32 to vector<1x32xf32>
    %231 = arith.subf %230, %222 : vector<1x32xf32>
    %232 = arith.mulf %231, %229 : vector<1x32xf32>
    %233 = arith.mulf %222, %206 : vector<1x32xf32>
    %234 = arith.addf %232, %233 : vector<1x32xf32>
    %235 = vector.extract_strided_slice %195 {offsets = [0, 32], sizes = [1, 32], strides = [1, 1]} : vector<1x96xf32> to vector<1x32xf32>
    %236 = vector.extract_strided_slice %203 {offsets = [0, 96], sizes = [1, 32], strides = [1, 1]} : vector<1x320xf32> to vector<1x32xf32>
    %237 = vector.extract_strided_slice %205 {offsets = [0, 96], sizes = [1, 32], strides = [1, 1]} : vector<1x320xf32> to vector<1x32xf32>
    %238 = arith.addf %236, %237 : vector<1x32xf32>
    %239 = arith.negf %238 : vector<1x32xf32>
    %240 = math.exp %239 : vector<1x32xf32>
    %cst_62 = arith.constant 1.000000e+00 : f32
    %241 = vector.broadcast %cst_62 : f32 to vector<1x32xf32>
    %242 = arith.addf %241, %240 : vector<1x32xf32>
    %243 = arith.divf %241, %242 : vector<1x32xf32>
    %244 = vector.extract_strided_slice %203 {offsets = [0, 128], sizes = [1, 32], strides = [1, 1]} : vector<1x320xf32> to vector<1x32xf32>
    %245 = vector.extract_strided_slice %205 {offsets = [0, 128], sizes = [1, 32], strides = [1, 1]} : vector<1x320xf32> to vector<1x32xf32>
    %246 = arith.addf %244, %245 : vector<1x32xf32>
    %247 = arith.negf %246 : vector<1x32xf32>
    %248 = math.exp %247 : vector<1x32xf32>
    %cst_63 = arith.constant 1.000000e+00 : f32
    %249 = vector.broadcast %cst_63 : f32 to vector<1x32xf32>
    %250 = arith.addf %249, %248 : vector<1x32xf32>
    %251 = arith.divf %249, %250 : vector<1x32xf32>
    %252 = vector.extract_strided_slice %203 {offsets = [0, 160], sizes = [1, 32], strides = [1, 1]} : vector<1x320xf32> to vector<1x32xf32>
    %253 = vector.extract_strided_slice %205 {offsets = [0, 160], sizes = [1, 32], strides = [1, 1]} : vector<1x320xf32> to vector<1x32xf32>
    %c0_64 = arith.constant 0 : index
    %c32_65 = arith.constant 32 : index
    %254 = vector.load %arg7[%c0_64, %c32_65] : memref<1x64xf32, #tpu.memory_space<vmem>>, vector<1x32xf32>
    %255 = arith.addf %253, %254 : vector<1x32xf32>
    %256 = arith.mulf %243, %255 : vector<1x32xf32>
    %257 = arith.addf %252, %256 : vector<1x32xf32>
    %258 = math.tanh %257 : vector<1x32xf32>
    %cst_66 = arith.constant 1.000000e+00 : f32
    %259 = vector.broadcast %cst_66 : f32 to vector<1x32xf32>
    %260 = arith.subf %259, %251 : vector<1x32xf32>
    %261 = arith.mulf %260, %258 : vector<1x32xf32>
    %262 = arith.mulf %251, %235 : vector<1x32xf32>
    %263 = arith.addf %261, %262 : vector<1x32xf32>
    %264 = vector.extract_strided_slice %203 {offsets = [0, 192], sizes = [1, 128], strides = [1, 1]} : vector<1x320xf32> to vector<1x128xf32>
    %265 = vector.extract_strided_slice %205 {offsets = [0, 192], sizes = [1, 128], strides = [1, 1]} : vector<1x320xf32> to vector<1x128xf32>
    %266 = arith.addf %264, %265 : vector<1x128xf32>
    %267 = vector.extract_strided_slice %266 {offsets = [0, 0], sizes = [1, 32], strides = [1, 1]} : vector<1x128xf32> to vector<1x32xf32>
    %268 = arith.negf %267 : vector<1x32xf32>
    %269 = math.exp %268 : vector<1x32xf32>
    %cst_67 = arith.constant 1.000000e+00 : f32
    %270 = vector.broadcast %cst_67 : f32 to vector<1x32xf32>
    %271 = arith.addf %270, %269 : vector<1x32xf32>
    %272 = arith.divf %270, %271 : vector<1x32xf32>
    %273 = vector.extract_strided_slice %266 {offsets = [0, 32], sizes = [1, 32], strides = [1, 1]} : vector<1x128xf32> to vector<1x32xf32>
    %274 = arith.negf %273 : vector<1x32xf32>
    %275 = math.exp %274 : vector<1x32xf32>
    %cst_68 = arith.constant 1.000000e+00 : f32
    %276 = vector.broadcast %cst_68 : f32 to vector<1x32xf32>
    %277 = arith.addf %276, %275 : vector<1x32xf32>
    %278 = arith.divf %276, %277 : vector<1x32xf32>
    %279 = vector.extract_strided_slice %266 {offsets = [0, 64], sizes = [1, 32], strides = [1, 1]} : vector<1x128xf32> to vector<1x32xf32>
    %280 = math.tanh %279 : vector<1x32xf32>
    %281 = vector.extract_strided_slice %266 {offsets = [0, 96], sizes = [1, 32], strides = [1, 1]} : vector<1x128xf32> to vector<1x32xf32>
    %282 = arith.negf %281 : vector<1x32xf32>
    %283 = math.exp %282 : vector<1x32xf32>
    %cst_69 = arith.constant 1.000000e+00 : f32
    %284 = vector.broadcast %cst_69 : f32 to vector<1x32xf32>
    %285 = arith.addf %284, %283 : vector<1x32xf32>
    %286 = arith.divf %284, %285 : vector<1x32xf32>
    %287 = arith.mulf %278, %192 : vector<1x32xf32>
    %288 = arith.mulf %272, %280 : vector<1x32xf32>
    %289 = arith.addf %287, %288 : vector<1x32xf32>
    %290 = math.tanh %289 : vector<1x32xf32>
    %291 = arith.mulf %286, %290 : vector<1x32xf32>
    %292 = tpu.concatenate %234, %263, %291 in 1 : vector<1x32xf32>, vector<1x32xf32>, vector<1x32xf32> -> vector<1x96xf32>
    %c0_70 = arith.constant 0 : index
    %c0_71 = arith.constant 0 : index
    %293 = vector.load %arg8[%c0_70, %c0_71] : memref<96x3xf32, #tpu.memory_space<vmem>>, vector<96x3xf32>
    %cst_72 = arith.constant dense<0.000000e+00> : vector<1x3xf32>
    %294 = tpu.matmul %292, %293, %cst_72 {dimension_numbers = #tpu.dot_dimension_numbers<[1], [0], [0], [1], [0, 0, 1, 1], [], []>} : vector<1x96xf32>, vector<96x3xf32>, vector<1x3xf32> -> vector<1x3xf32>
    %c0_73 = arith.constant 0 : index
    %c0_74 = arith.constant 0 : index
    %295 = vector.load %arg9[%c0_73, %c0_74] : memref<1x3xf32, #tpu.memory_space<vmem>>, vector<1x3xf32>
    %296 = arith.addf %294, %295 : vector<1x3xf32>
    %c0_75 = arith.constant 0 : index
    %c2 = arith.constant 2 : index
    %c0_76 = arith.constant 0 : index
    %297 = vector.load %arg19[%c0_75, %c2, %c0_76] : memref<2x8x8xf32, #tpu.memory_space<vmem>>, vector<1x1x3xf32>
    %298 = vector.shape_cast %297 : vector<1x1x3xf32> to vector<1x3xf32>
    %299 = vector.shape_cast %296 : vector<1x3xf32> to vector<1x1x3xf32>
    tpu.vector_store %arg19[%c0_75, %c2, %c0_76], %299 {strides = array<i32>} : memref<2x8x8xf32, #tpu.memory_space<vmem>>, vector<1x1x3xf32>,
    %300 = vector.extract_strided_slice %6 {offsets = [3, 0], sizes = [1, 320], strides = [1, 1]} : vector<8x320xf32> to vector<1x320xf32>
    %c0_77 = arith.constant 0 : index
    %c0_78 = arith.constant 0 : index
    %301 = vector.load %arg5[%c0_77, %c0_78] : memref<96x320xf32, #tpu.memory_space<vmem>>, vector<96x320xf32>
    %cst_79 = arith.constant dense<0.000000e+00> : vector<1x320xf32>
    %302 = tpu.matmul %292, %301, %cst_79 {dimension_numbers = #tpu.dot_dimension_numbers<[1], [0], [0], [1], [0, 0, 1, 1], [], []>} : vector<1x96xf32>, vector<96x320xf32>, vector<1x320xf32> -> vector<1x320xf32>
    %303 = vector.extract_strided_slice %292 {offsets = [0, 0], sizes = [1, 32], strides = [1, 1]} : vector<1x96xf32> to vector<1x32xf32>
    %304 = vector.extract_strided_slice %300 {offsets = [0, 0], sizes = [1, 32], strides = [1, 1]} : vector<1x320xf32> to vector<1x32xf32>
    %305 = vector.extract_strided_slice %302 {offsets = [0, 0], sizes = [1, 32], strides = [1, 1]} : vector<1x320xf32> to vector<1x32xf32>
    %306 = arith.addf %304, %305 : vector<1x32xf32>
    %307 = arith.negf %306 : vector<1x32xf32>
    %308 = math.exp %307 : vector<1x32xf32>
    %cst_80 = arith.constant 1.000000e+00 : f32
    %309 = vector.broadcast %cst_80 : f32 to vector<1x32xf32>
    %310 = arith.addf %309, %308 : vector<1x32xf32>
    %311 = arith.divf %309, %310 : vector<1x32xf32>
    %312 = vector.extract_strided_slice %300 {offsets = [0, 32], sizes = [1, 32], strides = [1, 1]} : vector<1x320xf32> to vector<1x32xf32>
    %313 = vector.extract_strided_slice %302 {offsets = [0, 32], sizes = [1, 32], strides = [1, 1]} : vector<1x320xf32> to vector<1x32xf32>
    %314 = arith.addf %312, %313 : vector<1x32xf32>
    %315 = arith.negf %314 : vector<1x32xf32>
    %316 = math.exp %315 : vector<1x32xf32>
    %cst_81 = arith.constant 1.000000e+00 : f32
    %317 = vector.broadcast %cst_81 : f32 to vector<1x32xf32>
    %318 = arith.addf %317, %316 : vector<1x32xf32>
    %319 = arith.divf %317, %318 : vector<1x32xf32>
    %320 = vector.extract_strided_slice %300 {offsets = [0, 64], sizes = [1, 32], strides = [1, 1]} : vector<1x320xf32> to vector<1x32xf32>
    %321 = vector.extract_strided_slice %302 {offsets = [0, 64], sizes = [1, 32], strides = [1, 1]} : vector<1x320xf32> to vector<1x32xf32>
    %c0_82 = arith.constant 0 : index
    %c0_83 = arith.constant 0 : index
    %322 = vector.load %arg7[%c0_82, %c0_83] : memref<1x64xf32, #tpu.memory_space<vmem>>, vector<1x32xf32>
    %323 = arith.addf %321, %322 : vector<1x32xf32>
    %324 = arith.mulf %311, %323 : vector<1x32xf32>
    %325 = arith.addf %320, %324 : vector<1x32xf32>
    %326 = math.tanh %325 : vector<1x32xf32>
    %cst_84 = arith.constant 1.000000e+00 : f32
    %327 = vector.broadcast %cst_84 : f32 to vector<1x32xf32>
    %328 = arith.subf %327, %319 : vector<1x32xf32>
    %329 = arith.mulf %328, %326 : vector<1x32xf32>
    %330 = arith.mulf %319, %303 : vector<1x32xf32>
    %331 = arith.addf %329, %330 : vector<1x32xf32>
    %332 = vector.extract_strided_slice %292 {offsets = [0, 32], sizes = [1, 32], strides = [1, 1]} : vector<1x96xf32> to vector<1x32xf32>
    %333 = vector.extract_strided_slice %300 {offsets = [0, 96], sizes = [1, 32], strides = [1, 1]} : vector<1x320xf32> to vector<1x32xf32>
    %334 = vector.extract_strided_slice %302 {offsets = [0, 96], sizes = [1, 32], strides = [1, 1]} : vector<1x320xf32> to vector<1x32xf32>
    %335 = arith.addf %333, %334 : vector<1x32xf32>
    %336 = arith.negf %335 : vector<1x32xf32>
    %337 = math.exp %336 : vector<1x32xf32>
    %cst_85 = arith.constant 1.000000e+00 : f32
    %338 = vector.broadcast %cst_85 : f32 to vector<1x32xf32>
    %339 = arith.addf %338, %337 : vector<1x32xf32>
    %340 = arith.divf %338, %339 : vector<1x32xf32>
    %341 = vector.extract_strided_slice %300 {offsets = [0, 128], sizes = [1, 32], strides = [1, 1]} : vector<1x320xf32> to vector<1x32xf32>
    %342 = vector.extract_strided_slice %302 {offsets = [0, 128], sizes = [1, 32], strides = [1, 1]} : vector<1x320xf32> to vector<1x32xf32>
    %343 = arith.addf %341, %342 : vector<1x32xf32>
    %344 = arith.negf %343 : vector<1x32xf32>
    %345 = math.exp %344 : vector<1x32xf32>
    %cst_86 = arith.constant 1.000000e+00 : f32
    %346 = vector.broadcast %cst_86 : f32 to vector<1x32xf32>
    %347 = arith.addf %346, %345 : vector<1x32xf32>
    %348 = arith.divf %346, %347 : vector<1x32xf32>
    %349 = vector.extract_strided_slice %300 {offsets = [0, 160], sizes = [1, 32], strides = [1, 1]} : vector<1x320xf32> to vector<1x32xf32>
    %350 = vector.extract_strided_slice %302 {offsets = [0, 160], sizes = [1, 32], strides = [1, 1]} : vector<1x320xf32> to vector<1x32xf32>
    %c0_87 = arith.constant 0 : index
    %c32_88 = arith.constant 32 : index
    %351 = vector.load %arg7[%c0_87, %c32_88] : memref<1x64xf32, #tpu.memory_space<vmem>>, vector<1x32xf32>
    %352 = arith.addf %350, %351 : vector<1x32xf32>
    %353 = arith.mulf %340, %352 : vector<1x32xf32>
    %354 = arith.addf %349, %353 : vector<1x32xf32>
    %355 = math.tanh %354 : vector<1x32xf32>
    %cst_89 = arith.constant 1.000000e+00 : f32
    %356 = vector.broadcast %cst_89 : f32 to vector<1x32xf32>
    %357 = arith.subf %356, %348 : vector<1x32xf32>
    %358 = arith.mulf %357, %355 : vector<1x32xf32>
    %359 = arith.mulf %348, %332 : vector<1x32xf32>
    %360 = arith.addf %358, %359 : vector<1x32xf32>
    %361 = vector.extract_strided_slice %300 {offsets = [0, 192], sizes = [1, 128], strides = [1, 1]} : vector<1x320xf32> to vector<1x128xf32>
    %362 = vector.extract_strided_slice %302 {offsets = [0, 192], sizes = [1, 128], strides = [1, 1]} : vector<1x320xf32> to vector<1x128xf32>
    %363 = arith.addf %361, %362 : vector<1x128xf32>
    %364 = vector.extract_strided_slice %363 {offsets = [0, 0], sizes = [1, 32], strides = [1, 1]} : vector<1x128xf32> to vector<1x32xf32>
    %365 = arith.negf %364 : vector<1x32xf32>
    %366 = math.exp %365 : vector<1x32xf32>
    %cst_90 = arith.constant 1.000000e+00 : f32
    %367 = vector.broadcast %cst_90 : f32 to vector<1x32xf32>
    %368 = arith.addf %367, %366 : vector<1x32xf32>
    %369 = arith.divf %367, %368 : vector<1x32xf32>
    %370 = vector.extract_strided_slice %363 {offsets = [0, 32], sizes = [1, 32], strides = [1, 1]} : vector<1x128xf32> to vector<1x32xf32>
    %371 = arith.negf %370 : vector<1x32xf32>
    %372 = math.exp %371 : vector<1x32xf32>
    %cst_91 = arith.constant 1.000000e+00 : f32
    %373 = vector.broadcast %cst_91 : f32 to vector<1x32xf32>
    %374 = arith.addf %373, %372 : vector<1x32xf32>
    %375 = arith.divf %373, %374 : vector<1x32xf32>
    %376 = vector.extract_strided_slice %363 {offsets = [0, 64], sizes = [1, 32], strides = [1, 1]} : vector<1x128xf32> to vector<1x32xf32>
    %377 = math.tanh %376 : vector<1x32xf32>
    %378 = vector.extract_strided_slice %363 {offsets = [0, 96], sizes = [1, 32], strides = [1, 1]} : vector<1x128xf32> to vector<1x32xf32>
    %379 = arith.negf %378 : vector<1x32xf32>
    %380 = math.exp %379 : vector<1x32xf32>
    %cst_92 = arith.constant 1.000000e+00 : f32
    %381 = vector.broadcast %cst_92 : f32 to vector<1x32xf32>
    %382 = arith.addf %381, %380 : vector<1x32xf32>
    %383 = arith.divf %381, %382 : vector<1x32xf32>
    %384 = arith.mulf %375, %289 : vector<1x32xf32>
    %385 = arith.mulf %369, %377 : vector<1x32xf32>
    %386 = arith.addf %384, %385 : vector<1x32xf32>
    %387 = math.tanh %386 : vector<1x32xf32>
    %388 = arith.mulf %383, %387 : vector<1x32xf32>
    %389 = tpu.concatenate %331, %360, %388 in 1 : vector<1x32xf32>, vector<1x32xf32>, vector<1x32xf32> -> vector<1x96xf32>
    %c0_93 = arith.constant 0 : index
    %c0_94 = arith.constant 0 : index
    %390 = vector.load %arg8[%c0_93, %c0_94] : memref<96x3xf32, #tpu.memory_space<vmem>>, vector<96x3xf32>
    %cst_95 = arith.constant dense<0.000000e+00> : vector<1x3xf32>
    %391 = tpu.matmul %389, %390, %cst_95 {dimension_numbers = #tpu.dot_dimension_numbers<[1], [0], [0], [1], [0, 0, 1, 1], [], []>} : vector<1x96xf32>, vector<96x3xf32>, vector<1x3xf32> -> vector<1x3xf32>
    %c0_96 = arith.constant 0 : index
    %c0_97 = arith.constant 0 : index
    %392 = vector.load %arg9[%c0_96, %c0_97] : memref<1x3xf32, #tpu.memory_space<vmem>>, vector<1x3xf32>
    %393 = arith.addf %391, %392 : vector<1x3xf32>
    %c0_98 = arith.constant 0 : index
    %c3 = arith.constant 3 : index
    %c0_99 = arith.constant 0 : index
    %394 = vector.load %arg19[%c0_98, %c3, %c0_99] : memref<2x8x8xf32, #tpu.memory_space<vmem>>, vector<1x1x3xf32>
    %395 = vector.shape_cast %394 : vector<1x1x3xf32> to vector<1x3xf32>
    %396 = vector.shape_cast %393 : vector<1x3xf32> to vector<1x1x3xf32>
    tpu.vector_store %arg19[%c0_98, %c3, %c0_99], %396 {strides = array<i32>} : memref<2x8x8xf32, #tpu.memory_space<vmem>>, vector<1x1x3xf32>,
    %397 = vector.extract_strided_slice %6 {offsets = [4, 0], sizes = [1, 320], strides = [1, 1]} : vector<8x320xf32> to vector<1x320xf32>
    %c0_100 = arith.constant 0 : index
    %c0_101 = arith.constant 0 : index
    %398 = vector.load %arg5[%c0_100, %c0_101] : memref<96x320xf32, #tpu.memory_space<vmem>>, vector<96x320xf32>
    %cst_102 = arith.constant dense<0.000000e+00> : vector<1x320xf32>
    %399 = tpu.matmul %389, %398, %cst_102 {dimension_numbers = #tpu.dot_dimension_numbers<[1], [0], [0], [1], [0, 0, 1, 1], [], []>} : vector<1x96xf32>, vector<96x320xf32>, vector<1x320xf32> -> vector<1x320xf32>
    %400 = vector.extract_strided_slice %389 {offsets = [0, 0], sizes = [1, 32], strides = [1, 1]} : vector<1x96xf32> to vector<1x32xf32>
    %401 = vector.extract_strided_slice %397 {offsets = [0, 0], sizes = [1, 32], strides = [1, 1]} : vector<1x320xf32> to vector<1x32xf32>
    %402 = vector.extract_strided_slice %399 {offsets = [0, 0], sizes = [1, 32], strides = [1, 1]} : vector<1x320xf32> to vector<1x32xf32>
    %403 = arith.addf %401, %402 : vector<1x32xf32>
    %404 = arith.negf %403 : vector<1x32xf32>
    %405 = math.exp %404 : vector<1x32xf32>
    %cst_103 = arith.constant 1.000000e+00 : f32
    %406 = vector.broadcast %cst_103 : f32 to vector<1x32xf32>
    %407 = arith.addf %406, %405 : vector<1x32xf32>
    %408 = arith.divf %406, %407 : vector<1x32xf32>
    %409 = vector.extract_strided_slice %397 {offsets = [0, 32], sizes = [1, 32], strides = [1, 1]} : vector<1x320xf32> to vector<1x32xf32>
    %410 = vector.extract_strided_slice %399 {offsets = [0, 32], sizes = [1, 32], strides = [1, 1]} : vector<1x320xf32> to vector<1x32xf32>
    %411 = arith.addf %409, %410 : vector<1x32xf32>
    %412 = arith.negf %411 : vector<1x32xf32>
    %413 = math.exp %412 : vector<1x32xf32>
    %cst_104 = arith.constant 1.000000e+00 : f32
    %414 = vector.broadcast %cst_104 : f32 to vector<1x32xf32>
    %415 = arith.addf %414, %413 : vector<1x32xf32>
    %416 = arith.divf %414, %415 : vector<1x32xf32>
    %417 = vector.extract_strided_slice %397 {offsets = [0, 64], sizes = [1, 32], strides = [1, 1]} : vector<1x320xf32> to vector<1x32xf32>
    %418 = vector.extract_strided_slice %399 {offsets = [0, 64], sizes = [1, 32], strides = [1, 1]} : vector<1x320xf32> to vector<1x32xf32>
    %c0_105 = arith.constant 0 : index
    %c0_106 = arith.constant 0 : index
    %419 = vector.load %arg7[%c0_105, %c0_106] : memref<1x64xf32, #tpu.memory_space<vmem>>, vector<1x32xf32>
    %420 = arith.addf %418, %419 : vector<1x32xf32>
    %421 = arith.mulf %408, %420 : vector<1x32xf32>
    %422 = arith.addf %417, %421 : vector<1x32xf32>
    %423 = math.tanh %422 : vector<1x32xf32>
    %cst_107 = arith.constant 1.000000e+00 : f32
    %424 = vector.broadcast %cst_107 : f32 to vector<1x32xf32>
    %425 = arith.subf %424, %416 : vector<1x32xf32>
    %426 = arith.mulf %425, %423 : vector<1x32xf32>
    %427 = arith.mulf %416, %400 : vector<1x32xf32>
    %428 = arith.addf %426, %427 : vector<1x32xf32>
    %429 = vector.extract_strided_slice %389 {offsets = [0, 32], sizes = [1, 32], strides = [1, 1]} : vector<1x96xf32> to vector<1x32xf32>
    %430 = vector.extract_strided_slice %397 {offsets = [0, 96], sizes = [1, 32], strides = [1, 1]} : vector<1x320xf32> to vector<1x32xf32>
    %431 = vector.extract_strided_slice %399 {offsets = [0, 96], sizes = [1, 32], strides = [1, 1]} : vector<1x320xf32> to vector<1x32xf32>
    %432 = arith.addf %430, %431 : vector<1x32xf32>
    %433 = arith.negf %432 : vector<1x32xf32>
    %434 = math.exp %433 : vector<1x32xf32>
    %cst_108 = arith.constant 1.000000e+00 : f32
    %435 = vector.broadcast %cst_108 : f32 to vector<1x32xf32>
    %436 = arith.addf %435, %434 : vector<1x32xf32>
    %437 = arith.divf %435, %436 : vector<1x32xf32>
    %438 = vector.extract_strided_slice %397 {offsets = [0, 128], sizes = [1, 32], strides = [1, 1]} : vector<1x320xf32> to vector<1x32xf32>
    %439 = vector.extract_strided_slice %399 {offsets = [0, 128], sizes = [1, 32], strides = [1, 1]} : vector<1x320xf32> to vector<1x32xf32>
    %440 = arith.addf %438, %439 : vector<1x32xf32>
    %441 = arith.negf %440 : vector<1x32xf32>
    %442 = math.exp %441 : vector<1x32xf32>
    %cst_109 = arith.constant 1.000000e+00 : f32
    %443 = vector.broadcast %cst_109 : f32 to vector<1x32xf32>
    %444 = arith.addf %443, %442 : vector<1x32xf32>
    %445 = arith.divf %443, %444 : vector<1x32xf32>
    %446 = vector.extract_strided_slice %397 {offsets = [0, 160], sizes = [1, 32], strides = [1, 1]} : vector<1x320xf32> to vector<1x32xf32>
    %447 = vector.extract_strided_slice %399 {offsets = [0, 160], sizes = [1, 32], strides = [1, 1]} : vector<1x320xf32> to vector<1x32xf32>
    %c0_110 = arith.constant 0 : index
    %c32_111 = arith.constant 32 : index
    %448 = vector.load %arg7[%c0_110, %c32_111] : memref<1x64xf32, #tpu.memory_space<vmem>>, vector<1x32xf32>
    %449 = arith.addf %447, %448 : vector<1x32xf32>
    %450 = arith.mulf %437, %449 : vector<1x32xf32>
    %451 = arith.addf %446, %450 : vector<1x32xf32>
    %452 = math.tanh %451 : vector<1x32xf32>
    %cst_112 = arith.constant 1.000000e+00 : f32
    %453 = vector.broadcast %cst_112 : f32 to vector<1x32xf32>
    %454 = arith.subf %453, %445 : vector<1x32xf32>
    %455 = arith.mulf %454, %452 : vector<1x32xf32>
    %456 = arith.mulf %445, %429 : vector<1x32xf32>
    %457 = arith.addf %455, %456 : vector<1x32xf32>
    %458 = vector.extract_strided_slice %397 {offsets = [0, 192], sizes = [1, 128], strides = [1, 1]} : vector<1x320xf32> to vector<1x128xf32>
    %459 = vector.extract_strided_slice %399 {offsets = [0, 192], sizes = [1, 128], strides = [1, 1]} : vector<1x320xf32> to vector<1x128xf32>
    %460 = arith.addf %458, %459 : vector<1x128xf32>
    %461 = vector.extract_strided_slice %460 {offsets = [0, 0], sizes = [1, 32], strides = [1, 1]} : vector<1x128xf32> to vector<1x32xf32>
    %462 = arith.negf %461 : vector<1x32xf32>
    %463 = math.exp %462 : vector<1x32xf32>
    %cst_113 = arith.constant 1.000000e+00 : f32
    %464 = vector.broadcast %cst_113 : f32 to vector<1x32xf32>
    %465 = arith.addf %464, %463 : vector<1x32xf32>
    %466 = arith.divf %464, %465 : vector<1x32xf32>
    %467 = vector.extract_strided_slice %460 {offsets = [0, 32], sizes = [1, 32], strides = [1, 1]} : vector<1x128xf32> to vector<1x32xf32>
    %468 = arith.negf %467 : vector<1x32xf32>
    %469 = math.exp %468 : vector<1x32xf32>
    %cst_114 = arith.constant 1.000000e+00 : f32
    %470 = vector.broadcast %cst_114 : f32 to vector<1x32xf32>
    %471 = arith.addf %470, %469 : vector<1x32xf32>
    %472 = arith.divf %470, %471 : vector<1x32xf32>
    %473 = vector.extract_strided_slice %460 {offsets = [0, 64], sizes = [1, 32], strides = [1, 1]} : vector<1x128xf32> to vector<1x32xf32>
    %474 = math.tanh %473 : vector<1x32xf32>
    %475 = vector.extract_strided_slice %460 {offsets = [0, 96], sizes = [1, 32], strides = [1, 1]} : vector<1x128xf32> to vector<1x32xf32>
    %476 = arith.negf %475 : vector<1x32xf32>
    %477 = math.exp %476 : vector<1x32xf32>
    %cst_115 = arith.constant 1.000000e+00 : f32
    %478 = vector.broadcast %cst_115 : f32 to vector<1x32xf32>
    %479 = arith.addf %478, %477 : vector<1x32xf32>
    %480 = arith.divf %478, %479 : vector<1x32xf32>
    %481 = arith.mulf %472, %386 : vector<1x32xf32>
    %482 = arith.mulf %466, %474 : vector<1x32xf32>
    %483 = arith.addf %481, %482 : vector<1x32xf32>
    %484 = math.tanh %483 : vector<1x32xf32>
    %485 = arith.mulf %480, %484 : vector<1x32xf32>
    %486 = tpu.concatenate %428, %457, %485 in 1 : vector<1x32xf32>, vector<1x32xf32>, vector<1x32xf32> -> vector<1x96xf32>
    %c0_116 = arith.constant 0 : index
    %c0_117 = arith.constant 0 : index
    %487 = vector.load %arg8[%c0_116, %c0_117] : memref<96x3xf32, #tpu.memory_space<vmem>>, vector<96x3xf32>
    %cst_118 = arith.constant dense<0.000000e+00> : vector<1x3xf32>
    %488 = tpu.matmul %486, %487, %cst_118 {dimension_numbers = #tpu.dot_dimension_numbers<[1], [0], [0], [1], [0, 0, 1, 1], [], []>} : vector<1x96xf32>, vector<96x3xf32>, vector<1x3xf32> -> vector<1x3xf32>
    %c0_119 = arith.constant 0 : index
    %c0_120 = arith.constant 0 : index
    %489 = vector.load %arg9[%c0_119, %c0_120] : memref<1x3xf32, #tpu.memory_space<vmem>>, vector<1x3xf32>
    %490 = arith.addf %488, %489 : vector<1x3xf32>
    %c0_121 = arith.constant 0 : index
    %c4 = arith.constant 4 : index
    %c0_122 = arith.constant 0 : index
    %491 = vector.load %arg19[%c0_121, %c4, %c0_122] : memref<2x8x8xf32, #tpu.memory_space<vmem>>, vector<1x1x3xf32>
    %492 = vector.shape_cast %491 : vector<1x1x3xf32> to vector<1x3xf32>
    %493 = vector.shape_cast %490 : vector<1x3xf32> to vector<1x1x3xf32>
    tpu.vector_store %arg19[%c0_121, %c4, %c0_122], %493 {strides = array<i32>} : memref<2x8x8xf32, #tpu.memory_space<vmem>>, vector<1x1x3xf32>,
    %494 = vector.extract_strided_slice %6 {offsets = [5, 0], sizes = [1, 320], strides = [1, 1]} : vector<8x320xf32> to vector<1x320xf32>
    %c0_123 = arith.constant 0 : index
    %c0_124 = arith.constant 0 : index
    %495 = vector.load %arg5[%c0_123, %c0_124] : memref<96x320xf32, #tpu.memory_space<vmem>>, vector<96x320xf32>
    %cst_125 = arith.constant dense<0.000000e+00> : vector<1x320xf32>
    %496 = tpu.matmul %486, %495, %cst_125 {dimension_numbers = #tpu.dot_dimension_numbers<[1], [0], [0], [1], [0, 0, 1, 1], [], []>} : vector<1x96xf32>, vector<96x320xf32>, vector<1x320xf32> -> vector<1x320xf32>
    %497 = vector.extract_strided_slice %486 {offsets = [0, 0], sizes = [1, 32], strides = [1, 1]} : vector<1x96xf32> to vector<1x32xf32>
    %498 = vector.extract_strided_slice %494 {offsets = [0, 0], sizes = [1, 32], strides = [1, 1]} : vector<1x320xf32> to vector<1x32xf32>
    %499 = vector.extract_strided_slice %496 {offsets = [0, 0], sizes = [1, 32], strides = [1, 1]} : vector<1x320xf32> to vector<1x32xf32>
    %500 = arith.addf %498, %499 : vector<1x32xf32>
    %501 = arith.negf %500 : vector<1x32xf32>
    %502 = math.exp %501 : vector<1x32xf32>
    %cst_126 = arith.constant 1.000000e+00 : f32
    %503 = vector.broadcast %cst_126 : f32 to vector<1x32xf32>
    %504 = arith.addf %503, %502 : vector<1x32xf32>
    %505 = arith.divf %503, %504 : vector<1x32xf32>
    %506 = vector.extract_strided_slice %494 {offsets = [0, 32], sizes = [1, 32], strides = [1, 1]} : vector<1x320xf32> to vector<1x32xf32>
    %507 = vector.extract_strided_slice %496 {offsets = [0, 32], sizes = [1, 32], strides = [1, 1]} : vector<1x320xf32> to vector<1x32xf32>
    %508 = arith.addf %506, %507 : vector<1x32xf32>
    %509 = arith.negf %508 : vector<1x32xf32>
    %510 = math.exp %509 : vector<1x32xf32>
    %cst_127 = arith.constant 1.000000e+00 : f32
    %511 = vector.broadcast %cst_127 : f32 to vector<1x32xf32>
    %512 = arith.addf %511, %510 : vector<1x32xf32>
    %513 = arith.divf %511, %512 : vector<1x32xf32>
    %514 = vector.extract_strided_slice %494 {offsets = [0, 64], sizes = [1, 32], strides = [1, 1]} : vector<1x320xf32> to vector<1x32xf32>
    %515 = vector.extract_strided_slice %496 {offsets = [0, 64], sizes = [1, 32], strides = [1, 1]} : vector<1x320xf32> to vector<1x32xf32>
    %c0_128 = arith.constant 0 : index
    %c0_129 = arith.constant 0 : index
    %516 = vector.load %arg7[%c0_128, %c0_129] : memref<1x64xf32, #tpu.memory_space<vmem>>, vector<1x32xf32>
    %517 = arith.addf %515, %516 : vector<1x32xf32>
    %518 = arith.mulf %505, %517 : vector<1x32xf32>
    %519 = arith.addf %514, %518 : vector<1x32xf32>
    %520 = math.tanh %519 : vector<1x32xf32>
    %cst_130 = arith.constant 1.000000e+00 : f32
    %521 = vector.broadcast %cst_130 : f32 to vector<1x32xf32>
    %522 = arith.subf %521, %513 : vector<1x32xf32>
    %523 = arith.mulf %522, %520 : vector<1x32xf32>
    %524 = arith.mulf %513, %497 : vector<1x32xf32>
    %525 = arith.addf %523, %524 : vector<1x32xf32>
    %526 = vector.extract_strided_slice %486 {offsets = [0, 32], sizes = [1, 32], strides = [1, 1]} : vector<1x96xf32> to vector<1x32xf32>
    %527 = vector.extract_strided_slice %494 {offsets = [0, 96], sizes = [1, 32], strides = [1, 1]} : vector<1x320xf32> to vector<1x32xf32>
    %528 = vector.extract_strided_slice %496 {offsets = [0, 96], sizes = [1, 32], strides = [1, 1]} : vector<1x320xf32> to vector<1x32xf32>
    %529 = arith.addf %527, %528 : vector<1x32xf32>
    %530 = arith.negf %529 : vector<1x32xf32>
    %531 = math.exp %530 : vector<1x32xf32>
    %cst_131 = arith.constant 1.000000e+00 : f32
    %532 = vector.broadcast %cst_131 : f32 to vector<1x32xf32>
    %533 = arith.addf %532, %531 : vector<1x32xf32>
    %534 = arith.divf %532, %533 : vector<1x32xf32>
    %535 = vector.extract_strided_slice %494 {offsets = [0, 128], sizes = [1, 32], strides = [1, 1]} : vector<1x320xf32> to vector<1x32xf32>
    %536 = vector.extract_strided_slice %496 {offsets = [0, 128], sizes = [1, 32], strides = [1, 1]} : vector<1x320xf32> to vector<1x32xf32>
    %537 = arith.addf %535, %536 : vector<1x32xf32>
    %538 = arith.negf %537 : vector<1x32xf32>
    %539 = math.exp %538 : vector<1x32xf32>
    %cst_132 = arith.constant 1.000000e+00 : f32
    %540 = vector.broadcast %cst_132 : f32 to vector<1x32xf32>
    %541 = arith.addf %540, %539 : vector<1x32xf32>
    %542 = arith.divf %540, %541 : vector<1x32xf32>
    %543 = vector.extract_strided_slice %494 {offsets = [0, 160], sizes = [1, 32], strides = [1, 1]} : vector<1x320xf32> to vector<1x32xf32>
    %544 = vector.extract_strided_slice %496 {offsets = [0, 160], sizes = [1, 32], strides = [1, 1]} : vector<1x320xf32> to vector<1x32xf32>
    %c0_133 = arith.constant 0 : index
    %c32_134 = arith.constant 32 : index
    %545 = vector.load %arg7[%c0_133, %c32_134] : memref<1x64xf32, #tpu.memory_space<vmem>>, vector<1x32xf32>
    %546 = arith.addf %544, %545 : vector<1x32xf32>
    %547 = arith.mulf %534, %546 : vector<1x32xf32>
    %548 = arith.addf %543, %547 : vector<1x32xf32>
    %549 = math.tanh %548 : vector<1x32xf32>
    %cst_135 = arith.constant 1.000000e+00 : f32
    %550 = vector.broadcast %cst_135 : f32 to vector<1x32xf32>
    %551 = arith.subf %550, %542 : vector<1x32xf32>
    %552 = arith.mulf %551, %549 : vector<1x32xf32>
    %553 = arith.mulf %542, %526 : vector<1x32xf32>
    %554 = arith.addf %552, %553 : vector<1x32xf32>
    %555 = vector.extract_strided_slice %494 {offsets = [0, 192], sizes = [1, 128], strides = [1, 1]} : vector<1x320xf32> to vector<1x128xf32>
    %556 = vector.extract_strided_slice %496 {offsets = [0, 192], sizes = [1, 128], strides = [1, 1]} : vector<1x320xf32> to vector<1x128xf32>
    %557 = arith.addf %555, %556 : vector<1x128xf32>
    %558 = vector.extract_strided_slice %557 {offsets = [0, 0], sizes = [1, 32], strides = [1, 1]} : vector<1x128xf32> to vector<1x32xf32>
    %559 = arith.negf %558 : vector<1x32xf32>
    %560 = math.exp %559 : vector<1x32xf32>
    %cst_136 = arith.constant 1.000000e+00 : f32
    %561 = vector.broadcast %cst_136 : f32 to vector<1x32xf32>
    %562 = arith.addf %561, %560 : vector<1x32xf32>
    %563 = arith.divf %561, %562 : vector<1x32xf32>
    %564 = vector.extract_strided_slice %557 {offsets = [0, 32], sizes = [1, 32], strides = [1, 1]} : vector<1x128xf32> to vector<1x32xf32>
    %565 = arith.negf %564 : vector<1x32xf32>
    %566 = math.exp %565 : vector<1x32xf32>
    %cst_137 = arith.constant 1.000000e+00 : f32
    %567 = vector.broadcast %cst_137 : f32 to vector<1x32xf32>
    %568 = arith.addf %567, %566 : vector<1x32xf32>
    %569 = arith.divf %567, %568 : vector<1x32xf32>
    %570 = vector.extract_strided_slice %557 {offsets = [0, 64], sizes = [1, 32], strides = [1, 1]} : vector<1x128xf32> to vector<1x32xf32>
    %571 = math.tanh %570 : vector<1x32xf32>
    %572 = vector.extract_strided_slice %557 {offsets = [0, 96], sizes = [1, 32], strides = [1, 1]} : vector<1x128xf32> to vector<1x32xf32>
    %573 = arith.negf %572 : vector<1x32xf32>
    %574 = math.exp %573 : vector<1x32xf32>
    %cst_138 = arith.constant 1.000000e+00 : f32
    %575 = vector.broadcast %cst_138 : f32 to vector<1x32xf32>
    %576 = arith.addf %575, %574 : vector<1x32xf32>
    %577 = arith.divf %575, %576 : vector<1x32xf32>
    %578 = arith.mulf %569, %483 : vector<1x32xf32>
    %579 = arith.mulf %563, %571 : vector<1x32xf32>
    %580 = arith.addf %578, %579 : vector<1x32xf32>
    %581 = math.tanh %580 : vector<1x32xf32>
    %582 = arith.mulf %577, %581 : vector<1x32xf32>
    %583 = tpu.concatenate %525, %554, %582 in 1 : vector<1x32xf32>, vector<1x32xf32>, vector<1x32xf32> -> vector<1x96xf32>
    %c0_139 = arith.constant 0 : index
    %c0_140 = arith.constant 0 : index
    %584 = vector.load %arg8[%c0_139, %c0_140] : memref<96x3xf32, #tpu.memory_space<vmem>>, vector<96x3xf32>
    %cst_141 = arith.constant dense<0.000000e+00> : vector<1x3xf32>
    %585 = tpu.matmul %583, %584, %cst_141 {dimension_numbers = #tpu.dot_dimension_numbers<[1], [0], [0], [1], [0, 0, 1, 1], [], []>} : vector<1x96xf32>, vector<96x3xf32>, vector<1x3xf32> -> vector<1x3xf32>
    %c0_142 = arith.constant 0 : index
    %c0_143 = arith.constant 0 : index
    %586 = vector.load %arg9[%c0_142, %c0_143] : memref<1x3xf32, #tpu.memory_space<vmem>>, vector<1x3xf32>
    %587 = arith.addf %585, %586 : vector<1x3xf32>
    %c0_144 = arith.constant 0 : index
    %c5 = arith.constant 5 : index
    %c0_145 = arith.constant 0 : index
    %588 = vector.load %arg19[%c0_144, %c5, %c0_145] : memref<2x8x8xf32, #tpu.memory_space<vmem>>, vector<1x1x3xf32>
    %589 = vector.shape_cast %588 : vector<1x1x3xf32> to vector<1x3xf32>
    %590 = vector.shape_cast %587 : vector<1x3xf32> to vector<1x1x3xf32>
    tpu.vector_store %arg19[%c0_144, %c5, %c0_145], %590 {strides = array<i32>} : memref<2x8x8xf32, #tpu.memory_space<vmem>>, vector<1x1x3xf32>,
    %591 = vector.extract_strided_slice %6 {offsets = [6, 0], sizes = [1, 320], strides = [1, 1]} : vector<8x320xf32> to vector<1x320xf32>
    %c0_146 = arith.constant 0 : index
    %c0_147 = arith.constant 0 : index
    %592 = vector.load %arg5[%c0_146, %c0_147] : memref<96x320xf32, #tpu.memory_space<vmem>>, vector<96x320xf32>
    %cst_148 = arith.constant dense<0.000000e+00> : vector<1x320xf32>
    %593 = tpu.matmul %583, %592, %cst_148 {dimension_numbers = #tpu.dot_dimension_numbers<[1], [0], [0], [1], [0, 0, 1, 1], [], []>} : vector<1x96xf32>, vector<96x320xf32>, vector<1x320xf32> -> vector<1x320xf32>
    %594 = vector.extract_strided_slice %583 {offsets = [0, 0], sizes = [1, 32], strides = [1, 1]} : vector<1x96xf32> to vector<1x32xf32>
    %595 = vector.extract_strided_slice %591 {offsets = [0, 0], sizes = [1, 32], strides = [1, 1]} : vector<1x320xf32> to vector<1x32xf32>
    %596 = vector.extract_strided_slice %593 {offsets = [0, 0], sizes = [1, 32], strides = [1, 1]} : vector<1x320xf32> to vector<1x32xf32>
    %597 = arith.addf %595, %596 : vector<1x32xf32>
    %598 = arith.negf %597 : vector<1x32xf32>
    %599 = math.exp %598 : vector<1x32xf32>
    %cst_149 = arith.constant 1.000000e+00 : f32
    %600 = vector.broadcast %cst_149 : f32 to vector<1x32xf32>
    %601 = arith.addf %600, %599 : vector<1x32xf32>
    %602 = arith.divf %600, %601 : vector<1x32xf32>
    %603 = vector.extract_strided_slice %591 {offsets = [0, 32], sizes = [1, 32], strides = [1, 1]} : vector<1x320xf32> to vector<1x32xf32>
    %604 = vector.extract_strided_slice %593 {offsets = [0, 32], sizes = [1, 32], strides = [1, 1]} : vector<1x320xf32> to vector<1x32xf32>
    %605 = arith.addf %603, %604 : vector<1x32xf32>
    %606 = arith.negf %605 : vector<1x32xf32>
    %607 = math.exp %606 : vector<1x32xf32>
    %cst_150 = arith.constant 1.000000e+00 : f32
    %608 = vector.broadcast %cst_150 : f32 to vector<1x32xf32>
    %609 = arith.addf %608, %607 : vector<1x32xf32>
    %610 = arith.divf %608, %609 : vector<1x32xf32>
    %611 = vector.extract_strided_slice %591 {offsets = [0, 64], sizes = [1, 32], strides = [1, 1]} : vector<1x320xf32> to vector<1x32xf32>
    %612 = vector.extract_strided_slice %593 {offsets = [0, 64], sizes = [1, 32], strides = [1, 1]} : vector<1x320xf32> to vector<1x32xf32>
    %c0_151 = arith.constant 0 : index
    %c0_152 = arith.constant 0 : index
    %613 = vector.load %arg7[%c0_151, %c0_152] : memref<1x64xf32, #tpu.memory_space<vmem>>, vector<1x32xf32>
    %614 = arith.addf %612, %613 : vector<1x32xf32>
    %615 = arith.mulf %602, %614 : vector<1x32xf32>
    %616 = arith.addf %611, %615 : vector<1x32xf32>
    %617 = math.tanh %616 : vector<1x32xf32>
    %cst_153 = arith.constant 1.000000e+00 : f32
    %618 = vector.broadcast %cst_153 : f32 to vector<1x32xf32>
    %619 = arith.subf %618, %610 : vector<1x32xf32>
    %620 = arith.mulf %619, %617 : vector<1x32xf32>
    %621 = arith.mulf %610, %594 : vector<1x32xf32>
    %622 = arith.addf %620, %621 : vector<1x32xf32>
    %623 = vector.extract_strided_slice %583 {offsets = [0, 32], sizes = [1, 32], strides = [1, 1]} : vector<1x96xf32> to vector<1x32xf32>
    %624 = vector.extract_strided_slice %591 {offsets = [0, 96], sizes = [1, 32], strides = [1, 1]} : vector<1x320xf32> to vector<1x32xf32>
    %625 = vector.extract_strided_slice %593 {offsets = [0, 96], sizes = [1, 32], strides = [1, 1]} : vector<1x320xf32> to vector<1x32xf32>
    %626 = arith.addf %624, %625 : vector<1x32xf32>
    %627 = arith.negf %626 : vector<1x32xf32>
    %628 = math.exp %627 : vector<1x32xf32>
    %cst_154 = arith.constant 1.000000e+00 : f32
    %629 = vector.broadcast %cst_154 : f32 to vector<1x32xf32>
    %630 = arith.addf %629, %628 : vector<1x32xf32>
    %631 = arith.divf %629, %630 : vector<1x32xf32>
    %632 = vector.extract_strided_slice %591 {offsets = [0, 128], sizes = [1, 32], strides = [1, 1]} : vector<1x320xf32> to vector<1x32xf32>
    %633 = vector.extract_strided_slice %593 {offsets = [0, 128], sizes = [1, 32], strides = [1, 1]} : vector<1x320xf32> to vector<1x32xf32>
    %634 = arith.addf %632, %633 : vector<1x32xf32>
    %635 = arith.negf %634 : vector<1x32xf32>
    %636 = math.exp %635 : vector<1x32xf32>
    %cst_155 = arith.constant 1.000000e+00 : f32
    %637 = vector.broadcast %cst_155 : f32 to vector<1x32xf32>
    %638 = arith.addf %637, %636 : vector<1x32xf32>
    %639 = arith.divf %637, %638 : vector<1x32xf32>
    %640 = vector.extract_strided_slice %591 {offsets = [0, 160], sizes = [1, 32], strides = [1, 1]} : vector<1x320xf32> to vector<1x32xf32>
    %641 = vector.extract_strided_slice %593 {offsets = [0, 160], sizes = [1, 32], strides = [1, 1]} : vector<1x320xf32> to vector<1x32xf32>
    %c0_156 = arith.constant 0 : index
    %c32_157 = arith.constant 32 : index
    %642 = vector.load %arg7[%c0_156, %c32_157] : memref<1x64xf32, #tpu.memory_space<vmem>>, vector<1x32xf32>
    %643 = arith.addf %641, %642 : vector<1x32xf32>
    %644 = arith.mulf %631, %643 : vector<1x32xf32>
    %645 = arith.addf %640, %644 : vector<1x32xf32>
    %646 = math.tanh %645 : vector<1x32xf32>
    %cst_158 = arith.constant 1.000000e+00 : f32
    %647 = vector.broadcast %cst_158 : f32 to vector<1x32xf32>
    %648 = arith.subf %647, %639 : vector<1x32xf32>
    %649 = arith.mulf %648, %646 : vector<1x32xf32>
    %650 = arith.mulf %639, %623 : vector<1x32xf32>
    %651 = arith.addf %649, %650 : vector<1x32xf32>
    %652 = vector.extract_strided_slice %591 {offsets = [0, 192], sizes = [1, 128], strides = [1, 1]} : vector<1x320xf32> to vector<1x128xf32>
    %653 = vector.extract_strided_slice %593 {offsets = [0, 192], sizes = [1, 128], strides = [1, 1]} : vector<1x320xf32> to vector<1x128xf32>
    %654 = arith.addf %652, %653 : vector<1x128xf32>
    %655 = vector.extract_strided_slice %654 {offsets = [0, 0], sizes = [1, 32], strides = [1, 1]} : vector<1x128xf32> to vector<1x32xf32>
    %656 = arith.negf %655 : vector<1x32xf32>
    %657 = math.exp %656 : vector<1x32xf32>
    %cst_159 = arith.constant 1.000000e+00 : f32
    %658 = vector.broadcast %cst_159 : f32 to vector<1x32xf32>
    %659 = arith.addf %658, %657 : vector<1x32xf32>
    %660 = arith.divf %658, %659 : vector<1x32xf32>
    %661 = vector.extract_strided_slice %654 {offsets = [0, 32], sizes = [1, 32], strides = [1, 1]} : vector<1x128xf32> to vector<1x32xf32>
    %662 = arith.negf %661 : vector<1x32xf32>
    %663 = math.exp %662 : vector<1x32xf32>
    %cst_160 = arith.constant 1.000000e+00 : f32
    %664 = vector.broadcast %cst_160 : f32 to vector<1x32xf32>
    %665 = arith.addf %664, %663 : vector<1x32xf32>
    %666 = arith.divf %664, %665 : vector<1x32xf32>
    %667 = vector.extract_strided_slice %654 {offsets = [0, 64], sizes = [1, 32], strides = [1, 1]} : vector<1x128xf32> to vector<1x32xf32>
    %668 = math.tanh %667 : vector<1x32xf32>
    %669 = vector.extract_strided_slice %654 {offsets = [0, 96], sizes = [1, 32], strides = [1, 1]} : vector<1x128xf32> to vector<1x32xf32>
    %670 = arith.negf %669 : vector<1x32xf32>
    %671 = math.exp %670 : vector<1x32xf32>
    %cst_161 = arith.constant 1.000000e+00 : f32
    %672 = vector.broadcast %cst_161 : f32 to vector<1x32xf32>
    %673 = arith.addf %672, %671 : vector<1x32xf32>
    %674 = arith.divf %672, %673 : vector<1x32xf32>
    %675 = arith.mulf %666, %580 : vector<1x32xf32>
    %676 = arith.mulf %660, %668 : vector<1x32xf32>
    %677 = arith.addf %675, %676 : vector<1x32xf32>
    %678 = math.tanh %677 : vector<1x32xf32>
    %679 = arith.mulf %674, %678 : vector<1x32xf32>
    %680 = tpu.concatenate %622, %651, %679 in 1 : vector<1x32xf32>, vector<1x32xf32>, vector<1x32xf32> -> vector<1x96xf32>
    %c0_162 = arith.constant 0 : index
    %c0_163 = arith.constant 0 : index
    %681 = vector.load %arg8[%c0_162, %c0_163] : memref<96x3xf32, #tpu.memory_space<vmem>>, vector<96x3xf32>
    %cst_164 = arith.constant dense<0.000000e+00> : vector<1x3xf32>
    %682 = tpu.matmul %680, %681, %cst_164 {dimension_numbers = #tpu.dot_dimension_numbers<[1], [0], [0], [1], [0, 0, 1, 1], [], []>} : vector<1x96xf32>, vector<96x3xf32>, vector<1x3xf32> -> vector<1x3xf32>
    %c0_165 = arith.constant 0 : index
    %c0_166 = arith.constant 0 : index
    %683 = vector.load %arg9[%c0_165, %c0_166] : memref<1x3xf32, #tpu.memory_space<vmem>>, vector<1x3xf32>
    %684 = arith.addf %682, %683 : vector<1x3xf32>
    %c0_167 = arith.constant 0 : index
    %c6 = arith.constant 6 : index
    %c0_168 = arith.constant 0 : index
    %685 = vector.load %arg19[%c0_167, %c6, %c0_168] : memref<2x8x8xf32, #tpu.memory_space<vmem>>, vector<1x1x3xf32>
    %686 = vector.shape_cast %685 : vector<1x1x3xf32> to vector<1x3xf32>
    %687 = vector.shape_cast %684 : vector<1x3xf32> to vector<1x1x3xf32>
    tpu.vector_store %arg19[%c0_167, %c6, %c0_168], %687 {strides = array<i32>} : memref<2x8x8xf32, #tpu.memory_space<vmem>>, vector<1x1x3xf32>,
    %688 = vector.extract_strided_slice %6 {offsets = [7, 0], sizes = [1, 320], strides = [1, 1]} : vector<8x320xf32> to vector<1x320xf32>
    %c0_169 = arith.constant 0 : index
    %c0_170 = arith.constant 0 : index
    %689 = vector.load %arg5[%c0_169, %c0_170] : memref<96x320xf32, #tpu.memory_space<vmem>>, vector<96x320xf32>
    %cst_171 = arith.constant dense<0.000000e+00> : vector<1x320xf32>
    %690 = tpu.matmul %680, %689, %cst_171 {dimension_numbers = #tpu.dot_dimension_numbers<[1], [0], [0], [1], [0, 0, 1, 1], [], []>} : vector<1x96xf32>, vector<96x320xf32>, vector<1x320xf32> -> vector<1x320xf32>
    %691 = vector.extract_strided_slice %680 {offsets = [0, 0], sizes = [1, 32], strides = [1, 1]} : vector<1x96xf32> to vector<1x32xf32>
    %692 = vector.extract_strided_slice %688 {offsets = [0, 0], sizes = [1, 32], strides = [1, 1]} : vector<1x320xf32> to vector<1x32xf32>
    %693 = vector.extract_strided_slice %690 {offsets = [0, 0], sizes = [1, 32], strides = [1, 1]} : vector<1x320xf32> to vector<1x32xf32>
    %694 = arith.addf %692, %693 : vector<1x32xf32>
    %695 = arith.negf %694 : vector<1x32xf32>
    %696 = math.exp %695 : vector<1x32xf32>
    %cst_172 = arith.constant 1.000000e+00 : f32
    %697 = vector.broadcast %cst_172 : f32 to vector<1x32xf32>
    %698 = arith.addf %697, %696 : vector<1x32xf32>
    %699 = arith.divf %697, %698 : vector<1x32xf32>
    %700 = vector.extract_strided_slice %688 {offsets = [0, 32], sizes = [1, 32], strides = [1, 1]} : vector<1x320xf32> to vector<1x32xf32>
    %701 = vector.extract_strided_slice %690 {offsets = [0, 32], sizes = [1, 32], strides = [1, 1]} : vector<1x320xf32> to vector<1x32xf32>
    %702 = arith.addf %700, %701 : vector<1x32xf32>
    %703 = arith.negf %702 : vector<1x32xf32>
    %704 = math.exp %703 : vector<1x32xf32>
    %cst_173 = arith.constant 1.000000e+00 : f32
    %705 = vector.broadcast %cst_173 : f32 to vector<1x32xf32>
    %706 = arith.addf %705, %704 : vector<1x32xf32>
    %707 = arith.divf %705, %706 : vector<1x32xf32>
    %708 = vector.extract_strided_slice %688 {offsets = [0, 64], sizes = [1, 32], strides = [1, 1]} : vector<1x320xf32> to vector<1x32xf32>
    %709 = vector.extract_strided_slice %690 {offsets = [0, 64], sizes = [1, 32], strides = [1, 1]} : vector<1x320xf32> to vector<1x32xf32>
    %c0_174 = arith.constant 0 : index
    %c0_175 = arith.constant 0 : index
    %710 = vector.load %arg7[%c0_174, %c0_175] : memref<1x64xf32, #tpu.memory_space<vmem>>, vector<1x32xf32>
    %711 = arith.addf %709, %710 : vector<1x32xf32>
    %712 = arith.mulf %699, %711 : vector<1x32xf32>
    %713 = arith.addf %708, %712 : vector<1x32xf32>
    %714 = math.tanh %713 : vector<1x32xf32>
    %cst_176 = arith.constant 1.000000e+00 : f32
    %715 = vector.broadcast %cst_176 : f32 to vector<1x32xf32>
    %716 = arith.subf %715, %707 : vector<1x32xf32>
    %717 = arith.mulf %716, %714 : vector<1x32xf32>
    %718 = arith.mulf %707, %691 : vector<1x32xf32>
    %719 = arith.addf %717, %718 : vector<1x32xf32>
    %720 = vector.extract_strided_slice %680 {offsets = [0, 32], sizes = [1, 32], strides = [1, 1]} : vector<1x96xf32> to vector<1x32xf32>
    %721 = vector.extract_strided_slice %688 {offsets = [0, 96], sizes = [1, 32], strides = [1, 1]} : vector<1x320xf32> to vector<1x32xf32>
    %722 = vector.extract_strided_slice %690 {offsets = [0, 96], sizes = [1, 32], strides = [1, 1]} : vector<1x320xf32> to vector<1x32xf32>
    %723 = arith.addf %721, %722 : vector<1x32xf32>
    %724 = arith.negf %723 : vector<1x32xf32>
    %725 = math.exp %724 : vector<1x32xf32>
    %cst_177 = arith.constant 1.000000e+00 : f32
    %726 = vector.broadcast %cst_177 : f32 to vector<1x32xf32>
    %727 = arith.addf %726, %725 : vector<1x32xf32>
    %728 = arith.divf %726, %727 : vector<1x32xf32>
    %729 = vector.extract_strided_slice %688 {offsets = [0, 128], sizes = [1, 32], strides = [1, 1]} : vector<1x320xf32> to vector<1x32xf32>
    %730 = vector.extract_strided_slice %690 {offsets = [0, 128], sizes = [1, 32], strides = [1, 1]} : vector<1x320xf32> to vector<1x32xf32>
    %731 = arith.addf %729, %730 : vector<1x32xf32>
    %732 = arith.negf %731 : vector<1x32xf32>
    %733 = math.exp %732 : vector<1x32xf32>
    %cst_178 = arith.constant 1.000000e+00 : f32
    %734 = vector.broadcast %cst_178 : f32 to vector<1x32xf32>
    %735 = arith.addf %734, %733 : vector<1x32xf32>
    %736 = arith.divf %734, %735 : vector<1x32xf32>
    %737 = vector.extract_strided_slice %688 {offsets = [0, 160], sizes = [1, 32], strides = [1, 1]} : vector<1x320xf32> to vector<1x32xf32>
    %738 = vector.extract_strided_slice %690 {offsets = [0, 160], sizes = [1, 32], strides = [1, 1]} : vector<1x320xf32> to vector<1x32xf32>
    %c0_179 = arith.constant 0 : index
    %c32_180 = arith.constant 32 : index
    %739 = vector.load %arg7[%c0_179, %c32_180] : memref<1x64xf32, #tpu.memory_space<vmem>>, vector<1x32xf32>
    %740 = arith.addf %738, %739 : vector<1x32xf32>
    %741 = arith.mulf %728, %740 : vector<1x32xf32>
    %742 = arith.addf %737, %741 : vector<1x32xf32>
    %743 = math.tanh %742 : vector<1x32xf32>
    %cst_181 = arith.constant 1.000000e+00 : f32
    %744 = vector.broadcast %cst_181 : f32 to vector<1x32xf32>
    %745 = arith.subf %744, %736 : vector<1x32xf32>
    %746 = arith.mulf %745, %743 : vector<1x32xf32>
    %747 = arith.mulf %736, %720 : vector<1x32xf32>
    %748 = arith.addf %746, %747 : vector<1x32xf32>
    %749 = vector.extract_strided_slice %688 {offsets = [0, 192], sizes = [1, 128], strides = [1, 1]} : vector<1x320xf32> to vector<1x128xf32>
    %750 = vector.extract_strided_slice %690 {offsets = [0, 192], sizes = [1, 128], strides = [1, 1]} : vector<1x320xf32> to vector<1x128xf32>
    %751 = arith.addf %749, %750 : vector<1x128xf32>
    %752 = vector.extract_strided_slice %751 {offsets = [0, 0], sizes = [1, 32], strides = [1, 1]} : vector<1x128xf32> to vector<1x32xf32>
    %753 = arith.negf %752 : vector<1x32xf32>
    %754 = math.exp %753 : vector<1x32xf32>
    %cst_182 = arith.constant 1.000000e+00 : f32
    %755 = vector.broadcast %cst_182 : f32 to vector<1x32xf32>
    %756 = arith.addf %755, %754 : vector<1x32xf32>
    %757 = arith.divf %755, %756 : vector<1x32xf32>
    %758 = vector.extract_strided_slice %751 {offsets = [0, 32], sizes = [1, 32], strides = [1, 1]} : vector<1x128xf32> to vector<1x32xf32>
    %759 = arith.negf %758 : vector<1x32xf32>
    %760 = math.exp %759 : vector<1x32xf32>
    %cst_183 = arith.constant 1.000000e+00 : f32
    %761 = vector.broadcast %cst_183 : f32 to vector<1x32xf32>
    %762 = arith.addf %761, %760 : vector<1x32xf32>
    %763 = arith.divf %761, %762 : vector<1x32xf32>
    %764 = vector.extract_strided_slice %751 {offsets = [0, 64], sizes = [1, 32], strides = [1, 1]} : vector<1x128xf32> to vector<1x32xf32>
    %765 = math.tanh %764 : vector<1x32xf32>
    %766 = vector.extract_strided_slice %751 {offsets = [0, 96], sizes = [1, 32], strides = [1, 1]} : vector<1x128xf32> to vector<1x32xf32>
    %767 = arith.negf %766 : vector<1x32xf32>
    %768 = math.exp %767 : vector<1x32xf32>
    %cst_184 = arith.constant 1.000000e+00 : f32
    %769 = vector.broadcast %cst_184 : f32 to vector<1x32xf32>
    %770 = arith.addf %769, %768 : vector<1x32xf32>
    %771 = arith.divf %769, %770 : vector<1x32xf32>
    %772 = arith.mulf %763, %677 : vector<1x32xf32>
    %773 = arith.mulf %757, %765 : vector<1x32xf32>
    %774 = arith.addf %772, %773 : vector<1x32xf32>
    %775 = math.tanh %774 : vector<1x32xf32>
    %776 = arith.mulf %771, %775 : vector<1x32xf32>
    %777 = tpu.concatenate %719, %748, %776 in 1 : vector<1x32xf32>, vector<1x32xf32>, vector<1x32xf32> -> vector<1x96xf32>
    %c0_185 = arith.constant 0 : index
    %c0_186 = arith.constant 0 : index
    %778 = vector.load %arg8[%c0_185, %c0_186] : memref<96x3xf32, #tpu.memory_space<vmem>>, vector<96x3xf32>
    %cst_187 = arith.constant dense<0.000000e+00> : vector<1x3xf32>
    %779 = tpu.matmul %777, %778, %cst_187 {dimension_numbers = #tpu.dot_dimension_numbers<[1], [0], [0], [1], [0, 0, 1, 1], [], []>} : vector<1x96xf32>, vector<96x3xf32>, vector<1x3xf32> -> vector<1x3xf32>
    %c0_188 = arith.constant 0 : index
    %c0_189 = arith.constant 0 : index
    %780 = vector.load %arg9[%c0_188, %c0_189] : memref<1x3xf32, #tpu.memory_space<vmem>>, vector<1x3xf32>
    %781 = arith.addf %779, %780 : vector<1x3xf32>
    %c0_190 = arith.constant 0 : index
    %c7 = arith.constant 7 : index
    %c0_191 = arith.constant 0 : index
    %782 = vector.load %arg19[%c0_190, %c7, %c0_191] : memref<2x8x8xf32, #tpu.memory_space<vmem>>, vector<1x1x3xf32>
    %783 = vector.shape_cast %782 : vector<1x1x3xf32> to vector<1x3xf32>
    %784 = vector.shape_cast %781 : vector<1x3xf32> to vector<1x1x3xf32>
    tpu.vector_store %arg19[%c0_190, %c7, %c0_191], %784 {strides = array<i32>} : memref<2x8x8xf32, #tpu.memory_space<vmem>>, vector<1x1x3xf32>,
    %c0_192 = arith.constant 0 : index
    %c0_193 = arith.constant 0 : index
    %c0_194 = arith.constant 0 : index
    %785 = vector.load %arg1[%c0_192, %c0_193, %c0_194] : memref<2x8x4xf32, #tpu.memory_space<vmem>>, vector<1x8x4xf32>
    %786 = vector.shape_cast %785 : vector<1x8x4xf32> to vector<8x4xf32>
    %c0_195 = arith.constant 0 : index
    %c0_196 = arith.constant 0 : index
    %787 = vector.load %arg2[%c0_195, %c0_196] : memref<8x8xf32, #tpu.memory_space<vmem>>, vector<8x8xf32>
    %cst_197 = arith.constant dense<0.000000e+00> : vector<8x4xf32>
    %788 = tpu.matmul %787, %786, %cst_197 {dimension_numbers = #tpu.dot_dimension_numbers<[1], [0], [0], [1], [0, 0, 1, 1], [], []>} : vector<8x8xf32>, vector<8x4xf32>, vector<8x4xf32> -> vector<8x4xf32>
    %c0_198 = arith.constant 0 : index
    %c0_199 = arith.constant 0 : index
    %789 = vector.load %arg10[%c0_198, %c0_199] : memref<4x16xf32, #tpu.memory_space<vmem>>, vector<4x16xf32>
    %cst_200 = arith.constant dense<0.000000e+00> : vector<8x16xf32>
    %790 = tpu.matmul %788, %789, %cst_200 {dimension_numbers = #tpu.dot_dimension_numbers<[1], [0], [0], [1], [0, 0, 1, 1], [], []>} : vector<8x4xf32>, vector<4x16xf32>, vector<8x16xf32> -> vector<8x16xf32>
    %c0_201 = arith.constant 0 : index
    %c0_202 = arith.constant 0 : index
    %791 = vector.load %arg11[%c0_201, %c0_202] : memref<1x16xf32, #tpu.memory_space<vmem>>, vector<1x16xf32>
    %792 = vector.broadcast %791 : vector<1x16xf32> to vector<8x16xf32>
    %793 = arith.addf %790, %792 : vector<8x16xf32>
    %cst_203 = arith.constant 0.000000e+00 : f32
    %794 = vector.broadcast %cst_203 : f32 to vector<8x16xf32>
    %795 = arith.maximumf %793, %794 : vector<8x16xf32>
    %c0_204 = arith.constant 0 : index
    %c0_205 = arith.constant 0 : index
    %796 = vector.load %arg3[%c0_204, %c0_205] : memref<8x8xf32, #tpu.memory_space<vmem>>, vector<8x8xf32>
    %cst_206 = arith.constant dense<0.000000e+00> : vector<8x16xf32>
    %797 = tpu.matmul %796, %795, %cst_206 {dimension_numbers = #tpu.dot_dimension_numbers<[1], [0], [0], [1], [0, 0, 1, 1], [], []>} : vector<8x8xf32>, vector<8x16xf32>, vector<8x16xf32> -> vector<8x16xf32>
    %c0_207 = arith.constant 0 : index
    %c0_208 = arith.constant 0 : index
    %798 = vector.load %arg12[%c0_207, %c0_208] : memref<16x5xf32, #tpu.memory_space<vmem>>, vector<16x5xf32>
    %cst_209 = arith.constant dense<0.000000e+00> : vector<8x5xf32>
    %799 = tpu.matmul %797, %798, %cst_209 {dimension_numbers = #tpu.dot_dimension_numbers<[1], [0], [0], [1], [0, 0, 1, 1], [], []>} : vector<8x16xf32>, vector<16x5xf32>, vector<8x5xf32> -> vector<8x5xf32>
    %c0_210 = arith.constant 0 : index
    %c0_211 = arith.constant 0 : index
    %800 = vector.load %arg13[%c0_210, %c0_211] : memref<1x5xf32, #tpu.memory_space<vmem>>, vector<1x5xf32>
    %801 = vector.broadcast %800 : vector<1x5xf32> to vector<8x5xf32>
    %802 = arith.addf %799, %801 : vector<8x5xf32>
    %c0_212 = arith.constant 0 : index
    %c0_213 = arith.constant 0 : index
    %c3_214 = arith.constant 3 : index
    %803 = vector.load %arg19[%c0_212, %c0_213, %c3_214] : memref<2x8x8xf32, #tpu.memory_space<vmem>>, vector<1x8x5xf32>
    %804 = vector.shape_cast %803 : vector<1x8x5xf32> to vector<8x5xf32>
    %805 = vector.shape_cast %802 : vector<8x5xf32> to vector<1x8x5xf32>
    tpu.vector_store %arg19[%c0_212, %c0_213, %c3_214], %805 {strides = array<i32>} : memref<2x8x8xf32, #tpu.memory_space<vmem>>, vector<1x8x5xf32>,
    %c0_215 = arith.constant 0 : index
    %c0_216 = arith.constant 0 : index
    %c0_217 = arith.constant 0 : index
    %806 = vector.load %arg19[%c0_215, %c0_216, %c0_217] : memref<2x8x8xf32, #tpu.memory_space<vmem>>, vector<1x8x8xf32>
    %807 = vector.shape_cast %806 : vector<1x8x8xf32> to vector<8x8xf32>
    %c0_218 = arith.constant 0 : index
    %c0_219 = arith.constant 0 : index
    %808 = vector.load %arg14[%c0_218, %c0_219] : memref<8x32xf32, #tpu.memory_space<vmem>>, vector<8x32xf32>
    %cst_220 = arith.constant dense<0.000000e+00> : vector<8x32xf32>
    %809 = tpu.matmul %807, %808, %cst_220 {dimension_numbers = #tpu.dot_dimension_numbers<[1], [0], [0], [1], [0, 0, 1, 1], [], []>} : vector<8x8xf32>, vector<8x32xf32>, vector<8x32xf32> -> vector<8x32xf32>
    %c0_221 = arith.constant 0 : index
    %c0_222 = arith.constant 0 : index
    %810 = vector.load %arg15[%c0_221, %c0_222] : memref<1x32xf32, #tpu.memory_space<vmem>>, vector<1x32xf32>
    %811 = vector.broadcast %810 : vector<1x32xf32> to vector<8x32xf32>
    %812 = arith.addf %809, %811 : vector<8x32xf32>
    %cst_223 = arith.constant 0.000000e+00 : f32
    %813 = vector.broadcast %cst_223 : f32 to vector<8x32xf32>
    %814 = arith.maximumf %812, %813 : vector<8x32xf32>
    %c0_224 = arith.constant 0 : index
    %c0_225 = arith.constant 0 : index
    %815 = vector.load %arg16[%c0_224, %c0_225] : memref<32x1xf32, #tpu.memory_space<vmem>>, vector<32x1xf32>
    %cst_226 = arith.constant dense<0.000000e+00> : vector<8x1xf32>
    %816 = tpu.matmul %814, %815, %cst_226 {dimension_numbers = #tpu.dot_dimension_numbers<[1], [0], [0], [1], [0, 0, 1, 1], [], []>} : vector<8x32xf32>, vector<32x1xf32>, vector<8x1xf32> -> vector<8x1xf32>
    %c0_227 = arith.constant 0 : index
    %c0_228 = arith.constant 0 : index
    %817 = vector.load %arg17[%c0_227, %c0_228] : memref<1x1xf32, #tpu.memory_space<vmem>>, vector<1x1xf32>
    %818 = vector.broadcast %817 : vector<1x1xf32> to vector<8x1xf32>
    %819 = arith.addf %816, %818 : vector<8x1xf32>
    %c0_229 = arith.constant 0 : index
    %c0_230 = arith.constant 0 : index
    %c0_231 = arith.constant 0 : index
    %820 = vector.load %arg18[%c0_229, %c0_230, %c0_231] : memref<2x8x1xf32, #tpu.memory_space<vmem>>, vector<1x8x1xf32>
    %821 = vector.shape_cast %820 : vector<1x8x1xf32> to vector<8x1xf32>
    %822 = vector.shape_cast %819 : vector<8x1xf32> to vector<1x8x1xf32>
    tpu.vector_store %arg18[%c0_229, %c0_230, %c0_231], %822 {strides = array<i32>} : memref<2x8x1xf32, #tpu.memory_space<vmem>>, vector<1x8x1xf32>,
    %c1_232 = arith.constant 1 : index
    %c0_233 = arith.constant 0 : index
    %c0_234 = arith.constant 0 : index
    %823 = vector.load %arg0[%c1_232, %c0_233, %c0_234] : memref<2x8x3xf32, #tpu.memory_space<vmem>>, vector<1x8x3xf32>
    %824 = vector.shape_cast %823 : vector<1x8x3xf32> to vector<8x3xf32>
    %c0_235 = arith.constant 0 : index
    %c0_236 = arith.constant 0 : index
    %825 = vector.load %arg4[%c0_235, %c0_236] : memref<3x320xf32, #tpu.memory_space<vmem>>, vector<3x320xf32>
    %cst_237 = arith.constant dense<0.000000e+00> : vector<8x320xf32>
    %826 = tpu.matmul %824, %825, %cst_237 {dimension_numbers = #tpu.dot_dimension_numbers<[1], [0], [0], [1], [0, 0, 1, 1], [], []>} : vector<8x3xf32>, vector<3x320xf32>, vector<8x320xf32> -> vector<8x320xf32>
    %c0_238 = arith.constant 0 : index
    %c0_239 = arith.constant 0 : index
    %827 = vector.load %arg6[%c0_238, %c0_239] : memref<1x320xf32, #tpu.memory_space<vmem>>, vector<1x320xf32>
    %828 = vector.broadcast %827 : vector<1x320xf32> to vector<8x320xf32>
    %829 = arith.addf %826, %828 : vector<8x320xf32>
    %cst_240 = arith.constant 0.000000e+00 : f32
    %830 = vector.broadcast %cst_240 : f32 to vector<1x96xf32>
    %cst_241 = arith.constant 0.000000e+00 : f32
    %831 = vector.broadcast %cst_241 : f32 to vector<1x32xf32>
    %832 = vector.extract_strided_slice %829 {offsets = [0, 0], sizes = [1, 320], strides = [1, 1]} : vector<8x320xf32> to vector<1x320xf32>
    %c0_242 = arith.constant 0 : index
    %c0_243 = arith.constant 0 : index
    %833 = vector.load %arg5[%c0_242, %c0_243] : memref<96x320xf32, #tpu.memory_space<vmem>>, vector<96x320xf32>
    %cst_244 = arith.constant dense<0.000000e+00> : vector<1x320xf32>
    %834 = tpu.matmul %830, %833, %cst_244 {dimension_numbers = #tpu.dot_dimension_numbers<[1], [0], [0], [1], [0, 0, 1, 1], [], []>} : vector<1x96xf32>, vector<96x320xf32>, vector<1x320xf32> -> vector<1x320xf32>
    %835 = vector.extract_strided_slice %830 {offsets = [0, 0], sizes = [1, 32], strides = [1, 1]} : vector<1x96xf32> to vector<1x32xf32>
    %836 = vector.extract_strided_slice %832 {offsets = [0, 0], sizes = [1, 32], strides = [1, 1]} : vector<1x320xf32> to vector<1x32xf32>
    %837 = vector.extract_strided_slice %834 {offsets = [0, 0], sizes = [1, 32], strides = [1, 1]} : vector<1x320xf32> to vector<1x32xf32>
    %838 = arith.addf %836, %837 : vector<1x32xf32>
    %839 = arith.negf %838 : vector<1x32xf32>
    %840 = math.exp %839 : vector<1x32xf32>
    %cst_245 = arith.constant 1.000000e+00 : f32
    %841 = vector.broadcast %cst_245 : f32 to vector<1x32xf32>
    %842 = arith.addf %841, %840 : vector<1x32xf32>
    %843 = arith.divf %841, %842 : vector<1x32xf32>
    %844 = vector.extract_strided_slice %832 {offsets = [0, 32], sizes = [1, 32], strides = [1, 1]} : vector<1x320xf32> to vector<1x32xf32>
    %845 = vector.extract_strided_slice %834 {offsets = [0, 32], sizes = [1, 32], strides = [1, 1]} : vector<1x320xf32> to vector<1x32xf32>
    %846 = arith.addf %844, %845 : vector<1x32xf32>
    %847 = arith.negf %846 : vector<1x32xf32>
    %848 = math.exp %847 : vector<1x32xf32>
    %cst_246 = arith.constant 1.000000e+00 : f32
    %849 = vector.broadcast %cst_246 : f32 to vector<1x32xf32>
    %850 = arith.addf %849, %848 : vector<1x32xf32>
    %851 = arith.divf %849, %850 : vector<1x32xf32>
    %852 = vector.extract_strided_slice %832 {offsets = [0, 64], sizes = [1, 32], strides = [1, 1]} : vector<1x320xf32> to vector<1x32xf32>
    %853 = vector.extract_strided_slice %834 {offsets = [0, 64], sizes = [1, 32], strides = [1, 1]} : vector<1x320xf32> to vector<1x32xf32>
    %c0_247 = arith.constant 0 : index
    %c0_248 = arith.constant 0 : index
    %854 = vector.load %arg7[%c0_247, %c0_248] : memref<1x64xf32, #tpu.memory_space<vmem>>, vector<1x32xf32>
    %855 = arith.addf %853, %854 : vector<1x32xf32>
    %856 = arith.mulf %843, %855 : vector<1x32xf32>
    %857 = arith.addf %852, %856 : vector<1x32xf32>
    %858 = math.tanh %857 : vector<1x32xf32>
    %cst_249 = arith.constant 1.000000e+00 : f32
    %859 = vector.broadcast %cst_249 : f32 to vector<1x32xf32>
    %860 = arith.subf %859, %851 : vector<1x32xf32>
    %861 = arith.mulf %860, %858 : vector<1x32xf32>
    %862 = arith.mulf %851, %835 : vector<1x32xf32>
    %863 = arith.addf %861, %862 : vector<1x32xf32>
    %864 = vector.extract_strided_slice %830 {offsets = [0, 32], sizes = [1, 32], strides = [1, 1]} : vector<1x96xf32> to vector<1x32xf32>
    %865 = vector.extract_strided_slice %832 {offsets = [0, 96], sizes = [1, 32], strides = [1, 1]} : vector<1x320xf32> to vector<1x32xf32>
    %866 = vector.extract_strided_slice %834 {offsets = [0, 96], sizes = [1, 32], strides = [1, 1]} : vector<1x320xf32> to vector<1x32xf32>
    %867 = arith.addf %865, %866 : vector<1x32xf32>
    %868 = arith.negf %867 : vector<1x32xf32>
    %869 = math.exp %868 : vector<1x32xf32>
    %cst_250 = arith.constant 1.000000e+00 : f32
    %870 = vector.broadcast %cst_250 : f32 to vector<1x32xf32>
    %871 = arith.addf %870, %869 : vector<1x32xf32>
    %872 = arith.divf %870, %871 : vector<1x32xf32>
    %873 = vector.extract_strided_slice %832 {offsets = [0, 128], sizes = [1, 32], strides = [1, 1]} : vector<1x320xf32> to vector<1x32xf32>
    %874 = vector.extract_strided_slice %834 {offsets = [0, 128], sizes = [1, 32], strides = [1, 1]} : vector<1x320xf32> to vector<1x32xf32>
    %875 = arith.addf %873, %874 : vector<1x32xf32>
    %876 = arith.negf %875 : vector<1x32xf32>
    %877 = math.exp %876 : vector<1x32xf32>
    %cst_251 = arith.constant 1.000000e+00 : f32
    %878 = vector.broadcast %cst_251 : f32 to vector<1x32xf32>
    %879 = arith.addf %878, %877 : vector<1x32xf32>
    %880 = arith.divf %878, %879 : vector<1x32xf32>
    %881 = vector.extract_strided_slice %832 {offsets = [0, 160], sizes = [1, 32], strides = [1, 1]} : vector<1x320xf32> to vector<1x32xf32>
    %882 = vector.extract_strided_slice %834 {offsets = [0, 160], sizes = [1, 32], strides = [1, 1]} : vector<1x320xf32> to vector<1x32xf32>
    %c0_252 = arith.constant 0 : index
    %c32_253 = arith.constant 32 : index
    %883 = vector.load %arg7[%c0_252, %c32_253] : memref<1x64xf32, #tpu.memory_space<vmem>>, vector<1x32xf32>
    %884 = arith.addf %882, %883 : vector<1x32xf32>
    %885 = arith.mulf %872, %884 : vector<1x32xf32>
    %886 = arith.addf %881, %885 : vector<1x32xf32>
    %887 = math.tanh %886 : vector<1x32xf32>
    %cst_254 = arith.constant 1.000000e+00 : f32
    %888 = vector.broadcast %cst_254 : f32 to vector<1x32xf32>
    %889 = arith.subf %888, %880 : vector<1x32xf32>
    %890 = arith.mulf %889, %887 : vector<1x32xf32>
    %891 = arith.mulf %880, %864 : vector<1x32xf32>
    %892 = arith.addf %890, %891 : vector<1x32xf32>
    %893 = vector.extract_strided_slice %832 {offsets = [0, 192], sizes = [1, 128], strides = [1, 1]} : vector<1x320xf32> to vector<1x128xf32>
    %894 = vector.extract_strided_slice %834 {offsets = [0, 192], sizes = [1, 128], strides = [1, 1]} : vector<1x320xf32> to vector<1x128xf32>
    %895 = arith.addf %893, %894 : vector<1x128xf32>
    %896 = vector.extract_strided_slice %895 {offsets = [0, 0], sizes = [1, 32], strides = [1, 1]} : vector<1x128xf32> to vector<1x32xf32>
    %897 = arith.negf %896 : vector<1x32xf32>
    %898 = math.exp %897 : vector<1x32xf32>
    %cst_255 = arith.constant 1.000000e+00 : f32
    %899 = vector.broadcast %cst_255 : f32 to vector<1x32xf32>
    %900 = arith.addf %899, %898 : vector<1x32xf32>
    %901 = arith.divf %899, %900 : vector<1x32xf32>
    %902 = vector.extract_strided_slice %895 {offsets = [0, 32], sizes = [1, 32], strides = [1, 1]} : vector<1x128xf32> to vector<1x32xf32>
    %903 = arith.negf %902 : vector<1x32xf32>
    %904 = math.exp %903 : vector<1x32xf32>
    %cst_256 = arith.constant 1.000000e+00 : f32
    %905 = vector.broadcast %cst_256 : f32 to vector<1x32xf32>
    %906 = arith.addf %905, %904 : vector<1x32xf32>
    %907 = arith.divf %905, %906 : vector<1x32xf32>
    %908 = vector.extract_strided_slice %895 {offsets = [0, 64], sizes = [1, 32], strides = [1, 1]} : vector<1x128xf32> to vector<1x32xf32>
    %909 = math.tanh %908 : vector<1x32xf32>
    %910 = vector.extract_strided_slice %895 {offsets = [0, 96], sizes = [1, 32], strides = [1, 1]} : vector<1x128xf32> to vector<1x32xf32>
    %911 = arith.negf %910 : vector<1x32xf32>
    %912 = math.exp %911 : vector<1x32xf32>
    %cst_257 = arith.constant 1.000000e+00 : f32
    %913 = vector.broadcast %cst_257 : f32 to vector<1x32xf32>
    %914 = arith.addf %913, %912 : vector<1x32xf32>
    %915 = arith.divf %913, %914 : vector<1x32xf32>
    %916 = arith.mulf %907, %831 : vector<1x32xf32>
    %917 = arith.mulf %901, %909 : vector<1x32xf32>
    %918 = arith.addf %916, %917 : vector<1x32xf32>
    %919 = math.tanh %918 : vector<1x32xf32>
    %920 = arith.mulf %915, %919 : vector<1x32xf32>
    %921 = tpu.concatenate %863, %892, %920 in 1 : vector<1x32xf32>, vector<1x32xf32>, vector<1x32xf32> -> vector<1x96xf32>
    %c0_258 = arith.constant 0 : index
    %c0_259 = arith.constant 0 : index
    %922 = vector.load %arg8[%c0_258, %c0_259] : memref<96x3xf32, #tpu.memory_space<vmem>>, vector<96x3xf32>
    %cst_260 = arith.constant dense<0.000000e+00> : vector<1x3xf32>
    %923 = tpu.matmul %921, %922, %cst_260 {dimension_numbers = #tpu.dot_dimension_numbers<[1], [0], [0], [1], [0, 0, 1, 1], [], []>} : vector<1x96xf32>, vector<96x3xf32>, vector<1x3xf32> -> vector<1x3xf32>
    %c0_261 = arith.constant 0 : index
    %c0_262 = arith.constant 0 : index
    %924 = vector.load %arg9[%c0_261, %c0_262] : memref<1x3xf32, #tpu.memory_space<vmem>>, vector<1x3xf32>
    %925 = arith.addf %923, %924 : vector<1x3xf32>
    %c1_263 = arith.constant 1 : index
    %c0_264 = arith.constant 0 : index
    %c0_265 = arith.constant 0 : index
    %926 = vector.load %arg19[%c1_263, %c0_264, %c0_265] : memref<2x8x8xf32, #tpu.memory_space<vmem>>, vector<1x1x3xf32>
    %927 = vector.shape_cast %926 : vector<1x1x3xf32> to vector<1x3xf32>
    %928 = vector.shape_cast %925 : vector<1x3xf32> to vector<1x1x3xf32>
    tpu.vector_store %arg19[%c1_263, %c0_264, %c0_265], %928 {strides = array<i32>} : memref<2x8x8xf32, #tpu.memory_space<vmem>>, vector<1x1x3xf32>,
    %929 = vector.extract_strided_slice %829 {offsets = [1, 0], sizes = [1, 320], strides = [1, 1]} : vector<8x320xf32> to vector<1x320xf32>
    %c0_266 = arith.constant 0 : index
    %c0_267 = arith.constant 0 : index
    %930 = vector.load %arg5[%c0_266, %c0_267] : memref<96x320xf32, #tpu.memory_space<vmem>>, vector<96x320xf32>
    %cst_268 = arith.constant dense<0.000000e+00> : vector<1x320xf32>
    %931 = tpu.matmul %921, %930, %cst_268 {dimension_numbers = #tpu.dot_dimension_numbers<[1], [0], [0], [1], [0, 0, 1, 1], [], []>} : vector<1x96xf32>, vector<96x320xf32>, vector<1x320xf32> -> vector<1x320xf32>
    %932 = vector.extract_strided_slice %921 {offsets = [0, 0], sizes = [1, 32], strides = [1, 1]} : vector<1x96xf32> to vector<1x32xf32>
    %933 = vector.extract_strided_slice %929 {offsets = [0, 0], sizes = [1, 32], strides = [1, 1]} : vector<1x320xf32> to vector<1x32xf32>
    %934 = vector.extract_strided_slice %931 {offsets = [0, 0], sizes = [1, 32], strides = [1, 1]} : vector<1x320xf32> to vector<1x32xf32>
    %935 = arith.addf %933, %934 : vector<1x32xf32>
    %936 = arith.negf %935 : vector<1x32xf32>
    %937 = math.exp %936 : vector<1x32xf32>
    %cst_269 = arith.constant 1.000000e+00 : f32
    %938 = vector.broadcast %cst_269 : f32 to vector<1x32xf32>
    %939 = arith.addf %938, %937 : vector<1x32xf32>
    %940 = arith.divf %938, %939 : vector<1x32xf32>
    %941 = vector.extract_strided_slice %929 {offsets = [0, 32], sizes = [1, 32], strides = [1, 1]} : vector<1x320xf32> to vector<1x32xf32>
    %942 = vector.extract_strided_slice %931 {offsets = [0, 32], sizes = [1, 32], strides = [1, 1]} : vector<1x320xf32> to vector<1x32xf32>
    %943 = arith.addf %941, %942 : vector<1x32xf32>
    %944 = arith.negf %943 : vector<1x32xf32>
    %945 = math.exp %944 : vector<1x32xf32>
    %cst_270 = arith.constant 1.000000e+00 : f32
    %946 = vector.broadcast %cst_270 : f32 to vector<1x32xf32>
    %947 = arith.addf %946, %945 : vector<1x32xf32>
    %948 = arith.divf %946, %947 : vector<1x32xf32>
    %949 = vector.extract_strided_slice %929 {offsets = [0, 64], sizes = [1, 32], strides = [1, 1]} : vector<1x320xf32> to vector<1x32xf32>
    %950 = vector.extract_strided_slice %931 {offsets = [0, 64], sizes = [1, 32], strides = [1, 1]} : vector<1x320xf32> to vector<1x32xf32>
    %c0_271 = arith.constant 0 : index
    %c0_272 = arith.constant 0 : index
    %951 = vector.load %arg7[%c0_271, %c0_272] : memref<1x64xf32, #tpu.memory_space<vmem>>, vector<1x32xf32>
    %952 = arith.addf %950, %951 : vector<1x32xf32>
    %953 = arith.mulf %940, %952 : vector<1x32xf32>
    %954 = arith.addf %949, %953 : vector<1x32xf32>
    %955 = math.tanh %954 : vector<1x32xf32>
    %cst_273 = arith.constant 1.000000e+00 : f32
    %956 = vector.broadcast %cst_273 : f32 to vector<1x32xf32>
    %957 = arith.subf %956, %948 : vector<1x32xf32>
    %958 = arith.mulf %957, %955 : vector<1x32xf32>
    %959 = arith.mulf %948, %932 : vector<1x32xf32>
    %960 = arith.addf %958, %959 : vector<1x32xf32>
    %961 = vector.extract_strided_slice %921 {offsets = [0, 32], sizes = [1, 32], strides = [1, 1]} : vector<1x96xf32> to vector<1x32xf32>
    %962 = vector.extract_strided_slice %929 {offsets = [0, 96], sizes = [1, 32], strides = [1, 1]} : vector<1x320xf32> to vector<1x32xf32>
    %963 = vector.extract_strided_slice %931 {offsets = [0, 96], sizes = [1, 32], strides = [1, 1]} : vector<1x320xf32> to vector<1x32xf32>
    %964 = arith.addf %962, %963 : vector<1x32xf32>
    %965 = arith.negf %964 : vector<1x32xf32>
    %966 = math.exp %965 : vector<1x32xf32>
    %cst_274 = arith.constant 1.000000e+00 : f32
    %967 = vector.broadcast %cst_274 : f32 to vector<1x32xf32>
    %968 = arith.addf %967, %966 : vector<1x32xf32>
    %969 = arith.divf %967, %968 : vector<1x32xf32>
    %970 = vector.extract_strided_slice %929 {offsets = [0, 128], sizes = [1, 32], strides = [1, 1]} : vector<1x320xf32> to vector<1x32xf32>
    %971 = vector.extract_strided_slice %931 {offsets = [0, 128], sizes = [1, 32], strides = [1, 1]} : vector<1x320xf32> to vector<1x32xf32>
    %972 = arith.addf %970, %971 : vector<1x32xf32>
    %973 = arith.negf %972 : vector<1x32xf32>
    %974 = math.exp %973 : vector<1x32xf32>
    %cst_275 = arith.constant 1.000000e+00 : f32
    %975 = vector.broadcast %cst_275 : f32 to vector<1x32xf32>
    %976 = arith.addf %975, %974 : vector<1x32xf32>
    %977 = arith.divf %975, %976 : vector<1x32xf32>
    %978 = vector.extract_strided_slice %929 {offsets = [0, 160], sizes = [1, 32], strides = [1, 1]} : vector<1x320xf32> to vector<1x32xf32>
    %979 = vector.extract_strided_slice %931 {offsets = [0, 160], sizes = [1, 32], strides = [1, 1]} : vector<1x320xf32> to vector<1x32xf32>
    %c0_276 = arith.constant 0 : index
    %c32_277 = arith.constant 32 : index
    %980 = vector.load %arg7[%c0_276, %c32_277] : memref<1x64xf32, #tpu.memory_space<vmem>>, vector<1x32xf32>
    %981 = arith.addf %979, %980 : vector<1x32xf32>
    %982 = arith.mulf %969, %981 : vector<1x32xf32>
    %983 = arith.addf %978, %982 : vector<1x32xf32>
    %984 = math.tanh %983 : vector<1x32xf32>
    %cst_278 = arith.constant 1.000000e+00 : f32
    %985 = vector.broadcast %cst_278 : f32 to vector<1x32xf32>
    %986 = arith.subf %985, %977 : vector<1x32xf32>
    %987 = arith.mulf %986, %984 : vector<1x32xf32>
    %988 = arith.mulf %977, %961 : vector<1x32xf32>
    %989 = arith.addf %987, %988 : vector<1x32xf32>
    %990 = vector.extract_strided_slice %929 {offsets = [0, 192], sizes = [1, 128], strides = [1, 1]} : vector<1x320xf32> to vector<1x128xf32>
    %991 = vector.extract_strided_slice %931 {offsets = [0, 192], sizes = [1, 128], strides = [1, 1]} : vector<1x320xf32> to vector<1x128xf32>
    %992 = arith.addf %990, %991 : vector<1x128xf32>
    %993 = vector.extract_strided_slice %992 {offsets = [0, 0], sizes = [1, 32], strides = [1, 1]} : vector<1x128xf32> to vector<1x32xf32>
    %994 = arith.negf %993 : vector<1x32xf32>
    %995 = math.exp %994 : vector<1x32xf32>
    %cst_279 = arith.constant 1.000000e+00 : f32
    %996 = vector.broadcast %cst_279 : f32 to vector<1x32xf32>
    %997 = arith.addf %996, %995 : vector<1x32xf32>
    %998 = arith.divf %996, %997 : vector<1x32xf32>
    %999 = vector.extract_strided_slice %992 {offsets = [0, 32], sizes = [1, 32], strides = [1, 1]} : vector<1x128xf32> to vector<1x32xf32>
    %1000 = arith.negf %999 : vector<1x32xf32>
    %1001 = math.exp %1000 : vector<1x32xf32>
    %cst_280 = arith.constant 1.000000e+00 : f32
    %1002 = vector.broadcast %cst_280 : f32 to vector<1x32xf32>
    %1003 = arith.addf %1002, %1001 : vector<1x32xf32>
    %1004 = arith.divf %1002, %1003 : vector<1x32xf32>
    %1005 = vector.extract_strided_slice %992 {offsets = [0, 64], sizes = [1, 32], strides = [1, 1]} : vector<1x128xf32> to vector<1x32xf32>
    %1006 = math.tanh %1005 : vector<1x32xf32>
    %1007 = vector.extract_strided_slice %992 {offsets = [0, 96], sizes = [1, 32], strides = [1, 1]} : vector<1x128xf32> to vector<1x32xf32>
    %1008 = arith.negf %1007 : vector<1x32xf32>
    %1009 = math.exp %1008 : vector<1x32xf32>
    %cst_281 = arith.constant 1.000000e+00 : f32
    %1010 = vector.broadcast %cst_281 : f32 to vector<1x32xf32>
    %1011 = arith.addf %1010, %1009 : vector<1x32xf32>
    %1012 = arith.divf %1010, %1011 : vector<1x32xf32>
    %1013 = arith.mulf %1004, %918 : vector<1x32xf32>
    %1014 = arith.mulf %998, %1006 : vector<1x32xf32>
    %1015 = arith.addf %1013, %1014 : vector<1x32xf32>
    %1016 = math.tanh %1015 : vector<1x32xf32>
    %1017 = arith.mulf %1012, %1016 : vector<1x32xf32>
    %1018 = tpu.concatenate %960, %989, %1017 in 1 : vector<1x32xf32>, vector<1x32xf32>, vector<1x32xf32> -> vector<1x96xf32>
    %c0_282 = arith.constant 0 : index
    %c0_283 = arith.constant 0 : index
    %1019 = vector.load %arg8[%c0_282, %c0_283] : memref<96x3xf32, #tpu.memory_space<vmem>>, vector<96x3xf32>
    %cst_284 = arith.constant dense<0.000000e+00> : vector<1x3xf32>
    %1020 = tpu.matmul %1018, %1019, %cst_284 {dimension_numbers = #tpu.dot_dimension_numbers<[1], [0], [0], [1], [0, 0, 1, 1], [], []>} : vector<1x96xf32>, vector<96x3xf32>, vector<1x3xf32> -> vector<1x3xf32>
    %c0_285 = arith.constant 0 : index
    %c0_286 = arith.constant 0 : index
    %1021 = vector.load %arg9[%c0_285, %c0_286] : memref<1x3xf32, #tpu.memory_space<vmem>>, vector<1x3xf32>
    %1022 = arith.addf %1020, %1021 : vector<1x3xf32>
    %c1_287 = arith.constant 1 : index
    %c1_288 = arith.constant 1 : index
    %c0_289 = arith.constant 0 : index
    %1023 = vector.load %arg19[%c1_287, %c1_288, %c0_289] : memref<2x8x8xf32, #tpu.memory_space<vmem>>, vector<1x1x3xf32>
    %1024 = vector.shape_cast %1023 : vector<1x1x3xf32> to vector<1x3xf32>
    %1025 = vector.shape_cast %1022 : vector<1x3xf32> to vector<1x1x3xf32>
    tpu.vector_store %arg19[%c1_287, %c1_288, %c0_289], %1025 {strides = array<i32>} : memref<2x8x8xf32, #tpu.memory_space<vmem>>, vector<1x1x3xf32>,
    %1026 = vector.extract_strided_slice %829 {offsets = [2, 0], sizes = [1, 320], strides = [1, 1]} : vector<8x320xf32> to vector<1x320xf32>
    %c0_290 = arith.constant 0 : index
    %c0_291 = arith.constant 0 : index
    %1027 = vector.load %arg5[%c0_290, %c0_291] : memref<96x320xf32, #tpu.memory_space<vmem>>, vector<96x320xf32>
    %cst_292 = arith.constant dense<0.000000e+00> : vector<1x320xf32>
    %1028 = tpu.matmul %1018, %1027, %cst_292 {dimension_numbers = #tpu.dot_dimension_numbers<[1], [0], [0], [1], [0, 0, 1, 1], [], []>} : vector<1x96xf32>, vector<96x320xf32>, vector<1x320xf32> -> vector<1x320xf32>
    %1029 = vector.extract_strided_slice %1018 {offsets = [0, 0], sizes = [1, 32], strides = [1, 1]} : vector<1x96xf32> to vector<1x32xf32>
    %1030 = vector.extract_strided_slice %1026 {offsets = [0, 0], sizes = [1, 32], strides = [1, 1]} : vector<1x320xf32> to vector<1x32xf32>
    %1031 = vector.extract_strided_slice %1028 {offsets = [0, 0], sizes = [1, 32], strides = [1, 1]} : vector<1x320xf32> to vector<1x32xf32>
    %1032 = arith.addf %1030, %1031 : vector<1x32xf32>
    %1033 = arith.negf %1032 : vector<1x32xf32>
    %1034 = math.exp %1033 : vector<1x32xf32>
    %cst_293 = arith.constant 1.000000e+00 : f32
    %1035 = vector.broadcast %cst_293 : f32 to vector<1x32xf32>
    %1036 = arith.addf %1035, %1034 : vector<1x32xf32>
    %1037 = arith.divf %1035, %1036 : vector<1x32xf32>
    %1038 = vector.extract_strided_slice %1026 {offsets = [0, 32], sizes = [1, 32], strides = [1, 1]} : vector<1x320xf32> to vector<1x32xf32>
    %1039 = vector.extract_strided_slice %1028 {offsets = [0, 32], sizes = [1, 32], strides = [1, 1]} : vector<1x320xf32> to vector<1x32xf32>
    %1040 = arith.addf %1038, %1039 : vector<1x32xf32>
    %1041 = arith.negf %1040 : vector<1x32xf32>
    %1042 = math.exp %1041 : vector<1x32xf32>
    %cst_294 = arith.constant 1.000000e+00 : f32
    %1043 = vector.broadcast %cst_294 : f32 to vector<1x32xf32>
    %1044 = arith.addf %1043, %1042 : vector<1x32xf32>
    %1045 = arith.divf %1043, %1044 : vector<1x32xf32>
    %1046 = vector.extract_strided_slice %1026 {offsets = [0, 64], sizes = [1, 32], strides = [1, 1]} : vector<1x320xf32> to vector<1x32xf32>
    %1047 = vector.extract_strided_slice %1028 {offsets = [0, 64], sizes = [1, 32], strides = [1, 1]} : vector<1x320xf32> to vector<1x32xf32>
    %c0_295 = arith.constant 0 : index
    %c0_296 = arith.constant 0 : index
    %1048 = vector.load %arg7[%c0_295, %c0_296] : memref<1x64xf32, #tpu.memory_space<vmem>>, vector<1x32xf32>
    %1049 = arith.addf %1047, %1048 : vector<1x32xf32>
    %1050 = arith.mulf %1037, %1049 : vector<1x32xf32>
    %1051 = arith.addf %1046, %1050 : vector<1x32xf32>
    %1052 = math.tanh %1051 : vector<1x32xf32>
    %cst_297 = arith.constant 1.000000e+00 : f32
    %1053 = vector.broadcast %cst_297 : f32 to vector<1x32xf32>
    %1054 = arith.subf %1053, %1045 : vector<1x32xf32>
    %1055 = arith.mulf %1054, %1052 : vector<1x32xf32>
    %1056 = arith.mulf %1045, %1029 : vector<1x32xf32>
    %1057 = arith.addf %1055, %1056 : vector<1x32xf32>
    %1058 = vector.extract_strided_slice %1018 {offsets = [0, 32], sizes = [1, 32], strides = [1, 1]} : vector<1x96xf32> to vector<1x32xf32>
    %1059 = vector.extract_strided_slice %1026 {offsets = [0, 96], sizes = [1, 32], strides = [1, 1]} : vector<1x320xf32> to vector<1x32xf32>
    %1060 = vector.extract_strided_slice %1028 {offsets = [0, 96], sizes = [1, 32], strides = [1, 1]} : vector<1x320xf32> to vector<1x32xf32>
    %1061 = arith.addf %1059, %1060 : vector<1x32xf32>
    %1062 = arith.negf %1061 : vector<1x32xf32>
    %1063 = math.exp %1062 : vector<1x32xf32>
    %cst_298 = arith.constant 1.000000e+00 : f32
    %1064 = vector.broadcast %cst_298 : f32 to vector<1x32xf32>
    %1065 = arith.addf %1064, %1063 : vector<1x32xf32>
    %1066 = arith.divf %1064, %1065 : vector<1x32xf32>
    %1067 = vector.extract_strided_slice %1026 {offsets = [0, 128], sizes = [1, 32], strides = [1, 1]} : vector<1x320xf32> to vector<1x32xf32>
    %1068 = vector.extract_strided_slice %1028 {offsets = [0, 128], sizes = [1, 32], strides = [1, 1]} : vector<1x320xf32> to vector<1x32xf32>
    %1069 = arith.addf %1067, %1068 : vector<1x32xf32>
    %1070 = arith.negf %1069 : vector<1x32xf32>
    %1071 = math.exp %1070 : vector<1x32xf32>
    %cst_299 = arith.constant 1.000000e+00 : f32
    %1072 = vector.broadcast %cst_299 : f32 to vector<1x32xf32>
    %1073 = arith.addf %1072, %1071 : vector<1x32xf32>
    %1074 = arith.divf %1072, %1073 : vector<1x32xf32>
    %1075 = vector.extract_strided_slice %1026 {offsets = [0, 160], sizes = [1, 32], strides = [1, 1]} : vector<1x320xf32> to vector<1x32xf32>
    %1076 = vector.extract_strided_slice %1028 {offsets = [0, 160], sizes = [1, 32], strides = [1, 1]} : vector<1x320xf32> to vector<1x32xf32>
    %c0_300 = arith.constant 0 : index
    %c32_301 = arith.constant 32 : index
    %1077 = vector.load %arg7[%c0_300, %c32_301] : memref<1x64xf32, #tpu.memory_space<vmem>>, vector<1x32xf32>
    %1078 = arith.addf %1076, %1077 : vector<1x32xf32>
    %1079 = arith.mulf %1066, %1078 : vector<1x32xf32>
    %1080 = arith.addf %1075, %1079 : vector<1x32xf32>
    %1081 = math.tanh %1080 : vector<1x32xf32>
    %cst_302 = arith.constant 1.000000e+00 : f32
    %1082 = vector.broadcast %cst_302 : f32 to vector<1x32xf32>
    %1083 = arith.subf %1082, %1074 : vector<1x32xf32>
    %1084 = arith.mulf %1083, %1081 : vector<1x32xf32>
    %1085 = arith.mulf %1074, %1058 : vector<1x32xf32>
    %1086 = arith.addf %1084, %1085 : vector<1x32xf32>
    %1087 = vector.extract_strided_slice %1026 {offsets = [0, 192], sizes = [1, 128], strides = [1, 1]} : vector<1x320xf32> to vector<1x128xf32>
    %1088 = vector.extract_strided_slice %1028 {offsets = [0, 192], sizes = [1, 128], strides = [1, 1]} : vector<1x320xf32> to vector<1x128xf32>
    %1089 = arith.addf %1087, %1088 : vector<1x128xf32>
    %1090 = vector.extract_strided_slice %1089 {offsets = [0, 0], sizes = [1, 32], strides = [1, 1]} : vector<1x128xf32> to vector<1x32xf32>
    %1091 = arith.negf %1090 : vector<1x32xf32>
    %1092 = math.exp %1091 : vector<1x32xf32>
    %cst_303 = arith.constant 1.000000e+00 : f32
    %1093 = vector.broadcast %cst_303 : f32 to vector<1x32xf32>
    %1094 = arith.addf %1093, %1092 : vector<1x32xf32>
    %1095 = arith.divf %1093, %1094 : vector<1x32xf32>
    %1096 = vector.extract_strided_slice %1089 {offsets = [0, 32], sizes = [1, 32], strides = [1, 1]} : vector<1x128xf32> to vector<1x32xf32>
    %1097 = arith.negf %1096 : vector<1x32xf32>
    %1098 = math.exp %1097 : vector<1x32xf32>
    %cst_304 = arith.constant 1.000000e+00 : f32
    %1099 = vector.broadcast %cst_304 : f32 to vector<1x32xf32>
    %1100 = arith.addf %1099, %1098 : vector<1x32xf32>
    %1101 = arith.divf %1099, %1100 : vector<1x32xf32>
    %1102 = vector.extract_strided_slice %1089 {offsets = [0, 64], sizes = [1, 32], strides = [1, 1]} : vector<1x128xf32> to vector<1x32xf32>
    %1103 = math.tanh %1102 : vector<1x32xf32>
    %1104 = vector.extract_strided_slice %1089 {offsets = [0, 96], sizes = [1, 32], strides = [1, 1]} : vector<1x128xf32> to vector<1x32xf32>
    %1105 = arith.negf %1104 : vector<1x32xf32>
    %1106 = math.exp %1105 : vector<1x32xf32>
    %cst_305 = arith.constant 1.000000e+00 : f32
    %1107 = vector.broadcast %cst_305 : f32 to vector<1x32xf32>
    %1108 = arith.addf %1107, %1106 : vector<1x32xf32>
    %1109 = arith.divf %1107, %1108 : vector<1x32xf32>
    %1110 = arith.mulf %1101, %1015 : vector<1x32xf32>
    %1111 = arith.mulf %1095, %1103 : vector<1x32xf32>
    %1112 = arith.addf %1110, %1111 : vector<1x32xf32>
    %1113 = math.tanh %1112 : vector<1x32xf32>
    %1114 = arith.mulf %1109, %1113 : vector<1x32xf32>
    %1115 = tpu.concatenate %1057, %1086, %1114 in 1 : vector<1x32xf32>, vector<1x32xf32>, vector<1x32xf32> -> vector<1x96xf32>
    %c0_306 = arith.constant 0 : index
    %c0_307 = arith.constant 0 : index
    %1116 = vector.load %arg8[%c0_306, %c0_307] : memref<96x3xf32, #tpu.memory_space<vmem>>, vector<96x3xf32>
    %cst_308 = arith.constant dense<0.000000e+00> : vector<1x3xf32>
    %1117 = tpu.matmul %1115, %1116, %cst_308 {dimension_numbers = #tpu.dot_dimension_numbers<[1], [0], [0], [1], [0, 0, 1, 1], [], []>} : vector<1x96xf32>, vector<96x3xf32>, vector<1x3xf32> -> vector<1x3xf32>
    %c0_309 = arith.constant 0 : index
    %c0_310 = arith.constant 0 : index
    %1118 = vector.load %arg9[%c0_309, %c0_310] : memref<1x3xf32, #tpu.memory_space<vmem>>, vector<1x3xf32>
    %1119 = arith.addf %1117, %1118 : vector<1x3xf32>
    %c1_311 = arith.constant 1 : index
    %c2_312 = arith.constant 2 : index
    %c0_313 = arith.constant 0 : index
    %1120 = vector.load %arg19[%c1_311, %c2_312, %c0_313] : memref<2x8x8xf32, #tpu.memory_space<vmem>>, vector<1x1x3xf32>
    %1121 = vector.shape_cast %1120 : vector<1x1x3xf32> to vector<1x3xf32>
    %1122 = vector.shape_cast %1119 : vector<1x3xf32> to vector<1x1x3xf32>
    tpu.vector_store %arg19[%c1_311, %c2_312, %c0_313], %1122 {strides = array<i32>} : memref<2x8x8xf32, #tpu.memory_space<vmem>>, vector<1x1x3xf32>,
    %1123 = vector.extract_strided_slice %829 {offsets = [3, 0], sizes = [1, 320], strides = [1, 1]} : vector<8x320xf32> to vector<1x320xf32>
    %c0_314 = arith.constant 0 : index
    %c0_315 = arith.constant 0 : index
    %1124 = vector.load %arg5[%c0_314, %c0_315] : memref<96x320xf32, #tpu.memory_space<vmem>>, vector<96x320xf32>
    %cst_316 = arith.constant dense<0.000000e+00> : vector<1x320xf32>
    %1125 = tpu.matmul %1115, %1124, %cst_316 {dimension_numbers = #tpu.dot_dimension_numbers<[1], [0], [0], [1], [0, 0, 1, 1], [], []>} : vector<1x96xf32>, vector<96x320xf32>, vector<1x320xf32> -> vector<1x320xf32>
    %1126 = vector.extract_strided_slice %1115 {offsets = [0, 0], sizes = [1, 32], strides = [1, 1]} : vector<1x96xf32> to vector<1x32xf32>
    %1127 = vector.extract_strided_slice %1123 {offsets = [0, 0], sizes = [1, 32], strides = [1, 1]} : vector<1x320xf32> to vector<1x32xf32>
    %1128 = vector.extract_strided_slice %1125 {offsets = [0, 0], sizes = [1, 32], strides = [1, 1]} : vector<1x320xf32> to vector<1x32xf32>
    %1129 = arith.addf %1127, %1128 : vector<1x32xf32>
    %1130 = arith.negf %1129 : vector<1x32xf32>
    %1131 = math.exp %1130 : vector<1x32xf32>
    %cst_317 = arith.constant 1.000000e+00 : f32
    %1132 = vector.broadcast %cst_317 : f32 to vector<1x32xf32>
    %1133 = arith.addf %1132, %1131 : vector<1x32xf32>
    %1134 = arith.divf %1132, %1133 : vector<1x32xf32>
    %1135 = vector.extract_strided_slice %1123 {offsets = [0, 32], sizes = [1, 32], strides = [1, 1]} : vector<1x320xf32> to vector<1x32xf32>
    %1136 = vector.extract_strided_slice %1125 {offsets = [0, 32], sizes = [1, 32], strides = [1, 1]} : vector<1x320xf32> to vector<1x32xf32>
    %1137 = arith.addf %1135, %1136 : vector<1x32xf32>
    %1138 = arith.negf %1137 : vector<1x32xf32>
    %1139 = math.exp %1138 : vector<1x32xf32>
    %cst_318 = arith.constant 1.000000e+00 : f32
    %1140 = vector.broadcast %cst_318 : f32 to vector<1x32xf32>
    %1141 = arith.addf %1140, %1139 : vector<1x32xf32>
    %1142 = arith.divf %1140, %1141 : vector<1x32xf32>
    %1143 = vector.extract_strided_slice %1123 {offsets = [0, 64], sizes = [1, 32], strides = [1, 1]} : vector<1x320xf32> to vector<1x32xf32>
    %1144 = vector.extract_strided_slice %1125 {offsets = [0, 64], sizes = [1, 32], strides = [1, 1]} : vector<1x320xf32> to vector<1x32xf32>
    %c0_319 = arith.constant 0 : index
    %c0_320 = arith.constant 0 : index
    %1145 = vector.load %arg7[%c0_319, %c0_320] : memref<1x64xf32, #tpu.memory_space<vmem>>, vector<1x32xf32>
    %1146 = arith.addf %1144, %1145 : vector<1x32xf32>
    %1147 = arith.mulf %1134, %1146 : vector<1x32xf32>
    %1148 = arith.addf %1143, %1147 : vector<1x32xf32>
    %1149 = math.tanh %1148 : vector<1x32xf32>
    %cst_321 = arith.constant 1.000000e+00 : f32
    %1150 = vector.broadcast %cst_321 : f32 to vector<1x32xf32>
    %1151 = arith.subf %1150, %1142 : vector<1x32xf32>
    %1152 = arith.mulf %1151, %1149 : vector<1x32xf32>
    %1153 = arith.mulf %1142, %1126 : vector<1x32xf32>
    %1154 = arith.addf %1152, %1153 : vector<1x32xf32>
    %1155 = vector.extract_strided_slice %1115 {offsets = [0, 32], sizes = [1, 32], strides = [1, 1]} : vector<1x96xf32> to vector<1x32xf32>
    %1156 = vector.extract_strided_slice %1123 {offsets = [0, 96], sizes = [1, 32], strides = [1, 1]} : vector<1x320xf32> to vector<1x32xf32>
    %1157 = vector.extract_strided_slice %1125 {offsets = [0, 96], sizes = [1, 32], strides = [1, 1]} : vector<1x320xf32> to vector<1x32xf32>
    %1158 = arith.addf %1156, %1157 : vector<1x32xf32>
    %1159 = arith.negf %1158 : vector<1x32xf32>
    %1160 = math.exp %1159 : vector<1x32xf32>
    %cst_322 = arith.constant 1.000000e+00 : f32
    %1161 = vector.broadcast %cst_322 : f32 to vector<1x32xf32>
    %1162 = arith.addf %1161, %1160 : vector<1x32xf32>
    %1163 = arith.divf %1161, %1162 : vector<1x32xf32>
    %1164 = vector.extract_strided_slice %1123 {offsets = [0, 128], sizes = [1, 32], strides = [1, 1]} : vector<1x320xf32> to vector<1x32xf32>
    %1165 = vector.extract_strided_slice %1125 {offsets = [0, 128], sizes = [1, 32], strides = [1, 1]} : vector<1x320xf32> to vector<1x32xf32>
    %1166 = arith.addf %1164, %1165 : vector<1x32xf32>
    %1167 = arith.negf %1166 : vector<1x32xf32>
    %1168 = math.exp %1167 : vector<1x32xf32>
    %cst_323 = arith.constant 1.000000e+00 : f32
    %1169 = vector.broadcast %cst_323 : f32 to vector<1x32xf32>
    %1170 = arith.addf %1169, %1168 : vector<1x32xf32>
    %1171 = arith.divf %1169, %1170 : vector<1x32xf32>
    %1172 = vector.extract_strided_slice %1123 {offsets = [0, 160], sizes = [1, 32], strides = [1, 1]} : vector<1x320xf32> to vector<1x32xf32>
    %1173 = vector.extract_strided_slice %1125 {offsets = [0, 160], sizes = [1, 32], strides = [1, 1]} : vector<1x320xf32> to vector<1x32xf32>
    %c0_324 = arith.constant 0 : index
    %c32_325 = arith.constant 32 : index
    %1174 = vector.load %arg7[%c0_324, %c32_325] : memref<1x64xf32, #tpu.memory_space<vmem>>, vector<1x32xf32>
    %1175 = arith.addf %1173, %1174 : vector<1x32xf32>
    %1176 = arith.mulf %1163, %1175 : vector<1x32xf32>
    %1177 = arith.addf %1172, %1176 : vector<1x32xf32>
    %1178 = math.tanh %1177 : vector<1x32xf32>
    %cst_326 = arith.constant 1.000000e+00 : f32
    %1179 = vector.broadcast %cst_326 : f32 to vector<1x32xf32>
    %1180 = arith.subf %1179, %1171 : vector<1x32xf32>
    %1181 = arith.mulf %1180, %1178 : vector<1x32xf32>
    %1182 = arith.mulf %1171, %1155 : vector<1x32xf32>
    %1183 = arith.addf %1181, %1182 : vector<1x32xf32>
    %1184 = vector.extract_strided_slice %1123 {offsets = [0, 192], sizes = [1, 128], strides = [1, 1]} : vector<1x320xf32> to vector<1x128xf32>
    %1185 = vector.extract_strided_slice %1125 {offsets = [0, 192], sizes = [1, 128], strides = [1, 1]} : vector<1x320xf32> to vector<1x128xf32>
    %1186 = arith.addf %1184, %1185 : vector<1x128xf32>
    %1187 = vector.extract_strided_slice %1186 {offsets = [0, 0], sizes = [1, 32], strides = [1, 1]} : vector<1x128xf32> to vector<1x32xf32>
    %1188 = arith.negf %1187 : vector<1x32xf32>
    %1189 = math.exp %1188 : vector<1x32xf32>
    %cst_327 = arith.constant 1.000000e+00 : f32
    %1190 = vector.broadcast %cst_327 : f32 to vector<1x32xf32>
    %1191 = arith.addf %1190, %1189 : vector<1x32xf32>
    %1192 = arith.divf %1190, %1191 : vector<1x32xf32>
    %1193 = vector.extract_strided_slice %1186 {offsets = [0, 32], sizes = [1, 32], strides = [1, 1]} : vector<1x128xf32> to vector<1x32xf32>
    %1194 = arith.negf %1193 : vector<1x32xf32>
    %1195 = math.exp %1194 : vector<1x32xf32>
    %cst_328 = arith.constant 1.000000e+00 : f32
    %1196 = vector.broadcast %cst_328 : f32 to vector<1x32xf32>
    %1197 = arith.addf %1196, %1195 : vector<1x32xf32>
    %1198 = arith.divf %1196, %1197 : vector<1x32xf32>
    %1199 = vector.extract_strided_slice %1186 {offsets = [0, 64], sizes = [1, 32], strides = [1, 1]} : vector<1x128xf32> to vector<1x32xf32>
    %1200 = math.tanh %1199 : vector<1x32xf32>
    %1201 = vector.extract_strided_slice %1186 {offsets = [0, 96], sizes = [1, 32], strides = [1, 1]} : vector<1x128xf32> to vector<1x32xf32>
    %1202 = arith.negf %1201 : vector<1x32xf32>
    %1203 = math.exp %1202 : vector<1x32xf32>
    %cst_329 = arith.constant 1.000000e+00 : f32
    %1204 = vector.broadcast %cst_329 : f32 to vector<1x32xf32>
    %1205 = arith.addf %1204, %1203 : vector<1x32xf32>
    %1206 = arith.divf %1204, %1205 : vector<1x32xf32>
    %1207 = arith.mulf %1198, %1112 : vector<1x32xf32>
    %1208 = arith.mulf %1192, %1200 : vector<1x32xf32>
    %1209 = arith.addf %1207, %1208 : vector<1x32xf32>
    %1210 = math.tanh %1209 : vector<1x32xf32>
    %1211 = arith.mulf %1206, %1210 : vector<1x32xf32>
    %1212 = tpu.concatenate %1154, %1183, %1211 in 1 : vector<1x32xf32>, vector<1x32xf32>, vector<1x32xf32> -> vector<1x96xf32>
    %c0_330 = arith.constant 0 : index
    %c0_331 = arith.constant 0 : index
    %1213 = vector.load %arg8[%c0_330, %c0_331] : memref<96x3xf32, #tpu.memory_space<vmem>>, vector<96x3xf32>
    %cst_332 = arith.constant dense<0.000000e+00> : vector<1x3xf32>
    %1214 = tpu.matmul %1212, %1213, %cst_332 {dimension_numbers = #tpu.dot_dimension_numbers<[1], [0], [0], [1], [0, 0, 1, 1], [], []>} : vector<1x96xf32>, vector<96x3xf32>, vector<1x3xf32> -> vector<1x3xf32>
    %c0_333 = arith.constant 0 : index
    %c0_334 = arith.constant 0 : index
    %1215 = vector.load %arg9[%c0_333, %c0_334] : memref<1x3xf32, #tpu.memory_space<vmem>>, vector<1x3xf32>
    %1216 = arith.addf %1214, %1215 : vector<1x3xf32>
    %c1_335 = arith.constant 1 : index
    %c3_336 = arith.constant 3 : index
    %c0_337 = arith.constant 0 : index
    %1217 = vector.load %arg19[%c1_335, %c3_336, %c0_337] : memref<2x8x8xf32, #tpu.memory_space<vmem>>, vector<1x1x3xf32>
    %1218 = vector.shape_cast %1217 : vector<1x1x3xf32> to vector<1x3xf32>
    %1219 = vector.shape_cast %1216 : vector<1x3xf32> to vector<1x1x3xf32>
    tpu.vector_store %arg19[%c1_335, %c3_336, %c0_337], %1219 {strides = array<i32>} : memref<2x8x8xf32, #tpu.memory_space<vmem>>, vector<1x1x3xf32>,
    %1220 = vector.extract_strided_slice %829 {offsets = [4, 0], sizes = [1, 320], strides = [1, 1]} : vector<8x320xf32> to vector<1x320xf32>
    %c0_338 = arith.constant 0 : index
    %c0_339 = arith.constant 0 : index
    %1221 = vector.load %arg5[%c0_338, %c0_339] : memref<96x320xf32, #tpu.memory_space<vmem>>, vector<96x320xf32>
    %cst_340 = arith.constant dense<0.000000e+00> : vector<1x320xf32>
    %1222 = tpu.matmul %1212, %1221, %cst_340 {dimension_numbers = #tpu.dot_dimension_numbers<[1], [0], [0], [1], [0, 0, 1, 1], [], []>} : vector<1x96xf32>, vector<96x320xf32>, vector<1x320xf32> -> vector<1x320xf32>
    %1223 = vector.extract_strided_slice %1212 {offsets = [0, 0], sizes = [1, 32], strides = [1, 1]} : vector<1x96xf32> to vector<1x32xf32>
    %1224 = vector.extract_strided_slice %1220 {offsets = [0, 0], sizes = [1, 32], strides = [1, 1]} : vector<1x320xf32> to vector<1x32xf32>
    %1225 = vector.extract_strided_slice %1222 {offsets = [0, 0], sizes = [1, 32], strides = [1, 1]} : vector<1x320xf32> to vector<1x32xf32>
    %1226 = arith.addf %1224, %1225 : vector<1x32xf32>
    %1227 = arith.negf %1226 : vector<1x32xf32>
    %1228 = math.exp %1227 : vector<1x32xf32>
    %cst_341 = arith.constant 1.000000e+00 : f32
    %1229 = vector.broadcast %cst_341 : f32 to vector<1x32xf32>
    %1230 = arith.addf %1229, %1228 : vector<1x32xf32>
    %1231 = arith.divf %1229, %1230 : vector<1x32xf32>
    %1232 = vector.extract_strided_slice %1220 {offsets = [0, 32], sizes = [1, 32], strides = [1, 1]} : vector<1x320xf32> to vector<1x32xf32>
    %1233 = vector.extract_strided_slice %1222 {offsets = [0, 32], sizes = [1, 32], strides = [1, 1]} : vector<1x320xf32> to vector<1x32xf32>
    %1234 = arith.addf %1232, %1233 : vector<1x32xf32>
    %1235 = arith.negf %1234 : vector<1x32xf32>
    %1236 = math.exp %1235 : vector<1x32xf32>
    %cst_342 = arith.constant 1.000000e+00 : f32
    %1237 = vector.broadcast %cst_342 : f32 to vector<1x32xf32>
    %1238 = arith.addf %1237, %1236 : vector<1x32xf32>
    %1239 = arith.divf %1237, %1238 : vector<1x32xf32>
    %1240 = vector.extract_strided_slice %1220 {offsets = [0, 64], sizes = [1, 32], strides = [1, 1]} : vector<1x320xf32> to vector<1x32xf32>
    %1241 = vector.extract_strided_slice %1222 {offsets = [0, 64], sizes = [1, 32], strides = [1, 1]} : vector<1x320xf32> to vector<1x32xf32>
    %c0_343 = arith.constant 0 : index
    %c0_344 = arith.constant 0 : index
    %1242 = vector.load %arg7[%c0_343, %c0_344] : memref<1x64xf32, #tpu.memory_space<vmem>>, vector<1x32xf32>
    %1243 = arith.addf %1241, %1242 : vector<1x32xf32>
    %1244 = arith.mulf %1231, %1243 : vector<1x32xf32>
    %1245 = arith.addf %1240, %1244 : vector<1x32xf32>
    %1246 = math.tanh %1245 : vector<1x32xf32>
    %cst_345 = arith.constant 1.000000e+00 : f32
    %1247 = vector.broadcast %cst_345 : f32 to vector<1x32xf32>
    %1248 = arith.subf %1247, %1239 : vector<1x32xf32>
    %1249 = arith.mulf %1248, %1246 : vector<1x32xf32>
    %1250 = arith.mulf %1239, %1223 : vector<1x32xf32>
    %1251 = arith.addf %1249, %1250 : vector<1x32xf32>
    %1252 = vector.extract_strided_slice %1212 {offsets = [0, 32], sizes = [1, 32], strides = [1, 1]} : vector<1x96xf32> to vector<1x32xf32>
    %1253 = vector.extract_strided_slice %1220 {offsets = [0, 96], sizes = [1, 32], strides = [1, 1]} : vector<1x320xf32> to vector<1x32xf32>
    %1254 = vector.extract_strided_slice %1222 {offsets = [0, 96], sizes = [1, 32], strides = [1, 1]} : vector<1x320xf32> to vector<1x32xf32>
    %1255 = arith.addf %1253, %1254 : vector<1x32xf32>
    %1256 = arith.negf %1255 : vector<1x32xf32>
    %1257 = math.exp %1256 : vector<1x32xf32>
    %cst_346 = arith.constant 1.000000e+00 : f32
    %1258 = vector.broadcast %cst_346 : f32 to vector<1x32xf32>
    %1259 = arith.addf %1258, %1257 : vector<1x32xf32>
    %1260 = arith.divf %1258, %1259 : vector<1x32xf32>
    %1261 = vector.extract_strided_slice %1220 {offsets = [0, 128], sizes = [1, 32], strides = [1, 1]} : vector<1x320xf32> to vector<1x32xf32>
    %1262 = vector.extract_strided_slice %1222 {offsets = [0, 128], sizes = [1, 32], strides = [1, 1]} : vector<1x320xf32> to vector<1x32xf32>
    %1263 = arith.addf %1261, %1262 : vector<1x32xf32>
    %1264 = arith.negf %1263 : vector<1x32xf32>
    %1265 = math.exp %1264 : vector<1x32xf32>
    %cst_347 = arith.constant 1.000000e+00 : f32
    %1266 = vector.broadcast %cst_347 : f32 to vector<1x32xf32>
    %1267 = arith.addf %1266, %1265 : vector<1x32xf32>
    %1268 = arith.divf %1266, %1267 : vector<1x32xf32>
    %1269 = vector.extract_strided_slice %1220 {offsets = [0, 160], sizes = [1, 32], strides = [1, 1]} : vector<1x320xf32> to vector<1x32xf32>
    %1270 = vector.extract_strided_slice %1222 {offsets = [0, 160], sizes = [1, 32], strides = [1, 1]} : vector<1x320xf32> to vector<1x32xf32>
    %c0_348 = arith.constant 0 : index
    %c32_349 = arith.constant 32 : index
    %1271 = vector.load %arg7[%c0_348, %c32_349] : memref<1x64xf32, #tpu.memory_space<vmem>>, vector<1x32xf32>
    %1272 = arith.addf %1270, %1271 : vector<1x32xf32>
    %1273 = arith.mulf %1260, %1272 : vector<1x32xf32>
    %1274 = arith.addf %1269, %1273 : vector<1x32xf32>
    %1275 = math.tanh %1274 : vector<1x32xf32>
    %cst_350 = arith.constant 1.000000e+00 : f32
    %1276 = vector.broadcast %cst_350 : f32 to vector<1x32xf32>
    %1277 = arith.subf %1276, %1268 : vector<1x32xf32>
    %1278 = arith.mulf %1277, %1275 : vector<1x32xf32>
    %1279 = arith.mulf %1268, %1252 : vector<1x32xf32>
    %1280 = arith.addf %1278, %1279 : vector<1x32xf32>
    %1281 = vector.extract_strided_slice %1220 {offsets = [0, 192], sizes = [1, 128], strides = [1, 1]} : vector<1x320xf32> to vector<1x128xf32>
    %1282 = vector.extract_strided_slice %1222 {offsets = [0, 192], sizes = [1, 128], strides = [1, 1]} : vector<1x320xf32> to vector<1x128xf32>
    %1283 = arith.addf %1281, %1282 : vector<1x128xf32>
    %1284 = vector.extract_strided_slice %1283 {offsets = [0, 0], sizes = [1, 32], strides = [1, 1]} : vector<1x128xf32> to vector<1x32xf32>
    %1285 = arith.negf %1284 : vector<1x32xf32>
    %1286 = math.exp %1285 : vector<1x32xf32>
    %cst_351 = arith.constant 1.000000e+00 : f32
    %1287 = vector.broadcast %cst_351 : f32 to vector<1x32xf32>
    %1288 = arith.addf %1287, %1286 : vector<1x32xf32>
    %1289 = arith.divf %1287, %1288 : vector<1x32xf32>
    %1290 = vector.extract_strided_slice %1283 {offsets = [0, 32], sizes = [1, 32], strides = [1, 1]} : vector<1x128xf32> to vector<1x32xf32>
    %1291 = arith.negf %1290 : vector<1x32xf32>
    %1292 = math.exp %1291 : vector<1x32xf32>
    %cst_352 = arith.constant 1.000000e+00 : f32
    %1293 = vector.broadcast %cst_352 : f32 to vector<1x32xf32>
    %1294 = arith.addf %1293, %1292 : vector<1x32xf32>
    %1295 = arith.divf %1293, %1294 : vector<1x32xf32>
    %1296 = vector.extract_strided_slice %1283 {offsets = [0, 64], sizes = [1, 32], strides = [1, 1]} : vector<1x128xf32> to vector<1x32xf32>
    %1297 = math.tanh %1296 : vector<1x32xf32>
    %1298 = vector.extract_strided_slice %1283 {offsets = [0, 96], sizes = [1, 32], strides = [1, 1]} : vector<1x128xf32> to vector<1x32xf32>
    %1299 = arith.negf %1298 : vector<1x32xf32>
    %1300 = math.exp %1299 : vector<1x32xf32>
    %cst_353 = arith.constant 1.000000e+00 : f32
    %1301 = vector.broadcast %cst_353 : f32 to vector<1x32xf32>
    %1302 = arith.addf %1301, %1300 : vector<1x32xf32>
    %1303 = arith.divf %1301, %1302 : vector<1x32xf32>
    %1304 = arith.mulf %1295, %1209 : vector<1x32xf32>
    %1305 = arith.mulf %1289, %1297 : vector<1x32xf32>
    %1306 = arith.addf %1304, %1305 : vector<1x32xf32>
    %1307 = math.tanh %1306 : vector<1x32xf32>
    %1308 = arith.mulf %1303, %1307 : vector<1x32xf32>
    %1309 = tpu.concatenate %1251, %1280, %1308 in 1 : vector<1x32xf32>, vector<1x32xf32>, vector<1x32xf32> -> vector<1x96xf32>
    %c0_354 = arith.constant 0 : index
    %c0_355 = arith.constant 0 : index
    %1310 = vector.load %arg8[%c0_354, %c0_355] : memref<96x3xf32, #tpu.memory_space<vmem>>, vector<96x3xf32>
    %cst_356 = arith.constant dense<0.000000e+00> : vector<1x3xf32>
    %1311 = tpu.matmul %1309, %1310, %cst_356 {dimension_numbers = #tpu.dot_dimension_numbers<[1], [0], [0], [1], [0, 0, 1, 1], [], []>} : vector<1x96xf32>, vector<96x3xf32>, vector<1x3xf32> -> vector<1x3xf32>
    %c0_357 = arith.constant 0 : index
    %c0_358 = arith.constant 0 : index
    %1312 = vector.load %arg9[%c0_357, %c0_358] : memref<1x3xf32, #tpu.memory_space<vmem>>, vector<1x3xf32>
    %1313 = arith.addf %1311, %1312 : vector<1x3xf32>
    %c1_359 = arith.constant 1 : index
    %c4_360 = arith.constant 4 : index
    %c0_361 = arith.constant 0 : index
    %1314 = vector.load %arg19[%c1_359, %c4_360, %c0_361] : memref<2x8x8xf32, #tpu.memory_space<vmem>>, vector<1x1x3xf32>
    %1315 = vector.shape_cast %1314 : vector<1x1x3xf32> to vector<1x3xf32>
    %1316 = vector.shape_cast %1313 : vector<1x3xf32> to vector<1x1x3xf32>
    tpu.vector_store %arg19[%c1_359, %c4_360, %c0_361], %1316 {strides = array<i32>} : memref<2x8x8xf32, #tpu.memory_space<vmem>>, vector<1x1x3xf32>,
    %1317 = vector.extract_strided_slice %829 {offsets = [5, 0], sizes = [1, 320], strides = [1, 1]} : vector<8x320xf32> to vector<1x320xf32>
    %c0_362 = arith.constant 0 : index
    %c0_363 = arith.constant 0 : index
    %1318 = vector.load %arg5[%c0_362, %c0_363] : memref<96x320xf32, #tpu.memory_space<vmem>>, vector<96x320xf32>
    %cst_364 = arith.constant dense<0.000000e+00> : vector<1x320xf32>
    %1319 = tpu.matmul %1309, %1318, %cst_364 {dimension_numbers = #tpu.dot_dimension_numbers<[1], [0], [0], [1], [0, 0, 1, 1], [], []>} : vector<1x96xf32>, vector<96x320xf32>, vector<1x320xf32> -> vector<1x320xf32>
    %1320 = vector.extract_strided_slice %1309 {offsets = [0, 0], sizes = [1, 32], strides = [1, 1]} : vector<1x96xf32> to vector<1x32xf32>
    %1321 = vector.extract_strided_slice %1317 {offsets = [0, 0], sizes = [1, 32], strides = [1, 1]} : vector<1x320xf32> to vector<1x32xf32>
    %1322 = vector.extract_strided_slice %1319 {offsets = [0, 0], sizes = [1, 32], strides = [1, 1]} : vector<1x320xf32> to vector<1x32xf32>
    %1323 = arith.addf %1321, %1322 : vector<1x32xf32>
    %1324 = arith.negf %1323 : vector<1x32xf32>
    %1325 = math.exp %1324 : vector<1x32xf32>
    %cst_365 = arith.constant 1.000000e+00 : f32
    %1326 = vector.broadcast %cst_365 : f32 to vector<1x32xf32>
    %1327 = arith.addf %1326, %1325 : vector<1x32xf32>
    %1328 = arith.divf %1326, %1327 : vector<1x32xf32>
    %1329 = vector.extract_strided_slice %1317 {offsets = [0, 32], sizes = [1, 32], strides = [1, 1]} : vector<1x320xf32> to vector<1x32xf32>
    %1330 = vector.extract_strided_slice %1319 {offsets = [0, 32], sizes = [1, 32], strides = [1, 1]} : vector<1x320xf32> to vector<1x32xf32>
    %1331 = arith.addf %1329, %1330 : vector<1x32xf32>
    %1332 = arith.negf %1331 : vector<1x32xf32>
    %1333 = math.exp %1332 : vector<1x32xf32>
    %cst_366 = arith.constant 1.000000e+00 : f32
    %1334 = vector.broadcast %cst_366 : f32 to vector<1x32xf32>
    %1335 = arith.addf %1334, %1333 : vector<1x32xf32>
    %1336 = arith.divf %1334, %1335 : vector<1x32xf32>
    %1337 = vector.extract_strided_slice %1317 {offsets = [0, 64], sizes = [1, 32], strides = [1, 1]} : vector<1x320xf32> to vector<1x32xf32>
    %1338 = vector.extract_strided_slice %1319 {offsets = [0, 64], sizes = [1, 32], strides = [1, 1]} : vector<1x320xf32> to vector<1x32xf32>
    %c0_367 = arith.constant 0 : index
    %c0_368 = arith.constant 0 : index
    %1339 = vector.load %arg7[%c0_367, %c0_368] : memref<1x64xf32, #tpu.memory_space<vmem>>, vector<1x32xf32>
    %1340 = arith.addf %1338, %1339 : vector<1x32xf32>
    %1341 = arith.mulf %1328, %1340 : vector<1x32xf32>
    %1342 = arith.addf %1337, %1341 : vector<1x32xf32>
    %1343 = math.tanh %1342 : vector<1x32xf32>
    %cst_369 = arith.constant 1.000000e+00 : f32
    %1344 = vector.broadcast %cst_369 : f32 to vector<1x32xf32>
    %1345 = arith.subf %1344, %1336 : vector<1x32xf32>
    %1346 = arith.mulf %1345, %1343 : vector<1x32xf32>
    %1347 = arith.mulf %1336, %1320 : vector<1x32xf32>
    %1348 = arith.addf %1346, %1347 : vector<1x32xf32>
    %1349 = vector.extract_strided_slice %1309 {offsets = [0, 32], sizes = [1, 32], strides = [1, 1]} : vector<1x96xf32> to vector<1x32xf32>
    %1350 = vector.extract_strided_slice %1317 {offsets = [0, 96], sizes = [1, 32], strides = [1, 1]} : vector<1x320xf32> to vector<1x32xf32>
    %1351 = vector.extract_strided_slice %1319 {offsets = [0, 96], sizes = [1, 32], strides = [1, 1]} : vector<1x320xf32> to vector<1x32xf32>
    %1352 = arith.addf %1350, %1351 : vector<1x32xf32>
    %1353 = arith.negf %1352 : vector<1x32xf32>
    %1354 = math.exp %1353 : vector<1x32xf32>
    %cst_370 = arith.constant 1.000000e+00 : f32
    %1355 = vector.broadcast %cst_370 : f32 to vector<1x32xf32>
    %1356 = arith.addf %1355, %1354 : vector<1x32xf32>
    %1357 = arith.divf %1355, %1356 : vector<1x32xf32>
    %1358 = vector.extract_strided_slice %1317 {offsets = [0, 128], sizes = [1, 32], strides = [1, 1]} : vector<1x320xf32> to vector<1x32xf32>
    %1359 = vector.extract_strided_slice %1319 {offsets = [0, 128], sizes = [1, 32], strides = [1, 1]} : vector<1x320xf32> to vector<1x32xf32>
    %1360 = arith.addf %1358, %1359 : vector<1x32xf32>
    %1361 = arith.negf %1360 : vector<1x32xf32>
    %1362 = math.exp %1361 : vector<1x32xf32>
    %cst_371 = arith.constant 1.000000e+00 : f32
    %1363 = vector.broadcast %cst_371 : f32 to vector<1x32xf32>
    %1364 = arith.addf %1363, %1362 : vector<1x32xf32>
    %1365 = arith.divf %1363, %1364 : vector<1x32xf32>
    %1366 = vector.extract_strided_slice %1317 {offsets = [0, 160], sizes = [1, 32], strides = [1, 1]} : vector<1x320xf32> to vector<1x32xf32>
    %1367 = vector.extract_strided_slice %1319 {offsets = [0, 160], sizes = [1, 32], strides = [1, 1]} : vector<1x320xf32> to vector<1x32xf32>
    %c0_372 = arith.constant 0 : index
    %c32_373 = arith.constant 32 : index
    %1368 = vector.load %arg7[%c0_372, %c32_373] : memref<1x64xf32, #tpu.memory_space<vmem>>, vector<1x32xf32>
    %1369 = arith.addf %1367, %1368 : vector<1x32xf32>
    %1370 = arith.mulf %1357, %1369 : vector<1x32xf32>
    %1371 = arith.addf %1366, %1370 : vector<1x32xf32>
    %1372 = math.tanh %1371 : vector<1x32xf32>
    %cst_374 = arith.constant 1.000000e+00 : f32
    %1373 = vector.broadcast %cst_374 : f32 to vector<1x32xf32>
    %1374 = arith.subf %1373, %1365 : vector<1x32xf32>
    %1375 = arith.mulf %1374, %1372 : vector<1x32xf32>
    %1376 = arith.mulf %1365, %1349 : vector<1x32xf32>
    %1377 = arith.addf %1375, %1376 : vector<1x32xf32>
    %1378 = vector.extract_strided_slice %1317 {offsets = [0, 192], sizes = [1, 128], strides = [1, 1]} : vector<1x320xf32> to vector<1x128xf32>
    %1379 = vector.extract_strided_slice %1319 {offsets = [0, 192], sizes = [1, 128], strides = [1, 1]} : vector<1x320xf32> to vector<1x128xf32>
    %1380 = arith.addf %1378, %1379 : vector<1x128xf32>
    %1381 = vector.extract_strided_slice %1380 {offsets = [0, 0], sizes = [1, 32], strides = [1, 1]} : vector<1x128xf32> to vector<1x32xf32>
    %1382 = arith.negf %1381 : vector<1x32xf32>
    %1383 = math.exp %1382 : vector<1x32xf32>
    %cst_375 = arith.constant 1.000000e+00 : f32
    %1384 = vector.broadcast %cst_375 : f32 to vector<1x32xf32>
    %1385 = arith.addf %1384, %1383 : vector<1x32xf32>
    %1386 = arith.divf %1384, %1385 : vector<1x32xf32>
    %1387 = vector.extract_strided_slice %1380 {offsets = [0, 32], sizes = [1, 32], strides = [1, 1]} : vector<1x128xf32> to vector<1x32xf32>
    %1388 = arith.negf %1387 : vector<1x32xf32>
    %1389 = math.exp %1388 : vector<1x32xf32>
    %cst_376 = arith.constant 1.000000e+00 : f32
    %1390 = vector.broadcast %cst_376 : f32 to vector<1x32xf32>
    %1391 = arith.addf %1390, %1389 : vector<1x32xf32>
    %1392 = arith.divf %1390, %1391 : vector<1x32xf32>
    %1393 = vector.extract_strided_slice %1380 {offsets = [0, 64], sizes = [1, 32], strides = [1, 1]} : vector<1x128xf32> to vector<1x32xf32>
    %1394 = math.tanh %1393 : vector<1x32xf32>
    %1395 = vector.extract_strided_slice %1380 {offsets = [0, 96], sizes = [1, 32], strides = [1, 1]} : vector<1x128xf32> to vector<1x32xf32>
    %1396 = arith.negf %1395 : vector<1x32xf32>
    %1397 = math.exp %1396 : vector<1x32xf32>
    %cst_377 = arith.constant 1.000000e+00 : f32
    %1398 = vector.broadcast %cst_377 : f32 to vector<1x32xf32>
    %1399 = arith.addf %1398, %1397 : vector<1x32xf32>
    %1400 = arith.divf %1398, %1399 : vector<1x32xf32>
    %1401 = arith.mulf %1392, %1306 : vector<1x32xf32>
    %1402 = arith.mulf %1386, %1394 : vector<1x32xf32>
    %1403 = arith.addf %1401, %1402 : vector<1x32xf32>
    %1404 = math.tanh %1403 : vector<1x32xf32>
    %1405 = arith.mulf %1400, %1404 : vector<1x32xf32>
    %1406 = tpu.concatenate %1348, %1377, %1405 in 1 : vector<1x32xf32>, vector<1x32xf32>, vector<1x32xf32> -> vector<1x96xf32>
    %c0_378 = arith.constant 0 : index
    %c0_379 = arith.constant 0 : index
    %1407 = vector.load %arg8[%c0_378, %c0_379] : memref<96x3xf32, #tpu.memory_space<vmem>>, vector<96x3xf32>
    %cst_380 = arith.constant dense<0.000000e+00> : vector<1x3xf32>
    %1408 = tpu.matmul %1406, %1407, %cst_380 {dimension_numbers = #tpu.dot_dimension_numbers<[1], [0], [0], [1], [0, 0, 1, 1], [], []>} : vector<1x96xf32>, vector<96x3xf32>, vector<1x3xf32> -> vector<1x3xf32>
    %c0_381 = arith.constant 0 : index
    %c0_382 = arith.constant 0 : index
    %1409 = vector.load %arg9[%c0_381, %c0_382] : memref<1x3xf32, #tpu.memory_space<vmem>>, vector<1x3xf32>
    %1410 = arith.addf %1408, %1409 : vector<1x3xf32>
    %c1_383 = arith.constant 1 : index
    %c5_384 = arith.constant 5 : index
    %c0_385 = arith.constant 0 : index
    %1411 = vector.load %arg19[%c1_383, %c5_384, %c0_385] : memref<2x8x8xf32, #tpu.memory_space<vmem>>, vector<1x1x3xf32>
    %1412 = vector.shape_cast %1411 : vector<1x1x3xf32> to vector<1x3xf32>
    %1413 = vector.shape_cast %1410 : vector<1x3xf32> to vector<1x1x3xf32>
    tpu.vector_store %arg19[%c1_383, %c5_384, %c0_385], %1413 {strides = array<i32>} : memref<2x8x8xf32, #tpu.memory_space<vmem>>, vector<1x1x3xf32>,
    %1414 = vector.extract_strided_slice %829 {offsets = [6, 0], sizes = [1, 320], strides = [1, 1]} : vector<8x320xf32> to vector<1x320xf32>
    %c0_386 = arith.constant 0 : index
    %c0_387 = arith.constant 0 : index
    %1415 = vector.load %arg5[%c0_386, %c0_387] : memref<96x320xf32, #tpu.memory_space<vmem>>, vector<96x320xf32>
    %cst_388 = arith.constant dense<0.000000e+00> : vector<1x320xf32>
    %1416 = tpu.matmul %1406, %1415, %cst_388 {dimension_numbers = #tpu.dot_dimension_numbers<[1], [0], [0], [1], [0, 0, 1, 1], [], []>} : vector<1x96xf32>, vector<96x320xf32>, vector<1x320xf32> -> vector<1x320xf32>
    %1417 = vector.extract_strided_slice %1406 {offsets = [0, 0], sizes = [1, 32], strides = [1, 1]} : vector<1x96xf32> to vector<1x32xf32>
    %1418 = vector.extract_strided_slice %1414 {offsets = [0, 0], sizes = [1, 32], strides = [1, 1]} : vector<1x320xf32> to vector<1x32xf32>
    %1419 = vector.extract_strided_slice %1416 {offsets = [0, 0], sizes = [1, 32], strides = [1, 1]} : vector<1x320xf32> to vector<1x32xf32>
    %1420 = arith.addf %1418, %1419 : vector<1x32xf32>
    %1421 = arith.negf %1420 : vector<1x32xf32>
    %1422 = math.exp %1421 : vector<1x32xf32>
    %cst_389 = arith.constant 1.000000e+00 : f32
    %1423 = vector.broadcast %cst_389 : f32 to vector<1x32xf32>
    %1424 = arith.addf %1423, %1422 : vector<1x32xf32>
    %1425 = arith.divf %1423, %1424 : vector<1x32xf32>
    %1426 = vector.extract_strided_slice %1414 {offsets = [0, 32], sizes = [1, 32], strides = [1, 1]} : vector<1x320xf32> to vector<1x32xf32>
    %1427 = vector.extract_strided_slice %1416 {offsets = [0, 32], sizes = [1, 32], strides = [1, 1]} : vector<1x320xf32> to vector<1x32xf32>
    %1428 = arith.addf %1426, %1427 : vector<1x32xf32>
    %1429 = arith.negf %1428 : vector<1x32xf32>
    %1430 = math.exp %1429 : vector<1x32xf32>
    %cst_390 = arith.constant 1.000000e+00 : f32
    %1431 = vector.broadcast %cst_390 : f32 to vector<1x32xf32>
    %1432 = arith.addf %1431, %1430 : vector<1x32xf32>
    %1433 = arith.divf %1431, %1432 : vector<1x32xf32>
    %1434 = vector.extract_strided_slice %1414 {offsets = [0, 64], sizes = [1, 32], strides = [1, 1]} : vector<1x320xf32> to vector<1x32xf32>
    %1435 = vector.extract_strided_slice %1416 {offsets = [0, 64], sizes = [1, 32], strides = [1, 1]} : vector<1x320xf32> to vector<1x32xf32>
    %c0_391 = arith.constant 0 : index
    %c0_392 = arith.constant 0 : index
    %1436 = vector.load %arg7[%c0_391, %c0_392] : memref<1x64xf32, #tpu.memory_space<vmem>>, vector<1x32xf32>
    %1437 = arith.addf %1435, %1436 : vector<1x32xf32>
    %1438 = arith.mulf %1425, %1437 : vector<1x32xf32>
    %1439 = arith.addf %1434, %1438 : vector<1x32xf32>
    %1440 = math.tanh %1439 : vector<1x32xf32>
    %cst_393 = arith.constant 1.000000e+00 : f32
    %1441 = vector.broadcast %cst_393 : f32 to vector<1x32xf32>
    %1442 = arith.subf %1441, %1433 : vector<1x32xf32>
    %1443 = arith.mulf %1442, %1440 : vector<1x32xf32>
    %1444 = arith.mulf %1433, %1417 : vector<1x32xf32>
    %1445 = arith.addf %1443, %1444 : vector<1x32xf32>
    %1446 = vector.extract_strided_slice %1406 {offsets = [0, 32], sizes = [1, 32], strides = [1, 1]} : vector<1x96xf32> to vector<1x32xf32>
    %1447 = vector.extract_strided_slice %1414 {offsets = [0, 96], sizes = [1, 32], strides = [1, 1]} : vector<1x320xf32> to vector<1x32xf32>
    %1448 = vector.extract_strided_slice %1416 {offsets = [0, 96], sizes = [1, 32], strides = [1, 1]} : vector<1x320xf32> to vector<1x32xf32>
    %1449 = arith.addf %1447, %1448 : vector<1x32xf32>
    %1450 = arith.negf %1449 : vector<1x32xf32>
    %1451 = math.exp %1450 : vector<1x32xf32>
    %cst_394 = arith.constant 1.000000e+00 : f32
    %1452 = vector.broadcast %cst_394 : f32 to vector<1x32xf32>
    %1453 = arith.addf %1452, %1451 : vector<1x32xf32>
    %1454 = arith.divf %1452, %1453 : vector<1x32xf32>
    %1455 = vector.extract_strided_slice %1414 {offsets = [0, 128], sizes = [1, 32], strides = [1, 1]} : vector<1x320xf32> to vector<1x32xf32>
    %1456 = vector.extract_strided_slice %1416 {offsets = [0, 128], sizes = [1, 32], strides = [1, 1]} : vector<1x320xf32> to vector<1x32xf32>
    %1457 = arith.addf %1455, %1456 : vector<1x32xf32>
    %1458 = arith.negf %1457 : vector<1x32xf32>
    %1459 = math.exp %1458 : vector<1x32xf32>
    %cst_395 = arith.constant 1.000000e+00 : f32
    %1460 = vector.broadcast %cst_395 : f32 to vector<1x32xf32>
    %1461 = arith.addf %1460, %1459 : vector<1x32xf32>
    %1462 = arith.divf %1460, %1461 : vector<1x32xf32>
    %1463 = vector.extract_strided_slice %1414 {offsets = [0, 160], sizes = [1, 32], strides = [1, 1]} : vector<1x320xf32> to vector<1x32xf32>
    %1464 = vector.extract_strided_slice %1416 {offsets = [0, 160], sizes = [1, 32], strides = [1, 1]} : vector<1x320xf32> to vector<1x32xf32>
    %c0_396 = arith.constant 0 : index
    %c32_397 = arith.constant 32 : index
    %1465 = vector.load %arg7[%c0_396, %c32_397] : memref<1x64xf32, #tpu.memory_space<vmem>>, vector<1x32xf32>
    %1466 = arith.addf %1464, %1465 : vector<1x32xf32>
    %1467 = arith.mulf %1454, %1466 : vector<1x32xf32>
    %1468 = arith.addf %1463, %1467 : vector<1x32xf32>
    %1469 = math.tanh %1468 : vector<1x32xf32>
    %cst_398 = arith.constant 1.000000e+00 : f32
    %1470 = vector.broadcast %cst_398 : f32 to vector<1x32xf32>
    %1471 = arith.subf %1470, %1462 : vector<1x32xf32>
    %1472 = arith.mulf %1471, %1469 : vector<1x32xf32>
    %1473 = arith.mulf %1462, %1446 : vector<1x32xf32>
    %1474 = arith.addf %1472, %1473 : vector<1x32xf32>
    %1475 = vector.extract_strided_slice %1414 {offsets = [0, 192], sizes = [1, 128], strides = [1, 1]} : vector<1x320xf32> to vector<1x128xf32>
    %1476 = vector.extract_strided_slice %1416 {offsets = [0, 192], sizes = [1, 128], strides = [1, 1]} : vector<1x320xf32> to vector<1x128xf32>
    %1477 = arith.addf %1475, %1476 : vector<1x128xf32>
    %1478 = vector.extract_strided_slice %1477 {offsets = [0, 0], sizes = [1, 32], strides = [1, 1]} : vector<1x128xf32> to vector<1x32xf32>
    %1479 = arith.negf %1478 : vector<1x32xf32>
    %1480 = math.exp %1479 : vector<1x32xf32>
    %cst_399 = arith.constant 1.000000e+00 : f32
    %1481 = vector.broadcast %cst_399 : f32 to vector<1x32xf32>
    %1482 = arith.addf %1481, %1480 : vector<1x32xf32>
    %1483 = arith.divf %1481, %1482 : vector<1x32xf32>
    %1484 = vector.extract_strided_slice %1477 {offsets = [0, 32], sizes = [1, 32], strides = [1, 1]} : vector<1x128xf32> to vector<1x32xf32>
    %1485 = arith.negf %1484 : vector<1x32xf32>
    %1486 = math.exp %1485 : vector<1x32xf32>
    %cst_400 = arith.constant 1.000000e+00 : f32
    %1487 = vector.broadcast %cst_400 : f32 to vector<1x32xf32>
    %1488 = arith.addf %1487, %1486 : vector<1x32xf32>
    %1489 = arith.divf %1487, %1488 : vector<1x32xf32>
    %1490 = vector.extract_strided_slice %1477 {offsets = [0, 64], sizes = [1, 32], strides = [1, 1]} : vector<1x128xf32> to vector<1x32xf32>
    %1491 = math.tanh %1490 : vector<1x32xf32>
    %1492 = vector.extract_strided_slice %1477 {offsets = [0, 96], sizes = [1, 32], strides = [1, 1]} : vector<1x128xf32> to vector<1x32xf32>
    %1493 = arith.negf %1492 : vector<1x32xf32>
    %1494 = math.exp %1493 : vector<1x32xf32>
    %cst_401 = arith.constant 1.000000e+00 : f32
    %1495 = vector.broadcast %cst_401 : f32 to vector<1x32xf32>
    %1496 = arith.addf %1495, %1494 : vector<1x32xf32>
    %1497 = arith.divf %1495, %1496 : vector<1x32xf32>
    %1498 = arith.mulf %1489, %1403 : vector<1x32xf32>
    %1499 = arith.mulf %1483, %1491 : vector<1x32xf32>
    %1500 = arith.addf %1498, %1499 : vector<1x32xf32>
    %1501 = math.tanh %1500 : vector<1x32xf32>
    %1502 = arith.mulf %1497, %1501 : vector<1x32xf32>
    %1503 = tpu.concatenate %1445, %1474, %1502 in 1 : vector<1x32xf32>, vector<1x32xf32>, vector<1x32xf32> -> vector<1x96xf32>
    %c0_402 = arith.constant 0 : index
    %c0_403 = arith.constant 0 : index
    %1504 = vector.load %arg8[%c0_402, %c0_403] : memref<96x3xf32, #tpu.memory_space<vmem>>, vector<96x3xf32>
    %cst_404 = arith.constant dense<0.000000e+00> : vector<1x3xf32>
    %1505 = tpu.matmul %1503, %1504, %cst_404 {dimension_numbers = #tpu.dot_dimension_numbers<[1], [0], [0], [1], [0, 0, 1, 1], [], []>} : vector<1x96xf32>, vector<96x3xf32>, vector<1x3xf32> -> vector<1x3xf32>
    %c0_405 = arith.constant 0 : index
    %c0_406 = arith.constant 0 : index
    %1506 = vector.load %arg9[%c0_405, %c0_406] : memref<1x3xf32, #tpu.memory_space<vmem>>, vector<1x3xf32>
    %1507 = arith.addf %1505, %1506 : vector<1x3xf32>
    %c1_407 = arith.constant 1 : index
    %c6_408 = arith.constant 6 : index
    %c0_409 = arith.constant 0 : index
    %1508 = vector.load %arg19[%c1_407, %c6_408, %c0_409] : memref<2x8x8xf32, #tpu.memory_space<vmem>>, vector<1x1x3xf32>
    %1509 = vector.shape_cast %1508 : vector<1x1x3xf32> to vector<1x3xf32>
    %1510 = vector.shape_cast %1507 : vector<1x3xf32> to vector<1x1x3xf32>
    tpu.vector_store %arg19[%c1_407, %c6_408, %c0_409], %1510 {strides = array<i32>} : memref<2x8x8xf32, #tpu.memory_space<vmem>>, vector<1x1x3xf32>,
    %1511 = vector.extract_strided_slice %829 {offsets = [7, 0], sizes = [1, 320], strides = [1, 1]} : vector<8x320xf32> to vector<1x320xf32>
    %c0_410 = arith.constant 0 : index
    %c0_411 = arith.constant 0 : index
    %1512 = vector.load %arg5[%c0_410, %c0_411] : memref<96x320xf32, #tpu.memory_space<vmem>>, vector<96x320xf32>
    %cst_412 = arith.constant dense<0.000000e+00> : vector<1x320xf32>
    %1513 = tpu.matmul %1503, %1512, %cst_412 {dimension_numbers = #tpu.dot_dimension_numbers<[1], [0], [0], [1], [0, 0, 1, 1], [], []>} : vector<1x96xf32>, vector<96x320xf32>, vector<1x320xf32> -> vector<1x320xf32>
    %1514 = vector.extract_strided_slice %1503 {offsets = [0, 0], sizes = [1, 32], strides = [1, 1]} : vector<1x96xf32> to vector<1x32xf32>
    %1515 = vector.extract_strided_slice %1511 {offsets = [0, 0], sizes = [1, 32], strides = [1, 1]} : vector<1x320xf32> to vector<1x32xf32>
    %1516 = vector.extract_strided_slice %1513 {offsets = [0, 0], sizes = [1, 32], strides = [1, 1]} : vector<1x320xf32> to vector<1x32xf32>
    %1517 = arith.addf %1515, %1516 : vector<1x32xf32>
    %1518 = arith.negf %1517 : vector<1x32xf32>
    %1519 = math.exp %1518 : vector<1x32xf32>
    %cst_413 = arith.constant 1.000000e+00 : f32
    %1520 = vector.broadcast %cst_413 : f32 to vector<1x32xf32>
    %1521 = arith.addf %1520, %1519 : vector<1x32xf32>
    %1522 = arith.divf %1520, %1521 : vector<1x32xf32>
    %1523 = vector.extract_strided_slice %1511 {offsets = [0, 32], sizes = [1, 32], strides = [1, 1]} : vector<1x320xf32> to vector<1x32xf32>
    %1524 = vector.extract_strided_slice %1513 {offsets = [0, 32], sizes = [1, 32], strides = [1, 1]} : vector<1x320xf32> to vector<1x32xf32>
    %1525 = arith.addf %1523, %1524 : vector<1x32xf32>
    %1526 = arith.negf %1525 : vector<1x32xf32>
    %1527 = math.exp %1526 : vector<1x32xf32>
    %cst_414 = arith.constant 1.000000e+00 : f32
    %1528 = vector.broadcast %cst_414 : f32 to vector<1x32xf32>
    %1529 = arith.addf %1528, %1527 : vector<1x32xf32>
    %1530 = arith.divf %1528, %1529 : vector<1x32xf32>
    %1531 = vector.extract_strided_slice %1511 {offsets = [0, 64], sizes = [1, 32], strides = [1, 1]} : vector<1x320xf32> to vector<1x32xf32>
    %1532 = vector.extract_strided_slice %1513 {offsets = [0, 64], sizes = [1, 32], strides = [1, 1]} : vector<1x320xf32> to vector<1x32xf32>
    %c0_415 = arith.constant 0 : index
    %c0_416 = arith.constant 0 : index
    %1533 = vector.load %arg7[%c0_415, %c0_416] : memref<1x64xf32, #tpu.memory_space<vmem>>, vector<1x32xf32>
    %1534 = arith.addf %1532, %1533 : vector<1x32xf32>
    %1535 = arith.mulf %1522, %1534 : vector<1x32xf32>
    %1536 = arith.addf %1531, %1535 : vector<1x32xf32>
    %1537 = math.tanh %1536 : vector<1x32xf32>
    %cst_417 = arith.constant 1.000000e+00 : f32
    %1538 = vector.broadcast %cst_417 : f32 to vector<1x32xf32>
    %1539 = arith.subf %1538, %1530 : vector<1x32xf32>
    %1540 = arith.mulf %1539, %1537 : vector<1x32xf32>
    %1541 = arith.mulf %1530, %1514 : vector<1x32xf32>
    %1542 = arith.addf %1540, %1541 : vector<1x32xf32>
    %1543 = vector.extract_strided_slice %1503 {offsets = [0, 32], sizes = [1, 32], strides = [1, 1]} : vector<1x96xf32> to vector<1x32xf32>
    %1544 = vector.extract_strided_slice %1511 {offsets = [0, 96], sizes = [1, 32], strides = [1, 1]} : vector<1x320xf32> to vector<1x32xf32>
    %1545 = vector.extract_strided_slice %1513 {offsets = [0, 96], sizes = [1, 32], strides = [1, 1]} : vector<1x320xf32> to vector<1x32xf32>
    %1546 = arith.addf %1544, %1545 : vector<1x32xf32>
    %1547 = arith.negf %1546 : vector<1x32xf32>
    %1548 = math.exp %1547 : vector<1x32xf32>
    %cst_418 = arith.constant 1.000000e+00 : f32
    %1549 = vector.broadcast %cst_418 : f32 to vector<1x32xf32>
    %1550 = arith.addf %1549, %1548 : vector<1x32xf32>
    %1551 = arith.divf %1549, %1550 : vector<1x32xf32>
    %1552 = vector.extract_strided_slice %1511 {offsets = [0, 128], sizes = [1, 32], strides = [1, 1]} : vector<1x320xf32> to vector<1x32xf32>
    %1553 = vector.extract_strided_slice %1513 {offsets = [0, 128], sizes = [1, 32], strides = [1, 1]} : vector<1x320xf32> to vector<1x32xf32>
    %1554 = arith.addf %1552, %1553 : vector<1x32xf32>
    %1555 = arith.negf %1554 : vector<1x32xf32>
    %1556 = math.exp %1555 : vector<1x32xf32>
    %cst_419 = arith.constant 1.000000e+00 : f32
    %1557 = vector.broadcast %cst_419 : f32 to vector<1x32xf32>
    %1558 = arith.addf %1557, %1556 : vector<1x32xf32>
    %1559 = arith.divf %1557, %1558 : vector<1x32xf32>
    %1560 = vector.extract_strided_slice %1511 {offsets = [0, 160], sizes = [1, 32], strides = [1, 1]} : vector<1x320xf32> to vector<1x32xf32>
    %1561 = vector.extract_strided_slice %1513 {offsets = [0, 160], sizes = [1, 32], strides = [1, 1]} : vector<1x320xf32> to vector<1x32xf32>
    %c0_420 = arith.constant 0 : index
    %c32_421 = arith.constant 32 : index
    %1562 = vector.load %arg7[%c0_420, %c32_421] : memref<1x64xf32, #tpu.memory_space<vmem>>, vector<1x32xf32>
    %1563 = arith.addf %1561, %1562 : vector<1x32xf32>
    %1564 = arith.mulf %1551, %1563 : vector<1x32xf32>
    %1565 = arith.addf %1560, %1564 : vector<1x32xf32>
    %1566 = math.tanh %1565 : vector<1x32xf32>
    %cst_422 = arith.constant 1.000000e+00 : f32
    %1567 = vector.broadcast %cst_422 : f32 to vector<1x32xf32>
    %1568 = arith.subf %1567, %1559 : vector<1x32xf32>
    %1569 = arith.mulf %1568, %1566 : vector<1x32xf32>
    %1570 = arith.mulf %1559, %1543 : vector<1x32xf32>
    %1571 = arith.addf %1569, %1570 : vector<1x32xf32>
    %1572 = vector.extract_strided_slice %1511 {offsets = [0, 192], sizes = [1, 128], strides = [1, 1]} : vector<1x320xf32> to vector<1x128xf32>
    %1573 = vector.extract_strided_slice %1513 {offsets = [0, 192], sizes = [1, 128], strides = [1, 1]} : vector<1x320xf32> to vector<1x128xf32>
    %1574 = arith.addf %1572, %1573 : vector<1x128xf32>
    %1575 = vector.extract_strided_slice %1574 {offsets = [0, 0], sizes = [1, 32], strides = [1, 1]} : vector<1x128xf32> to vector<1x32xf32>
    %1576 = arith.negf %1575 : vector<1x32xf32>
    %1577 = math.exp %1576 : vector<1x32xf32>
    %cst_423 = arith.constant 1.000000e+00 : f32
    %1578 = vector.broadcast %cst_423 : f32 to vector<1x32xf32>
    %1579 = arith.addf %1578, %1577 : vector<1x32xf32>
    %1580 = arith.divf %1578, %1579 : vector<1x32xf32>
    %1581 = vector.extract_strided_slice %1574 {offsets = [0, 32], sizes = [1, 32], strides = [1, 1]} : vector<1x128xf32> to vector<1x32xf32>
    %1582 = arith.negf %1581 : vector<1x32xf32>
    %1583 = math.exp %1582 : vector<1x32xf32>
    %cst_424 = arith.constant 1.000000e+00 : f32
    %1584 = vector.broadcast %cst_424 : f32 to vector<1x32xf32>
    %1585 = arith.addf %1584, %1583 : vector<1x32xf32>
    %1586 = arith.divf %1584, %1585 : vector<1x32xf32>
    %1587 = vector.extract_strided_slice %1574 {offsets = [0, 64], sizes = [1, 32], strides = [1, 1]} : vector<1x128xf32> to vector<1x32xf32>
    %1588 = math.tanh %1587 : vector<1x32xf32>
    %1589 = vector.extract_strided_slice %1574 {offsets = [0, 96], sizes = [1, 32], strides = [1, 1]} : vector<1x128xf32> to vector<1x32xf32>
    %1590 = arith.negf %1589 : vector<1x32xf32>
    %1591 = math.exp %1590 : vector<1x32xf32>
    %cst_425 = arith.constant 1.000000e+00 : f32
    %1592 = vector.broadcast %cst_425 : f32 to vector<1x32xf32>
    %1593 = arith.addf %1592, %1591 : vector<1x32xf32>
    %1594 = arith.divf %1592, %1593 : vector<1x32xf32>
    %1595 = arith.mulf %1586, %1500 : vector<1x32xf32>
    %1596 = arith.mulf %1580, %1588 : vector<1x32xf32>
    %1597 = arith.addf %1595, %1596 : vector<1x32xf32>
    %1598 = math.tanh %1597 : vector<1x32xf32>
    %1599 = arith.mulf %1594, %1598 : vector<1x32xf32>
    %1600 = tpu.concatenate %1542, %1571, %1599 in 1 : vector<1x32xf32>, vector<1x32xf32>, vector<1x32xf32> -> vector<1x96xf32>
    %c0_426 = arith.constant 0 : index
    %c0_427 = arith.constant 0 : index
    %1601 = vector.load %arg8[%c0_426, %c0_427] : memref<96x3xf32, #tpu.memory_space<vmem>>, vector<96x3xf32>
    %cst_428 = arith.constant dense<0.000000e+00> : vector<1x3xf32>
    %1602 = tpu.matmul %1600, %1601, %cst_428 {dimension_numbers = #tpu.dot_dimension_numbers<[1], [0], [0], [1], [0, 0, 1, 1], [], []>} : vector<1x96xf32>, vector<96x3xf32>, vector<1x3xf32> -> vector<1x3xf32>
    %c0_429 = arith.constant 0 : index
    %c0_430 = arith.constant 0 : index
    %1603 = vector.load %arg9[%c0_429, %c0_430] : memref<1x3xf32, #tpu.memory_space<vmem>>, vector<1x3xf32>
    %1604 = arith.addf %1602, %1603 : vector<1x3xf32>
    %c1_431 = arith.constant 1 : index
    %c7_432 = arith.constant 7 : index
    %c0_433 = arith.constant 0 : index
    %1605 = vector.load %arg19[%c1_431, %c7_432, %c0_433] : memref<2x8x8xf32, #tpu.memory_space<vmem>>, vector<1x1x3xf32>
    %1606 = vector.shape_cast %1605 : vector<1x1x3xf32> to vector<1x3xf32>
    %1607 = vector.shape_cast %1604 : vector<1x3xf32> to vector<1x1x3xf32>
    tpu.vector_store %arg19[%c1_431, %c7_432, %c0_433], %1607 {strides = array<i32>} : memref<2x8x8xf32, #tpu.memory_space<vmem>>, vector<1x1x3xf32>,
    %c1_434 = arith.constant 1 : index
    %c0_435 = arith.constant 0 : index
    %c0_436 = arith.constant 0 : index
    %1608 = vector.load %arg1[%c1_434, %c0_435, %c0_436] : memref<2x8x4xf32, #tpu.memory_space<vmem>>, vector<1x8x4xf32>
    %1609 = vector.shape_cast %1608 : vector<1x8x4xf32> to vector<8x4xf32>
    %c0_437 = arith.constant 0 : index
    %c0_438 = arith.constant 0 : index
    %1610 = vector.load %arg2[%c0_437, %c0_438] : memref<8x8xf32, #tpu.memory_space<vmem>>, vector<8x8xf32>
    %cst_439 = arith.constant dense<0.000000e+00> : vector<8x4xf32>
    %1611 = tpu.matmul %1610, %1609, %cst_439 {dimension_numbers = #tpu.dot_dimension_numbers<[1], [0], [0], [1], [0, 0, 1, 1], [], []>} : vector<8x8xf32>, vector<8x4xf32>, vector<8x4xf32> -> vector<8x4xf32>
    %c0_440 = arith.constant 0 : index
    %c0_441 = arith.constant 0 : index
    %1612 = vector.load %arg10[%c0_440, %c0_441] : memref<4x16xf32, #tpu.memory_space<vmem>>, vector<4x16xf32>
    %cst_442 = arith.constant dense<0.000000e+00> : vector<8x16xf32>
    %1613 = tpu.matmul %1611, %1612, %cst_442 {dimension_numbers = #tpu.dot_dimension_numbers<[1], [0], [0], [1], [0, 0, 1, 1], [], []>} : vector<8x4xf32>, vector<4x16xf32>, vector<8x16xf32> -> vector<8x16xf32>
    %c0_443 = arith.constant 0 : index
    %c0_444 = arith.constant 0 : index
    %1614 = vector.load %arg11[%c0_443, %c0_444] : memref<1x16xf32, #tpu.memory_space<vmem>>, vector<1x16xf32>
    %1615 = vector.broadcast %1614 : vector<1x16xf32> to vector<8x16xf32>
    %1616 = arith.addf %1613, %1615 : vector<8x16xf32>
    %cst_445 = arith.constant 0.000000e+00 : f32
    %1617 = vector.broadcast %cst_445 : f32 to vector<8x16xf32>
    %1618 = arith.maximumf %1616, %1617 : vector<8x16xf32>
    %c0_446 = arith.constant 0 : index
    %c0_447 = arith.constant 0 : index
    %1619 = vector.load %arg3[%c0_446, %c0_447] : memref<8x8xf32, #tpu.memory_space<vmem>>, vector<8x8xf32>
    %cst_448 = arith.constant dense<0.000000e+00> : vector<8x16xf32>
    %1620 = tpu.matmul %1619, %1618, %cst_448 {dimension_numbers = #tpu.dot_dimension_numbers<[1], [0], [0], [1], [0, 0, 1, 1], [], []>} : vector<8x8xf32>, vector<8x16xf32>, vector<8x16xf32> -> vector<8x16xf32>
    %c0_449 = arith.constant 0 : index
    %c0_450 = arith.constant 0 : index
    %1621 = vector.load %arg12[%c0_449, %c0_450] : memref<16x5xf32, #tpu.memory_space<vmem>>, vector<16x5xf32>
    %cst_451 = arith.constant dense<0.000000e+00> : vector<8x5xf32>
    %1622 = tpu.matmul %1620, %1621, %cst_451 {dimension_numbers = #tpu.dot_dimension_numbers<[1], [0], [0], [1], [0, 0, 1, 1], [], []>} : vector<8x16xf32>, vector<16x5xf32>, vector<8x5xf32> -> vector<8x5xf32>
    %c0_452 = arith.constant 0 : index
    %c0_453 = arith.constant 0 : index
    %1623 = vector.load %arg13[%c0_452, %c0_453] : memref<1x5xf32, #tpu.memory_space<vmem>>, vector<1x5xf32>
    %1624 = vector.broadcast %1623 : vector<1x5xf32> to vector<8x5xf32>
    %1625 = arith.addf %1622, %1624 : vector<8x5xf32>
    %c1_454 = arith.constant 1 : index
    %c0_455 = arith.constant 0 : index
    %c3_456 = arith.constant 3 : index
    %1626 = vector.load %arg19[%c1_454, %c0_455, %c3_456] : memref<2x8x8xf32, #tpu.memory_space<vmem>>, vector<1x8x5xf32>
    %1627 = vector.shape_cast %1626 : vector<1x8x5xf32> to vector<8x5xf32>
    %1628 = vector.shape_cast %1625 : vector<8x5xf32> to vector<1x8x5xf32>
    tpu.vector_store %arg19[%c1_454, %c0_455, %c3_456], %1628 {strides = array<i32>} : memref<2x8x8xf32, #tpu.memory_space<vmem>>, vector<1x8x5xf32>,
    %c1_457 = arith.constant 1 : index
    %c0_458 = arith.constant 0 : index
    %c0_459 = arith.constant 0 : index
    %1629 = vector.load %arg19[%c1_457, %c0_458, %c0_459] : memref<2x8x8xf32, #tpu.memory_space<vmem>>, vector<1x8x8xf32>
    %1630 = vector.shape_cast %1629 : vector<1x8x8xf32> to vector<8x8xf32>
    %c0_460 = arith.constant 0 : index
    %c0_461 = arith.constant 0 : index
    %1631 = vector.load %arg14[%c0_460, %c0_461] : memref<8x32xf32, #tpu.memory_space<vmem>>, vector<8x32xf32>
    %cst_462 = arith.constant dense<0.000000e+00> : vector<8x32xf32>
    %1632 = tpu.matmul %1630, %1631, %cst_462 {dimension_numbers = #tpu.dot_dimension_numbers<[1], [0], [0], [1], [0, 0, 1, 1], [], []>} : vector<8x8xf32>, vector<8x32xf32>, vector<8x32xf32> -> vector<8x32xf32>
    %c0_463 = arith.constant 0 : index
    %c0_464 = arith.constant 0 : index
    %1633 = vector.load %arg15[%c0_463, %c0_464] : memref<1x32xf32, #tpu.memory_space<vmem>>, vector<1x32xf32>
    %1634 = vector.broadcast %1633 : vector<1x32xf32> to vector<8x32xf32>
    %1635 = arith.addf %1632, %1634 : vector<8x32xf32>
    %cst_465 = arith.constant 0.000000e+00 : f32
    %1636 = vector.broadcast %cst_465 : f32 to vector<8x32xf32>
    %1637 = arith.maximumf %1635, %1636 : vector<8x32xf32>
    %c0_466 = arith.constant 0 : index
    %c0_467 = arith.constant 0 : index
    %1638 = vector.load %arg16[%c0_466, %c0_467] : memref<32x1xf32, #tpu.memory_space<vmem>>, vector<32x1xf32>
    %cst_468 = arith.constant dense<0.000000e+00> : vector<8x1xf32>
    %1639 = tpu.matmul %1637, %1638, %cst_468 {dimension_numbers = #tpu.dot_dimension_numbers<[1], [0], [0], [1], [0, 0, 1, 1], [], []>} : vector<8x32xf32>, vector<32x1xf32>, vector<8x1xf32> -> vector<8x1xf32>
    %c0_469 = arith.constant 0 : index
    %c0_470 = arith.constant 0 : index
    %1640 = vector.load %arg17[%c0_469, %c0_470] : memref<1x1xf32, #tpu.memory_space<vmem>>, vector<1x1xf32>
    %1641 = vector.broadcast %1640 : vector<1x1xf32> to vector<8x1xf32>
    %1642 = arith.addf %1639, %1641 : vector<8x1xf32>
    %c1_471 = arith.constant 1 : index
    %c0_472 = arith.constant 0 : index
    %c0_473 = arith.constant 0 : index
    %1643 = vector.load %arg18[%c1_471, %c0_472, %c0_473] : memref<2x8x1xf32, #tpu.memory_space<vmem>>, vector<1x8x1xf32>
    %1644 = vector.shape_cast %1643 : vector<1x8x1xf32> to vector<8x1xf32>
    %1645 = vector.shape_cast %1642 : vector<8x1xf32> to vector<1x8x1xf32>
    tpu.vector_store %arg18[%c1_471, %c0_472, %c0_473], %1645 {strides = array<i32>} : memref<2x8x1xf32, #tpu.memory_space<vmem>>, vector<1x8x1xf32>,
    return
  }
}

</mosaic_0001>

<bundles_post_ra>
// kernel: _generator_forward.1
= control target key start
LH: loop header
LB: loop body
LE: loop exit
PB: predicated region body
PF: predicated region fallthrough
CT: control target
= control target key end

     0   :  { %s7970_s0 = inlined_call_operand.vmem [shape: f32[2,8,3], index: 0, kind: input, shape index: {}]   ;;  %s7971_s1 = inlined_call_operand.vmem [shape: f32[2,8,4], index: 1, kind: input, shape index: {}]   ;;  %s7972_s2 = inlined_call_operand.vmem [shape: f32[8,8], index: 2, kind: input, shape index: {}]   ;;  %s7973_s3 = inlined_call_operand.vmem [shape: f32[8,8], index: 3, kind: input, shape index: {}]   ;;  %s7974_s4 = inlined_call_operand.vmem [shape: f32[3,320], index: 4, kind: input, shape index: {}]   ;;  %s7975_s5 = inlined_call_operand.hbm [shape: f32[96,320], index: 5, kind: input, shape index: {}]   ;;  %s7976_s6 = inlined_call_operand.vmem [shape: f32[1,320], index: 6, kind: input, shape index: {}]   ;;  %s7977_s7 = inlined_call_operand.vmem [shape: f32[1,64], index: 7, kind: input, shape index: {}]   ;;  %s7978_s8 = inlined_call_operand.vmem [shape: f32[96,3], index: 8, kind: input, shape index: {}]   ;;  %s7979_s9 = inlined_call_operand.vmem [shape: f32[1,3], index: 9, kind: input, shape index: {}]   ;;  %s7980_s10 = inlined_call_operand.vmem [shape: f32[4,16], index: 10, kind: input, shape index: {}]   ;;  %s7981_s11 = inlined_call_operand.vmem [shape: f32[1,16], index: 11, kind: input, shape index: {}]   ;;  %s7982_s12 = inlined_call_operand.vmem [shape: f32[16,5], index: 12, kind: input, shape index: {}]   ;;  %s7983_s13 = inlined_call_operand.vmem [shape: f32[1,5], index: 13, kind: input, shape index: {}]   ;;  %s7984_s14 = inlined_call_operand.vmem [shape: f32[8,32], index: 14, kind: input, shape index: {}]   ;;  %s7985_s15 = inlined_call_operand.vmem [shape: f32[1,32], index: 15, kind: input, shape index: {}]   ;;  %s7986_s16 = inlined_call_operand.vmem [shape: f32[32,1], index: 16, kind: input, shape index: {}]   ;;  %s7987_s17 = inlined_call_operand.<no memory space> [shape: f32[1,1], index: 17, kind: input, shape index: {}]   ;;  %s7988_s18 = inlined_call_operand.vmem [shape: f32[2,8,1], index: 18, kind: output, shape index: {}]  }
   0x1   :  { %7992 = sst [smem:[#allocation7_spill]] %s7970_s0  ;;  %v23_v0 = vstv %s7987_s17 }
   0x2   :  { %7993 = sst [smem:[#allocation8_spill]] %s7971_s1  ;;  %24 = vst [vmem:[#allocation3] sm:$0x1] %v23_v0 }
   0x3   :  { %7994 = sst [smem:[#allocation9_spill]] %s7972_s2 }
   0x4   :  { %25 = vsyncpa [#allocation5], 0  ;;  %s40_s0 = sshll.u32 %s7975_s5, 4  ;;  %s5786_s19 = smov [#allocation4]   ;;  %s41_s0 = int_to_ptr.hbm [resolvable:$true] %s40_s0 }
   0x5   :  { %s42_s1 = sshll.u32 %s5786_s19, 4  ;;  %s5787_s20 = smov 384   ;;  %s43_s1 = int_to_ptr.vmem [resolvable:$true] %s42_s1 }
   0x6   :  { %s5788_s21 = smov 24  }
   0x7   :  { %48 = dma.hbm_to_vmem [thread:$0]  %s41_s0, 4608, %s43_s1, [#allocation5], %s5787_s20, %s5787_s20, %s5788_s21  }
   0x8   :  { %5784 = dma.done.wait [#allocation5], 4608  }
   0x9   :  { %5785 = vsyncadd [#allocation5], 4294962688  ;;  %v5895_v1 = vld [vmem:[#allocation4 + $0x108] sm:$0xff]  ;;  %v5897_v2 = vld [vmem:[#allocation4 + $0xf0] sm:$0xff]  ;;  %vm100_vm0 = vcmask 1042432   ;;  %vm96_vm1 = vcmask 23552  }
   0xa   :  { %211 = vmatpush.msra.mxu3 %v5895_v1  ;;  %v78_v3 = vld [vmem:[%s7974_s4] sm:$0x77]  ;;  %v5903_v4 = vld [vmem:[#allocation4 + $0xd8] sm:$0xff]  ;;  %v5915_v8 = vld [vmem:[#allocation4 + $0x110] sm:$0xff]  ;;  %s7995_s27 = sld [smem:[#allocation7_spill]]  ;;  %s5789_s19 = smov 64  }
   0xb   :  { %90 = vst [vmem:[#allocation1] ss:$2 sm:$0xff] %v78_v3  ;;  %v5906_v5 = vld [vmem:[#allocation4 + $0xc0] sm:$0xff]  ;;  %v5909_v6 = vld [vmem:[#allocation4 + $0xa8] sm:$0xff]  ;;  %v5917_v9 = vld [vmem:[#allocation4 + $0x118] sm:$0xff]  ;;  %v5790_v39 = vmov 0.0  }
   0xc   :  { %212 = vmatpush.msra.mxu3 %v5897_v2  ;;  %v2680_v7 = vld [vmem:[%s7974_s4] sm:$0x77]  ;;  %v5919_v10 = vld [vmem:[#allocation4 + $0x90] sm:$0xff]  ;;  %v5924_v13 = vld [vmem:[#allocation4 + $0xf8] sm:$0xff]  ;;  %s5791_s17 = smov 32   ;;  %s5792_s22 = smov 96  }
   0xd   :  { %v5926_v14 = vld [vmem:[#allocation4 + $0x100] sm:$0xff]  ;;  %v79_v15 = vld [vmem:[%s7974_s4 + $0x8] sm:$0x7]  ;;  %v5933_v16 = vld [vmem:[#allocation4 + $0x78] sm:$0xff]  ;;  %vm402_vm14 = vcmask 261120   ;;  %vm404_vm15 = vcmask 523264  }
   0xe   :  { %213 = vmatpush.msra.mxu3 %v5903_v4  ;;  %92 = vst [vmem:[#allocation1 + $0x10] ss:$2 sm:$0xff] %v79_v15  ;;  %v5939_v18 = vld [vmem:[#allocation4 + $0xe0] sm:$0xff]  ;;  %v5941_v19 = vld [vmem:[#allocation4 + $0xe8] sm:$0xff]  ;;  %v5950_v22 = vld [vmem:[#allocation4 + $0xd0] sm:$0xff]  ;;  %s7996_s5 = sld [smem:[#allocation8_spill]] }
   0xf   :  { %v5946_v20 = vld [vmem:[#allocation4 + $0x60] sm:$0xff]  ;;  %v5948_v21 = vld [vmem:[#allocation4 + $0xc8] sm:$0xff]  ;;  %v5955_v24 = vld [vmem:[#allocation4 + $0xb0] sm:$0xff]  ;;  %s7997_s24 = sld [smem:[#allocation9_spill]] }
  0x10   :  { %214 = vmatpush.msra.mxu3 %v5906_v5  ;;  %v77_v17 = vld [vmem:[%s7995_s27] sm:$0xff]  ;;  %v5957_v25 = vld [vmem:[#allocation4 + $0xb8] sm:$0xff]  ;;  %v5962_v26 = vld [vmem:[#allocation4 + $0x30] sm:$0xff] }
  0x11   :  { %v5953_v23 = vld [vmem:[#allocation4 + $0x48] sm:$0xff]  ;;  %v5416_v27 = vld [vmem:[%s7977_s7] ss:$0 sm:$0xff]  ;;  %v5968_v28 = vld [vmem:[#allocation4 + $0x98] sm:$0xff] }
  0x12   :  { %v93_v11 = vld.sshfl [vmem:[#allocation1] sm:$0xff pattern:$0x75316420]  ;;  %v94_v12 = vld.sshfl [vmem:[#allocation1 + $0x8] sm:$0xff pattern:$0x75316420]  ;;  %215 = vmatpush.msra.mxu3 %v5909_v6  ;;  %290 = vrot.lane.b32.xlu0 %v5416_v27, %s5789_s19 }
  0x13   :  { %5273 = vmatpush.msk.msra.mxu0 %vm100_vm0, %v93_v11  ;;  %5275 = vmatpush.msk.msra.mxu1 %vm100_vm0, %v94_v12  ;;  %2692 = vst [vmem:[#allocation1] ss:$2 sm:$0xff] %v2680_v7  ;;  %v2681_v29 = vld [vmem:[%s7974_s4 + $0x8] sm:$0x7]  ;;  %v5976_v30 = vld [vmem:[#allocation4 + $0xa0] sm:$0xff]  ;;  %v5981_v32 = vld [vmem:[#allocation4 + $0x18] sm:$0xff] }
  0x14   :  { %216 = vmatpush.msra.mxu3 %v5919_v10  ;;  %5274 = vmatmul.msk.f32.vlgmr.msra.gmra.mxu0 %vm96_vm1, %v77_v17  ;;  %v5984_v33 = vld [vmem:[#allocation4 + $0x80] sm:$0xff]  ;;  %v5986_v34 = vld [vmem:[#allocation4 + $0x88] sm:$0xff]  ;;  %v5999_v37 = vld [vmem:[#allocation4 + $0x70] sm:$0xff]  ;;  %s5793_s4 = smov 3  }
  0x15   :  { %231 = vmatpush.msrb.mxu0 %v5915_v8  ;;  %251 = vmatpush.msrb.mxu1 %v5917_v9  ;;  %v95_v31 = vld.sshfl [vmem:[#allocation1 + $0x10] sm:$0xff pattern:$0x75316420]  ;;  %v5991_v35 = vld [vmem:[#allocation4] sm:$0xff]  ;;  %v5994_v36 = vld [vmem:[#allocation4 + $0x68] sm:$0xff] }
  0x16   :  { %217 = vmatpush.msra.mxu3 %v5933_v16  ;;  %5276 = vmatmul.msk.f32.vlgmr.msra.gmra.mxu1 %vm96_vm1, %v77_v17  ;;  %2694 = vst [vmem:[#allocation1 + $0x10] ss:$2 sm:$0xff] %v2681_v29  ;;  %v6002_v38 = vld [vmem:[#allocation4 + $0x50] sm:$0xff]  ;;  %v6006_v40 = vld [vmem:[#allocation4 + $0x58] sm:$0xff]  ;;  %v6013_v42 = vld [vmem:[#allocation4 + $0x40] sm:$0xff] }
  0x17   :  { %232 = vmatpush.msrb.mxu0 %v5924_v13  ;;  %252 = vmatpush.msrb.mxu1 %v5926_v14  ;;  %v6009_v41 = vld [vmem:[#allocation4 + $0x38] sm:$0xff]  ;;  %v6016_v43 = vld [vmem:[#allocation4 + $0x20] sm:$0xff]  ;;  %v6020_v44 = vld [vmem:[#allocation4 + $0x28] sm:$0xff] }
  0x18   :  { %218 = vmatpush.msra.mxu3 %v5946_v20  ;;  %5277 = vmatpush.msk.msra.mxu2 %vm100_vm0, %v95_v31  ;;  %v6023_v45 = vld [vmem:[#allocation4 + $0x8] sm:$0xff]  ;;  %v6027_v46 = vld [vmem:[#allocation4 + $0x10] sm:$0xff]  ;;  %v287_v54 = vld [vmem:[%s7977_s7] sm:$0x1] }
  0x19   :  { %233 = vmatpush.msrb.mxu0 %v5939_v18  ;;  %253 = vmatpush.msrb.mxu1 %v5941_v19  ;;  %v80_v49 = vld [vmem:[%s7976_s6] sm:$0x7] }
  0x1a   :  { %219 = vmatpush.msra.mxu3 %v5953_v23  ;;  %5278 = vmatmul.msk.f32.vlgmr.msra.gmra.mxu2 %vm96_vm1, %v77_v17  ;;  %v84_v50 = vperm.slane %v80_v49, 2  ;;  %v82_v62 = vperm.slane %v80_v49, 0 }
  0x1b   :  { %234 = vmatpush.msrb.mxu0 %v5948_v21  ;;  %254 = vmatpush.msrb.mxu1 %v5950_v22 }
  0x1c   :  { %220 = vmatpush.msra.mxu3 %v5962_v26 }
  0x1d   :  { %235 = vmatpush.msrb.mxu0 %v5955_v24  ;;  %255 = vmatpush.msrb.mxu1 %v5957_v25 }
  0x1e   :  { %221 = vmatpush.msra.mxu3 %v5981_v32 }
  0x1f   :  { %236 = vmatpush.msrb.mxu0 %v5968_v28  ;;  %256 = vmatpush.msrb.mxu1 %v5976_v30 }
  0x20   :  { %222 = vmatpush.msra.mxu3 %v5991_v35 }
  0x21   :  { %237 = vmatpush.msrb.mxu0 %v5984_v33  ;;  %257 = vmatpush.msrb.mxu1 %v5986_v34 }
  0x22   :  { %223 = vmatmul.f32.vlgmr.msra.gmra.mxu3 %v5790_v39 }
  0x23   :  { %238 = vmatpush.msrb.mxu0 %v5994_v36  ;;  %258 = vmatpush.msrb.mxu1 %v5999_v37 }
  0x24   :  { %484 = vmatpush.msrb.mxu3 %v5895_v1 }
  0x25   :  { %239 = vmatpush.msrb.mxu0 %v6002_v38  ;;  %259 = vmatpush.msrb.mxu1 %v6006_v40 }
  0x26   :  { %485 = vmatpush.msrb.mxu3 %v5897_v2 }
  0x27   :  { %240 = vmatpush.msrb.mxu0 %v6009_v41  ;;  %260 = vmatpush.msrb.mxu1 %v6013_v42 }
  0x28   :  { %486 = vmatpush.msrb.mxu3 %v5903_v4 }
  0x29   :  { %241 = vmatpush.msrb.mxu0 %v6016_v43  ;;  %261 = vmatpush.msrb.mxu1 %v6020_v44 }
  0x2a   :  { %487 = vmatpush.msrb.mxu3 %v5906_v5 }
  0x2b   :  { %242 = vmatpush.msrb.mxu0 %v6023_v45  ;;  %262 = vmatpush.msrb.mxu1 %v6027_v46 }
  0x2c   :  { %243 = vmatmul.f32.vlgmr.msrb.gmra.mxu0 %v5790_v39  ;;  %263 = vmatmul.f32.vlgmr.msrb.gmra.mxu1 %v5790_v39 }
  0x2d   :  { %504 = vmatpush.msra.mxu0 %v5915_v8  ;;  %524 = vmatpush.msra.mxu1 %v5917_v9 }
  0x2e   :  { %488 = vmatpush.msrb.mxu3 %v5909_v6 }
  0x2f   :  { %505 = vmatpush.msra.mxu0 %v5924_v13  ;;  %525 = vmatpush.msra.mxu1 %v5926_v14 }
  0x30   :  { %489 = vmatpush.msrb.mxu3 %v5919_v10 }
  0x31   :  { %506 = vmatpush.msra.mxu0 %v5939_v18  ;;  %526 = vmatpush.msra.mxu1 %v5941_v19 }
  0x32   :  { %490 = vmatpush.msrb.mxu3 %v5933_v16 }
  0x33   :  { %507 = vmatpush.msra.mxu0 %v5948_v21  ;;  %527 = vmatpush.msra.mxu1 %v5950_v22 }
  0x34   :  { %491 = vmatpush.msrb.mxu3 %v5946_v20 }
  0x35   :  { %508 = vmatpush.msra.mxu0 %v5955_v24  ;;  %528 = vmatpush.msra.mxu1 %v5957_v25 }
  0x36   :  { %492 = vmatpush.msrb.mxu3 %v5953_v23 }
  0x37   :  { %509 = vmatpush.msra.mxu0 %v5968_v28  ;;  %529 = vmatpush.msra.mxu1 %v5976_v30 }
  0x38   :  { %493 = vmatpush.msrb.mxu3 %v5962_v26 }
  0x39   :  { %510 = vmatpush.msra.mxu0 %v5984_v33  ;;  %530 = vmatpush.msra.mxu1 %v5986_v34 }
  0x3a   :  { %494 = vmatpush.msrb.mxu3 %v5981_v32 }
  0x3b   :  { %511 = vmatpush.msra.mxu0 %v5994_v36  ;;  %531 = vmatpush.msra.mxu1 %v5999_v37 }
  0x3c   :  { %495 = vmatpush.msrb.mxu3 %v5991_v35 }
  0x3d   :  { %512 = vmatpush.msra.mxu0 %v6002_v38  ;;  %532 = vmatpush.msra.mxu1 %v6006_v40 }
  0x3e   :  { %777 = vmatpush.msra.mxu3 %v5895_v1 }
  0x3f   :  { %513 = vmatpush.msra.mxu0 %v6009_v41  ;;  %533 = vmatpush.msra.mxu1 %v6013_v42 }
  0x40   :  { %778 = vmatpush.msra.mxu3 %v5897_v2  ;;  %v83_v2 = vperm.slane %v80_v49, 1 }
  0x41   :  { %514 = vmatpush.msra.mxu0 %v6016_v43  ;;  %534 = vmatpush.msra.mxu1 %v6020_v44 }
  0x42   :  { %779 = vmatpush.msra.mxu3 %v5903_v4 }
  0x43   :  { %515 = vmatpush.msra.mxu0 %v6023_v45  ;;  %535 = vmatpush.msra.mxu1 %v6027_v46 }
  0x44   :  { %780 = vmatpush.msra.mxu3 %v5906_v5 }
  0x45   :  { %797 = vmatpush.msrb.mxu0 %v5915_v8  ;;  %817 = vmatpush.msrb.mxu1 %v5917_v9 }
  0x46   :  { %781 = vmatpush.msra.mxu3 %v5909_v6 }
  0x47   :  { %798 = vmatpush.msrb.mxu0 %v5924_v13  ;;  %818 = vmatpush.msrb.mxu1 %v5926_v14 }
  0x48   :  { %782 = vmatpush.msra.mxu3 %v5919_v10 }
  0x49   :  { %799 = vmatpush.msrb.mxu0 %v5939_v18  ;;  %819 = vmatpush.msrb.mxu1 %v5941_v19 }
  0x4a   :  { %783 = vmatpush.msra.mxu3 %v5933_v16 }
  0x4b   :  { %800 = vmatpush.msrb.mxu0 %v5948_v21  ;;  %820 = vmatpush.msrb.mxu1 %v5950_v22 }
  0x4c   :  { %784 = vmatpush.msra.mxu3 %v5946_v20 }
  0x4d   :  { %801 = vmatpush.msrb.mxu0 %v5955_v24  ;;  %821 = vmatpush.msrb.mxu1 %v5957_v25 }
  0x4e   :  { %785 = vmatpush.msra.mxu3 %v5953_v23 }
  0x4f   :  { %802 = vmatpush.msrb.mxu0 %v5968_v28  ;;  %822 = vmatpush.msrb.mxu1 %v5976_v30 }
  0x50   :  { %786 = vmatpush.msra.mxu3 %v5962_v26 }
  0x51   :  { %803 = vmatpush.msrb.mxu0 %v5984_v33  ;;  %823 = vmatpush.msrb.mxu1 %v5986_v34 }
  0x52   :  { %787 = vmatpush.msra.mxu3 %v5981_v32 }
  0x53   :  { %804 = vmatpush.msrb.mxu0 %v5994_v36  ;;  %824 = vmatpush.msrb.mxu1 %v5999_v37 }
  0x54   :  { %788 = vmatpush.msra.mxu3 %v5991_v35 }
  0x55   :  { %805 = vmatpush.msrb.mxu0 %v6002_v38  ;;  %825 = vmatpush.msrb.mxu1 %v6006_v40 }
  0x57   :  { %806 = vmatpush.msrb.mxu0 %v6009_v41  ;;  %826 = vmatpush.msrb.mxu1 %v6013_v42 }
  0x59   :  { %807 = vmatpush.msrb.mxu0 %v6016_v43  ;;  %827 = vmatpush.msrb.mxu1 %v6020_v44 }
  0x5b   :  { %808 = vmatpush.msrb.mxu0 %v6023_v45  ;;  %828 = vmatpush.msrb.mxu1 %v6027_v46 }
  0x84   :  { %v291_v51 = vpop.permute.xlu0 %290 }
  0x91   :  { %v124_v47 = vpop.f32.mrf.mxu0 }
  0x92   :  { %v6118_v63 = vadd.f32 %v124_v47, %v82_v62 }
  0x93   :  { %v144_v48 = vpop.f32.mrf.mxu1 }
  0x94   :  { %v6121_v3 = vadd.f32 %v144_v48, %v83_v2 }
  0x9d   :  { %v164_v52 = vpop.f32.mrf.mxu2 }
  0x9e   :  { %v6109_v56 = vadd.f32 %v164_v52, %v84_v50 }
  0xa5   :  { %v224_v53 = vpop.f32.mrf.mxu3 }
  0xa6   :  { %v293_v55 = vadd.f32 %v291_v51, %v224_v53  ;;  %v267_v0 = vadd.f32 %v224_v53, %v6118_v63 }
  0xa8   :  { %295 = vrot.lane.b32.xlu0 %v293_v55, %s5789_s19  ;;  %v5279_v1 = vmul.f32 -1.442695, %v267_v0 }
  0xa9   :  { %v244_v57 = vpop.f32.mrf.mxu0  ;;  %v264_v58 = vpop.f32.mrf.mxu1 }
  0xaa   :  { %v333_v59 = vadd.f32 %v287_v54, %v244_v57  ;;  %v6113_v60 = vadd.f32 %v264_v58, %v6109_v56  ;;  %v313_v4 = vadd.f32 %v244_v57, %v6121_v3 }
  0xac   :  { %335 = vrot.lane.b32.xlu1 %v333_v59, %s5789_s19  ;;  %5440 = vtanh.f32 %v6113_v60  ;;  %v5280_v6 = vmul.f32 -1.442695, %v313_v4  ;;  %v5281_v51 = vmul.f32 -1.442695, %v6113_v60 }
  0xad   :  { %5442 = vpow2.f32 %v5279_v1 }
  0xae   :  { %5444 = vpow2.f32 %v5280_v6 }
  0xb2   :  { %v5441_v61 = vpop.eup %5440 }
  0xb3   :  { %v5443_v5 = vpop.eup %5442 }
  0xb4   :  { %375 = vrot.lane.b32.xlu1 %v5441_v61, %s5789_s19  ;;  %v271_v7 = vadd.f32 1.0, %v5443_v5  ;;  %v5445_v8 = vpop.eup %5444 }
  0xb5   :  { %v317_v10 = vadd.f32 1.0, %v5445_v8 }
  0xb6   :  { %5446 = vrcp.f32 %v271_v7  ;;  %v283_v17 = vand.u32 2147483648, %v271_v7  ;;  %vm277_vm3 = vweird.f32 %v271_v7  ;;  %v281_v18 = vand.u32 2147483647, %v271_v7 }
  0xb7   :  { %5448 = vrcp.f32 %v317_v10  ;;  %v329_v28 = vand.u32 2147483648, %v317_v10  ;;  %vm323_vm7 = vweird.f32 %v317_v10  ;;  %v327_v29 = vand.u32 2147483647, %v317_v10 }
  0xb8   :  { %v284_v21 = vor.u32 1.1754944e-38, %v283_v17  ;;  %vm282_vm5 = vcmp.eq.f32.partialorder %v281_v18, 8.507059e+37  ;;  %v410_v17 = vld [vmem:[%s7978_s8 + $0x20] sm:$0xff]  ;;  %v409_v18 = vld [vmem:[%s7978_s8 + $0x18] sm:$0xff] }
  0xb9   :  { %v330_v32 = vor.u32 1.1754944e-38, %v329_v28  ;;  %vm328_vm9 = vcmp.eq.f32.partialorder %v327_v29, 8.507059e+37  ;;  %v563_v28 = vld [vmem:[%s7977_s7] sm:$0x1] }
  0xbc   :  { %v5447_v9 = vpop.eup %5446 }
  0xbd   :  { %v273_v11 = vmul.f32 %v5447_v9, %v271_v7  ;;  %v5449_v13 = vpop.eup %5448  ;;  %vm278_vm2 = vweird.f32 %v5447_v9 }
  0xbe   :  { %v319_v15 = vmul.f32 %v5449_v13, %v317_v10  ;;  %vm279_vm4 = vmor %vm277_vm3, %vm278_vm2  ;;  %vm324_vm6 = vweird.f32 %v5449_v13  ;;  %v417_v10 = vld [vmem:[%s7978_s8 + $0x58] sm:$0xff]  ;;  %vm203_vm2 = vcmask 785408   ;;  %vm442_vm3 = vcmask 16384  }
  0xbf   :  { %v274_v12 = vsub.f32 1.0, %v273_v11  ;;  %vm325_vm8 = vmor %vm323_vm7, %vm324_vm6  ;;  %v416_v11 = vld [vmem:[%s7978_s8 + $0x50] sm:$0xff]  ;;  %426 = vmatpush.msrb.mxu2 %v417_v10 }
  0xc0   :  { %v320_v19 = vsub.f32 1.0, %v319_v15  ;;  %v412_v15 = vld [vmem:[%s7978_s8 + $0x30] sm:$0xff] }
  0xc1   :  { %v275_v14 = vmul.f32 %v5447_v9, %v274_v12  ;;  %v415_v12 = vld [vmem:[%s7978_s8 + $0x48] sm:$0xff]  ;;  %427 = vmatpush.msrb.mxu2 %v416_v11 }
  0xc2   :  { %v321_v24 = vmul.f32 %v5449_v13, %v320_v19  ;;  %v408_v19 = vld [vmem:[%s7978_s8 + $0x10] sm:$0xff] }
  0xc3   :  { %v276_v16 = vadd.f32 %v5447_v9, %v275_v14  ;;  %428 = vmatpush.msrb.mxu2 %v415_v12  ;;  %v413_v14 = vld [vmem:[%s7978_s8 + $0x38] sm:$0xff] }
  0xc4   :  { %v322_v27 = vadd.f32 %v5449_v13, %v321_v24 }
  0xc5   :  { %v280_v20 = vsel %vm279_vm4, %v5447_v9, %v276_v16  ;;  %v411_v16 = vld [vmem:[%s7978_s8 + $0x28] sm:$0xff] }
  0xc6   :  { %v285_v23 = vsel %vm282_vm5, %v284_v21, %v280_v20  ;;  %v326_v30 = vsel %vm325_vm8, %v5449_v13, %v322_v27  ;;  %v414_v13 = vld [vmem:[%s7978_s8 + $0x40] sm:$0xff]  ;;  %v407_v20 = vld [vmem:[%s7978_s8 + $0x8] sm:$0xff] }
  0xc7   :  { %v331_v34 = vsel %vm328_vm9, %v330_v32, %v326_v30  ;;  %v305_v52 = vsub.f32 1.0, %v285_v23  ;;  %v311_v55 = vmul.f32 0.0, %v285_v23  ;;  %429 = vmatpush.msrb.mxu2 %v414_v13  ;;  %v406_v21 = vld [vmem:[%s7978_s8] sm:$0xff] }
  0xc8   :  { %v351_v43 = vmul.f32 0.0, %v331_v34  ;;  %v345_v47 = vsub.f32 1.0, %v331_v34 }
  0xc9   :  { %430 = vmatpush.msrb.mxu2 %v413_v14 }
  0xcb   :  { %431 = vmatpush.msrb.mxu2 %v412_v15 }
  0xcd   :  { %432 = vmatpush.msrb.mxu2 %v411_v16 }
  0xcf   :  { %433 = vmatpush.msrb.mxu2 %v410_v17 }
  0xd1   :  { %434 = vmatpush.msrb.mxu2 %v409_v18 }
  0xd3   :  { %435 = vmatpush.msrb.mxu2 %v408_v19 }
  0xd5   :  { %436 = vmatpush.msrb.mxu2 %v407_v20 }
  0xd7   :  { %437 = vmatpush.msrb.mxu2 %v406_v21 }
  0xd9   :  { %720 = vmatpush.msra.mxu2 %v417_v10 }
  0xdb   :  { %721 = vmatpush.msra.mxu2 %v416_v11 }
  0xdd   :  { %722 = vmatpush.msra.mxu2 %v415_v12 }
  0xdf   :  { %723 = vmatpush.msra.mxu2 %v414_v13 }
  0xe1   :  { %724 = vmatpush.msra.mxu2 %v413_v14 }
  0xe3   :  { %725 = vmatpush.msra.mxu2 %v412_v15 }
  0xe5   :  { %726 = vmatpush.msra.mxu2 %v411_v16 }
  0xe7   :  { %727 = vmatpush.msra.mxu2 %v410_v17 }
  0xe9   :  { %728 = vmatpush.msra.mxu2 %v409_v18 }
  0xeb   :  { %729 = vmatpush.msra.mxu2 %v408_v19 }
  0xed   :  { %730 = vmatpush.msra.mxu2 %v407_v20 }
  0xef   :  { %731 = vmatpush.msra.mxu2 %v406_v21 }
 0x11a   :  { %v296_v22 = vpop.permute.xlu0 %295 }
 0x11b   :  { %v298_v25 = vmul.f32 %v296_v22, %v285_v23  ;;  %v5417_v22 = vld [vmem:[%s7977_s7] ss:$0 sm:$0xff] }
 0x11d   :  { %300 = vrot.lane.b32.xlu2 %v298_v25, %s5789_s19 }
 0x11e   :  { %v336_v26 = vpop.permute.xlu1 %335 }
 0x11f   :  { %v338_v31 = vmul.f32 %v336_v26, %v285_v23 }
 0x125   :  { %340 = vrot.lane.b32.xlu2 %v338_v31, %s5789_s19 }
 0x126   :  { %v376_v33 = vpop.permute.xlu1 %375 }
 0x127   :  { %v378_v35 = vmul.f32 %v376_v33, %v331_v34 }
 0x129   :  { %380 = vrot.lane.b32.xlu0 %v378_v35, %s5791_s17 }
 0x177   :  { %v301_v36 = vpop.permute.xlu2 %300 }
 0x178   :  { %v303_v37 = vadd.f32 %v301_v36, %v6118_v63  ;;  %v418_v36 = vld [vmem:[%s7979_s9] sm:$0x1] }
 0x17a   :  { %5450 = vtanh.f32 %v303_v37 }
 0x17f   :  { %v341_v38 = vpop.permute.xlu2 %340 }
 0x180   :  { %v5451_v40 = vpop.eup %5450  ;;  %v343_v41 = vadd.f32 %v341_v38, %v6121_v3 }
 0x181   :  { %307 = vrot.lane.b32.xlu1 %v5451_v40, %s5792_s22 }
 0x182   :  { %5452 = vtanh.f32 %v343_v41 }
 0x188   :  { %v5453_v42 = vpop.eup %5452 }
 0x189   :  { %347 = vrot.lane.b32.xlu2 %v5453_v42, %s5792_s22 }
 0x19b   :  { %v381_v44 = vpop.permute.xlu0 %380 }
 0x19c   :  { %v6131_v45 = vadd.f32 %v381_v44, %v351_v43 }
 0x19e   :  { %5454 = vtanh.f32 %v6131_v45 }
 0x19f   :  { %5456 = vpow2.f32 %v5281_v51 }
 0x1a4   :  { %v5455_v46 = vpop.eup %5454 }
 0x1a5   :  { %386 = vrot.lane.b32.xlu0 %v5455_v46, %s5789_s19  ;;  %v5457_v53 = vpop.eup %5456 }
 0x1a6   :  { %v358_v58 = vadd.f32 1.0, %v5457_v53 }
 0x1a8   :  { %5458 = vrcp.f32 %v358_v58  ;;  %v370_v4 = vand.u32 2147483648, %v358_v58  ;;  %vm364_vm11 = vweird.f32 %v358_v58  ;;  %v368_v60 = vand.u32 2147483647, %v358_v58 }
 0x1aa   :  { %v371_v6 = vor.u32 1.1754944e-38, %v370_v4  ;;  %vm369_vm13 = vcmp.eq.f32.partialorder %v368_v60, 8.507059e+37 }
 0x1ae   :  { %v5459_v61 = vpop.eup %5458 }
 0x1af   :  { %v360_v62 = vmul.f32 %v5459_v61, %v358_v58  ;;  %vm365_vm10 = vweird.f32 %v5459_v61 }
 0x1b0   :  { %vm366_vm12 = vmor %vm364_vm11, %vm365_vm10 }
 0x1b1   :  { %v361_v0 = vsub.f32 1.0, %v360_v62 }
 0x1b3   :  { %v362_v1 = vmul.f32 %v5459_v61, %v361_v0 }
 0x1b5   :  { %v363_v2 = vadd.f32 %v5459_v61, %v362_v1 }
 0x1b7   :  { %v367_v5 = vsel %vm366_vm12, %v5459_v61, %v363_v2 }
 0x1b8   :  { %v372_v7 = vsel %vm369_vm13, %v371_v6, %v367_v5 }
 0x1e3   :  { %v348_v48 = vpop.permute.xlu2 %347 }
 0x1e4   :  { %v350_v49 = vmul.f32 %v348_v48, %v345_v47 }
 0x1e6   :  { %v352_v50 = vadd.f32 %v351_v43, %v350_v49 }
 0x1e8   :  { %395 = vrot.lane.b32.xlu2 %v352_v50, %s5791_s17 }
 0x1f3   :  { %v308_v54 = vpop.permute.xlu1 %307 }
 0x1f4   :  { %v310_v57 = vmul.f32 %v308_v54, %v305_v52 }
 0x1f6   :  { %v312_v59 = vadd.f32 %v311_v55, %v310_v57 }
 0x1f8   :  { %391 = vrot.lane.b32.xlu1 %v312_v59, %s5792_s22 }
 0x200   :  { %566 = vrot.lane.b32.xlu1 %v5417_v22, %s5789_s19 }
 0x217   :  { %v387_v8 = vpop.permute.xlu0 %386 }
 0x218   :  { %v389_v9 = vmul.f32 %v387_v8, %v372_v7 }
 0x21a   :  { %399 = vrot.lane.b32.xlu0 %v389_v9, %s5791_s17 }
 0x242   :  { %v396_v24 = vpop.permute.xlu2 %395 }
 0x26a   :  { %v392_v23 = vpop.permute.xlu1 %391 }
 0x26b   :  { %v403_v25 = vsel %vm402_vm14, %v392_v23, %v396_v24 }
 0x272   :  { %v567_v35 = vpop.permute.xlu1 %566 }
 0x28c   :  { %v400_v26 = vpop.permute.xlu0 %399 }
 0x28d   :  { %v6181_v27 = vsel %vm404_vm15, %v403_v25, %v400_v26  ;;  %v666_v26 = vrot.slane %v6131_v45, 7 }
 0x28e   :  { %5282 = vmatmul.msk.f32.vlgmr.msrb.gmra.mxu2 %vm203_vm2, %v6181_v27  ;;  %5283 = vmatmul.msk.f32.vlgmr.msrb.gmra.mxu3 %vm203_vm2, %v6181_v27 }
 0x28f   :  { %5284 = vmatmul.msk.f32.vlgmr.msra.gmra.mxu0 %vm203_vm2, %v6181_v27  ;;  %5285 = vmatmul.msk.f32.vlgmr.msra.gmra.mxu1 %vm203_vm2, %v6181_v27 }
 0x290   :  { %1013 = vmatpush.msrb.mxu2 %v417_v10 }
 0x292   :  { %1014 = vmatpush.msrb.mxu2 %v416_v11 }
 0x294   :  { %1015 = vmatpush.msrb.mxu2 %v415_v12 }
 0x296   :  { %1016 = vmatpush.msrb.mxu2 %v414_v13 }
 0x298   :  { %1017 = vmatpush.msrb.mxu2 %v413_v14 }
 0x29a   :  { %1018 = vmatpush.msrb.mxu2 %v412_v15 }
 0x29c   :  { %1019 = vmatpush.msrb.mxu2 %v411_v16 }
 0x29e   :  { %1020 = vmatpush.msrb.mxu2 %v410_v17 }
 0x2a0   :  { %1021 = vmatpush.msrb.mxu2 %v409_v18 }
 0x2a2   :  { %1022 = vmatpush.msrb.mxu2 %v408_v19 }
 0x2a4   :  { %1023 = vmatpush.msrb.mxu2 %v407_v20  ;;  %v588_v20 = vrot.slane %v6181_v27, 7 }
 0x2a6   :  { %1024 = vmatpush.msrb.mxu2 %v406_v21 }
 0x30c   :  { %v517_v29 = vpop.f32.mrf.mxu0  ;;  %v537_v30 = vpop.f32.mrf.mxu1 }
 0x30d   :  { %v617_v31 = vadd.f32 %v563_v28, %v517_v29  ;;  %v642_v32 = vrot.slane %v537_v30, 7  ;;  %v595_v50 = vrot.slane %v517_v29, 7 }
 0x30f   :  { %v619_v33 = vrot.slane %v617_v31, 7  ;;  %v6195_v34 = vadd.f32 %v642_v32, %v6109_v56  ;;  %v597_v51 = vadd.f32 %v595_v50, %v6121_v3 }
 0x311   :  { %5460 = vtanh.f32 %v6195_v34  ;;  %620 = vrot.lane.b32.xlu0 %v619_v33, %s5789_s19  ;;  %v439_v37 = vpop.f32.mrf.mxu2  ;;  %v497_v38 = vpop.f32.mrf.mxu3  ;;  %v5287_v53 = vmul.f32 -1.442695, %v597_v51  ;;  %v5288_v45 = vmul.f32 -1.442695, %v6195_v34 }
 0x312   :  { %v440_v40 = vadd.f32 %v439_v37, %v418_v36  ;;  %v569_v41 = vadd.f32 %v567_v35, %v497_v38  ;;  %v541_v44 = vrot.slane %v497_v38, 7 }
 0x314   :  { %443 = vst.msk [vmem:[#allocation2] sm:$0x1] %vm442_vm3, %v440_v40  ;;  %v571_v42 = vrot.slane %v569_v41, 7  ;;  %v543_v46 = vadd.f32 %v541_v44, %v6118_v63 }
 0x316   :  { %572 = vrot.lane.b32.xlu2 %v571_v42, %s5789_s19  ;;  %v5286_v47 = vmul.f32 -1.442695, %v543_v46 }
 0x317   :  { %v5461_v43 = vpop.eup %5460 }
 0x318   :  { %670 = vrot.lane.b32.xlu1 %v5461_v43, %s5789_s19  ;;  %5462 = vpow2.f32 %v5286_v47 }
 0x31e   :  { %v5463_v48 = vpop.eup %5462 }
 0x31f   :  { %v547_v49 = vadd.f32 1.0, %v5463_v48 }
 0x321   :  { %5464 = vrcp.f32 %v547_v49  ;;  %v559_v62 = vand.u32 2147483648, %v547_v49  ;;  %vm553_vm5 = vweird.f32 %v547_v49  ;;  %v557_v0 = vand.u32 2147483647, %v547_v49 }
 0x322   :  { %5466 = vpow2.f32 %v5287_v53 }
 0x323   :  { %v560_v2 = vor.u32 1.1754944e-38, %v559_v62  ;;  %vm558_vm7 = vcmp.eq.f32.partialorder %v557_v0, 8.507059e+37  ;;  %v5418_v62 = vld [vmem:[%s7977_s7] ss:$0 sm:$0xff] }
 0x327   :  { %v5465_v52 = vpop.eup %5464 }
 0x328   :  { %v549_v54 = vmul.f32 %v5465_v52, %v547_v49  ;;  %v5467_v58 = vpop.eup %5466  ;;  %vm554_vm4 = vweird.f32 %v5465_v52 }
 0x329   :  { %v601_v61 = vadd.f32 1.0, %v5467_v58  ;;  %vm555_vm6 = vmor %vm553_vm5, %vm554_vm4 }
 0x32a   :  { %v550_v55 = vsub.f32 1.0, %v549_v54 }
 0x32b   :  { %5468 = vrcp.f32 %v601_v61  ;;  %v613_v13 = vand.u32 2147483648, %v601_v61  ;;  %vm607_vm9 = vweird.f32 %v601_v61  ;;  %v611_v14 = vand.u32 2147483647, %v601_v61 }
 0x32c   :  { %v551_v57 = vmul.f32 %v5465_v52, %v550_v55 }
 0x32d   :  { %v614_v16 = vor.u32 1.1754944e-38, %v613_v13  ;;  %vm612_vm11 = vcmp.eq.f32.partialorder %v611_v14, 8.507059e+37  ;;  %v711_v14 = vld [vmem:[%s7979_s9] sm:$0x1] }
 0x32e   :  { %v552_v59 = vadd.f32 %v5465_v52, %v551_v57 }
 0x330   :  { %v556_v1 = vsel %vm555_vm6, %v5465_v52, %v552_v59 }
 0x331   :  { %v561_v60 = vsel %vm558_vm7, %v560_v2, %v556_v1  ;;  %v5469_v6 = vpop.eup %5468 }
 0x332   :  { %v603_v7 = vmul.f32 %v5469_v6, %v601_v61  ;;  %vm608_vm8 = vweird.f32 %v5469_v6  ;;  %v582_v33 = vsub.f32 1.0, %v561_v60 }
 0x333   :  { %vm609_vm10 = vmor %vm607_vm9, %vm608_vm8 }
 0x334   :  { %v604_v8 = vsub.f32 1.0, %v603_v7 }
 0x336   :  { %v605_v9 = vmul.f32 %v5469_v6, %v604_v8 }
 0x338   :  { %v606_v11 = vadd.f32 %v5469_v6, %v605_v9 }
 0x33a   :  { %v610_v15 = vsel %vm609_vm10, %v5469_v6, %v606_v11  ;;  %v856_v6 = vld [vmem:[%s7977_s7] sm:$0x1] }
 0x33b   :  { %v615_v18 = vsel %vm612_vm11, %v614_v16, %v610_v15 }
 0x33c   :  { %v668_v27 = vmul.f32 %v666_v26, %v615_v18  ;;  %v630_v48 = vsub.f32 1.0, %v615_v18 }
 0x370   :  { %v573_v4 = vpop.permute.xlu2 %572 }
 0x371   :  { %v575_v5 = vmul.f32 %v573_v4, %v561_v60 }
 0x373   :  { %577 = vrot.lane.b32.xlu2 %v575_v5, %s5789_s19 }
 0x383   :  { %v621_v10 = vpop.permute.xlu0 %620 }
 0x384   :  { %v623_v12 = vmul.f32 %v621_v10, %v561_v60 }
 0x386   :  { %625 = vrot.lane.b32.xlu0 %v623_v12, %s5789_s19 }
 0x38a   :  { %v671_v17 = vpop.permute.xlu1 %670 }
 0x38b   :  { %v673_v19 = vmul.f32 %v671_v17, %v615_v18 }
 0x38d   :  { %675 = vrot.lane.b32.xlu1 %v673_v19, %s5791_s17 }
 0x38e   :  { %589 = vrot.lane.b32.xlu0 %v588_v20, %s5791_s17 }
 0x3cd   :  { %v578_v21 = vpop.permute.xlu2 %577 }
 0x3ce   :  { %v580_v22 = vadd.f32 %v578_v21, %v6118_v63 }
 0x3d0   :  { %5470 = vtanh.f32 %v580_v22 }
 0x3d6   :  { %v5471_v23 = vpop.eup %5470 }
 0x3d7   :  { %584 = vrot.lane.b32.xlu2 %v5471_v23, %s5792_s22 }
 0x3df   :  { %636 = vrot.lane.b32.xlu2 %v588_v20, %s5792_s22 }
 0x3f8   :  { %v626_v24 = vpop.permute.xlu0 %625 }
 0x3f9   :  { %v628_v25 = vadd.f32 %v626_v24, %v6121_v3 }
 0x3fb   :  { %5472 = vtanh.f32 %v628_v25 }
 0x3ff   :  { %v676_v28 = vpop.permute.xlu1 %675 }
 0x400   :  { %v6217_v29 = vadd.f32 %v676_v28, %v668_v27  ;;  %v590_v32 = vpop.permute.xlu0 %589 }
 0x401   :  { %v5473_v30 = vpop.eup %5472  ;;  %v592_v36 = vmul.f32 %v590_v32, %v561_v60 }
 0x402   :  { %5474 = vtanh.f32 %v6217_v29  ;;  %632 = vrot.lane.b32.xlu1 %v5473_v30, %s5792_s22 }
 0x403   :  { %5476 = vpow2.f32 %v5288_v45 }
 0x408   :  { %v5475_v31 = vpop.eup %5474 }
 0x409   :  { %681 = vrot.lane.b32.xlu0 %v5475_v31, %s5789_s19  ;;  %v5477_v40 = vpop.eup %5476 }
 0x40a   :  { %v649_v41 = vadd.f32 1.0, %v5477_v40 }
 0x40c   :  { %5478 = vrcp.f32 %v649_v41  ;;  %v661_v53 = vand.u32 2147483648, %v649_v41  ;;  %vm655_vm13 = vweird.f32 %v649_v41  ;;  %v659_v54 = vand.u32 2147483647, %v649_v41 }
 0x40e   :  { %v662_v57 = vor.u32 1.1754944e-38, %v661_v53  ;;  %vm660_vm5 = vcmp.eq.f32.partialorder %v659_v54, 8.507059e+37 }
 0x412   :  { %v5479_v42 = vpop.eup %5478 }
 0x413   :  { %v651_v43 = vmul.f32 %v5479_v42, %v649_v41  ;;  %vm656_vm12 = vweird.f32 %v5479_v42 }
 0x414   :  { %vm657_vm4 = vmor %vm655_vm13, %vm656_vm12 }
 0x415   :  { %v652_v44 = vsub.f32 1.0, %v651_v43 }
 0x417   :  { %v653_v46 = vmul.f32 %v5479_v42, %v652_v44 }
 0x419   :  { %v654_v50 = vadd.f32 %v5479_v42, %v653_v46 }
 0x41b   :  { %v658_v34 = vsel %vm657_vm4, %v5479_v42, %v654_v50 }
 0x41c   :  { %v663_v58 = vsel %vm660_vm5, %v662_v57, %v658_v34 }
 0x431   :  { %v585_v35 = vpop.permute.xlu2 %584 }
 0x432   :  { %v587_v37 = vmul.f32 %v585_v35, %v582_v33 }
 0x434   :  { %v593_v38 = vadd.f32 %v592_v36, %v587_v37 }
 0x436   :  { %686 = vrot.lane.b32.xlu1 %v593_v38, %s5792_s22 }
 0x439   :  { %v637_v47 = vpop.permute.xlu2 %636 }
 0x43a   :  { %v639_v51 = vmul.f32 %v637_v47, %v615_v18 }
 0x43e   :  { %859 = vrot.lane.b32.xlu1 %v5418_v62, %s5789_s19 }
 0x474   :  { %v633_v49 = vpop.permute.xlu1 %632 }
 0x475   :  { %v635_v52 = vmul.f32 %v633_v49, %v630_v48 }
 0x477   :  { %v640_v55 = vadd.f32 %v639_v51, %v635_v52 }
 0x479   :  { %690 = vrot.lane.b32.xlu2 %v640_v55, %s5791_s17 }
 0x47b   :  { %v682_v59 = vpop.permute.xlu0 %681 }
 0x47c   :  { %v684_v61 = vmul.f32 %v682_v59, %v663_v58 }
 0x47e   :  { %694 = vrot.lane.b32.xlu0 %v684_v61, %s5791_s17 }
 0x4a8   :  { %v687_v1 = vpop.permute.xlu1 %686 }
 0x4b0   :  { %v860_v13 = vpop.permute.xlu1 %859 }
 0x4d3   :  { %v691_v0 = vpop.permute.xlu2 %690 }
 0x4d4   :  { %v697_v2 = vsel %vm402_vm14, %v687_v1, %v691_v0 }
 0x4f0   :  { %v695_v4 = vpop.permute.xlu0 %694 }
 0x4f1   :  { %v6232_v60 = vsel %vm404_vm15, %v697_v2, %v695_v4 }
 0x4f2   :  { %v713_v5 = vrot.slane %v6232_v60, 1  ;;  %v881_v61 = vrot.slane %v6232_v60, 7 }
 0x4f4   :  { %5289 = vmatmul.msk.f32.vlgmr.msra.gmra.mxu2 %vm203_vm2, %v713_v5  ;;  %5290 = vmatmul.msk.f32.vlgmr.msra.gmra.mxu3 %vm203_vm2, %v713_v5 }
 0x4f5   :  { %5291 = vmatmul.msk.f32.vlgmr.msrb.gmra.mxu0 %vm203_vm2, %v713_v5  ;;  %5292 = vmatmul.msk.f32.vlgmr.msrb.gmra.mxu1 %vm203_vm2, %v713_v5  ;;  %v959_v5 = vrot.slane %v6217_v29, 7 }
 0x572   :  { %v810_v7 = vpop.f32.mrf.mxu0  ;;  %v830_v8 = vpop.f32.mrf.mxu1 }
 0x573   :  { %v910_v9 = vadd.f32 %v856_v6, %v810_v7  ;;  %v935_v10 = vrot.slane %v830_v8, 6  ;;  %v888_v26 = vrot.slane %v810_v7, 6 }
 0x575   :  { %v912_v11 = vrot.slane %v910_v9, 6  ;;  %v6243_v12 = vadd.f32 %v935_v10, %v6109_v56  ;;  %v890_v27 = vadd.f32 %v888_v26, %v6121_v3 }
 0x577   :  { %5480 = vtanh.f32 %v6243_v12  ;;  %913 = vrot.lane.b32.xlu0 %v912_v11, %s5789_s19  ;;  %v733_v15 = vpop.f32.mrf.mxu2  ;;  %v790_v16 = vpop.f32.mrf.mxu3  ;;  %v5294_v30 = vmul.f32 -1.442695, %v890_v27  ;;  %v5295_v29 = vmul.f32 -1.442695, %v6243_v12 }
 0x578   :  { %v734_v17 = vadd.f32 %v733_v15, %v711_v14  ;;  %v862_v18 = vadd.f32 %v860_v13, %v790_v16  ;;  %v834_v21 = vrot.slane %v790_v16, 6 }
 0x57a   :  { %736 = vst.msk [vmem:[#allocation2 + $0x1] sm:$0x1] %vm442_vm3, %v734_v17  ;;  %v864_v19 = vrot.slane %v862_v18, 6  ;;  %v836_v22 = vadd.f32 %v834_v21, %v6118_v63 }
 0x57c   :  { %865 = vrot.lane.b32.xlu2 %v864_v19, %s5789_s19  ;;  %v5293_v23 = vmul.f32 -1.442695, %v836_v22 }
 0x57d   :  { %v5481_v20 = vpop.eup %5480 }
 0x57e   :  { %963 = vrot.lane.b32.xlu1 %v5481_v20, %s5789_s19  ;;  %5482 = vpow2.f32 %v5293_v23 }
 0x584   :  { %v5483_v24 = vpop.eup %5482 }
 0x585   :  { %v840_v25 = vadd.f32 1.0, %v5483_v24 }
 0x587   :  { %5484 = vrcp.f32 %v840_v25  ;;  %v852_v38 = vand.u32 2147483648, %v840_v25  ;;  %vm846_vm7 = vweird.f32 %v840_v25  ;;  %v850_v45 = vand.u32 2147483647, %v840_v25 }
 0x588   :  { %5486 = vpow2.f32 %v5294_v30 }
 0x589   :  { %v853_v41 = vor.u32 1.1754944e-38, %v852_v38  ;;  %vm851_vm9 = vcmp.eq.f32.partialorder %v850_v45, 8.507059e+37  ;;  %v6274_v38 = vld [vmem:[#allocation4 + $0x108] sm:$0xff]  ;;  %v6276_v45 = vld [vmem:[#allocation4 + $0x110] sm:$0xff] }
 0x58a   :  { %1070 = vmatpush.msrb.mxu3 %v6274_v38  ;;  %1090 = vmatpush.msra.mxu0 %v6276_v45 }
 0x58d   :  { %v5485_v28 = vpop.eup %5484 }
 0x58e   :  { %v842_v31 = vmul.f32 %v5485_v28, %v840_v25  ;;  %v5487_v35 = vpop.eup %5486  ;;  %vm847_vm6 = vweird.f32 %v5485_v28 }
 0x58f   :  { %v894_v37 = vadd.f32 1.0, %v5487_v35  ;;  %vm848_vm8 = vmor %vm846_vm7, %vm847_vm6 }
 0x590   :  { %v843_v32 = vsub.f32 1.0, %v842_v31 }
 0x591   :  { %5488 = vrcp.f32 %v894_v37  ;;  %v906_v53 = vand.u32 2147483648, %v894_v37  ;;  %vm900_vm11 = vweird.f32 %v894_v37  ;;  %v904_v54 = vand.u32 2147483647, %v894_v37 }
 0x592   :  { %v844_v33 = vmul.f32 %v5485_v28, %v843_v32 }
 0x593   :  { %v907_v34 = vor.u32 1.1754944e-38, %v906_v53  ;;  %vm905_vm13 = vcmp.eq.f32.partialorder %v904_v54, 8.507059e+37  ;;  %v6313_v53 = vld [vmem:[#allocation4 + $0xb8] sm:$0xff]  ;;  %v6316_v54 = vld [vmem:[#allocation4 + $0x90] sm:$0xff] }
 0x594   :  { %v845_v36 = vadd.f32 %v5485_v28, %v844_v33 }
 0x596   :  { %v849_v40 = vsel %vm848_vm8, %v5485_v28, %v845_v36 }
 0x597   :  { %v854_v43 = vsel %vm851_vm9, %v853_v41, %v849_v40  ;;  %v5489_v46 = vpop.eup %5488  ;;  %v6278_v40 = vld [vmem:[#allocation4 + $0x118] sm:$0xff]  ;;  %v6282_v41 = vld [vmem:[#allocation4 + $0xf0] sm:$0xff] }
 0x598   :  { %v896_v47 = vmul.f32 %v5489_v46, %v894_v37  ;;  %vm901_vm10 = vweird.f32 %v5489_v46  ;;  %v875_v11 = vsub.f32 1.0, %v854_v43  ;;  %1110 = vmatpush.msra.mxu1 %v6278_v40  ;;  %1071 = vmatpush.msrb.mxu3 %v6282_v41 }
 0x599   :  { %vm902_vm12 = vmor %vm900_vm11, %vm901_vm10 }
 0x59a   :  { %v897_v48 = vsub.f32 1.0, %v896_v47  ;;  %v6295_v47 = vld [vmem:[#allocation4 + $0xe8] sm:$0xff] }
 0x59c   :  { %v898_v49 = vmul.f32 %v5489_v46, %v897_v48  ;;  %v6298_v48 = vld [vmem:[#allocation4 + $0xc0] sm:$0xff] }
 0x59e   :  { %v899_v51 = vadd.f32 %v5489_v46, %v898_v49  ;;  %v6300_v49 = vld [vmem:[#allocation4 + $0xc8] sm:$0xff] }
 0x5a0   :  { %v903_v55 = vsel %vm902_vm12, %v5489_v46, %v899_v51  ;;  %v6291_v46 = vld [vmem:[#allocation4 + $0xe0] sm:$0xff]  ;;  %v6307_v51 = vld [vmem:[#allocation4 + $0xa8] sm:$0xff] }
 0x5a1   :  { %v908_v58 = vsel %vm905_vm13, %v907_v34, %v903_v55  ;;  %v6318_v55 = vld [vmem:[#allocation4 + $0x98] sm:$0xff]  ;;  %v6322_v34 = vld [vmem:[#allocation4 + $0xa0] sm:$0xff] }
 0x5a2   :  { %v961_v60 = vmul.f32 %v959_v5, %v908_v58  ;;  %v923_v24 = vsub.f32 1.0, %v908_v58  ;;  %v6352_v5 = vld [vmem:[#allocation4 + $0x30] sm:$0xff] }
 0x5d6   :  { %v866_v42 = vpop.permute.xlu2 %865 }
 0x5d7   :  { %v868_v44 = vmul.f32 %v866_v42, %v854_v43  ;;  %v6284_v42 = vld [vmem:[#allocation4 + $0xf8] sm:$0xff] }
 0x5d8   :  { %1091 = vmatpush.msra.mxu0 %v6284_v42 }
 0x5d9   :  { %870 = vrot.lane.b32.xlu2 %v868_v44, %s5789_s19  ;;  %v6289_v44 = vld [vmem:[#allocation4 + $0xd8] sm:$0xff] }
 0x5da   :  { %1072 = vmatpush.msrb.mxu3 %v6289_v44  ;;  %1092 = vmatpush.msra.mxu0 %v6291_v46 }
 0x5dc   :  { %1073 = vmatpush.msrb.mxu3 %v6298_v48  ;;  %1093 = vmatpush.msra.mxu0 %v6300_v49 }
 0x5de   :  { %1074 = vmatpush.msrb.mxu3 %v6307_v51 }
 0x5e0   :  { %1075 = vmatpush.msrb.mxu3 %v6316_v54 }
 0x5e9   :  { %v914_v50 = vpop.permute.xlu0 %913 }
 0x5ea   :  { %v916_v52 = vmul.f32 %v914_v50, %v854_v43  ;;  %v6304_v50 = vld [vmem:[#allocation4 + $0xd0] sm:$0xff] }
 0x5ec   :  { %918 = vrot.lane.b32.xlu0 %v916_v52, %s5789_s19  ;;  %v6309_v52 = vld [vmem:[#allocation4 + $0xb0] sm:$0xff] }
 0x5ed   :  { %1094 = vmatpush.msra.mxu0 %v6309_v52 }
 0x5ef   :  { %1095 = vmatpush.msra.mxu0 %v6318_v55 }
 0x5f0   :  { %v964_v57 = vpop.permute.xlu1 %963 }
 0x5f1   :  { %v966_v59 = vmul.f32 %v964_v57, %v908_v58  ;;  %v6325_v57 = vld [vmem:[#allocation4 + $0x78] sm:$0xff] }
 0x5f2   :  { %1076 = vmatpush.msrb.mxu3 %v6325_v57 }
 0x5f3   :  { %968 = vrot.lane.b32.xlu1 %v966_v59, %s5791_s17  ;;  %v6331_v59 = vld [vmem:[#allocation4 + $0x88] sm:$0xff] }
 0x5f4   :  { %882 = vrot.lane.b32.xlu0 %v881_v61, %s5791_s17 }
 0x633   :  { %v871_v62 = vpop.permute.xlu2 %870 }
 0x634   :  { %v873_v0 = vadd.f32 %v871_v62, %v6118_v63  ;;  %v6336_v62 = vld [vmem:[#allocation4 + $0x68] sm:$0xff] }
 0x636   :  { %5490 = vtanh.f32 %v873_v0  ;;  %v6340_v0 = vld [vmem:[#allocation4 + $0x70] sm:$0xff] }
 0x63c   :  { %v5491_v1 = vpop.eup %5490 }
 0x63d   :  { %877 = vrot.lane.b32.xlu2 %v5491_v1, %s5792_s22  ;;  %v6343_v1 = vld [vmem:[#allocation4 + $0x48] sm:$0xff] }
 0x645   :  { %929 = vrot.lane.b32.xlu2 %v881_v61, %s5792_s22  ;;  %v6334_v61 = vld [vmem:[#allocation4 + $0x60] sm:$0xff] }
 0x646   :  { %1077 = vmatpush.msrb.mxu3 %v6334_v61 }
 0x648   :  { %1078 = vmatpush.msrb.mxu3 %v6343_v1 }
 0x64a   :  { %1079 = vmatpush.msrb.mxu3 %v6352_v5 }
 0x65e   :  { %v919_v2 = vpop.permute.xlu0 %918 }
 0x65f   :  { %v921_v4 = vadd.f32 %v919_v2, %v6121_v3  ;;  %v6345_v2 = vld [vmem:[#allocation4 + $0x50] sm:$0xff] }
 0x661   :  { %5492 = vtanh.f32 %v921_v4  ;;  %v6349_v4 = vld [vmem:[#allocation4 + $0x58] sm:$0xff] }
 0x665   :  { %v969_v6 = vpop.permute.xlu1 %968 }
 0x666   :  { %v6265_v7 = vadd.f32 %v969_v6, %v961_v60  ;;  %v883_v10 = vpop.permute.xlu0 %882  ;;  %v6354_v60 = vld [vmem:[#allocation4 + $0x38] sm:$0xff]  ;;  %v6358_v6 = vld [vmem:[#allocation4 + $0x40] sm:$0xff] }
 0x667   :  { %v5493_v8 = vpop.eup %5492  ;;  %v885_v14 = vmul.f32 %v883_v10, %v854_v43  ;;  %v6286_v43 = vld [vmem:[#allocation4 + $0x100] sm:$0xff]  ;;  %v6368_v10 = vld [vmem:[#allocation4 + $0x28] sm:$0xff] }
 0x668   :  { %5494 = vtanh.f32 %v6265_v7  ;;  %925 = vrot.lane.b32.xlu1 %v5493_v8, %s5792_s22  ;;  %1111 = vmatpush.msra.mxu1 %v6286_v43  ;;  %v6364_v8 = vld [vmem:[#allocation4 + $0x18] sm:$0xff] }
 0x669   :  { %5496 = vpow2.f32 %v5295_v29  ;;  %1080 = vmatpush.msrb.mxu3 %v6364_v8 }
 0x66a   :  { %1112 = vmatpush.msra.mxu1 %v6295_v47 }
 0x66c   :  { %1113 = vmatpush.msra.mxu1 %v6304_v50 }
 0x66e   :  { %v5495_v9 = vpop.eup %5494  ;;  %1114 = vmatpush.msra.mxu1 %v6313_v53 }
 0x66f   :  { %974 = vrot.lane.b32.xlu0 %v5495_v9, %s5789_s19  ;;  %v5497_v17 = vpop.eup %5496  ;;  %v6366_v9 = vld [vmem:[#allocation4 + $0x20] sm:$0xff] }
 0x670   :  { %v942_v18 = vadd.f32 1.0, %v5497_v17  ;;  %1115 = vmatpush.msra.mxu1 %v6322_v34 }
 0x672   :  { %5498 = vrcp.f32 %v942_v18  ;;  %v954_v30 = vand.u32 2147483648, %v942_v18  ;;  %vm948_vm5 = vweird.f32 %v942_v18  ;;  %v952_v31 = vand.u32 2147483647, %v942_v18  ;;  %1116 = vmatpush.msra.mxu1 %v6331_v59 }
 0x674   :  { %v955_v33 = vor.u32 1.1754944e-38, %v954_v30  ;;  %vm953_vm7 = vcmp.eq.f32.partialorder %v952_v31, 8.507059e+37  ;;  %1117 = vmatpush.msra.mxu1 %v6340_v0  ;;  %v1004_v30 = vld [vmem:[%s7979_s9] sm:$0x1] }
 0x676   :  { %1118 = vmatpush.msra.mxu1 %v6349_v4 }
 0x678   :  { %v5499_v19 = vpop.eup %5498  ;;  %1119 = vmatpush.msra.mxu1 %v6358_v6 }
 0x679   :  { %v944_v20 = vmul.f32 %v5499_v19, %v942_v18  ;;  %vm949_vm4 = vweird.f32 %v5499_v19 }
 0x67a   :  { %vm950_vm6 = vmor %vm948_vm5, %vm949_vm4  ;;  %1120 = vmatpush.msra.mxu1 %v6368_v10 }
 0x67b   :  { %v945_v21 = vsub.f32 1.0, %v944_v20 }
 0x67d   :  { %v946_v22 = vmul.f32 %v5499_v19, %v945_v21  ;;  %v1149_v21 = vld [vmem:[%s7977_s7] sm:$0x1] }
 0x67f   :  { %v947_v26 = vadd.f32 %v5499_v19, %v946_v22 }
 0x681   :  { %v951_v12 = vsel %vm950_vm6, %v5499_v19, %v947_v26 }
 0x682   :  { %v956_v35 = vsel %vm953_vm7, %v955_v33, %v951_v12 }
 0x697   :  { %v878_v13 = vpop.permute.xlu2 %877 }
 0x698   :  { %v880_v15 = vmul.f32 %v878_v13, %v875_v11  ;;  %v6372_v11 = vld [vmem:[#allocation4] sm:$0xff]  ;;  %v6374_v13 = vld [vmem:[#allocation4 + $0x8] sm:$0xff] }
 0x699   :  { %1081 = vmatpush.msrb.mxu3 %v6372_v11 }
 0x69a   :  { %v886_v16 = vadd.f32 %v885_v14, %v880_v15  ;;  %v6376_v14 = vld [vmem:[#allocation4 + $0x10] sm:$0xff]  ;;  %v5419_v15 = vld [vmem:[%s7977_s7] ss:$0 sm:$0xff] }
 0x69b   :  { %1121 = vmatpush.msra.mxu1 %v6376_v14  ;;  %1363 = vmatpush.msra.mxu3 %v6274_v38 }
 0x69c   :  { %979 = vrot.lane.b32.xlu1 %v886_v16, %s5792_s22 }
 0x69d   :  { %1403 = vmatpush.msrb.mxu1 %v6278_v40  ;;  %1364 = vmatpush.msra.mxu3 %v6282_v41 }
 0x69f   :  { %v930_v23 = vpop.permute.xlu2 %929  ;;  %1404 = vmatpush.msrb.mxu1 %v6286_v43  ;;  %1365 = vmatpush.msra.mxu3 %v6289_v44 }
 0x6a0   :  { %v932_v27 = vmul.f32 %v930_v23, %v908_v58  ;;  %v6327_v58 = vld [vmem:[#allocation4 + $0x80] sm:$0xff] }
 0x6a1   :  { %1096 = vmatpush.msra.mxu0 %v6327_v58  ;;  %1405 = vmatpush.msrb.mxu1 %v6295_v47 }
 0x6a2   :  { %1366 = vmatpush.msra.mxu3 %v6298_v48 }
 0x6a3   :  { %1097 = vmatpush.msra.mxu0 %v6336_v62  ;;  %1406 = vmatpush.msrb.mxu1 %v6304_v50 }
 0x6a4   :  { %1152 = vrot.lane.b32.xlu1 %v5419_v15, %s5789_s19  ;;  %1367 = vmatpush.msra.mxu3 %v6307_v51 }
 0x6a5   :  { %1098 = vmatpush.msra.mxu0 %v6345_v2  ;;  %1407 = vmatpush.msrb.mxu1 %v6313_v53 }
 0x6a6   :  { %1368 = vmatpush.msra.mxu3 %v6316_v54 }
 0x6a7   :  { %1099 = vmatpush.msra.mxu0 %v6354_v60  ;;  %1408 = vmatpush.msrb.mxu1 %v6322_v34 }
 0x6a8   :  { %1369 = vmatpush.msra.mxu3 %v6325_v57 }
 0x6a9   :  { %1100 = vmatpush.msra.mxu0 %v6366_v9  ;;  %1409 = vmatpush.msrb.mxu1 %v6331_v59 }
 0x6aa   :  { %1370 = vmatpush.msra.mxu3 %v6334_v61 }
 0x6ab   :  { %1101 = vmatpush.msra.mxu0 %v6374_v13  ;;  %1410 = vmatpush.msrb.mxu1 %v6340_v0 }
 0x6ac   :  { %1371 = vmatpush.msra.mxu3 %v6343_v1 }
 0x6ad   :  { %1383 = vmatpush.msrb.mxu0 %v6276_v45  ;;  %1411 = vmatpush.msrb.mxu1 %v6349_v4 }
 0x6ae   :  { %1372 = vmatpush.msra.mxu3 %v6352_v5 }
 0x6af   :  { %1384 = vmatpush.msrb.mxu0 %v6284_v42  ;;  %1412 = vmatpush.msrb.mxu1 %v6358_v6 }
 0x6b0   :  { %1373 = vmatpush.msra.mxu3 %v6364_v8 }
 0x6b1   :  { %1385 = vmatpush.msrb.mxu0 %v6291_v46  ;;  %1413 = vmatpush.msrb.mxu1 %v6368_v10 }
 0x6b2   :  { %1374 = vmatpush.msra.mxu3 %v6372_v11 }
 0x6b3   :  { %1386 = vmatpush.msrb.mxu0 %v6300_v49  ;;  %1414 = vmatpush.msrb.mxu1 %v6376_v14 }
 0x6b5   :  { %1387 = vmatpush.msrb.mxu0 %v6309_v52 }
 0x6b7   :  { %1388 = vmatpush.msrb.mxu0 %v6318_v55 }
 0x6b9   :  { %1389 = vmatpush.msrb.mxu0 %v6327_v58 }
 0x6bb   :  { %1390 = vmatpush.msrb.mxu0 %v6336_v62 }
 0x6bd   :  { %1391 = vmatpush.msrb.mxu0 %v6345_v2 }
 0x6bf   :  { %1392 = vmatpush.msrb.mxu0 %v6354_v60 }
 0x6c1   :  { %1393 = vmatpush.msrb.mxu0 %v6366_v9 }
 0x6c3   :  { %1394 = vmatpush.msrb.mxu0 %v6374_v13 }
 0x6da   :  { %v926_v25 = vpop.permute.xlu1 %925 }
 0x6db   :  { %v928_v28 = vmul.f32 %v926_v25, %v923_v24 }
 0x6dd   :  { %v933_v32 = vadd.f32 %v932_v27, %v928_v28 }
 0x6df   :  { %983 = vrot.lane.b32.xlu2 %v933_v32, %s5791_s17 }
 0x6e1   :  { %v975_v36 = vpop.permute.xlu0 %974 }
 0x6e2   :  { %v977_v37 = vmul.f32 %v975_v36, %v956_v35 }
 0x6e4   :  { %987 = vrot.lane.b32.xlu0 %v977_v37, %s5791_s17 }
 0x70e   :  { %v980_v29 = vpop.permute.xlu1 %979 }
 0x716   :  { %v1153_v28 = vpop.permute.xlu1 %1152 }
 0x739   :  { %v984_v16 = vpop.permute.xlu2 %983 }
 0x73a   :  { %v990_v17 = vsel %vm402_vm14, %v980_v29, %v984_v16 }
 0x756   :  { %v988_v18 = vpop.permute.xlu0 %987 }
 0x757   :  { %v6424_v19 = vsel %vm404_vm15, %v990_v17, %v988_v18 }
 0x758   :  { %v1006_v20 = vrot.slane %v6424_v19, 2 }
 0x75a   :  { %5296 = vmatmul.msk.f32.vlgmr.msrb.gmra.mxu2 %vm203_vm2, %v1006_v20  ;;  %5297 = vmatmul.msk.f32.vlgmr.msrb.gmra.mxu3 %vm203_vm2, %v1006_v20 }
 0x75b   :  { %5298 = vmatmul.msk.f32.vlgmr.msra.gmra.mxu0 %vm203_vm2, %v1006_v20  ;;  %5299 = vmatmul.msk.f32.vlgmr.msra.gmra.mxu1 %vm203_vm2, %v1006_v20  ;;  %v1252_v20 = vrot.slane %v6265_v7, 7 }
 0x75c   :  { %1656 = vmatpush.msrb.mxu3 %v6274_v38  ;;  %1676 = vmatpush.msra.mxu0 %v6276_v45 }
 0x75d   :  { %1696 = vmatpush.msra.mxu1 %v6278_v40 }
 0x75e   :  { %1657 = vmatpush.msrb.mxu3 %v6282_v41  ;;  %1677 = vmatpush.msra.mxu0 %v6284_v42 }
 0x75f   :  { %1697 = vmatpush.msra.mxu1 %v6286_v43 }
 0x760   :  { %1658 = vmatpush.msrb.mxu3 %v6289_v44  ;;  %1678 = vmatpush.msra.mxu0 %v6291_v46 }
 0x761   :  { %1698 = vmatpush.msra.mxu1 %v6295_v47 }
 0x762   :  { %1659 = vmatpush.msrb.mxu3 %v6298_v48  ;;  %1679 = vmatpush.msra.mxu0 %v6300_v49 }
 0x763   :  { %1699 = vmatpush.msra.mxu1 %v6304_v50 }
 0x764   :  { %1660 = vmatpush.msrb.mxu3 %v6307_v51  ;;  %1680 = vmatpush.msra.mxu0 %v6309_v52 }
 0x765   :  { %1700 = vmatpush.msra.mxu1 %v6313_v53 }
 0x766   :  { %1661 = vmatpush.msrb.mxu3 %v6316_v54  ;;  %1681 = vmatpush.msra.mxu0 %v6318_v55 }
 0x767   :  { %1701 = vmatpush.msra.mxu1 %v6322_v34 }
 0x768   :  { %1662 = vmatpush.msrb.mxu3 %v6325_v57  ;;  %1682 = vmatpush.msra.mxu0 %v6327_v58 }
 0x769   :  { %1702 = vmatpush.msra.mxu1 %v6331_v59 }
 0x76a   :  { %1663 = vmatpush.msrb.mxu3 %v6334_v61  ;;  %1683 = vmatpush.msra.mxu0 %v6336_v62 }
 0x76b   :  { %1703 = vmatpush.msra.mxu1 %v6340_v0 }
 0x76c   :  { %1664 = vmatpush.msrb.mxu3 %v6343_v1  ;;  %1684 = vmatpush.msra.mxu0 %v6345_v2 }
 0x76d   :  { %1704 = vmatpush.msra.mxu1 %v6349_v4 }
 0x76e   :  { %1665 = vmatpush.msrb.mxu3 %v6352_v5  ;;  %1685 = vmatpush.msra.mxu0 %v6354_v60 }
 0x76f   :  { %1705 = vmatpush.msra.mxu1 %v6358_v6 }
 0x770   :  { %1666 = vmatpush.msrb.mxu3 %v6364_v8  ;;  %1686 = vmatpush.msra.mxu0 %v6366_v9 }
 0x771   :  { %1706 = vmatpush.msra.mxu1 %v6368_v10 }
 0x772   :  { %1667 = vmatpush.msrb.mxu3 %v6372_v11  ;;  %1687 = vmatpush.msra.mxu0 %v6374_v13 }
 0x773   :  { %1707 = vmatpush.msra.mxu1 %v6376_v14  ;;  %v1174_v14 = vrot.slane %v6424_v19, 7 }
 0x7d8   :  { %v1103_v22 = vpop.f32.mrf.mxu0  ;;  %v1123_v23 = vpop.f32.mrf.mxu1 }
 0x7d9   :  { %v1203_v24 = vadd.f32 %v1149_v21, %v1103_v22  ;;  %v1228_v25 = vrot.slane %v1123_v23, 5  ;;  %v1181_v42 = vrot.slane %v1103_v22, 5 }
 0x7db   :  { %v1205_v26 = vrot.slane %v1203_v24, 5  ;;  %v6471_v27 = vadd.f32 %v1228_v25, %v6109_v56  ;;  %v1183_v43 = vadd.f32 %v1181_v42, %v6121_v3 }
 0x7dd   :  { %5500 = vtanh.f32 %v6471_v27  ;;  %1206 = vrot.lane.b32.xlu0 %v1205_v26, %s5789_s19  ;;  %v1026_v31 = vpop.f32.mrf.mxu2  ;;  %v1083_v32 = vpop.f32.mrf.mxu3  ;;  %v5301_v46 = vmul.f32 -1.442695, %v1183_v43  ;;  %v5302_v7 = vmul.f32 -1.442695, %v6471_v27 }
 0x7de   :  { %v1027_v12 = vadd.f32 %v1026_v31, %v1004_v30  ;;  %v1155_v33 = vadd.f32 %v1153_v28, %v1083_v32  ;;  %v1127_v37 = vrot.slane %v1083_v32, 5 }
 0x7e0   :  { %1029 = vst.msk [vmem:[#allocation2 + $0x2] sm:$0x1] %vm442_vm3, %v1027_v12  ;;  %v1157_v35 = vrot.slane %v1155_v33, 5  ;;  %v1129_v38 = vadd.f32 %v1127_v37, %v6118_v63 }
 0x7e2   :  { %1158 = vrot.lane.b32.xlu2 %v1157_v35, %s5789_s19  ;;  %v5300_v45 = vmul.f32 -1.442695, %v1129_v38 }
 0x7e3   :  { %v5501_v36 = vpop.eup %5500 }
 0x7e4   :  { %1256 = vrot.lane.b32.xlu1 %v5501_v36, %s5789_s19  ;;  %5502 = vpow2.f32 %v5300_v45 }
 0x7ea   :  { %v5503_v40 = vpop.eup %5502 }
 0x7eb   :  { %v1133_v41 = vadd.f32 1.0, %v5503_v40 }
 0x7ed   :  { %5504 = vrcp.f32 %v1133_v41  ;;  %v1145_v53 = vand.u32 2147483648, %v1133_v41  ;;  %vm1139_vm9 = vweird.f32 %v1133_v41  ;;  %v1143_v54 = vand.u32 2147483647, %v1133_v41 }
 0x7ee   :  { %5506 = vpow2.f32 %v5301_v46 }
 0x7ef   :  { %v1146_v34 = vor.u32 1.1754944e-38, %v1145_v53  ;;  %vm1144_vm11 = vcmp.eq.f32.partialorder %v1143_v54, 8.507059e+37  ;;  %v1296_v53 = vld [vmem:[%s7978_s8 + $0x58] sm:$0xff]  ;;  %v1295_v54 = vld [vmem:[%s7978_s8 + $0x50] sm:$0xff] }
 0x7f0   :  { %1306 = vmatpush.msra.mxu2 %v1296_v53 }
 0x7f2   :  { %1307 = vmatpush.msra.mxu2 %v1295_v54 }
 0x7f3   :  { %v5505_v44 = vpop.eup %5504 }
 0x7f4   :  { %v1135_v47 = vmul.f32 %v5505_v44, %v1133_v41  ;;  %v5507_v50 = vpop.eup %5506  ;;  %vm1140_vm8 = vweird.f32 %v5505_v44 }
 0x7f5   :  { %v1187_v52 = vadd.f32 1.0, %v5507_v50  ;;  %vm1141_vm10 = vmor %vm1139_vm9, %vm1140_vm8 }
 0x7f6   :  { %v1136_v48 = vsub.f32 1.0, %v1135_v47 }
 0x7f7   :  { %5508 = vrcp.f32 %v1187_v52  ;;  %v1199_v60 = vand.u32 2147483648, %v1187_v52  ;;  %vm1193_vm13 = vweird.f32 %v1187_v52  ;;  %v1197_v6 = vand.u32 2147483647, %v1187_v52 }
 0x7f8   :  { %v1137_v49 = vmul.f32 %v5505_v44, %v1136_v48 }
 0x7f9   :  { %v1200_v9 = vor.u32 1.1754944e-38, %v1199_v60  ;;  %vm1198_vm5 = vcmp.eq.f32.partialorder %v1197_v6, 8.507059e+37 }
 0x7fa   :  { %v1138_v51 = vadd.f32 %v5505_v44, %v1137_v49 }
 0x7fc   :  { %v1142_v55 = vsel %vm1141_vm10, %v5505_v44, %v1138_v51 }
 0x7fd   :  { %v1147_v58 = vsel %vm1144_vm11, %v1146_v34, %v1142_v55  ;;  %v5509_v61 = vpop.eup %5508  ;;  %v1294_v55 = vld [vmem:[%s7978_s8 + $0x48] sm:$0xff]  ;;  %v1293_v34 = vld [vmem:[%s7978_s8 + $0x40] sm:$0xff] }
 0x7fe   :  { %v1189_v62 = vmul.f32 %v5509_v61, %v1187_v52  ;;  %vm1194_vm12 = vweird.f32 %v5509_v61  ;;  %v1168_v26 = vsub.f32 1.0, %v1147_v58  ;;  %1308 = vmatpush.msra.mxu2 %v1294_v55 }
 0x7ff   :  { %vm1195_vm4 = vmor %vm1193_vm13, %vm1194_vm12 }
 0x800   :  { %v1190_v0 = vsub.f32 1.0, %v1189_v62  ;;  %1309 = vmatpush.msra.mxu2 %v1293_v34  ;;  %v1288_v62 = vld [vmem:[%s7978_s8 + $0x18] sm:$0xff] }
 0x802   :  { %v1191_v1 = vmul.f32 %v5509_v61, %v1190_v0  ;;  %v1287_v0 = vld [vmem:[%s7978_s8 + $0x10] sm:$0xff] }
 0x804   :  { %v1192_v4 = vadd.f32 %v5509_v61, %v1191_v1  ;;  %v1286_v1 = vld [vmem:[%s7978_s8 + $0x8] sm:$0xff] }
 0x806   :  { %v1196_v8 = vsel %vm1195_vm4, %v5509_v61, %v1192_v4  ;;  %v1289_v61 = vld [vmem:[%s7978_s8 + $0x20] sm:$0xff] }
 0x807   :  { %v1201_v11 = vsel %vm1198_vm5, %v1200_v9, %v1196_v8  ;;  %v5420_v4 = vld [vmem:[%s7977_s7] ss:$0 sm:$0xff] }
 0x808   :  { %v1254_v19 = vmul.f32 %v1252_v20, %v1201_v11  ;;  %v1216_v40 = vsub.f32 1.0, %v1201_v11  ;;  %v1297_v20 = vld [vmem:[%s7979_s9] sm:$0x1] }
 0x83c   :  { %v1159_v57 = vpop.permute.xlu2 %1158 }
 0x83d   :  { %v1161_v59 = vmul.f32 %v1159_v57, %v1147_v58  ;;  %v1292_v57 = vld [vmem:[%s7978_s8 + $0x38] sm:$0xff] }
 0x83e   :  { %1310 = vmatpush.msra.mxu2 %v1292_v57 }
 0x83f   :  { %1163 = vrot.lane.b32.xlu2 %v1161_v59, %s5789_s19  ;;  %v1290_v59 = vld [vmem:[%s7978_s8 + $0x28] sm:$0xff] }
 0x84f   :  { %v1207_v2 = vpop.permute.xlu0 %1206 }
 0x850   :  { %v1209_v5 = vmul.f32 %v1207_v2, %v1147_v58  ;;  %v1285_v2 = vld [vmem:[%s7978_s8] sm:$0xff] }
 0x852   :  { %1211 = vrot.lane.b32.xlu0 %v1209_v5, %s5789_s19 }
 0x856   :  { %v1257_v10 = vpop.permute.xlu1 %1256 }
 0x857   :  { %v1259_v13 = vmul.f32 %v1257_v10, %v1201_v11 }
 0x859   :  { %1261 = vrot.lane.b32.xlu1 %v1259_v13, %s5791_s17 }
 0x85a   :  { %1175 = vrot.lane.b32.xlu0 %v1174_v14, %s5791_s17 }
 0x899   :  { %v1164_v15 = vpop.permute.xlu2 %1163 }
 0x89a   :  { %v1166_v16 = vadd.f32 %v1164_v15, %v6118_v63 }
 0x89c   :  { %5510 = vtanh.f32 %v1166_v16 }
 0x8a2   :  { %v5511_v29 = vpop.eup %5510 }
 0x8a3   :  { %1170 = vrot.lane.b32.xlu2 %v5511_v29, %s5792_s22 }
 0x8ab   :  { %1222 = vrot.lane.b32.xlu2 %v1174_v14, %s5792_s22 }
 0x8c4   :  { %v1212_v17 = vpop.permute.xlu0 %1211 }
 0x8c5   :  { %v1214_v18 = vadd.f32 %v1212_v17, %v6121_v3 }
 0x8c7   :  { %5512 = vtanh.f32 %v1214_v18 }
 0x8cb   :  { %v1262_v21 = vpop.permute.xlu1 %1261 }
 0x8cc   :  { %v6493_v22 = vadd.f32 %v1262_v21, %v1254_v19  ;;  %v1176_v25 = vpop.permute.xlu0 %1175 }
 0x8cd   :  { %v5513_v23 = vpop.eup %5512  ;;  %v1178_v30 = vmul.f32 %v1176_v25, %v1147_v58  ;;  %v1291_v58 = vld [vmem:[%s7978_s8 + $0x30] sm:$0xff] }
 0x8ce   :  { %5514 = vtanh.f32 %v6493_v22  ;;  %1218 = vrot.lane.b32.xlu1 %v5513_v23, %s5792_s22  ;;  %1311 = vmatpush.msra.mxu2 %v1291_v58 }
 0x8cf   :  { %5516 = vpow2.f32 %v5302_v7 }
 0x8d0   :  { %1312 = vmatpush.msra.mxu2 %v1290_v59 }
 0x8d2   :  { %1313 = vmatpush.msra.mxu2 %v1289_v61 }
 0x8d4   :  { %v5515_v24 = vpop.eup %5514  ;;  %1314 = vmatpush.msra.mxu2 %v1288_v62 }
 0x8d5   :  { %1267 = vrot.lane.b32.xlu0 %v5515_v24, %s5789_s19  ;;  %v5517_v12 = vpop.eup %5516 }
 0x8d6   :  { %v1235_v33 = vadd.f32 1.0, %v5517_v12  ;;  %1315 = vmatpush.msra.mxu2 %v1287_v0 }
 0x8d8   :  { %5518 = vrcp.f32 %v1235_v33  ;;  %v1247_v46 = vand.u32 2147483648, %v1235_v33  ;;  %vm1241_vm7 = vweird.f32 %v1235_v33  ;;  %v1245_v47 = vand.u32 2147483647, %v1235_v33  ;;  %1316 = vmatpush.msra.mxu2 %v1286_v1 }
 0x8da   :  { %v1248_v49 = vor.u32 1.1754944e-38, %v1247_v46  ;;  %vm1246_vm9 = vcmp.eq.f32.partialorder %v1245_v47, 8.507059e+37  ;;  %1317 = vmatpush.msra.mxu2 %v1285_v2 }
 0x8dc   :  { %1599 = vmatpush.msrb.mxu2 %v1296_v53 }
 0x8de   :  { %v5519_v35 = vpop.eup %5518  ;;  %1600 = vmatpush.msrb.mxu2 %v1295_v54 }
 0x8df   :  { %v1237_v36 = vmul.f32 %v5519_v35, %v1235_v33  ;;  %vm1242_vm6 = vweird.f32 %v5519_v35 }
 0x8e0   :  { %vm1243_vm8 = vmor %vm1241_vm7, %vm1242_vm6  ;;  %1601 = vmatpush.msrb.mxu2 %v1294_v55 }
 0x8e1   :  { %v1238_v37 = vsub.f32 1.0, %v1237_v36 }
 0x8e2   :  { %1602 = vmatpush.msrb.mxu2 %v1293_v34 }
 0x8e3   :  { %v1239_v38 = vmul.f32 %v5519_v35, %v1238_v37 }
 0x8e4   :  { %1603 = vmatpush.msrb.mxu2 %v1292_v57 }
 0x8e5   :  { %v1240_v42 = vadd.f32 %v5519_v35, %v1239_v38 }
 0x8e6   :  { %1604 = vmatpush.msrb.mxu2 %v1291_v58 }
 0x8e7   :  { %v1244_v27 = vsel %vm1243_vm8, %v5519_v35, %v1240_v42 }
 0x8e8   :  { %v1249_v50 = vsel %vm1246_vm9, %v1248_v49, %v1244_v27  ;;  %1605 = vmatpush.msrb.mxu2 %v1290_v59 }
 0x8ea   :  { %1606 = vmatpush.msrb.mxu2 %v1289_v61 }
 0x8ec   :  { %1607 = vmatpush.msrb.mxu2 %v1288_v62 }
 0x8ee   :  { %1608 = vmatpush.msrb.mxu2 %v1287_v0 }
 0x8f0   :  { %1609 = vmatpush.msrb.mxu2 %v1286_v1 }
 0x8f2   :  { %1610 = vmatpush.msrb.mxu2 %v1285_v2 }
 0x8fd   :  { %v1171_v28 = vpop.permute.xlu2 %1170 }
 0x8fe   :  { %v1173_v31 = vmul.f32 %v1171_v28, %v1168_v26 }
 0x900   :  { %v1179_v32 = vadd.f32 %v1178_v30, %v1173_v31 }
 0x902   :  { %1272 = vrot.lane.b32.xlu1 %v1179_v32, %s5792_s22 }
 0x905   :  { %v1223_v45 = vpop.permute.xlu2 %1222 }
 0x906   :  { %v1225_v43 = vmul.f32 %v1223_v45, %v1201_v11  ;;  %v1442_v11 = vld [vmem:[%s7977_s7] sm:$0x1] }
 0x90a   :  { %1445 = vrot.lane.b32.xlu1 %v5420_v4, %s5789_s19 }
 0x940   :  { %v1219_v41 = vpop.permute.xlu1 %1218 }
 0x941   :  { %v1221_v44 = vmul.f32 %v1219_v41, %v1216_v40 }
 0x943   :  { %v1226_v48 = vadd.f32 %v1225_v43, %v1221_v44 }
 0x945   :  { %1276 = vrot.lane.b32.xlu2 %v1226_v48, %s5791_s17 }
 0x947   :  { %v1268_v51 = vpop.permute.xlu0 %1267 }
 0x948   :  { %v1270_v52 = vmul.f32 %v1268_v51, %v1249_v50 }
 0x94a   :  { %1280 = vrot.lane.b32.xlu0 %v1270_v52, %s5791_s17 }
 0x974   :  { %v1273_v60 = vpop.permute.xlu1 %1272 }
 0x97c   :  { %v1446_v18 = vpop.permute.xlu1 %1445 }
 0x99f   :  { %v1277_v5 = vpop.permute.xlu2 %1276 }
 0x9a0   :  { %v1283_v6 = vsel %vm402_vm14, %v1273_v60, %v1277_v5 }
 0x9bc   :  { %v1281_v8 = vpop.permute.xlu0 %1280 }
 0x9bd   :  { %v6544_v9 = vsel %vm404_vm15, %v1283_v6, %v1281_v8 }
 0x9be   :  { %v1299_v10 = vrot.slane %v6544_v9, 3 }
 0x9c0   :  { %5303 = vmatmul.msk.f32.vlgmr.msra.gmra.mxu2 %vm203_vm2, %v1299_v10  ;;  %5304 = vmatmul.msk.f32.vlgmr.msra.gmra.mxu3 %vm203_vm2, %v1299_v10 }
 0x9c1   :  { %5305 = vmatmul.msk.f32.vlgmr.msrb.gmra.mxu0 %vm203_vm2, %v1299_v10  ;;  %5306 = vmatmul.msk.f32.vlgmr.msrb.gmra.mxu1 %vm203_vm2, %v1299_v10  ;;  %v1545_v10 = vrot.slane %v6493_v22, 7 }
 0x9c2   :  { %1892 = vmatpush.msra.mxu2 %v1296_v53 }
 0x9c4   :  { %1893 = vmatpush.msra.mxu2 %v1295_v54 }
 0x9c6   :  { %1894 = vmatpush.msra.mxu2 %v1294_v55 }
 0x9c8   :  { %1895 = vmatpush.msra.mxu2 %v1293_v34 }
 0x9ca   :  { %1896 = vmatpush.msra.mxu2 %v1292_v57 }
 0x9cc   :  { %1897 = vmatpush.msra.mxu2 %v1291_v58 }
 0x9ce   :  { %1898 = vmatpush.msra.mxu2 %v1290_v59 }
 0x9d0   :  { %1899 = vmatpush.msra.mxu2 %v1289_v61 }
 0x9d2   :  { %1900 = vmatpush.msra.mxu2 %v1288_v62 }
 0x9d4   :  { %1901 = vmatpush.msra.mxu2 %v1287_v0 }
 0x9d6   :  { %1902 = vmatpush.msra.mxu2 %v1286_v1 }
 0x9d8   :  { %1903 = vmatpush.msra.mxu2 %v1285_v2  ;;  %v1467_v2 = vrot.slane %v6544_v9, 7 }
 0xa3e   :  { %v1396_v13 = vpop.f32.mrf.mxu0  ;;  %v1416_v14 = vpop.f32.mrf.mxu1 }
 0xa3f   :  { %v1496_v15 = vadd.f32 %v1442_v11, %v1396_v13  ;;  %v1521_v16 = vrot.slane %v1416_v14, 4  ;;  %v1474_v12 = vrot.slane %v1396_v13, 4 }
 0xa41   :  { %v1498_v29 = vrot.slane %v1496_v15, 4  ;;  %v6555_v17 = vadd.f32 %v1521_v16, %v6109_v56  ;;  %v1476_v33 = vadd.f32 %v1474_v12, %v6121_v3 }
 0xa43   :  { %5520 = vtanh.f32 %v6555_v17  ;;  %1499 = vrot.lane.b32.xlu0 %v1498_v29, %s5789_s19  ;;  %v1319_v19 = vpop.f32.mrf.mxu2  ;;  %v1376_v21 = vpop.f32.mrf.mxu3  ;;  %v5308_v36 = vmul.f32 -1.442695, %v1476_v33  ;;  %v5309_v22 = vmul.f32 -1.442695, %v6555_v17 }
 0xa44   :  { %v1320_v23 = vadd.f32 %v1319_v19, %v1297_v20  ;;  %v1448_v24 = vadd.f32 %v1446_v18, %v1376_v21  ;;  %v1420_v28 = vrot.slane %v1376_v21, 4 }
 0xa46   :  { %1322 = vst.msk [vmem:[#allocation2 + $0x3] sm:$0x1] %vm442_vm3, %v1320_v23  ;;  %v1450_v25 = vrot.slane %v1448_v24, 4  ;;  %v1422_v30 = vadd.f32 %v1420_v28, %v6118_v63 }
 0xa48   :  { %1451 = vrot.lane.b32.xlu2 %v1450_v25, %s5789_s19  ;;  %v5307_v31 = vmul.f32 -1.442695, %v1422_v30 }
 0xa49   :  { %v5521_v26 = vpop.eup %5520 }
 0xa4a   :  { %1549 = vrot.lane.b32.xlu1 %v5521_v26, %s5789_s19  ;;  %5522 = vpow2.f32 %v5307_v31 }
 0xa50   :  { %v5523_v32 = vpop.eup %5522 }
 0xa51   :  { %v1426_v7 = vadd.f32 1.0, %v5523_v32 }
 0xa53   :  { %5524 = vrcp.f32 %v1426_v7  ;;  %v1438_v43 = vand.u32 2147483648, %v1426_v7  ;;  %vm1432_vm11 = vweird.f32 %v1426_v7  ;;  %v1436_v44 = vand.u32 2147483647, %v1426_v7 }
 0xa54   :  { %5526 = vpow2.f32 %v5308_v36 }
 0xa55   :  { %v1439_v47 = vor.u32 1.1754944e-38, %v1438_v43  ;;  %vm1437_vm13 = vcmp.eq.f32.partialorder %v1436_v44, 8.507059e+37  ;;  %v5421_v43 = vld [vmem:[%s7977_s7] ss:$0 sm:$0xff] }
 0xa59   :  { %v5525_v35 = vpop.eup %5524 }
 0xa5a   :  { %v1428_v37 = vmul.f32 %v5525_v35, %v1426_v7  ;;  %v5527_v40 = vpop.eup %5526  ;;  %vm1433_vm10 = vweird.f32 %v5525_v35 }
 0xa5b   :  { %v1480_v42 = vadd.f32 1.0, %v5527_v40  ;;  %vm1434_vm12 = vmor %vm1432_vm11, %vm1433_vm10 }
 0xa5c   :  { %v1429_v38 = vsub.f32 1.0, %v1428_v37 }
 0xa5d   :  { %5528 = vrcp.f32 %v1480_v42  ;;  %v1492_v57 = vand.u32 2147483648, %v1480_v42  ;;  %vm1486_vm5 = vweird.f32 %v1480_v42  ;;  %v1490_v58 = vand.u32 2147483647, %v1480_v42 }
 0xa5e   :  { %v1430_v45 = vmul.f32 %v5525_v35, %v1429_v38 }
 0xa5f   :  { %v1493_v61 = vor.u32 1.1754944e-38, %v1492_v57  ;;  %vm1491_vm7 = vcmp.eq.f32.partialorder %v1490_v58, 8.507059e+37  ;;  %v1590_v58 = vld [vmem:[%s7979_s9] sm:$0x1] }
 0xa60   :  { %v1431_v41 = vadd.f32 %v5525_v35, %v1430_v45 }
 0xa62   :  { %v1435_v46 = vsel %vm1434_vm12, %v5525_v35, %v1431_v41 }
 0xa63   :  { %v1440_v27 = vsel %vm1437_vm13, %v1439_v47, %v1435_v46  ;;  %v5529_v50 = vpop.eup %5528 }
 0xa64   :  { %v1482_v51 = vmul.f32 %v5529_v50, %v1480_v42  ;;  %vm1487_vm4 = vweird.f32 %v5529_v50  ;;  %v1461_v29 = vsub.f32 1.0, %v1440_v27 }
 0xa65   :  { %vm1488_vm6 = vmor %vm1486_vm5, %vm1487_vm4 }
 0xa66   :  { %v1483_v52 = vsub.f32 1.0, %v1482_v51 }
 0xa68   :  { %v1484_v53 = vmul.f32 %v5529_v50, %v1483_v52 }
 0xa6a   :  { %v1485_v55 = vadd.f32 %v5529_v50, %v1484_v53 }
 0xa6c   :  { %v1489_v59 = vsel %vm1488_vm6, %v5529_v50, %v1485_v55  ;;  %v1735_v50 = vld [vmem:[%s7977_s7] sm:$0x1] }
 0xa6d   :  { %v1494_v0 = vsel %vm1491_vm7, %v1493_v61, %v1489_v59 }
 0xa6e   :  { %v1547_v9 = vmul.f32 %v1545_v10, %v1494_v0  ;;  %v1509_v32 = vsub.f32 1.0, %v1494_v0 }
 0xaa2   :  { %v1452_v48 = vpop.permute.xlu2 %1451 }
 0xaa3   :  { %v1454_v49 = vmul.f32 %v1452_v48, %v1440_v27 }
 0xaa5   :  { %1456 = vrot.lane.b32.xlu2 %v1454_v49, %s5789_s19 }
 0xab5   :  { %v1500_v54 = vpop.permute.xlu0 %1499 }
 0xab6   :  { %v1502_v34 = vmul.f32 %v1500_v54, %v1440_v27 }
 0xab8   :  { %1504 = vrot.lane.b32.xlu0 %v1502_v34, %s5789_s19 }
 0xabc   :  { %v1550_v62 = vpop.permute.xlu1 %1549 }
 0xabd   :  { %v1552_v1 = vmul.f32 %v1550_v62, %v1494_v0 }
 0xabf   :  { %1554 = vrot.lane.b32.xlu1 %v1552_v1, %s5791_s17 }
 0xac0   :  { %1468 = vrot.lane.b32.xlu0 %v1467_v2, %s5791_s17 }
 0xaff   :  { %v1457_v4 = vpop.permute.xlu2 %1456 }
 0xb00   :  { %v1459_v5 = vadd.f32 %v1457_v4, %v6118_v63 }
 0xb02   :  { %5530 = vtanh.f32 %v1459_v5 }
 0xb08   :  { %v5531_v60 = vpop.eup %5530 }
 0xb09   :  { %1463 = vrot.lane.b32.xlu2 %v5531_v60, %s5792_s22 }
 0xb11   :  { %1515 = vrot.lane.b32.xlu2 %v1467_v2, %s5792_s22 }
 0xb2a   :  { %v1505_v6 = vpop.permute.xlu0 %1504 }
 0xb2b   :  { %v1507_v8 = vadd.f32 %v1505_v6, %v6121_v3 }
 0xb2d   :  { %5532 = vtanh.f32 %v1507_v8 }
 0xb31   :  { %v1555_v11 = vpop.permute.xlu1 %1554 }
 0xb32   :  { %v6577_v13 = vadd.f32 %v1555_v11, %v1547_v9  ;;  %v1469_v16 = vpop.permute.xlu0 %1468 }
 0xb33   :  { %v5533_v14 = vpop.eup %5532  ;;  %v1471_v20 = vmul.f32 %v1469_v16, %v1440_v27 }
 0xb34   :  { %5534 = vtanh.f32 %v6577_v13  ;;  %1511 = vrot.lane.b32.xlu1 %v5533_v14, %s5792_s22 }
 0xb35   :  { %5536 = vpow2.f32 %v5309_v22 }
 0xb3a   :  { %v5535_v15 = vpop.eup %5534 }
 0xb3b   :  { %1560 = vrot.lane.b32.xlu0 %v5535_v15, %s5789_s19  ;;  %v5537_v23 = vpop.eup %5536 }
 0xb3c   :  { %v1528_v24 = vadd.f32 1.0, %v5537_v23 }
 0xb3e   :  { %5538 = vrcp.f32 %v1528_v24  ;;  %v1540_v36 = vand.u32 2147483648, %v1528_v24  ;;  %vm1534_vm9 = vweird.f32 %v1528_v24  ;;  %v1538_v37 = vand.u32 2147483647, %v1528_v24 }
 0xb40   :  { %v1541_v45 = vor.u32 1.1754944e-38, %v1540_v36  ;;  %vm1539_vm11 = vcmp.eq.f32.partialorder %v1538_v37, 8.507059e+37 }
 0xb44   :  { %v5539_v25 = vpop.eup %5538 }
 0xb45   :  { %v1530_v26 = vmul.f32 %v5539_v25, %v1528_v24  ;;  %vm1535_vm8 = vweird.f32 %v5539_v25 }
 0xb46   :  { %vm1536_vm10 = vmor %vm1534_vm9, %vm1535_vm8 }
 0xb47   :  { %v1531_v28 = vsub.f32 1.0, %v1530_v26 }
 0xb49   :  { %v1532_v30 = vmul.f32 %v5539_v25, %v1531_v28 }
 0xb4b   :  { %v1533_v12 = vadd.f32 %v5539_v25, %v1532_v30 }
 0xb4d   :  { %v1537_v17 = vsel %vm1536_vm10, %v5539_v25, %v1533_v12 }
 0xb4e   :  { %v1542_v40 = vsel %vm1539_vm11, %v1541_v45, %v1537_v17 }
 0xb63   :  { %v1464_v18 = vpop.permute.xlu2 %1463 }
 0xb64   :  { %v1466_v19 = vmul.f32 %v1464_v18, %v1461_v29 }
 0xb66   :  { %v1472_v21 = vadd.f32 %v1471_v20, %v1466_v19 }
 0xb68   :  { %1565 = vrot.lane.b32.xlu1 %v1472_v21, %s5792_s22 }
 0xb6b   :  { %v1516_v31 = vpop.permute.xlu2 %1515 }
 0xb6c   :  { %v1518_v33 = vmul.f32 %v1516_v31, %v1494_v0 }
 0xb70   :  { %1738 = vrot.lane.b32.xlu1 %v5421_v43, %s5789_s19 }
 0xba6   :  { %v1512_v7 = vpop.permute.xlu1 %1511 }
 0xba7   :  { %v1514_v35 = vmul.f32 %v1512_v7, %v1509_v32 }
 0xba9   :  { %v1519_v38 = vadd.f32 %v1518_v33, %v1514_v35 }
 0xbab   :  { %1569 = vrot.lane.b32.xlu2 %v1519_v38, %s5791_s17 }
 0xbad   :  { %v1561_v41 = vpop.permute.xlu0 %1560 }
 0xbae   :  { %v1563_v42 = vmul.f32 %v1561_v41, %v1542_v40 }
 0xbb0   :  { %1573 = vrot.lane.b32.xlu0 %v1563_v42, %s5791_s17 }
 0xbda   :  { %v1566_v46 = vpop.permute.xlu1 %1565 }
 0xbe2   :  { %v1739_v57 = vpop.permute.xlu1 %1738 }
 0xc05   :  { %v1570_v44 = vpop.permute.xlu2 %1569 }
 0xc06   :  { %v1576_v47 = vsel %vm402_vm14, %v1566_v46, %v1570_v44 }
 0xc22   :  { %v1574_v48 = vpop.permute.xlu0 %1573 }
 0xc23   :  { %v6592_v27 = vsel %vm404_vm15, %v1576_v47, %v1574_v48 }
 0xc24   :  { %v1592_v49 = vrot.slane %v6592_v27, 4  ;;  %v1760_v42 = vrot.slane %v6592_v27, 7 }
 0xc26   :  { %5310 = vmatmul.msk.f32.vlgmr.msrb.gmra.mxu2 %vm203_vm2, %v1592_v49  ;;  %5311 = vmatmul.msk.f32.vlgmr.msrb.gmra.mxu3 %vm203_vm2, %v1592_v49 }
 0xc27   :  { %5312 = vmatmul.msk.f32.vlgmr.msra.gmra.mxu0 %vm203_vm2, %v1592_v49  ;;  %5313 = vmatmul.msk.f32.vlgmr.msra.gmra.mxu1 %vm203_vm2, %v1592_v49  ;;  %v1838_v49 = vrot.slane %v6577_v13, 7 }
 0xca4   :  { %v1689_v51 = vpop.f32.mrf.mxu0  ;;  %v1709_v52 = vpop.f32.mrf.mxu1 }
 0xca5   :  { %v1789_v53 = vadd.f32 %v1735_v50, %v1689_v51  ;;  %v1814_v54 = vrot.slane %v1709_v52, 3  ;;  %v1767_v10 = vrot.slane %v1689_v51, 3 }
 0xca7   :  { %v1791_v55 = vrot.slane %v1789_v53, 3  ;;  %v6603_v34 = vadd.f32 %v1814_v54, %v6109_v56  ;;  %v1769_v9 = vadd.f32 %v1767_v10, %v6121_v3 }
 0xca9   :  { %5540 = vtanh.f32 %v6603_v34  ;;  %1792 = vrot.lane.b32.xlu0 %v1791_v55, %s5789_s19  ;;  %v1612_v59 = vpop.f32.mrf.mxu2  ;;  %v1669_v61 = vpop.f32.mrf.mxu3  ;;  %v5315_v14 = vmul.f32 -1.442695, %v1769_v9  ;;  %v5316_v13 = vmul.f32 -1.442695, %v6603_v34 }
 0xcaa   :  { %v1613_v62 = vadd.f32 %v1612_v59, %v1590_v58  ;;  %v1741_v0 = vadd.f32 %v1739_v57, %v1669_v61  ;;  %v1713_v4 = vrot.slane %v1669_v61, 3 }
 0xcac   :  { %1615 = vst.msk [vmem:[#allocation2 + $0x4] sm:$0x1] %vm442_vm3, %v1613_v62  ;;  %v1743_v1 = vrot.slane %v1741_v0, 3  ;;  %v1715_v5 = vadd.f32 %v1713_v4, %v6118_v63 }
 0xcae   :  { %1744 = vrot.lane.b32.xlu2 %v1743_v1, %s5789_s19  ;;  %v5314_v60 = vmul.f32 -1.442695, %v1715_v5 }
 0xcaf   :  { %v5541_v2 = vpop.eup %5540 }
 0xcb0   :  { %1842 = vrot.lane.b32.xlu1 %v5541_v2, %s5789_s19  ;;  %5542 = vpow2.f32 %v5314_v60 }
 0xcb6   :  { %v5543_v6 = vpop.eup %5542 }
 0xcb7   :  { %v1719_v8 = vadd.f32 1.0, %v5543_v6 }
 0xcb9   :  { %5544 = vrcp.f32 %v1719_v8  ;;  %v1731_v21 = vand.u32 2147483648, %v1719_v8  ;;  %vm1725_vm13 = vweird.f32 %v1719_v8  ;;  %v1729_v22 = vand.u32 2147483647, %v1719_v8 }
 0xcba   :  { %5546 = vpow2.f32 %v5315_v14 }
 0xcbb   :  { %v1732_v24 = vor.u32 1.1754944e-38, %v1731_v21  ;;  %vm1730_vm5 = vcmp.eq.f32.partialorder %v1729_v22, 8.507059e+37  ;;  %v6634_v21 = vld [vmem:[#allocation4 + $0x108] sm:$0xff]  ;;  %v6636_v22 = vld [vmem:[#allocation4 + $0x110] sm:$0xff] }
 0xcbc   :  { %1949 = vmatpush.msra.mxu3 %v6634_v21  ;;  %1969 = vmatpush.msrb.mxu0 %v6636_v22 }
 0xcbf   :  { %v5545_v11 = vpop.eup %5544 }
 0xcc0   :  { %v1721_v15 = vmul.f32 %v5545_v11, %v1719_v8  ;;  %v5547_v18 = vpop.eup %5546  ;;  %vm1726_vm12 = vweird.f32 %v5545_v11 }
 0xcc1   :  { %v1773_v19 = vadd.f32 1.0, %v5547_v18  ;;  %vm1727_vm4 = vmor %vm1725_vm13, %vm1726_vm12 }
 0xcc2   :  { %v1722_v16 = vsub.f32 1.0, %v1721_v15 }
 0xcc3   :  { %5548 = vrcp.f32 %v1773_v19  ;;  %v1785_v36 = vand.u32 2147483648, %v1773_v19  ;;  %vm1779_vm7 = vweird.f32 %v1773_v19  ;;  %v1783_v37 = vand.u32 2147483647, %v1773_v19 }
 0xcc4   :  { %v1723_v29 = vmul.f32 %v5545_v11, %v1722_v16 }
 0xcc5   :  { %v1786_v17 = vor.u32 1.1754944e-38, %v1785_v36  ;;  %vm1784_vm9 = vcmp.eq.f32.partialorder %v1783_v37, 8.507059e+37  ;;  %v6673_v36 = vld [vmem:[#allocation4 + $0xb8] sm:$0xff]  ;;  %v1927_v37 = vld [vmem:[#allocation4 + $0x90] sm:$0xff] }
 0xcc6   :  { %v1724_v20 = vadd.f32 %v5545_v11, %v1723_v29 }
 0xcc8   :  { %v1728_v23 = vsel %vm1727_vm4, %v5545_v11, %v1724_v20 }
 0xcc9   :  { %v1733_v26 = vsel %vm1730_vm5, %v1732_v24, %v1728_v23  ;;  %v5549_v30 = vpop.eup %5548  ;;  %v6638_v23 = vld [vmem:[#allocation4 + $0x118] sm:$0xff]  ;;  %v6642_v24 = vld [vmem:[#allocation4 + $0xf0] sm:$0xff] }
 0xcca   :  { %v1775_v31 = vmul.f32 %v5549_v30, %v1773_v19  ;;  %vm1780_vm6 = vweird.f32 %v5549_v30  ;;  %v1754_v55 = vsub.f32 1.0, %v1733_v26  ;;  %1989 = vmatpush.msrb.mxu1 %v6638_v23  ;;  %1950 = vmatpush.msra.mxu3 %v6642_v24 }
 0xccb   :  { %vm1781_vm8 = vmor %vm1779_vm7, %vm1780_vm6 }
 0xccc   :  { %v1776_v32 = vsub.f32 1.0, %v1775_v31  ;;  %v6655_v31 = vld [vmem:[#allocation4 + $0xe8] sm:$0xff] }
 0xcce   :  { %v1777_v7 = vmul.f32 %v5549_v30, %v1776_v32  ;;  %v6658_v32 = vld [vmem:[#allocation4 + $0xc0] sm:$0xff] }
 0xcd0   :  { %v1778_v33 = vadd.f32 %v5549_v30, %v1777_v7  ;;  %v6660_v7 = vld [vmem:[#allocation4 + $0xc8] sm:$0xff] }
 0xcd2   :  { %v1782_v38 = vsel %vm1781_vm8, %v5549_v30, %v1778_v33  ;;  %v6651_v30 = vld [vmem:[#allocation4 + $0xe0] sm:$0xff]  ;;  %v6667_v33 = vld [vmem:[#allocation4 + $0xa8] sm:$0xff] }
 0xcd3   :  { %v1787_v40 = vsel %vm1784_vm9, %v1786_v17, %v1782_v38  ;;  %v1928_v38 = vld [vmem:[#allocation4 + $0x98] sm:$0xff]  ;;  %v6678_v17 = vld [vmem:[#allocation4 + $0xa0] sm:$0xff] }
 0xcd4   :  { %v1840_v27 = vmul.f32 %v1838_v49, %v1787_v40  ;;  %v1802_v6 = vsub.f32 1.0, %v1787_v40  ;;  %v1915_v49 = vld [vmem:[#allocation4 + $0x30] sm:$0xff] }
 0xd08   :  { %v1745_v25 = vpop.permute.xlu2 %1744 }
 0xd09   :  { %v1747_v28 = vmul.f32 %v1745_v25, %v1733_v26  ;;  %v6644_v25 = vld [vmem:[#allocation4 + $0xf8] sm:$0xff] }
 0xd0a   :  { %1970 = vmatpush.msrb.mxu0 %v6644_v25 }
 0xd0b   :  { %1749 = vrot.lane.b32.xlu2 %v1747_v28, %s5789_s19  ;;  %v6649_v28 = vld [vmem:[#allocation4 + $0xd8] sm:$0xff] }
 0xd0c   :  { %1951 = vmatpush.msra.mxu3 %v6649_v28  ;;  %1971 = vmatpush.msrb.mxu0 %v6651_v30 }
 0xd0e   :  { %1952 = vmatpush.msra.mxu3 %v6658_v32  ;;  %1972 = vmatpush.msrb.mxu0 %v6660_v7 }
 0xd10   :  { %1953 = vmatpush.msra.mxu3 %v6667_v33 }
 0xd12   :  { %1954 = vmatpush.msra.mxu3 %v1927_v37 }
 0xd1b   :  { %v1793_v12 = vpop.permute.xlu0 %1792 }
 0xd1c   :  { %v1795_v35 = vmul.f32 %v1793_v12, %v1733_v26  ;;  %v6664_v12 = vld [vmem:[#allocation4 + $0xd0] sm:$0xff] }
 0xd1e   :  { %1797 = vrot.lane.b32.xlu0 %v1795_v35, %s5789_s19  ;;  %v6669_v35 = vld [vmem:[#allocation4 + $0xb0] sm:$0xff] }
 0xd1f   :  { %1973 = vmatpush.msrb.mxu0 %v6669_v35 }
 0xd21   :  { %1974 = vmatpush.msrb.mxu0 %v1928_v38 }
 0xd22   :  { %v1843_v45 = vpop.permute.xlu1 %1842 }
 0xd23   :  { %v1845_v41 = vmul.f32 %v1843_v45, %v1787_v40  ;;  %v1924_v45 = vld [vmem:[#allocation4 + $0x78] sm:$0xff] }
 0xd24   :  { %1955 = vmatpush.msra.mxu3 %v1924_v45 }
 0xd25   :  { %1847 = vrot.lane.b32.xlu1 %v1845_v41, %s5791_s17  ;;  %v6681_v41 = vld [vmem:[#allocation4 + $0x88] sm:$0xff] }
 0xd26   :  { %1761 = vrot.lane.b32.xlu0 %v1760_v42, %s5791_s17 }
 0xd65   :  { %v1750_v43 = vpop.permute.xlu2 %1749 }
 0xd66   :  { %v1752_v44 = vadd.f32 %v1750_v43, %v6118_v63  ;;  %v6684_v43 = vld [vmem:[#allocation4 + $0x68] sm:$0xff] }
 0xd68   :  { %5550 = vtanh.f32 %v1752_v44  ;;  %v6686_v44 = vld [vmem:[#allocation4 + $0x70] sm:$0xff] }
 0xd6e   :  { %v5551_v46 = vpop.eup %5550 }
 0xd6f   :  { %1756 = vrot.lane.b32.xlu2 %v5551_v46, %s5792_s22  ;;  %v1918_v46 = vld [vmem:[#allocation4 + $0x48] sm:$0xff] }
 0xd77   :  { %1808 = vrot.lane.b32.xlu2 %v1760_v42, %s5792_s22  ;;  %v1921_v42 = vld [vmem:[#allocation4 + $0x60] sm:$0xff] }
 0xd78   :  { %1956 = vmatpush.msra.mxu3 %v1921_v42 }
 0xd7a   :  { %1957 = vmatpush.msra.mxu3 %v1918_v46 }
 0xd7c   :  { %1958 = vmatpush.msra.mxu3 %v1915_v49 }
 0xd90   :  { %v1798_v47 = vpop.permute.xlu0 %1797 }
 0xd91   :  { %v1800_v48 = vadd.f32 %v1798_v47, %v6121_v3  ;;  %v6689_v47 = vld [vmem:[#allocation4 + $0x50] sm:$0xff] }
 0xd93   :  { %5552 = vtanh.f32 %v1800_v48  ;;  %v6692_v48 = vld [vmem:[#allocation4 + $0x58] sm:$0xff] }
 0xd97   :  { %v1848_v50 = vpop.permute.xlu1 %1847 }
 0xd98   :  { %v6625_v51 = vadd.f32 %v1848_v50, %v1840_v27  ;;  %v1762_v54 = vpop.permute.xlu0 %1761  ;;  %v6695_v27 = vld [vmem:[#allocation4 + $0x38] sm:$0xff]  ;;  %v6698_v50 = vld [vmem:[#allocation4 + $0x40] sm:$0xff] }
 0xd99   :  { %v5553_v52 = vpop.eup %5552  ;;  %v1764_v58 = vmul.f32 %v1762_v54, %v1733_v26  ;;  %v6646_v26 = vld [vmem:[#allocation4 + $0x100] sm:$0xff]  ;;  %v6705_v54 = vld [vmem:[#allocation4 + $0x28] sm:$0xff] }
 0xd9a   :  { %5554 = vtanh.f32 %v6625_v51  ;;  %1804 = vrot.lane.b32.xlu1 %v5553_v52, %s5792_s22  ;;  %1990 = vmatpush.msrb.mxu1 %v6646_v26  ;;  %v1912_v52 = vld [vmem:[#allocation4 + $0x18] sm:$0xff] }
 0xd9b   :  { %5556 = vpow2.f32 %v5316_v13  ;;  %1959 = vmatpush.msra.mxu3 %v1912_v52 }
 0xd9c   :  { %1991 = vmatpush.msrb.mxu1 %v6655_v31 }
 0xd9e   :  { %1992 = vmatpush.msrb.mxu1 %v6664_v12 }
 0xda0   :  { %v5555_v53 = vpop.eup %5554  ;;  %1993 = vmatpush.msrb.mxu1 %v6673_v36 }
 0xda1   :  { %1853 = vrot.lane.b32.xlu0 %v5555_v53, %s5789_s19  ;;  %v5557_v62 = vpop.eup %5556  ;;  %v6703_v53 = vld [vmem:[#allocation4 + $0x20] sm:$0xff] }
 0xda2   :  { %v1821_v0 = vadd.f32 1.0, %v5557_v62  ;;  %1994 = vmatpush.msrb.mxu1 %v6678_v17 }
 0xda4   :  { %5558 = vrcp.f32 %v1821_v0  ;;  %v1833_v14 = vand.u32 2147483648, %v1821_v0  ;;  %vm1827_vm11 = vweird.f32 %v1821_v0  ;;  %v1831_v15 = vand.u32 2147483647, %v1821_v0  ;;  %1995 = vmatpush.msrb.mxu1 %v6681_v41 }
 0xda6   :  { %v1834_v29 = vor.u32 1.1754944e-38, %v1833_v14  ;;  %vm1832_vm13 = vcmp.eq.f32.partialorder %v1831_v15, 8.507059e+37  ;;  %1996 = vmatpush.msrb.mxu1 %v6686_v44  ;;  %v1883_v14 = vld [vmem:[%s7979_s9] sm:$0x1] }
 0xda8   :  { %1997 = vmatpush.msrb.mxu1 %v6692_v48 }
 0xdaa   :  { %v5559_v1 = vpop.eup %5558  ;;  %1998 = vmatpush.msrb.mxu1 %v6698_v50 }
 0xdab   :  { %v1823_v2 = vmul.f32 %v5559_v1, %v1821_v0  ;;  %vm1828_vm10 = vweird.f32 %v5559_v1 }
 0xdac   :  { %vm1829_vm12 = vmor %vm1827_vm11, %vm1828_vm10  ;;  %1999 = vmatpush.msrb.mxu1 %v6705_v54 }
 0xdad   :  { %v1824_v4 = vsub.f32 1.0, %v1823_v2 }
 0xdaf   :  { %v1825_v5 = vmul.f32 %v5559_v1, %v1824_v4  ;;  %v2028_v4 = vld [vmem:[%s7977_s7] sm:$0x1] }
 0xdb1   :  { %v1826_v10 = vadd.f32 %v5559_v1, %v1825_v5 }
 0xdb3   :  { %v1830_v34 = vsel %vm1829_vm12, %v5559_v1, %v1826_v10 }
 0xdb4   :  { %v1835_v18 = vsel %vm1832_vm13, %v1834_v29, %v1830_v34 }
 0xdc9   :  { %v1757_v57 = vpop.permute.xlu2 %1756 }
 0xdca   :  { %v1759_v59 = vmul.f32 %v1757_v57, %v1754_v55  ;;  %v1909_v55 = vld [vmem:[#allocation4] sm:$0xff]  ;;  %v6708_v57 = vld [vmem:[#allocation4 + $0x8] sm:$0xff] }
 0xdcb   :  { %1960 = vmatpush.msra.mxu3 %v1909_v55 }
 0xdcc   :  { %v1765_v61 = vadd.f32 %v1764_v58, %v1759_v59  ;;  %v6710_v58 = vld [vmem:[#allocation4 + $0x10] sm:$0xff]  ;;  %v5422_v59 = vld [vmem:[%s7977_s7] ss:$0 sm:$0xff] }
 0xdcd   :  { %2000 = vmatpush.msrb.mxu1 %v6710_v58  ;;  %2242 = vmatpush.msrb.mxu3 %v6634_v21 }
 0xdce   :  { %1858 = vrot.lane.b32.xlu1 %v1765_v61, %s5792_s22 }
 0xdcf   :  { %2282 = vmatpush.msra.mxu1 %v6638_v23  ;;  %2243 = vmatpush.msrb.mxu3 %v6642_v24 }
 0xdd1   :  { %v1809_v60 = vpop.permute.xlu2 %1808  ;;  %2283 = vmatpush.msra.mxu1 %v6646_v26  ;;  %2244 = vmatpush.msrb.mxu3 %v6649_v28 }
 0xdd2   :  { %v1811_v9 = vmul.f32 %v1809_v60, %v1787_v40  ;;  %v1925_v40 = vld [vmem:[#allocation4 + $0x80] sm:$0xff] }
 0xdd3   :  { %1975 = vmatpush.msrb.mxu0 %v1925_v40  ;;  %2284 = vmatpush.msra.mxu1 %v6655_v31 }
 0xdd4   :  { %2245 = vmatpush.msrb.mxu3 %v6658_v32 }
 0xdd5   :  { %1976 = vmatpush.msrb.mxu0 %v6684_v43  ;;  %2285 = vmatpush.msra.mxu1 %v6664_v12 }
 0xdd6   :  { %2031 = vrot.lane.b32.xlu1 %v5422_v59, %s5789_s19  ;;  %2246 = vmatpush.msrb.mxu3 %v6667_v33 }
 0xdd7   :  { %1977 = vmatpush.msrb.mxu0 %v6689_v47  ;;  %2286 = vmatpush.msra.mxu1 %v6673_v36 }
 0xdd8   :  { %2247 = vmatpush.msrb.mxu3 %v1927_v37 }
 0xdd9   :  { %1978 = vmatpush.msrb.mxu0 %v6695_v27  ;;  %2287 = vmatpush.msra.mxu1 %v6678_v17 }
 0xdda   :  { %2248 = vmatpush.msrb.mxu3 %v1924_v45 }
 0xddb   :  { %1979 = vmatpush.msrb.mxu0 %v6703_v53  ;;  %2288 = vmatpush.msra.mxu1 %v6681_v41 }
 0xddc   :  { %2249 = vmatpush.msrb.mxu3 %v1921_v42 }
 0xddd   :  { %1980 = vmatpush.msrb.mxu0 %v6708_v57  ;;  %2289 = vmatpush.msra.mxu1 %v6686_v44 }
 0xdde   :  { %2250 = vmatpush.msrb.mxu3 %v1918_v46 }
 0xddf   :  { %2262 = vmatpush.msra.mxu0 %v6636_v22  ;;  %2290 = vmatpush.msra.mxu1 %v6692_v48 }
 0xde0   :  { %2251 = vmatpush.msrb.mxu3 %v1915_v49 }
 0xde1   :  { %2263 = vmatpush.msra.mxu0 %v6644_v25  ;;  %2291 = vmatpush.msra.mxu1 %v6698_v50 }
 0xde2   :  { %2252 = vmatpush.msrb.mxu3 %v1912_v52 }
 0xde3   :  { %2264 = vmatpush.msra.mxu0 %v6651_v30  ;;  %2292 = vmatpush.msra.mxu1 %v6705_v54 }
 0xde4   :  { %2253 = vmatpush.msrb.mxu3 %v1909_v55 }
 0xde5   :  { %2265 = vmatpush.msra.mxu0 %v6660_v7  ;;  %2293 = vmatpush.msra.mxu1 %v6710_v58 }
 0xde7   :  { %2266 = vmatpush.msra.mxu0 %v6669_v35 }
 0xde9   :  { %2267 = vmatpush.msra.mxu0 %v1928_v38 }
 0xdeb   :  { %2268 = vmatpush.msra.mxu0 %v1925_v40 }
 0xded   :  { %2269 = vmatpush.msra.mxu0 %v6684_v43 }
 0xdef   :  { %2270 = vmatpush.msra.mxu0 %v6689_v47 }
 0xdf1   :  { %2271 = vmatpush.msra.mxu0 %v6695_v27 }
 0xdf3   :  { %2272 = vmatpush.msra.mxu0 %v6703_v53 }
 0xdf5   :  { %2273 = vmatpush.msra.mxu0 %v6708_v57 }
 0xe0c   :  { %v1805_v8 = vpop.permute.xlu1 %1804 }
 0xe0d   :  { %v1807_v11 = vmul.f32 %v1805_v8, %v1802_v6 }
 0xe0f   :  { %v1812_v16 = vadd.f32 %v1811_v9, %v1807_v11 }
 0xe11   :  { %1862 = vrot.lane.b32.xlu2 %v1812_v16, %s5791_s17 }
 0xe13   :  { %v1854_v20 = vpop.permute.xlu0 %1853 }
 0xe14   :  { %v1856_v19 = vmul.f32 %v1854_v20, %v1835_v18 }
 0xe16   :  { %1866 = vrot.lane.b32.xlu0 %v1856_v19, %s5791_s17 }
 0xe40   :  { %v1859_v13 = vpop.permute.xlu1 %1858 }
 0xe48   :  { %v2032_v11 = vpop.permute.xlu1 %2031 }
 0xe6b   :  { %v1863_v61 = vpop.permute.xlu2 %1862 }
 0xe6c   :  { %v1869_v62 = vsel %vm402_vm14, %v1859_v13, %v1863_v61 }
 0xe88   :  { %v1867_v0 = vpop.permute.xlu0 %1866 }
 0xe89   :  { %v6748_v1 = vsel %vm404_vm15, %v1869_v62, %v1867_v0 }
 0xe8a   :  { %v1885_v2 = vrot.slane %v6748_v1, 5 }
 0xe8c   :  { %5317 = vmatmul.msk.f32.vlgmr.msra.gmra.mxu2 %vm203_vm2, %v1885_v2  ;;  %5318 = vmatmul.msk.f32.vlgmr.msra.gmra.mxu3 %vm203_vm2, %v1885_v2 }
 0xe8d   :  { %5319 = vmatmul.msk.f32.vlgmr.msrb.gmra.mxu0 %vm203_vm2, %v1885_v2  ;;  %5320 = vmatmul.msk.f32.vlgmr.msrb.gmra.mxu1 %vm203_vm2, %v1885_v2 }
 0xf0a   :  { %v1982_v5 = vpop.f32.mrf.mxu0  ;;  %v2002_v60 = vpop.f32.mrf.mxu1 }
 0xf0b   :  { %v2082_v6 = vadd.f32 %v2028_v4, %v1982_v5  ;;  %v2107_v8 = vrot.slane %v2002_v60, 2  ;;  %v2060_v28 = vrot.slane %v1982_v5, 2 }
 0xf0d   :  { %v2084_v10 = vrot.slane %v2082_v6, 2  ;;  %v6759_v9 = vadd.f32 %v2107_v8, %v6109_v56  ;;  %v2062_v30 = vadd.f32 %v2060_v28, %v6121_v3 }
 0xf0f   :  { %5560 = vtanh.f32 %v6759_v9  ;;  %2085 = vrot.lane.b32.xlu0 %v2084_v10, %s5789_s19  ;;  %v1905_v15 = vpop.f32.mrf.mxu2  ;;  %v1962_v16 = vpop.f32.mrf.mxu3  ;;  %v5322_v7 = vmul.f32 -1.442695, %v2062_v30 }
 0xf10   :  { %v1906_v34 = vadd.f32 %v1905_v15, %v1883_v14  ;;  %v2034_v29 = vadd.f32 %v2032_v11, %v1962_v16  ;;  %v2006_v19 = vrot.slane %v1962_v16, 2 }
 0xf12   :  { %1908 = vst.msk [vmem:[#allocation2 + $0x5] sm:$0x1] %vm442_vm3, %v1906_v34  ;;  %v2036_v18 = vrot.slane %v2034_v29, 2  ;;  %v2008_v21 = vadd.f32 %v2006_v19, %v6118_v63  ;;  %v2053_v34 = vrot.slane %v6748_v1, 7 }
 0xf14   :  { %2037 = vrot.lane.b32.xlu2 %v2036_v18, %s5789_s19  ;;  %v5321_v22 = vmul.f32 -1.442695, %v2008_v21 }
 0xf15   :  { %v5561_v20 = vpop.eup %5560 }
 0xf16   :  { %2135 = vrot.lane.b32.xlu1 %v5561_v20, %s5789_s19  ;;  %5562 = vpow2.f32 %v5321_v22  ;;  %v2131_v22 = vrot.slane %v6625_v51, 7  ;;  %v5323_v51 = vmul.f32 -1.442695, %v6759_v9 }
 0xf1c   :  { %v5563_v24 = vpop.eup %5562 }
 0xf1d   :  { %v2012_v25 = vadd.f32 1.0, %v5563_v24 }
 0xf1f   :  { %5564 = vrcp.f32 %v2012_v25  ;;  %v2024_v42 = vand.u32 2147483648, %v2012_v25  ;;  %vm2018_vm5 = vweird.f32 %v2012_v25  ;;  %v2022_v46 = vand.u32 2147483647, %v2012_v25 }
 0xf20   :  { %5566 = vpow2.f32 %v5322_v7 }
 0xf21   :  { %v2025_v52 = vor.u32 1.1754944e-38, %v2024_v42  ;;  %vm2023_vm7 = vcmp.eq.f32.partialorder %v2022_v46, 8.507059e+37 }
 0xf25   :  { %v5565_v32 = vpop.eup %5564 }
 0xf26   :  { %v2014_v33 = vmul.f32 %v5565_v32, %v2012_v25  ;;  %v5567_v38 = vpop.eup %5566  ;;  %vm2019_vm4 = vweird.f32 %v5565_v32 }
 0xf27   :  { %v2066_v40 = vadd.f32 1.0, %v5567_v38  ;;  %vm2020_vm6 = vmor %vm2018_vm5, %vm2019_vm4 }
 0xf28   :  { %v2015_v35 = vsub.f32 1.0, %v2014_v33 }
 0xf29   :  { %5568 = vrcp.f32 %v2066_v40  ;;  %v2078_v6 = vand.u32 2147483648, %v2066_v40  ;;  %vm2072_vm9 = vweird.f32 %v2066_v40  ;;  %v2076_v8 = vand.u32 2147483647, %v2066_v40 }
 0xf2a   :  { %v2016_v37 = vmul.f32 %v5565_v32, %v2015_v35 }
 0xf2b   :  { %v2079_v11 = vor.u32 1.1754944e-38, %v2078_v6  ;;  %vm2077_vm11 = vcmp.eq.f32.partialorder %v2076_v8, 8.507059e+37 }
 0xf2c   :  { %v2017_v45 = vadd.f32 %v5565_v32, %v2016_v37 }
 0xf2e   :  { %v2021_v49 = vsel %vm2020_vm6, %v5565_v32, %v2017_v45  ;;  %vm2497_vm6 = vcmask 64512  }
 0xf2f   :  { %v2026_v59 = vsel %vm2023_vm7, %v2025_v52, %v2021_v49  ;;  %v5569_v13 = vpop.eup %5568 }
 0xf30   :  { %v2068_v62 = vmul.f32 %v5569_v13, %v2066_v40  ;;  %vm2073_vm8 = vweird.f32 %v5569_v13  ;;  %v2047_v7 = vsub.f32 1.0, %v2026_v59 }
 0xf31   :  { %vm2074_vm10 = vmor %vm2072_vm9, %vm2073_vm8 }
 0xf32   :  { %v2069_v0 = vsub.f32 1.0, %v2068_v62 }
 0xf34   :  { %v2070_v2 = vmul.f32 %v5569_v13, %v2069_v0 }
 0xf36   :  { %v2071_v5 = vadd.f32 %v5569_v13, %v2070_v2 }
 0xf38   :  { %v2075_v10 = vsel %vm2074_vm10, %v5569_v13, %v2071_v5 }
 0xf39   :  { %v2080_v15 = vsel %vm2077_vm11, %v2079_v11, %v2075_v10  ;;  %v2175_v11 = vld [vmem:[%s7978_s8 + $0x58] sm:$0xff] }
 0xf3a   :  { %v2133_v1 = vmul.f32 %v2131_v22, %v2080_v15  ;;  %2185 = vmatpush.msrb.mxu2 %v2175_v11  ;;  %v6823_v22 = vld [vmem:[%s7978_s8 + $0x8] sm:$0xff] }
 0xf6e   :  { %v2038_v55 = vpop.permute.xlu2 %2037 }
 0xf6f   :  { %v2040_v61 = vmul.f32 %v2038_v55, %v2026_v59 }
 0xf71   :  { %2042 = vrot.lane.b32.xlu2 %v2040_v61, %s5789_s19  ;;  %v2095_v61 = vsub.f32 1.0, %v2080_v15 }
 0xf81   :  { %v2086_v4 = vpop.permute.xlu0 %2085 }
 0xf82   :  { %v2088_v60 = vmul.f32 %v2086_v4, %v2026_v59 }
 0xf84   :  { %2090 = vrot.lane.b32.xlu0 %v2088_v60, %s5789_s19 }
 0xf88   :  { %v2136_v14 = vpop.permute.xlu1 %2135 }
 0xf89   :  { %v2138_v16 = vmul.f32 %v2136_v14, %v2080_v15  ;;  %v2174_v14 = vld [vmem:[%s7978_s8 + $0x50] sm:$0xff] }
 0xf8a   :  { %2186 = vmatpush.msrb.mxu2 %v2174_v14 }
 0xf8b   :  { %2140 = vrot.lane.b32.xlu1 %v2138_v16, %s5791_s17  ;;  %v2172_v16 = vld [vmem:[%s7978_s8 + $0x40] sm:$0xff] }
 0xf8c   :  { %2054 = vrot.lane.b32.xlu0 %v2053_v34, %s5791_s17 }
 0xfcb   :  { %v2043_v29 = vpop.permute.xlu2 %2042 }
 0xfcc   :  { %v2045_v18 = vadd.f32 %v2043_v29, %v6118_v63  ;;  %v2170_v29 = vld [vmem:[%s7978_s8 + $0x30] sm:$0xff] }
 0xfce   :  { %5570 = vtanh.f32 %v2045_v18  ;;  %v2169_v18 = vld [vmem:[%s7978_s8 + $0x28] sm:$0xff] }
 0xfd4   :  { %v5571_v20 = vpop.eup %5570 }
 0xfd5   :  { %2049 = vrot.lane.b32.xlu2 %v5571_v20, %s5792_s22  ;;  %v2168_v20 = vld [vmem:[%s7978_s8 + $0x20] sm:$0xff] }
 0xfdd   :  { %2101 = vrot.lane.b32.xlu2 %v2053_v34, %s5792_s22  ;;  %v2171_v34 = vld [vmem:[%s7978_s8 + $0x38] sm:$0xff] }
 0xff6   :  { %v2091_v19 = vpop.permute.xlu0 %2090 }
 0xff7   :  { %v2093_v21 = vadd.f32 %v2091_v19, %v6121_v3  ;;  %v2167_v19 = vld [vmem:[%s7978_s8 + $0x18] sm:$0xff] }
 0xff9   :  { %5572 = vtanh.f32 %v2093_v21  ;;  %v2166_v21 = vld [vmem:[%s7978_s8 + $0x10] sm:$0xff] }
 0xffd   :  { %v2141_v24 = vpop.permute.xlu1 %2140 }
 0xffe   :  { %v6781_v25 = vadd.f32 %v2141_v24, %v2133_v1  ;;  %v2055_v32 = vpop.permute.xlu0 %2054  ;;  %v2164_v1 = vld [vmem:[%s7978_s8] sm:$0xff] }
 0xfff   :  { %v5573_v28 = vpop.eup %5572  ;;  %v2057_v35 = vmul.f32 %v2055_v32, %v2026_v59  ;;  %v5423_v24 = vld [vmem:[%s7977_s7] ss:$0 sm:$0xff] }
0x1000   :  { %5574 = vtanh.f32 %v6781_v25  ;;  %2097 = vrot.lane.b32.xlu1 %v5573_v28, %s5792_s22 }
0x1001   :  { %5576 = vpow2.f32 %v5323_v51  ;;  %v2321_v51 = vld [vmem:[%s7977_s7] sm:$0x1] }
0x1006   :  { %v5575_v30 = vpop.eup %5574 }
0x1007   :  { %2146 = vrot.lane.b32.xlu0 %v5575_v30, %s5789_s19  ;;  %v5577_v45 = vpop.eup %5576 }
0x1008   :  { %v2114_v40 = vadd.f32 1.0, %v5577_v45 }
0x100a   :  { %5578 = vrcp.f32 %v2114_v40  ;;  %v2126_v2 = vand.u32 2147483648, %v2114_v40  ;;  %vm2120_vm13 = vweird.f32 %v2114_v40  ;;  %v2124_v4 = vand.u32 2147483647, %v2114_v40 }
0x100c   :  { %v2127_v60 = vor.u32 1.1754944e-38, %v2126_v2  ;;  %vm2125_vm5 = vcmp.eq.f32.partialorder %v2124_v4, 8.507059e+37 }
0x1010   :  { %v5579_v42 = vpop.eup %5578 }
0x1011   :  { %v2116_v46 = vmul.f32 %v5579_v42, %v2114_v40  ;;  %vm2121_vm12 = vweird.f32 %v5579_v42 }
0x1012   :  { %vm2122_vm4 = vmor %vm2120_vm13, %vm2121_vm12 }
0x1013   :  { %v2117_v49 = vsub.f32 1.0, %v2116_v46 }
0x1015   :  { %v2118_v52 = vmul.f32 %v5579_v42, %v2117_v49 }
0x1017   :  { %v2119_v62 = vadd.f32 %v5579_v42, %v2118_v52 }
0x1019   :  { %v2123_v9 = vsel %vm2122_vm4, %v5579_v42, %v2119_v62 }
0x101a   :  { %v2128_v6 = vsel %vm2125_vm5, %v2127_v60, %v2123_v9  ;;  %vm2530_vm5 = vcmask 1043456  }
0x102f   :  { %v2050_v33 = vpop.permute.xlu2 %2049 }
0x1030   :  { %v2052_v37 = vmul.f32 %v2050_v33, %v2047_v7 }
0x1032   :  { %v2058_v38 = vadd.f32 %v2057_v35, %v2052_v37  ;;  %v2495_v37 = vld [vmem:[%s7996_s5] sm:$0xff] }
0x1033   :  { %2516 = vmatpush.msra.mxu3 %v2495_v37 }
0x1034   :  { %2151 = vrot.lane.b32.xlu1 %v2058_v38, %s5792_s22  ;;  %v2496_v38 = vld [vmem:[%s7997_s24] sm:$0xff] }
0x1037   :  { %v2102_v55 = vpop.permute.xlu2 %2101 }
0x1038   :  { %v2104_v59 = vmul.f32 %v2102_v55, %v2080_v15  ;;  %v2173_v15 = vld [vmem:[%s7978_s8 + $0x48] sm:$0xff] }
0x1039   :  { %2187 = vmatpush.msrb.mxu2 %v2173_v15 }
0x103b   :  { %2188 = vmatpush.msrb.mxu2 %v2172_v16 }
0x103c   :  { %2324 = vrot.lane.b32.xlu1 %v5423_v24, %s5789_s19 }
0x103d   :  { %2189 = vmatpush.msrb.mxu2 %v2171_v34 }
0x103f   :  { %2190 = vmatpush.msrb.mxu2 %v2170_v29 }
0x1041   :  { %2191 = vmatpush.msrb.mxu2 %v2169_v18 }
0x1043   :  { %2192 = vmatpush.msrb.mxu2 %v2168_v20 }
0x1045   :  { %2193 = vmatpush.msrb.mxu2 %v2167_v19 }
0x1047   :  { %2194 = vmatpush.msrb.mxu2 %v2166_v21 }
0x1049   :  { %2195 = vmatpush.msrb.mxu2 %v6823_v22 }
0x104b   :  { %2196 = vmatpush.msrb.mxu2 %v2164_v1 }
0x104d   :  { %2478 = vmatpush.msra.mxu2 %v2175_v11 }
0x104f   :  { %2479 = vmatpush.msra.mxu2 %v2174_v14 }
0x1051   :  { %2480 = vmatpush.msra.mxu2 %v2173_v15 }
0x1053   :  { %2481 = vmatpush.msra.mxu2 %v2172_v16 }
0x1055   :  { %2482 = vmatpush.msra.mxu2 %v2171_v34 }
0x1057   :  { %2483 = vmatpush.msra.mxu2 %v2170_v29 }
0x1059   :  { %2484 = vmatpush.msra.mxu2 %v2169_v18 }
0x105b   :  { %2485 = vmatpush.msra.mxu2 %v2168_v20 }
0x105d   :  { %2486 = vmatpush.msra.mxu2 %v2167_v19 }
0x105f   :  { %2487 = vmatpush.msra.mxu2 %v2166_v21 }
0x1061   :  { %2488 = vmatpush.msra.mxu2 %v6823_v22 }
0x1063   :  { %2489 = vmatpush.msra.mxu2 %v2164_v1 }
0x1072   :  { %v2098_v13 = vpop.permute.xlu1 %2097 }
0x1073   :  { %v2100_v0 = vmul.f32 %v2098_v13, %v2095_v61  ;;  %v2176_v61 = vld [vmem:[%s7979_s9] sm:$0x1] }
0x1075   :  { %v2105_v5 = vadd.f32 %v2104_v59, %v2100_v0 }
0x1077   :  { %2155 = vrot.lane.b32.xlu2 %v2105_v5, %s5791_s17 }
0x1079   :  { %v2147_v8 = vpop.permute.xlu0 %2146 }
0x107a   :  { %v2149_v10 = vmul.f32 %v2147_v8, %v2128_v6 }
0x107c   :  { %2159 = vrot.lane.b32.xlu0 %v2149_v10, %s5791_s17 }
0x10a6   :  { %v2152_v30 = vpop.permute.xlu1 %2151 }
0x10ae   :  { %v2325_v55 = vpop.permute.xlu1 %2324 }
0x10d1   :  { %v2156_v28 = vpop.permute.xlu2 %2155 }
0x10d2   :  { %v2162_v32 = vsel %vm402_vm14, %v2152_v30, %v2156_v28 }
0x10ee   :  { %v2160_v7 = vpop.permute.xlu0 %2159 }
0x10ef   :  { %v6836_v33 = vsel %vm404_vm15, %v2162_v32, %v2160_v7 }
0x10f0   :  { %v2178_v35 = vrot.slane %v6836_v33, 6 }
0x10f2   :  { %5324 = vmatmul.msk.f32.vlgmr.msrb.gmra.mxu2 %vm203_vm2, %v2178_v35  ;;  %5325 = vmatmul.msk.f32.vlgmr.msrb.gmra.mxu3 %vm203_vm2, %v2178_v35 }
0x10f3   :  { %5326 = vmatmul.msk.f32.vlgmr.msra.gmra.mxu0 %vm203_vm2, %v2178_v35  ;;  %5327 = vmatmul.msk.f32.vlgmr.msra.gmra.mxu1 %vm203_vm2, %v2178_v35 }
0x10fa   :  { %5332 = vmatmul.msk.f32.vlgmr.msra.gmra.mxu3 %vm2497_vm6, %v2496_v38 }
0x1170   :  { %v2275_v45 = vpop.f32.mrf.mxu0  ;;  %v2295_v40 = vpop.f32.mrf.mxu1 }
0x1171   :  { %v2375_v42 = vadd.f32 %v2321_v51, %v2275_v45  ;;  %v2400_v46 = vrot.slane %v2295_v40, 1  ;;  %v2353_v8 = vrot.slane %v2275_v45, 1 }
0x1173   :  { %v2377_v49 = vrot.slane %v2375_v42, 1  ;;  %v6854_v52 = vadd.f32 %v2400_v46, %v6109_v56  ;;  %v2355_v10 = vadd.f32 %v2353_v8, %v6121_v3 }
0x1175   :  { %5580 = vtanh.f32 %v6854_v52  ;;  %2378 = vrot.lane.b32.xlu0 %v2377_v49, %s5789_s19  ;;  %v2198_v13 = vpop.f32.mrf.mxu2  ;;  %v2255_v62 = vpop.f32.mrf.mxu3  ;;  %v5329_v14 = vmul.f32 -1.442695, %v2355_v10 }
0x1176   :  { %v2199_v59 = vadd.f32 %v2198_v13, %v2176_v61  ;;  %v2327_v0 = vadd.f32 %v2325_v55, %v2255_v62  ;;  %v2299_v4 = vrot.slane %v2255_v62, 1 }
0x1178   :  { %2201 = vst.msk [vmem:[#allocation2 + $0x6] sm:$0x1] %vm442_vm3, %v2199_v59  ;;  %v2329_v2 = vrot.slane %v2327_v0, 1  ;;  %v2301_v5 = vadd.f32 %v2299_v4, %v6118_v63  ;;  %v2346_v59 = vrot.slane %v6836_v33, 7 }
0x117a   :  { %2330 = vrot.lane.b32.xlu2 %v2329_v2, %s5789_s19  ;;  %v5328_v9 = vmul.f32 -1.442695, %v2301_v5  ;;  %v2521_v2 = vld [vmem:[%s7980_s10] sm:$0xf] }
0x117b   :  { %v5581_v56 = vpop.eup %5580  ;;  %5333 = vmatpush.msk.msrb.mxu0 %vm2530_vm5, %v2521_v2  ;;  %v2579_v2 = vld [vmem:[%s7982_s12] sm:$0xff] }
0x117c   :  { %2428 = vrot.lane.b32.xlu1 %v5581_v56, %s5789_s19  ;;  %5582 = vpow2.f32 %v5328_v9 }
0x117d   :  { %v2518_v0 = vpop.f32.mrf.mxu3 }
0x1182   :  { %v5583_v60 = vpop.eup %5582 }
0x1183   :  { %v2305_v6 = vadd.f32 1.0, %v5583_v60  ;;  %v2424_v60 = vrot.slane %v6781_v25, 7 }
0x1185   :  { %5584 = vrcp.f32 %v2305_v6  ;;  %v2317_v19 = vand.u32 2147483648, %v2305_v6  ;;  %vm2311_vm8 = vweird.f32 %v2305_v6  ;;  %v2315_v21 = vand.u32 2147483647, %v2305_v6 }
0x1186   :  { %5586 = vpow2.f32 %v5329_v14 }
0x1187   :  { %v2318_v24 = vor.u32 1.1754944e-38, %v2317_v19  ;;  %vm2316_vm10 = vcmp.eq.f32.partialorder %v2315_v21, 8.507059e+37  ;;  %v5330_v21 = vmul.f32 -1.442695, %v6854_v52 }
0x118b   :  { %v5585_v11 = vpop.eup %5584 }
0x118c   :  { %v2307_v15 = vmul.f32 %v5585_v11, %v2305_v6  ;;  %v5587_v29 = vpop.eup %5586  ;;  %vm2312_vm7 = vweird.f32 %v5585_v11 }
0x118d   :  { %v2359_v20 = vadd.f32 1.0, %v5587_v29  ;;  %vm2313_vm9 = vmor %vm2311_vm8, %vm2312_vm7  ;;  %vm2526_vm7 = vcmask 31744  }
0x118e   :  { %v2308_v16 = vsub.f32 1.0, %v2307_v15  ;;  %5334 = vmatmul.msk.f32.vlgmr.msrb.gmra.mxu0 %vm2526_vm7, %v2518_v0 }
0x118f   :  { %5588 = vrcp.f32 %v2359_v20  ;;  %v2371_v42 = vand.u32 2147483648, %v2359_v20  ;;  %vm2365_vm12 = vweird.f32 %v2359_v20  ;;  %v2369_v46 = vand.u32 2147483647, %v2359_v20 }
0x1190   :  { %v2309_v34 = vmul.f32 %v5585_v11, %v2308_v16 }
0x1191   :  { %v2372_v55 = vor.u32 1.1754944e-38, %v2371_v42  ;;  %vm2370_vm4 = vcmp.eq.f32.partialorder %v2369_v46, 8.507059e+37 }
0x1192   :  { %v2310_v18 = vadd.f32 %v5585_v11, %v2309_v34 }
0x1194   :  { %v2314_v1 = vsel %vm2313_vm9, %v5585_v11, %v2310_v18 }
0x1195   :  { %v2319_v30 = vsel %vm2316_vm10, %v2318_v24, %v2314_v1  ;;  %v5589_v7 = vpop.eup %5588 }
0x1196   :  { %v2361_v35 = vmul.f32 %v5589_v7, %v2359_v20  ;;  %vm2366_vm11 = vweird.f32 %v5589_v7  ;;  %v2340_v15 = vsub.f32 1.0, %v2319_v30 }
0x1197   :  { %vm2367_vm13 = vmor %vm2365_vm12, %vm2366_vm11  ;;  %vm2585_vm12 = vcmask 130048  }
0x1198   :  { %v2362_v37 = vsub.f32 1.0, %v2361_v35 }
0x119a   :  { %v2363_v38 = vmul.f32 %v5589_v7, %v2362_v37 }
0x119c   :  { %v2364_v45 = vadd.f32 %v5589_v7, %v2363_v38 }
0x119e   :  { %v2368_v49 = vsel %vm2367_vm13, %v5589_v7, %v2364_v45 }
0x119f   :  { %v2373_v13 = vsel %vm2370_vm4, %v2372_v55, %v2368_v49 }
0x11a0   :  { %v2426_v6 = vmul.f32 %v2424_v60, %v2373_v13  ;;  %v2388_v38 = vsub.f32 1.0, %v2373_v13 }
0x11d4   :  { %v2331_v28 = vpop.permute.xlu2 %2330 }
0x11d5   :  { %v2333_v32 = vmul.f32 %v2331_v28, %v2319_v30  ;;  %v2555_v28 = vld [vmem:[%s7973_s3] sm:$0xff] }
0x11d7   :  { %2335 = vrot.lane.b32.xlu2 %v2333_v32, %s5789_s19 }
0x11e7   :  { %v2379_v51 = vpop.permute.xlu0 %2378 }
0x11e8   :  { %v2381_v40 = vmul.f32 %v2379_v51, %v2319_v30 }
0x11ea   :  { %2383 = vrot.lane.b32.xlu0 %v2381_v40, %s5789_s19 }
0x11ee   :  { %v2429_v61 = vpop.permute.xlu1 %2428 }
0x11ef   :  { %v2431_v62 = vmul.f32 %v2429_v61, %v2373_v13 }
0x11f1   :  { %2433 = vrot.lane.b32.xlu1 %v2431_v62, %s5791_s17 }
0x11f2   :  { %2347 = vrot.lane.b32.xlu0 %v2346_v59, %s5791_s17 }
0x120b   :  { %v2551_v25 = vpop.f32.mrf.mxu0 }
0x1231   :  { %v2336_v56 = vpop.permute.xlu2 %2335 }
0x1232   :  { %v2338_v4 = vadd.f32 %v2336_v56, %v6118_v63 }
0x1234   :  { %5590 = vtanh.f32 %v2338_v4 }
0x123a   :  { %v5591_v33 = vpop.eup %5590 }
0x123b   :  { %2342 = vrot.lane.b32.xlu2 %v5591_v33, %s5792_s22 }
0x1243   :  { %2394 = vrot.lane.b32.xlu2 %v2346_v59, %s5792_s22 }
0x125c   :  { %v2384_v5 = vpop.permute.xlu0 %2383 }
0x125d   :  { %v2386_v9 = vadd.f32 %v2384_v5, %v6121_v3  ;;  %v5424_v3 = vld [vmem:[%s7981_s11] ss:$0 sm:$0xff] }
0x125e   :  { %v2552_v20 = vadd.f32 %v5424_v3, %v2551_v25  ;;  %v6966_v3 = vld [vmem:[#allocation4 + $0xf0] sm:$0xff]  ;;  %v6970_v25 = vld [vmem:[#allocation4 + $0x80] sm:$0xff] }
0x125f   :  { %5592 = vtanh.f32 %v2386_v9 }
0x1260   :  { %v2554_v19 = vmax.f32 %v2552_v20, 0.0  ;;  %v6972_v20 = vld [vmem:[#allocation4 + $0xd8] sm:$0xff] }
0x1262   :  { %2574 = vmatpush.msrb.mxu1 %v2554_v19  ;;  %v6976_v19 = vld [vmem:[#allocation4 + $0xc0] sm:$0xff] }
0x1263   :  { %v2434_v8 = vpop.permute.xlu1 %2433  ;;  %5335 = vmatmul.msk.f32.vlgmr.msrb.gmra.mxu1 %vm2497_vm6, %v2555_v28 }
0x1264   :  { %v2436_v10 = vadd.f32 %v2434_v8, %v2426_v6  ;;  %v2348_v14 = vpop.permute.xlu0 %2347  ;;  %v2696_v8 = vld.sshfl [vmem:[#allocation1 + $0x8] sm:$0xff pattern:$0x75316420] }
0x1265   :  { %v5593_v11 = vpop.eup %5592  ;;  %v2350_v34 = vmul.f32 %v2348_v14, %v2319_v30  ;;  %v2646_v14 = vld [vmem:[%s7986_s16 + $0x8] sm:$0xff] }
0x1266   :  { %5594 = vtanh.f32 %v2436_v10  ;;  %2390 = vrot.lane.b32.xlu1 %v5593_v11, %s5792_s22  ;;  %v2648_v10 = vld [vmem:[%s7986_s16 + $0x18] sm:$0xff] }
0x1267   :  { %5596 = vpow2.f32 %v5330_v21  ;;  %v6943_v11 = vld [vmem:[#allocation4 + $0xe0] sm:$0xff]  ;;  %2668 = vmatpush.msra.mxu0 %v2648_v10  ;;  %v5428_v10 = vld [vmem:[#allocation3] ss:$0 sm:$0xff] }
0x126c   :  { %v5595_v63 = vpop.eup %5594 }
0x126d   :  { %2439 = vrot.lane.b32.xlu0 %v5595_v63, %s5789_s19  ;;  %v5597_v1 = vpop.eup %5596  ;;  %v2647_v63 = vld [vmem:[%s7986_s16 + $0x10] sm:$0xff] }
0x126e   :  { %v2407_v24 = vadd.f32 1.0, %v5597_v1  ;;  %2669 = vmatpush.msra.mxu0 %v2647_v63  ;;  %v6980_v1 = vld [vmem:[#allocation4 + $0xa8] sm:$0xff] }
0x1270   :  { %5598 = vrcp.f32 %v2407_v24  ;;  %v2419_v42 = vand.u32 2147483648, %v2407_v24  ;;  %vm2413_vm9 = vweird.f32 %v2407_v24  ;;  %v2417_v46 = vand.u32 2147483647, %v2407_v24  ;;  %2670 = vmatpush.msra.mxu0 %v2646_v14 }
0x1272   :  { %v2420_v61 = vor.u32 1.1754944e-38, %v2419_v42  ;;  %vm2418_vm11 = vcmp.eq.f32.partialorder %v2417_v46, 8.507059e+37  ;;  %v2883_v42 = vld [vmem:[%s7977_s7] sm:$0x1] }
0x1276   :  { %v5599_v30 = vpop.eup %5598 }
0x1277   :  { %v2409_v32 = vmul.f32 %v5599_v30, %v2407_v24  ;;  %vm2414_vm8 = vweird.f32 %v5599_v30 }
0x1278   :  { %vm2415_vm10 = vmor %vm2413_vm9, %vm2414_vm8  ;;  %vm2676_vm9 = vcmask 7168  }
0x1279   :  { %v2410_v7 = vsub.f32 1.0, %v2409_v32 }
0x127b   :  { %v2411_v35 = vmul.f32 %v5599_v30, %v2410_v7  ;;  %v2773_v7 = vld [vmem:[#allocation4 + $0x30] sm:$0xff] }
0x127d   :  { %v2412_v45 = vadd.f32 %v5599_v30, %v2411_v35  ;;  %v2770_v35 = vld [vmem:[#allocation4 + $0x18] sm:$0xff] }
0x127f   :  { %v2416_v55 = vsel %vm2415_vm10, %v5599_v30, %v2412_v45  ;;  %v2776_v30 = vld [vmem:[#allocation4 + $0x48] sm:$0xff] }
0x1280   :  { %v2421_v62 = vsel %vm2418_vm11, %v2420_v61, %v2416_v55 }
0x1295   :  { %v2343_v16 = vpop.permute.xlu2 %2342 }
0x1296   :  { %v2345_v29 = vmul.f32 %v2343_v16, %v2340_v15  ;;  %v6953_v15 = vld [vmem:[#allocation4 + $0xc8] sm:$0xff] }
0x1297   :  { %v2645_v16 = vld [vmem:[%s7986_s16] sm:$0xff] }
0x1298   :  { %v2351_v18 = vadd.f32 %v2350_v34, %v2345_v29  ;;  %v6959_v34 = vld [vmem:[#allocation4 + $0xb0] sm:$0xff]  ;;  %v6961_v29 = vld [vmem:[#allocation4 + $0x108] sm:$0xff]  ;;  %2671 = vmatpush.msra.mxu0 %v2645_v16 }
0x129a   :  { %2444 = vrot.lane.b32.xlu1 %v2351_v18, %s5792_s22  ;;  %v6964_v18 = vld [vmem:[#allocation4 + $0x98] sm:$0xff]  ;;  %2807 = vmatpush.msrb.mxu0 %v6961_v29 }
0x129c   :  { %2808 = vmatpush.msrb.mxu0 %v6966_v3 }
0x129d   :  { %v2395_v37 = vpop.permute.xlu2 %2394 }
0x129e   :  { %v2397_v52 = vmul.f32 %v2395_v37, %v2373_v13  ;;  %v2580_v13 = vld [vmem:[%s7982_s12 + $0x8] sm:$0xff]  ;;  %2809 = vmatpush.msrb.mxu0 %v6972_v20  ;;  %v5427_v37 = vld [vmem:[%s7977_s7] ss:$0 sm:$0xff] }
0x129f   :  { %2603 = vmatpush.msrb.mxu2 %v2580_v13 }
0x12a0   :  { %2810 = vmatpush.msrb.mxu0 %v6976_v19 }
0x12a1   :  { %2604 = vmatpush.msrb.mxu2 %v2579_v2 }
0x12a2   :  { %2811 = vmatpush.msrb.mxu0 %v6980_v1 }
0x12d8   :  { %v2391_v51 = vpop.permute.xlu1 %2390 }
0x12d9   :  { %v2393_v40 = vmul.f32 %v2391_v51, %v2388_v38  ;;  %v2767_v38 = vld [vmem:[#allocation4] sm:$0xff] }
0x12db   :  { %v2398_v49 = vadd.f32 %v2397_v52, %v2393_v40  ;;  %v5426_v40 = vld [vmem:[%s7985_s15] ss:$0 sm:$0xff] }
0x12dd   :  { %2448 = vrot.lane.b32.xlu2 %v2398_v49, %s5791_s17 }
0x12df   :  { %v2440_v59 = vpop.permute.xlu0 %2439 }
0x12e0   :  { %v2442_v0 = vmul.f32 %v2440_v59, %v2421_v62  ;;  %v2576_v6 = vpop.f32.mrf.mxu1 }
0x12e2   :  { %2452 = vrot.lane.b32.xlu0 %v2442_v0, %s5791_s17 }
0x12e5   :  { %2886 = vrot.lane.b32.xlu2 %v5427_v37, %s5789_s19 }
0x130c   :  { %v2445_v4 = vpop.permute.xlu1 %2444 }
0x1337   :  { %v2449_v56 = vpop.permute.xlu2 %2448 }
0x1338   :  { %v2455_v33 = vsel %vm402_vm14, %v2445_v4, %v2449_v56 }
0x1354   :  { %v2453_v5 = vpop.permute.xlu0 %2452 }
0x1355   :  { %v2456_v9 = vsel %vm404_vm15, %v2455_v33, %v2453_v5 }
0x1356   :  { %v2471_v60 = vrot.slane %v2456_v9, 7 }
0x1358   :  { %5331 = vmatmul.msk.f32.vlgmr.msra.gmra.mxu2 %vm203_vm2, %v2471_v60 }
0x1359   :  { %5342 = vmatpush.msk.msra.mxu2 %vm100_vm0, %v2696_v8 }
0x1360   :  { %5336 = vmatmul.msk.f32.vlgmr.msrb.gmra.mxu2 %vm2585_vm12, %v2576_v6 }
0x1361   :  { %2847 = vmatpush.msrb.mxu2 %v6638_v23  ;;  %v2469_v23 = vld [vmem:[%s7979_s9] sm:$0x1] }
0x1363   :  { %2848 = vmatpush.msrb.mxu2 %v6646_v26 }
0x1365   :  { %2849 = vmatpush.msrb.mxu2 %v6655_v31 }
0x1367   :  { %2850 = vmatpush.msrb.mxu2 %v6664_v12  ;;  %v5425_v12 = vld [vmem:[%s7983_s13] ss:$0 sm:$0xff] }
0x1369   :  { %2851 = vmatpush.msrb.mxu2 %v6673_v36 }
0x136b   :  { %2852 = vmatpush.msrb.mxu2 %v6678_v17 }
0x136d   :  { %2853 = vmatpush.msrb.mxu2 %v6681_v41  ;;  %v2616_v41 = vld [vmem:[%s7984_s14] sm:$0xff] }
0x136e   :  { %2639 = vmatpush.msrb.mxu3 %v2616_v41 }
0x136f   :  { %2854 = vmatpush.msrb.mxu2 %v6686_v44  ;;  %v5339_v44 = vld [vmem:[%s7995_s27 + $0x8] sm:$0xff] }
0x1370   :  { %5343 = vmatmul.msk.f32.vlgmr.msra.gmra.mxu2 %vm96_vm1, %v5339_v44 }
0x1371   :  { %2855 = vmatpush.msrb.mxu2 %v6692_v48  ;;  %v2697_v48 = vld.sshfl [vmem:[#allocation1 + $0x10] sm:$0xff pattern:$0x75316420] }
0x1372   :  { %5344 = vmatpush.msk.msra.mxu3 %vm100_vm0, %v2697_v48 }
0x1373   :  { %2856 = vmatpush.msrb.mxu2 %v6698_v50  ;;  %v2695_v50 = vld.sshfl [vmem:[#allocation1] sm:$0xff pattern:$0x75316420] }
0x1374   :  { %5340 = vmatpush.msk.msra.mxu1 %vm100_vm0, %v2695_v50  ;;  %vm2613_vm0 = vcmask 64536  }
0x1375   :  { %2857 = vmatpush.msrb.mxu2 %v6705_v54  ;;  %v6933_v54 = vld [vmem:[#allocation4 + $0x110] sm:$0xff]  ;;  %5341 = vmatmul.msk.f32.vlgmr.msra.gmra.mxu1 %vm96_vm1, %v5339_v44 }
0x1376   :  { %2827 = vmatpush.msrb.mxu1 %v6933_v54 }
0x1377   :  { %2858 = vmatpush.msrb.mxu2 %v6710_v58  ;;  %v6937_v58 = vld [vmem:[#allocation4 + $0xf8] sm:$0xff] }
0x1378   :  { %2859 = vmatmul.f32.vlgmr.msrb.gmra.mxu2 %v5790_v39  ;;  %2828 = vmatpush.msrb.mxu1 %v6937_v58 }
0x137a   :  { %2829 = vmatpush.msrb.mxu1 %v6943_v11 }
0x137c   :  { %2830 = vmatpush.msrb.mxu1 %v6953_v15 }
0x137e   :  { %2831 = vmatpush.msrb.mxu1 %v6959_v34 }
0x1380   :  { %2832 = vmatpush.msrb.mxu1 %v6964_v18 }
0x1382   :  { %2833 = vmatpush.msrb.mxu1 %v6970_v25 }
0x1384   :  { %2834 = vmatpush.msrb.mxu1 %v6684_v43  ;;  %v2785_v43 = vld [vmem:[#allocation4 + $0x90] sm:$0xff] }
0x1385   :  { %2812 = vmatpush.msrb.mxu0 %v2785_v43 }
0x1386   :  { %2835 = vmatpush.msrb.mxu1 %v6689_v47  ;;  %v2782_v47 = vld [vmem:[#allocation4 + $0x78] sm:$0xff] }
0x1387   :  { %2813 = vmatpush.msrb.mxu0 %v2782_v47 }
0x1388   :  { %2836 = vmatpush.msrb.mxu1 %v6695_v27  ;;  %v2682_v27 = vld [vmem:[%s7976_s6] sm:$0x7] }
0x1389   :  { %v2684_v51 = vperm.slane %v2682_v27, 0  ;;  %v2686_v59 = vperm.slane %v2682_v27, 2 }
0x138a   :  { %2837 = vmatpush.msrb.mxu1 %v6703_v53  ;;  %v2779_v53 = vld [vmem:[#allocation4 + $0x60] sm:$0xff] }
0x138b   :  { %2814 = vmatpush.msrb.mxu0 %v2779_v53 }
0x138c   :  { %2838 = vmatpush.msrb.mxu1 %v6708_v57  ;;  %v2685_v57 = vperm.slane %v2682_v27, 1 }
0x138d   :  { %2839 = vmatmul.f32.vlgmr.msrb.gmra.mxu1 %v5790_v39  ;;  %2815 = vmatpush.msrb.mxu0 %v2776_v30 }
0x138e   :  { %3098 = vmatpush.msra.mxu1 %v6933_v54 }
0x138f   :  { %2816 = vmatpush.msrb.mxu0 %v2773_v7 }
0x1390   :  { %3099 = vmatpush.msra.mxu1 %v6937_v58 }
0x1391   :  { %2817 = vmatpush.msrb.mxu0 %v2770_v35 }
0x1392   :  { %3100 = vmatpush.msra.mxu1 %v6943_v11 }
0x1393   :  { %2818 = vmatpush.msrb.mxu0 %v2767_v38 }
0x1394   :  { %3101 = vmatpush.msra.mxu1 %v6953_v15 }
0x1396   :  { %3102 = vmatpush.msra.mxu1 %v6959_v34 }
0x1398   :  { %3103 = vmatpush.msra.mxu1 %v6964_v18 }
0x139a   :  { %3104 = vmatpush.msra.mxu1 %v6970_v25 }
0x13db   :  { %v2491_v26 = vpop.f32.mrf.mxu2 }
0x13dc   :  { %v2492_v31 = vadd.f32 %v2491_v26, %v2469_v23  ;;  %v2887_v26 = vpop.permute.xlu2 %2886 }
0x13de   :  { %2494 = vst.msk [vmem:[#allocation2 + $0x7] sm:$0x1] %vm442_vm3, %v2492_v31 }
0x13e3   :  { %v2606_v36 = vpop.f32.mrf.mxu2 }
0x13e4   :  { %v2607_v17 = vadd.f32 %v5425_v12, %v2606_v36 }
0x13e6   :  { %2610 = vrot.lane.b32.xlu1 %v2607_v17, %s5793_s4 }
0x13f2   :  { %v2724_v45 = vpop.f32.mrf.mxu1 }
0x13f3   :  { %v2744_v28 = vpop.f32.mrf.mxu2  ;;  %v7009_v52 = vadd.f32 %v2724_v45, %v2684_v51 }
0x13f4   :  { %v7003_v32 = vadd.f32 %v2744_v28, %v2685_v57 }
0x13fb   :  { %v2860_v13 = vpop.f32.mrf.mxu2 }
0x140a   :  { %v2840_v49 = vpop.f32.mrf.mxu1 }
0x140b   :  { %v2929_v61 = vadd.f32 %v2883_v42, %v2840_v49 }
0x140d   :  { %2931 = vrot.lane.b32.xlu1 %v2929_v61, %s5789_s19 }
0x1458   :  { %v2611_v21 = vpop.permute.xlu1 %2610 }
0x1459   :  { %2614 = vst.msk [vmem:[#allocation2] sm:$0xff] %vm2613_vm0, %v2611_v21 }
0x1460   :  { %v2615_v24 = vld [vmem:[#allocation2] sm:$0xff] }
0x1461   :  { %5337 = vmatmul.msk.f32.vlgmr.msrb.gmra.mxu3 %vm2497_vm6, %v2615_v24 }
0x1469   :  { %5345 = vmatmul.msk.f32.vlgmr.msra.gmra.mxu3 %vm96_vm1, %v5339_v44 }
0x147f   :  { %v2932_v28 = vpop.permute.xlu1 %2931 }
0x14e4   :  { %v2641_v46 = vpop.f32.mrf.mxu3 }
0x14e5   :  { %v2642_v55 = vadd.f32 %v5426_v40, %v2641_v46 }
0x14e7   :  { %v2644_v62 = vmax.f32 %v2642_v55, 0.0 }
0x14e9   :  { %5338 = vmatmul.msk.f32.vlgmr.msra.gmra.mxu0 %vm402_vm14, %v2644_v62 }
0x14ea   :  { %3078 = vmatpush.msra.mxu0 %v6961_v29 }
0x14ec   :  { %v2764_v0 = vpop.f32.mrf.mxu3  ;;  %3079 = vmatpush.msra.mxu0 %v6966_v3 }
0x14ed   :  { %v7021_v2 = vadd.f32 %v2764_v0, %v2686_v59 }
0x14ee   :  { %3080 = vmatpush.msra.mxu0 %v6972_v20 }
0x14ef   :  { %v7025_v56 = vadd.f32 %v2860_v13, %v7021_v2 }
0x14f0   :  { %3081 = vmatpush.msra.mxu0 %v6976_v19 }
0x14f1   :  { %5600 = vtanh.f32 %v7025_v56  ;;  %2819 = vmatmul.f32.vlgmr.msrb.gmra.mxu0 %v5790_v39  ;;  %v2909_v39 = vadd.f32 %v2840_v49, %v7003_v32  ;;  %v5348_v49 = vmul.f32 -1.442695, %v7025_v56 }
0x14f2   :  { %3082 = vmatpush.msra.mxu0 %v6980_v1 }
0x14f3   :  { %v5347_v33 = vmul.f32 -1.442695, %v2909_v39 }
0x14f4   :  { %3083 = vmatpush.msra.mxu0 %v2785_v43 }
0x14f5   :  { %5602 = vpow2.f32 %v5347_v33 }
0x14f6   :  { %3084 = vmatpush.msra.mxu0 %v2782_v47 }
0x14f7   :  { %v5601_v4 = vpop.eup %5600 }
0x14f8   :  { %2971 = vrot.lane.b32.xlu2 %v5601_v4, %s5789_s19  ;;  %3085 = vmatpush.msra.mxu0 %v2779_v53 }
0x14fa   :  { %3086 = vmatpush.msra.mxu0 %v2776_v30 }
0x14fb   :  { %v5603_v5 = vpop.eup %5602 }
0x14fc   :  { %3087 = vmatpush.msra.mxu0 %v2773_v7  ;;  %v2913_v9 = vadd.f32 1.0, %v5603_v5 }
0x14fe   :  { %3088 = vmatpush.msra.mxu0 %v2770_v35  ;;  %5604 = vrcp.f32 %v2913_v9  ;;  %vm2919_vm1 = vweird.f32 %v2913_v9  ;;  %v2925_v31 = vand.u32 2147483648, %v2913_v9  ;;  %v2923_v36 = vand.u32 2147483647, %v2913_v9 }
0x1500   :  { %3089 = vmatpush.msra.mxu0 %v2767_v38  ;;  %v2926_v17 = vor.u32 1.1754944e-38, %v2925_v31  ;;  %vm2924_vm8 = vcmp.eq.f32.partialorder %v2923_v36, 8.507059e+37 }
0x1502   :  { %3371 = vmatpush.msrb.mxu0 %v6961_v29 }
0x1504   :  { %3372 = vmatpush.msrb.mxu0 %v6966_v3  ;;  %v5605_v60 = vpop.eup %5604 }
0x1505   :  { %v2915_v6 = vmul.f32 %v5605_v60, %v2913_v9  ;;  %vm2920_vm13 = vweird.f32 %v5605_v60 }
0x1506   :  { %3373 = vmatpush.msrb.mxu0 %v6972_v20  ;;  %vm2921_vm4 = vmor %vm2919_vm1, %vm2920_vm13 }
0x1507   :  { %v2916_v8 = vsub.f32 1.0, %v2915_v6 }
0x1508   :  { %3374 = vmatpush.msrb.mxu0 %v6976_v19 }
0x1509   :  { %v2917_v23 = vmul.f32 %v5605_v60, %v2916_v8 }
0x150a   :  { %3375 = vmatpush.msrb.mxu0 %v6980_v1 }
0x150b   :  { %v2918_v12 = vadd.f32 %v5605_v60, %v2917_v23 }
0x150c   :  { %3376 = vmatpush.msrb.mxu0 %v2785_v43 }
0x150d   :  { %v2922_v41 = vsel %vm2921_vm4, %v5605_v60, %v2918_v12 }
0x150e   :  { %3377 = vmatpush.msrb.mxu0 %v2782_v47  ;;  %v7038_v44 = vsel %vm2924_vm8, %v2926_v17, %v2922_v41 }
0x150f   :  { %v2941_v17 = vsub.f32 1.0, %v7038_v44 }
0x1510   :  { %3378 = vmatpush.msrb.mxu0 %v2779_v53 }
0x1512   :  { %3379 = vmatpush.msrb.mxu0 %v2776_v30 }
0x1514   :  { %3380 = vmatpush.msrb.mxu0 %v2773_v7 }
0x1516   :  { %3381 = vmatpush.msrb.mxu0 %v2770_v35 }
0x1518   :  { %3382 = vmatpush.msrb.mxu0 %v2767_v38  ;;  %v2947_v38 = vmul.f32 0.0, %v7038_v44 }
0x1552   :  { %v2972_v48 = vpop.permute.xlu2 %2971 }
0x1553   :  { %v2974_v50 = vmul.f32 %v2972_v48, %v7038_v44 }
0x1555   :  { %2976 = vrot.lane.b32.xlu2 %v2974_v50, %s5791_s17 }
0x1566   :  { %v2673_v63 = vpop.f32.mrf.mxu0 }
0x1567   :  { %v2674_v14 = vadd.f32 %v5428_v10, %v2673_v63 }
0x1569   :  { %2677 = vst.msk [vmem:[%s7988_s18] sm:$0xff] %vm2676_vm9, %v2674_v14  ;;  %v7066_v14 = vld [vmem:[%s7978_s8 + $0x58] sm:$0xff] }
0x156a   :  { %3020 = vmatpush.msrb.mxu3 %v7066_v14 }
0x156e   :  { %v2820_v16 = vpop.f32.mrf.mxu0 }
0x156f   :  { %v2863_v29 = vadd.f32 %v2820_v16, %v7009_v52  ;;  %v2889_v3 = vadd.f32 %v2887_v26, %v2820_v16  ;;  %v7068_v16 = vld [vmem:[#allocation4 + $0x118] sm:$0xff] }
0x1570   :  { %3118 = vmatpush.msra.mxu2 %v7068_v16 }
0x1571   :  { %v5346_v20 = vmul.f32 -1.442695, %v2863_v29  ;;  %2891 = vrot.lane.b32.xlu0 %v2889_v3, %s5789_s19  ;;  %v7073_v29 = vld [vmem:[%s7978_s8 + $0x50] sm:$0xff] }
0x1572   :  { %3021 = vmatpush.msrb.mxu3 %v7073_v29 }
0x1573   :  { %5606 = vpow2.f32 %v5346_v20  ;;  %v7077_v20 = vld [vmem:[#allocation4 + $0x100] sm:$0xff] }
0x1574   :  { %3119 = vmatpush.msra.mxu2 %v7077_v20 }
0x1579   :  { %v5607_v19 = vpop.eup %5606 }
0x157a   :  { %v2867_v21 = vadd.f32 1.0, %v5607_v19  ;;  %v7082_v19 = vld [vmem:[%s7978_s8 + $0x48] sm:$0xff] }
0x157b   :  { %3022 = vmatpush.msrb.mxu3 %v7082_v19 }
0x157c   :  { %5608 = vrcp.f32 %v2867_v21  ;;  %v2879_v47 = vand.u32 2147483648, %v2867_v21  ;;  %v2877_v53 = vand.u32 2147483647, %v2867_v21  ;;  %vm2873_vm11 = vweird.f32 %v2867_v21 }
0x157e   :  { %v2880_v30 = vor.u32 1.1754944e-38, %v2879_v47  ;;  %vm2878_vm13 = vcmp.eq.f32.partialorder %v2877_v53, 8.507059e+37  ;;  %v7097_v47 = vld [vmem:[#allocation4 + $0x68] sm:$0xff]  ;;  %v7106_v53 = vld [vmem:[#allocation4 + $0x50] sm:$0xff] }
0x157f   :  { %3105 = vmatpush.msra.mxu1 %v7097_v47 }
0x1581   :  { %3106 = vmatpush.msra.mxu1 %v7106_v53 }
0x1582   :  { %v5609_v1 = vpop.eup %5608 }
0x1583   :  { %v2869_v24 = vmul.f32 %v5609_v1, %v2867_v21  ;;  %vm2874_vm10 = vweird.f32 %v5609_v1 }
0x1584   :  { %vm2875_vm1 = vmor %vm2873_vm11, %vm2874_vm10 }
0x1585   :  { %v2870_v43 = vsub.f32 1.0, %v2869_v24  ;;  %v7091_v24 = vld [vmem:[%s7978_s8 + $0x40] sm:$0xff] }
0x1586   :  { %3023 = vmatpush.msrb.mxu3 %v7091_v24 }
0x1587   :  { %v2871_v27 = vmul.f32 %v5609_v1, %v2870_v43  ;;  %v7095_v43 = vld [vmem:[#allocation4 + $0xd0] sm:$0xff] }
0x1589   :  { %v2872_v57 = vadd.f32 %v5609_v1, %v2871_v27  ;;  %v7103_v27 = vld [vmem:[%s7978_s8 + $0x38] sm:$0xff] }
0x158a   :  { %3024 = vmatpush.msrb.mxu3 %v7103_v27 }
0x158b   :  { %v2876_v7 = vsel %vm2875_vm1, %v5609_v1, %v2872_v57  ;;  %v7086_v1 = vld [vmem:[#allocation4 + $0xe8] sm:$0xff]  ;;  %v7109_v57 = vld [vmem:[#allocation4 + $0xb8] sm:$0xff] }
0x158c   :  { %v2881_v35 = vsel %vm2878_vm13, %v2880_v30, %v2876_v7  ;;  %3120 = vmatpush.msra.mxu2 %v7086_v1  ;;  %v7117_v30 = vld [vmem:[%s7978_s8 + $0x30] sm:$0xff]  ;;  %v7121_v7 = vld [vmem:[#allocation4 + $0xa0] sm:$0xff] }
0x158d   :  { %v2934_v37 = vmul.f32 %v2932_v28, %v2881_v35  ;;  %v2901_v10 = vsub.f32 1.0, %v2881_v35  ;;  %v2907_v44 = vmul.f32 0.0, %v2881_v35  ;;  %v7111_v28 = vld [vmem:[#allocation4 + $0x38] sm:$0xff]  ;;  %3025 = vmatpush.msrb.mxu3 %v7117_v30 }
0x158e   :  { %3121 = vmatpush.msra.mxu2 %v7095_v43  ;;  %3107 = vmatpush.msra.mxu1 %v7111_v28 }
0x158f   :  { %2936 = vrot.lane.b32.xlu1 %v2934_v37, %s5789_s19  ;;  %v7129_v37 = vld [vmem:[%s7978_s8 + $0x28] sm:$0xff] }
0x1590   :  { %3122 = vmatpush.msra.mxu2 %v7109_v57  ;;  %3026 = vmatpush.msrb.mxu3 %v7129_v37 }
0x1592   :  { %3123 = vmatpush.msra.mxu2 %v7121_v7 }
0x15af   :  { %v2977_v51 = vpop.permute.xlu2 %2976 }
0x15b0   :  { %v7050_v45 = vadd.f32 %v2977_v51, %v2947_v38  ;;  %v7139_v51 = vld [vmem:[%s7978_s8 + $0x20] sm:$0xff] }
0x15b1   :  { %3027 = vmatpush.msrb.mxu3 %v7139_v51 }
0x15b2   :  { %5610 = vtanh.f32 %v7050_v45 }
0x15b3   :  { %5612 = vpow2.f32 %v5348_v49  ;;  %v7158_v49 = vld [vmem:[%s7978_s8 + $0x10] sm:$0xff] }
0x15b8   :  { %v5611_v40 = vpop.eup %5610 }
0x15b9   :  { %2982 = vrot.lane.b32.xlu2 %v5611_v40, %s5789_s19  ;;  %v5613_v55 = vpop.eup %5612  ;;  %v7143_v40 = vld [vmem:[#allocation4 + $0x70] sm:$0xff] }
0x15ba   :  { %v2954_v61 = vadd.f32 1.0, %v5613_v55  ;;  %v7161_v55 = vld [vmem:[#allocation4 + $0x40] sm:$0xff] }
0x15bc   :  { %5614 = vrcp.f32 %v2954_v61  ;;  %vm2960_vm4 = vweird.f32 %v2954_v61  ;;  %v2966_v56 = vand.u32 2147483648, %v2954_v61  ;;  %v2964_v9 = vand.u32 2147483647, %v2954_v61 }
0x15be   :  { %v2967_v60 = vor.u32 1.1754944e-38, %v2966_v56  ;;  %vm2965_vm11 = vcmp.eq.f32.partialorder %v2964_v9, 8.507059e+37  ;;  %v3012_v9 = vld [vmem:[%s7979_s9] sm:$0x1] }
0x15c2   :  { %v5615_v62 = vpop.eup %5614 }
0x15c3   :  { %v2956_v59 = vmul.f32 %v5615_v62, %v2954_v61  ;;  %vm2961_vm8 = vweird.f32 %v5615_v62  ;;  %v7165_v61 = vld [vmem:[#allocation4 + $0x28] sm:$0xff] }
0x15c4   :  { %vm2962_vm10 = vmor %vm2960_vm4, %vm2961_vm8 }
0x15c5   :  { %v2957_v4 = vsub.f32 1.0, %v2956_v59  ;;  %v7175_v59 = vld [vmem:[#allocation4 + $0x8] sm:$0xff] }
0x15c7   :  { %v2958_v39 = vmul.f32 %v5615_v62, %v2957_v4 }
0x15c9   :  { %v2959_v5 = vadd.f32 %v5615_v62, %v2958_v39 }
0x15cb   :  { %v2963_v6 = vsel %vm2962_vm10, %v5615_v62, %v2959_v5  ;;  %v7173_v62 = vld [vmem:[%s7978_s8] sm:$0xff] }
0x15cc   :  { %v2968_v8 = vsel %vm2965_vm11, %v2967_v60, %v2963_v6 }
0x15e3   :  { %v2892_v42 = vpop.permute.xlu0 %2891 }
0x15e4   :  { %v2894_v46 = vmul.f32 %v2892_v42, %v2881_v35  ;;  %v7123_v35 = vld [vmem:[#allocation4 + $0x20] sm:$0xff] }
0x15e5   :  { %3108 = vmatpush.msra.mxu1 %v7123_v35  ;;  %v7149_v42 = vld [vmem:[%s7978_s8 + $0x18] sm:$0xff] }
0x15e6   :  { %2896 = vrot.lane.b32.xlu0 %v2894_v46, %s5789_s19  ;;  %v7152_v46 = vld [vmem:[#allocation4 + $0x58] sm:$0xff]  ;;  %3028 = vmatpush.msrb.mxu3 %v7149_v42 }
0x15e7   :  { %3109 = vmatpush.msra.mxu1 %v7175_v59 }
0x15e8   :  { %3029 = vmatpush.msrb.mxu3 %v7158_v49 }
0x15e9   :  { %3391 = vmatpush.msrb.mxu1 %v6933_v54 }
0x15ea   :  { %3030 = vmatpush.msrb.mxu3 %v6823_v22 }
0x15eb   :  { %3392 = vmatpush.msrb.mxu1 %v6937_v58 }
0x15ec   :  { %3031 = vmatpush.msrb.mxu3 %v7173_v62 }
0x15ed   :  { %3393 = vmatpush.msrb.mxu1 %v6943_v11 }
0x15ee   :  { %3314 = vmatpush.msra.mxu3 %v7066_v14 }
0x15ef   :  { %3394 = vmatpush.msrb.mxu1 %v6953_v15 }
0x15f0   :  { %3315 = vmatpush.msra.mxu3 %v7073_v29 }
0x15f1   :  { %3395 = vmatpush.msrb.mxu1 %v6959_v34 }
0x15f2   :  { %3316 = vmatpush.msra.mxu3 %v7082_v19 }
0x15f3   :  { %3396 = vmatpush.msrb.mxu1 %v6964_v18  ;;  %v3157_v18 = vld [vmem:[%s7977_s7] sm:$0x1] }
0x15f4   :  { %3317 = vmatpush.msra.mxu3 %v7091_v24 }
0x15f5   :  { %3397 = vmatpush.msrb.mxu1 %v6970_v25 }
0x15f6   :  { %3318 = vmatpush.msra.mxu3 %v7103_v27 }
0x15f7   :  { %3398 = vmatpush.msrb.mxu1 %v7097_v47 }
0x15f8   :  { %3319 = vmatpush.msra.mxu3 %v7117_v30 }
0x15f9   :  { %3399 = vmatpush.msrb.mxu1 %v7106_v53 }
0x15fa   :  { %3320 = vmatpush.msra.mxu3 %v7129_v37 }
0x15fb   :  { %3400 = vmatpush.msrb.mxu1 %v7111_v28 }
0x15fc   :  { %3321 = vmatpush.msra.mxu3 %v7139_v51 }
0x15fd   :  { %3401 = vmatpush.msrb.mxu1 %v7123_v35 }
0x15fe   :  { %3322 = vmatpush.msra.mxu3 %v7149_v42 }
0x15ff   :  { %3402 = vmatpush.msrb.mxu1 %v7175_v59 }
0x1600   :  { %3323 = vmatpush.msra.mxu3 %v7158_v49 }
0x1601   :  { %v2937_v0 = vpop.permute.xlu1 %2936 }
0x1602   :  { %v2939_v13 = vadd.f32 %v2937_v0, %v7003_v32  ;;  %v3040_v0 = vld [vmem:[#allocation4 + $0x10] sm:$0xff] }
0x1604   :  { %5616 = vtanh.f32 %v2939_v13  ;;  %v5429_v13 = vld [vmem:[%s7977_s7] ss:$0 sm:$0xff] }
0x160a   :  { %v5617_v33 = vpop.eup %5616 }
0x160b   :  { %2943 = vrot.lane.b32.xlu1 %v5617_v33, %s5792_s22 }
0x1613   :  { %v2983_v23 = vpop.permute.xlu2 %2982 }
0x1614   :  { %v2985_v26 = vmul.f32 %v2983_v23, %v2968_v8 }
0x1616   :  { %2995 = vrot.lane.b32.xlu2 %v2985_v26, %s5791_s17 }
0x1658   :  { %v2897_v31 = vpop.permute.xlu0 %2896 }
0x1659   :  { %v2899_v12 = vadd.f32 %v2897_v31, %v7009_v52 }
0x165b   :  { %5618 = vtanh.f32 %v2899_v12 }
0x1661   :  { %v5619_v36 = vpop.eup %5618 }
0x1662   :  { %2903 = vrot.lane.b32.xlu0 %v5619_v36, %s5792_s22 }
0x1670   :  { %v2996_v58 = vpop.permute.xlu2 %2995 }
0x167d   :  { %v2944_v41 = vpop.permute.xlu1 %2943 }
0x167e   :  { %v2946_v48 = vmul.f32 %v2944_v41, %v2941_v17 }
0x1680   :  { %v2948_v50 = vadd.f32 %v2947_v38, %v2946_v48  ;;  %v7133_v38 = vld [vmem:[#allocation4 + $0x88] sm:$0xff] }
0x1681   :  { %3124 = vmatpush.msra.mxu2 %v7133_v38 }
0x1682   :  { %2991 = vrot.lane.b32.xlu1 %v2948_v50, %s5791_s17 }
0x1683   :  { %3125 = vmatpush.msra.mxu2 %v7143_v40 }
0x1685   :  { %3126 = vmatpush.msra.mxu2 %v7152_v46 }
0x1687   :  { %3127 = vmatpush.msra.mxu2 %v7161_v55 }
0x1689   :  { %3128 = vmatpush.msra.mxu2 %v7165_v61 }
0x168b   :  { %3129 = vmatpush.msra.mxu2 %v3040_v0 }
0x168d   :  { %3411 = vmatpush.msrb.mxu2 %v7068_v16 }
0x168f   :  { %3412 = vmatpush.msrb.mxu2 %v7077_v20 }
0x1691   :  { %3413 = vmatpush.msrb.mxu2 %v7086_v1 }
0x1693   :  { %3414 = vmatpush.msrb.mxu2 %v7095_v43 }
0x1695   :  { %3415 = vmatpush.msrb.mxu2 %v7109_v57 }
0x1697   :  { %3416 = vmatpush.msrb.mxu2 %v7121_v7 }
0x1699   :  { %3417 = vmatpush.msrb.mxu2 %v7133_v38 }
0x169b   :  { %3418 = vmatpush.msrb.mxu2 %v7143_v40 }
0x169d   :  { %3419 = vmatpush.msrb.mxu2 %v7152_v46 }
0x169f   :  { %3420 = vmatpush.msrb.mxu2 %v7161_v55 }
0x16a1   :  { %3421 = vmatpush.msrb.mxu2 %v7165_v61 }
0x16a3   :  { %3422 = vmatpush.msrb.mxu2 %v3040_v0 }
0x16d4   :  { %v2904_v63 = vpop.permute.xlu0 %2903 }
0x16d5   :  { %v2906_v3 = vmul.f32 %v2904_v63, %v2901_v10 }
0x16d7   :  { %v2908_v21 = vadd.f32 %v2907_v44, %v2906_v3 }
0x16d9   :  { %2987 = vrot.lane.b32.xlu0 %v2908_v21, %s5792_s22 }
0x16e1   :  { %3160 = vrot.lane.b32.xlu0 %v5429_v13, %s5789_s19 }
0x16f4   :  { %v2992_v22 = vpop.permute.xlu1 %2991 }
0x174b   :  { %v2988_v54 = vpop.permute.xlu0 %2987 }
0x174c   :  { %v2998_v11 = vsel %vm402_vm14, %v2988_v54, %v2992_v22 }
0x174d   :  { %v7218_v15 = vsel %vm404_vm15, %v2998_v11, %v2996_v58 }
0x174e   :  { %5349 = vmatmul.msk.f32.vlgmr.msrb.gmra.mxu3 %vm203_vm2, %v7218_v15  ;;  %5350 = vmatmul.msk.f32.vlgmr.msra.gmra.mxu0 %vm203_vm2, %v7218_v15 }
0x174f   :  { %5351 = vmatmul.msk.f32.vlgmr.msra.gmra.mxu1 %vm203_vm2, %v7218_v15  ;;  %5352 = vmatmul.msk.f32.vlgmr.msra.gmra.mxu2 %vm203_vm2, %v7218_v15 }
0x1750   :  { %3704 = vmatpush.msra.mxu2 %v7068_v16 }
0x1752   :  { %3705 = vmatpush.msra.mxu2 %v7077_v20 }
0x1753   :  { %v3161_v34 = vpop.permute.xlu0 %3160 }
0x1754   :  { %3706 = vmatpush.msra.mxu2 %v7086_v1 }
0x1756   :  { %3707 = vmatpush.msra.mxu2 %v7095_v43 }
0x1758   :  { %3708 = vmatpush.msra.mxu2 %v7109_v57 }
0x175a   :  { %3709 = vmatpush.msra.mxu2 %v7121_v7 }
0x175c   :  { %3710 = vmatpush.msra.mxu2 %v7133_v38 }
0x175e   :  { %3711 = vmatpush.msra.mxu2 %v7143_v40 }
0x1760   :  { %3712 = vmatpush.msra.mxu2 %v7152_v46 }
0x1762   :  { %3713 = vmatpush.msra.mxu2 %v7161_v55 }
0x1764   :  { %3714 = vmatpush.msra.mxu2 %v7165_v61 }
0x1766   :  { %3715 = vmatpush.msra.mxu2 %v3040_v0  ;;  %v3182_v0 = vrot.slane %v7218_v15, 7 }
0x17cb   :  { %v3091_v25 = vpop.f32.mrf.mxu0 }
0x17cc   :  { %v3111_v4 = vpop.f32.mrf.mxu1  ;;  %v3163_v39 = vadd.f32 %v3161_v34, %v3091_v25  ;;  %v3135_v12 = vrot.slane %v3091_v25, 7 }
0x17cd   :  { %v3211_v33 = vadd.f32 %v3157_v18, %v3111_v4  ;;  %v3189_v63 = vrot.slane %v3111_v4, 7 }
0x17ce   :  { %v3165_v56 = vrot.slane %v3163_v39, 7  ;;  %v3137_v36 = vadd.f32 %v3135_v12, %v7009_v52  ;;  %v3260_v12 = vrot.slane %v7050_v45, 7 }
0x17cf   :  { %v3213_v5 = vrot.slane %v3211_v33, 7  ;;  %v3191_v44 = vadd.f32 %v3189_v63, %v7003_v32 }
0x17d0   :  { %3166 = vrot.lane.b32.xlu1 %v3165_v56, %s5789_s19  ;;  %v5353_v17 = vmul.f32 -1.442695, %v3137_v36 }
0x17d1   :  { %3214 = vrot.lane.b32.xlu2 %v3213_v5, %s5789_s19  ;;  %v3033_v60 = vpop.f32.mrf.mxu3  ;;  %v5354_v20 = vmul.f32 -1.442695, %v3191_v44 }
0x17d2   :  { %v3034_v6 = vadd.f32 %v3033_v60, %v3012_v9  ;;  %v3131_v8 = vpop.f32.mrf.mxu2 }
0x17d3   :  { %v3236_v23 = vrot.slane %v3131_v8, 7 }
0x17d4   :  { %3037 = vst.msk [vmem:[#allocation2 + $0x8] sm:$0x1] %vm442_vm3, %v3034_v6 }
0x17d5   :  { %v7249_v26 = vadd.f32 %v3236_v23, %v7021_v2 }
0x17d7   :  { %5620 = vtanh.f32 %v7249_v26 }
0x17d8   :  { %5622 = vpow2.f32 %v5353_v17 }
0x17dd   :  { %v5621_v31 = vpop.eup %5620 }
0x17de   :  { %3264 = vrot.lane.b32.xlu0 %v5621_v31, %s5789_s19  ;;  %v5623_v41 = vpop.eup %5622 }
0x17df   :  { %v3141_v48 = vadd.f32 1.0, %v5623_v41 }
0x17e1   :  { %5624 = vrcp.f32 %v3141_v48  ;;  %v3153_v1 = vand.u32 2147483648, %v3141_v48  ;;  %vm3147_vm13 = vweird.f32 %v3141_v48  ;;  %v3151_v43 = vand.u32 2147483647, %v3141_v48 }
0x17e2   :  { %5626 = vpow2.f32 %v5354_v20 }
0x17e3   :  { %v3154_v7 = vor.u32 1.1754944e-38, %v3153_v1  ;;  %vm3152_vm8 = vcmp.eq.f32.partialorder %v3151_v43, 8.507059e+37 }
0x17e7   :  { %v5625_v50 = vpop.eup %5624 }
0x17e8   :  { %v3143_v10 = vmul.f32 %v5625_v50, %v3141_v48  ;;  %vm3148_vm1 = vweird.f32 %v5625_v50  ;;  %v5627_v55 = vpop.eup %5626 }
0x17e9   :  { %vm3149_vm4 = vmor %vm3147_vm13, %vm3148_vm1  ;;  %v3195_v61 = vadd.f32 1.0, %v5627_v55 }
0x17ea   :  { %v3144_v16 = vsub.f32 1.0, %v3143_v10 }
0x17eb   :  { %5628 = vrcp.f32 %v3195_v61  ;;  %v3207_v25 = vand.u32 2147483648, %v3195_v61  ;;  %vm3201_vm11 = vweird.f32 %v3195_v61  ;;  %v3205_v4 = vand.u32 2147483647, %v3195_v61 }
0x17ec   :  { %v3145_v3 = vmul.f32 %v5625_v50, %v3144_v16 }
0x17ed   :  { %v3208_v33 = vor.u32 1.1754944e-38, %v3207_v25  ;;  %vm3206_vm13 = vcmp.eq.f32.partialorder %v3205_v4, 8.507059e+37  ;;  %v7283_v4 = vld [vmem:[%s7978_s8 + $0x8] sm:$0xff] }
0x17ee   :  { %v3146_v21 = vadd.f32 %v5625_v50, %v3145_v3  ;;  %3324 = vmatpush.msra.mxu3 %v7283_v4 }
0x17f0   :  { %v3150_v57 = vsel %vm3149_vm4, %v5625_v50, %v3146_v21  ;;  %v5355_v50 = vmul.f32 -1.442695, %v7249_v26  ;;  %3325 = vmatpush.msra.mxu3 %v7173_v62 }
0x17f1   :  { %v7255_v40 = vsel %vm3152_vm8, %v3154_v7, %v3150_v57  ;;  %v5629_v13 = vpop.eup %5628 }
0x17f2   :  { %v3197_v22 = vmul.f32 %v5629_v13, %v3195_v61  ;;  %vm3202_vm10 = vweird.f32 %v5629_v13  ;;  %v3176_v55 = vsub.f32 1.0, %v7255_v40  ;;  %3607 = vmatpush.msrb.mxu3 %v7066_v14 }
0x17f3   :  { %vm3203_vm1 = vmor %vm3201_vm11, %vm3202_vm10 }
0x17f4   :  { %v3198_v54 = vsub.f32 1.0, %v3197_v22  ;;  %3608 = vmatpush.msrb.mxu3 %v7073_v29 }
0x17f6   :  { %v3199_v34 = vmul.f32 %v5629_v13, %v3198_v54  ;;  %3609 = vmatpush.msrb.mxu3 %v7082_v19 }
0x17f8   :  { %v3200_v18 = vadd.f32 %v5629_v13, %v3199_v34  ;;  %3610 = vmatpush.msrb.mxu3 %v7091_v24 }
0x17fa   :  { %v3204_v39 = vsel %vm3203_vm1, %v5629_v13, %v3200_v18  ;;  %3611 = vmatpush.msrb.mxu3 %v7103_v27 }
0x17fb   :  { %v3209_v15 = vsel %vm3206_vm13, %v3208_v33, %v3204_v39 }
0x17fc   :  { %v3262_v36 = vmul.f32 %v3260_v12, %v3209_v15  ;;  %3612 = vmatpush.msrb.mxu3 %v7117_v30 }
0x17fe   :  { %3613 = vmatpush.msrb.mxu3 %v7129_v37 }
0x1800   :  { %3614 = vmatpush.msrb.mxu3 %v7139_v51  ;;  %v3450_v51 = vld [vmem:[%s7977_s7] sm:$0x1] }
0x1802   :  { %3615 = vmatpush.msrb.mxu3 %v7149_v42 }
0x1804   :  { %3616 = vmatpush.msrb.mxu3 %v7158_v49 }
0x1806   :  { %3617 = vmatpush.msrb.mxu3 %v7283_v4 }
0x1808   :  { %3618 = vmatpush.msrb.mxu3 %v7173_v62 }
0x182b   :  { %v3215_v38 = vpop.permute.xlu2 %3214 }
0x182c   :  { %v3217_v46 = vmul.f32 %v3215_v38, %v7255_v40 }
0x182e   :  { %3219 = vrot.lane.b32.xlu2 %v3217_v46, %s5789_s19 }
0x1836   :  { %3183 = vrot.lane.b32.xlu2 %v3182_v0, %s5791_s17 }
0x1842   :  { %v3167_v58 = vpop.permute.xlu1 %3166 }
0x1843   :  { %v3169_v11 = vmul.f32 %v3167_v58, %v7255_v40  ;;  %v3224_v58 = vsub.f32 1.0, %v3209_v15 }
0x1845   :  { %3171 = vrot.lane.b32.xlu1 %v3169_v11, %s5789_s19 }
0x1850   :  { %v3265_v56 = vpop.permute.xlu0 %3264 }
0x1851   :  { %v3267_v5 = vmul.f32 %v3265_v56, %v3209_v15  ;;  %v3305_v56 = vld [vmem:[%s7979_s9] sm:$0x1] }
0x1853   :  { %3269 = vrot.lane.b32.xlu0 %v3267_v5, %s5791_s17 }
0x1888   :  { %v3220_v9 = vpop.permute.xlu2 %3219 }
0x1889   :  { %v3222_v60 = vadd.f32 %v3220_v9, %v7003_v32 }
0x188b   :  { %5630 = vtanh.f32 %v3222_v60 }
0x1890   :  { %v3184_v20 = vpop.permute.xlu2 %3183 }
0x1891   :  { %v5631_v6 = vpop.eup %5630 }
0x1892   :  { %3226 = vrot.lane.b32.xlu0 %v5631_v6, %s5792_s22 }
0x18b7   :  { %v3172_v8 = vpop.permute.xlu1 %3171 }
0x18b8   :  { %v3174_v23 = vadd.f32 %v3172_v8, %v7009_v52 }
0x18ba   :  { %5632 = vtanh.f32 %v3174_v23 }
0x18c0   :  { %v5633_v31 = vpop.eup %5632 }
0x18c1   :  { %3178 = vrot.lane.b32.xlu1 %v5633_v31, %s5792_s22 }
0x18c5   :  { %v3270_v17 = vpop.permute.xlu0 %3269 }
0x18c6   :  { %v7269_v41 = vadd.f32 %v3270_v17, %v3262_v36 }
0x18c8   :  { %5634 = vtanh.f32 %v7269_v41 }
0x18c9   :  { %3230 = vrot.lane.b32.xlu1 %v3182_v0, %s5792_s22  ;;  %5636 = vpow2.f32 %v5355_v50  ;;  %v3186_v0 = vmul.f32 %v3184_v20, %v7255_v40  ;;  %v5430_v40 = vld [vmem:[%s7977_s7] ss:$0 sm:$0xff] }
0x18ce   :  { %v5635_v48 = vpop.eup %5634 }
0x18cf   :  { %3275 = vrot.lane.b32.xlu2 %v5635_v48, %s5789_s19  ;;  %v5637_v10 = vpop.eup %5636 }
0x18d0   :  { %v3243_v63 = vadd.f32 1.0, %v5637_v10 }
0x18d2   :  { %5638 = vrcp.f32 %v3243_v63  ;;  %v3255_v1 = vand.u32 2147483648, %v3243_v63  ;;  %vm3249_vm8 = vweird.f32 %v3243_v63  ;;  %v3253_v43 = vand.u32 2147483647, %v3243_v63 }
0x18d4   :  { %v3256_v7 = vor.u32 1.1754944e-38, %v3255_v1  ;;  %vm3254_vm11 = vcmp.eq.f32.partialorder %v3253_v43, 8.507059e+37 }
0x18d8   :  { %v5639_v16 = vpop.eup %5638 }
0x18d9   :  { %v3245_v44 = vmul.f32 %v5639_v16, %v3243_v63  ;;  %vm3250_vm4 = vweird.f32 %v5639_v16 }
0x18da   :  { %vm3251_vm10 = vmor %vm3249_vm8, %vm3250_vm4 }
0x18db   :  { %v3246_v45 = vsub.f32 1.0, %v3245_v44 }
0x18dd   :  { %v3247_v3 = vmul.f32 %v5639_v16, %v3246_v45 }
0x18df   :  { %v3248_v21 = vadd.f32 %v5639_v16, %v3247_v3 }
0x18e1   :  { %v3252_v57 = vsel %vm3251_vm10, %v5639_v16, %v3248_v21 }
0x18e2   :  { %v3257_v38 = vsel %vm3254_vm11, %v3256_v7, %v3252_v57 }
0x1904   :  { %v3227_v54 = vpop.permute.xlu0 %3226 }
0x1905   :  { %v3229_v34 = vmul.f32 %v3227_v54, %v3224_v58 }
0x1929   :  { %v3276_v26 = vpop.permute.xlu2 %3275 }
0x192a   :  { %v3278_v46 = vmul.f32 %v3276_v26, %v3257_v38 }
0x192c   :  { %3288 = vrot.lane.b32.xlu2 %v3278_v46, %s5791_s17 }
0x1933   :  { %v3179_v61 = vpop.permute.xlu1 %3178 }
0x1934   :  { %v3181_v13 = vmul.f32 %v3179_v61, %v3176_v55 }
0x1936   :  { %v3187_v22 = vadd.f32 %v3186_v0, %v3181_v13 }
0x1938   :  { %3280 = vrot.lane.b32.xlu0 %v3187_v22, %s5792_s22 }
0x193b   :  { %v3231_v11 = vpop.permute.xlu1 %3230 }
0x193c   :  { %v3233_v18 = vmul.f32 %v3231_v11, %v3209_v15 }
0x193e   :  { %v3234_v25 = vadd.f32 %v3233_v18, %v3229_v34 }
0x1940   :  { %3284 = vrot.lane.b32.xlu1 %v3234_v25, %s5791_s17  ;;  %3453 = vrot.lane.b32.xlu0 %v5430_v40, %s5789_s19 }
0x1986   :  { %v3289_v19 = vpop.permute.xlu2 %3288 }
0x19aa   :  { %v3281_v14 = vpop.permute.xlu0 %3280 }
0x19b2   :  { %v3285_v29 = vpop.permute.xlu1 %3284  ;;  %v3454_v37 = vpop.permute.xlu0 %3453 }
0x19b3   :  { %v3291_v24 = vsel %vm402_vm14, %v3281_v14, %v3285_v29 }
0x19b4   :  { %v7305_v27 = vsel %vm404_vm15, %v3291_v24, %v3289_v19 }
0x19b5   :  { %v3307_v30 = vrot.slane %v7305_v27, 1  ;;  %v3475_v61 = vrot.slane %v7305_v27, 7 }
0x19b7   :  { %5356 = vmatmul.msk.f32.vlgmr.msra.gmra.mxu3 %vm203_vm2, %v3307_v30  ;;  %5357 = vmatmul.msk.f32.vlgmr.msrb.gmra.mxu0 %vm203_vm2, %v3307_v30 }
0x19b8   :  { %5358 = vmatmul.msk.f32.vlgmr.msrb.gmra.mxu1 %vm203_vm2, %v3307_v30  ;;  %5359 = vmatmul.msk.f32.vlgmr.msrb.gmra.mxu2 %vm203_vm2, %v3307_v30 }
0x1a34   :  { %v3384_v42 = vpop.f32.mrf.mxu0 }
0x1a35   :  { %v3404_v49 = vpop.f32.mrf.mxu1  ;;  %v3456_v62 = vadd.f32 %v3454_v37, %v3384_v42  ;;  %v3428_v31 = vrot.slane %v3384_v42, 6 }
0x1a36   :  { %v3504_v39 = vadd.f32 %v3450_v51, %v3404_v49  ;;  %v3482_v63 = vrot.slane %v3404_v49, 6 }
0x1a37   :  { %v3458_v33 = vrot.slane %v3456_v62, 6  ;;  %v3430_v12 = vadd.f32 %v3428_v31, %v7009_v52  ;;  %v3553_v62 = vrot.slane %v7269_v41, 7 }
0x1a38   :  { %v3506_v15 = vrot.slane %v3504_v39, 6  ;;  %v3484_v44 = vadd.f32 %v3482_v63, %v7003_v32 }
0x1a39   :  { %3459 = vrot.lane.b32.xlu1 %v3458_v33, %s5789_s19  ;;  %v5360_v36 = vmul.f32 -1.442695, %v3430_v12 }
0x1a3a   :  { %3507 = vrot.lane.b32.xlu2 %v3506_v15, %s5789_s19  ;;  %v3327_v5 = vpop.f32.mrf.mxu3  ;;  %v5361_v3 = vmul.f32 -1.442695, %v3484_v44 }
0x1a3b   :  { %v3328_v9 = vadd.f32 %v3327_v5, %v3305_v56  ;;  %v3424_v60 = vpop.f32.mrf.mxu2 }
0x1a3c   :  { %v3529_v6 = vrot.slane %v3424_v60, 6 }
0x1a3d   :  { %3330 = vst.msk [vmem:[#allocation2 + $0x9] sm:$0x1] %vm442_vm3, %v3328_v9 }
0x1a3e   :  { %v7322_v8 = vadd.f32 %v3529_v6, %v7021_v2 }
0x1a40   :  { %5640 = vtanh.f32 %v7322_v8  ;;  %v5362_v5 = vmul.f32 -1.442695, %v7322_v8 }
0x1a41   :  { %5642 = vpow2.f32 %v5360_v36 }
0x1a46   :  { %v5641_v23 = vpop.eup %5640 }
0x1a47   :  { %3557 = vrot.lane.b32.xlu0 %v5641_v23, %s5789_s19  ;;  %v5643_v17 = vpop.eup %5642 }
0x1a48   :  { %v3434_v48 = vadd.f32 1.0, %v5643_v17 }
0x1a4a   :  { %5644 = vrcp.f32 %v3434_v48  ;;  %v3446_v21 = vand.u32 2147483648, %v3434_v48  ;;  %vm3440_vm13 = vweird.f32 %v3434_v48  ;;  %v3444_v1 = vand.u32 2147483647, %v3434_v48 }
0x1a4b   :  { %5646 = vpow2.f32 %v5361_v3 }
0x1a4c   :  { %v3447_v57 = vor.u32 1.1754944e-38, %v3446_v21  ;;  %vm3445_vm8 = vcmp.eq.f32.partialorder %v3444_v1, 8.507059e+37 }
0x1a50   :  { %v5645_v50 = vpop.eup %5644 }
0x1a51   :  { %v3436_v10 = vmul.f32 %v5645_v50, %v3434_v48  ;;  %vm3441_vm1 = vweird.f32 %v5645_v50  ;;  %v5647_v46 = vpop.eup %5646 }
0x1a52   :  { %vm3442_vm4 = vmor %vm3440_vm13, %vm3441_vm1  ;;  %v3488_v55 = vadd.f32 1.0, %v5647_v46 }
0x1a53   :  { %v3437_v16 = vsub.f32 1.0, %v3436_v10 }
0x1a54   :  { %5648 = vrcp.f32 %v3488_v55  ;;  %v3500_v18 = vand.u32 2147483648, %v3488_v55  ;;  %vm3494_vm11 = vweird.f32 %v3488_v55  ;;  %v3498_v25 = vand.u32 2147483647, %v3488_v55 }
0x1a55   :  { %v3438_v45 = vmul.f32 %v5645_v50, %v3437_v16 }
0x1a56   :  { %v3501_v14 = vor.u32 1.1754944e-38, %v3500_v18  ;;  %vm3499_vm13 = vcmp.eq.f32.partialorder %v3498_v25, 8.507059e+37  ;;  %v3642_v18 = vld [vmem:[#allocation4 + $0x90] sm:$0xff]  ;;  %v7381_v25 = vld [vmem:[#allocation4 + $0x98] sm:$0xff] }
0x1a57   :  { %v3439_v20 = vadd.f32 %v5645_v50, %v3438_v45 }
0x1a59   :  { %v3443_v43 = vsel %vm3442_vm4, %v5645_v50, %v3439_v20 }
0x1a5a   :  { %v7328_v38 = vsel %vm3445_vm8, %v3447_v57, %v3443_v43  ;;  %v5649_v0 = vpop.eup %5648 }
0x1a5b   :  { %v3490_v13 = vmul.f32 %v5649_v0, %v3488_v55  ;;  %vm3495_vm10 = vweird.f32 %v5649_v0  ;;  %v3469_v44 = vsub.f32 1.0, %v7328_v38  ;;  %v7353_v55 = vld [vmem:[#allocation4 + $0x108] sm:$0xff] }
0x1a5c   :  { %vm3496_vm1 = vmor %vm3494_vm11, %vm3495_vm10  ;;  %3664 = vmatpush.msra.mxu0 %v7353_v55 }
0x1a5d   :  { %v3491_v22 = vsub.f32 1.0, %v3490_v13  ;;  %v7363_v13 = vld [vmem:[#allocation4 + $0xd8] sm:$0xff] }
0x1a5f   :  { %v3492_v11 = vmul.f32 %v5649_v0, %v3491_v22  ;;  %v7365_v22 = vld [vmem:[#allocation4 + $0xe0] sm:$0xff] }
0x1a61   :  { %v3493_v34 = vadd.f32 %v5649_v0, %v3492_v11  ;;  %v7375_v11 = vld [vmem:[#allocation4 + $0xa8] sm:$0xff] }
0x1a63   :  { %v3497_v40 = vsel %vm3496_vm1, %v5649_v0, %v3493_v34  ;;  %v7357_v0 = vld [vmem:[#allocation4 + $0xf0] sm:$0xff] }
0x1a64   :  { %v3502_v29 = vsel %vm3499_vm13, %v3501_v14, %v3497_v40  ;;  %3665 = vmatpush.msra.mxu0 %v7357_v0  ;;  %v7377_v34 = vld [vmem:[#allocation4 + $0xb0] sm:$0xff]  ;;  %v3639_v40 = vld [vmem:[#allocation4 + $0x78] sm:$0xff]  ;;  %v7386_v14 = vld [vmem:[#allocation4 + $0x80] sm:$0xff] }
0x1a65   :  { %v3555_v39 = vmul.f32 %v3553_v62, %v3502_v29  ;;  %v3517_v43 = vsub.f32 1.0, %v3502_v29 }
0x1a66   :  { %3666 = vmatpush.msra.mxu0 %v7363_v13 }
0x1a94   :  { %v3508_v7 = vpop.permute.xlu2 %3507 }
0x1a95   :  { %v3510_v26 = vmul.f32 %v3508_v7, %v7328_v38 }
0x1a97   :  { %3512 = vrot.lane.b32.xlu2 %v3510_v26, %s5789_s19 }
0x1a9f   :  { %3476 = vrot.lane.b32.xlu2 %v3475_v61, %s5791_s17 }
0x1aab   :  { %v3460_v54 = vpop.permute.xlu1 %3459 }
0x1aac   :  { %v3462_v58 = vmul.f32 %v3460_v54, %v7328_v38  ;;  %v7369_v54 = vld [vmem:[#allocation4 + $0xc0] sm:$0xff] }
0x1aad   :  { %3667 = vmatpush.msra.mxu0 %v7369_v54 }
0x1aae   :  { %3464 = vrot.lane.b32.xlu1 %v3462_v58, %s5789_s19  ;;  %v7371_v58 = vld [vmem:[#allocation4 + $0xc8] sm:$0xff] }
0x1aaf   :  { %3668 = vmatpush.msra.mxu0 %v7375_v11 }
0x1ab1   :  { %3669 = vmatpush.msra.mxu0 %v3642_v18 }
0x1ab3   :  { %3670 = vmatpush.msra.mxu0 %v3639_v40 }
0x1ab9   :  { %v3558_v19 = vpop.permute.xlu0 %3557 }
0x1aba   :  { %v3560_v24 = vmul.f32 %v3558_v19, %v3502_v29  ;;  %v3633_v19 = vld [vmem:[#allocation4 + $0x48] sm:$0xff] }
0x1abc   :  { %3562 = vrot.lane.b32.xlu0 %v3560_v24, %s5791_s17  ;;  %v3630_v24 = vld [vmem:[#allocation4 + $0x30] sm:$0xff] }
0x1af1   :  { %v3513_v27 = vpop.permute.xlu2 %3512 }
0x1af2   :  { %v3515_v30 = vadd.f32 %v3513_v27, %v7003_v32  ;;  %v3627_v27 = vld [vmem:[#allocation4 + $0x18] sm:$0xff] }
0x1af4   :  { %5650 = vtanh.f32 %v3515_v30  ;;  %v3624_v30 = vld [vmem:[#allocation4] sm:$0xff] }
0x1af9   :  { %v3477_v12 = vpop.permute.xlu2 %3476 }
0x1afa   :  { %v5651_v37 = vpop.eup %5650  ;;  %v3479_v3 = vmul.f32 %v3477_v12, %v7328_v38  ;;  %v7361_v38 = vld [vmem:[#allocation4 + $0xf8] sm:$0xff] }
0x1afb   :  { %3519 = vrot.lane.b32.xlu0 %v5651_v37, %s5792_s22 }
0x1b20   :  { %v3465_v51 = vpop.permute.xlu1 %3464 }
0x1b21   :  { %v3467_v42 = vadd.f32 %v3465_v51, %v7009_v52 }
0x1b23   :  { %5652 = vtanh.f32 %v3467_v42 }
0x1b29   :  { %v5653_v49 = vpop.eup %5652 }
0x1b2a   :  { %3471 = vrot.lane.b32.xlu1 %v5653_v49, %s5792_s22  ;;  %v3743_v49 = vld [vmem:[%s7977_s7] sm:$0x1] }
0x1b2e   :  { %v3563_v33 = vpop.permute.xlu0 %3562 }
0x1b2f   :  { %v7342_v15 = vadd.f32 %v3563_v33, %v3555_v39 }
0x1b31   :  { %5654 = vtanh.f32 %v7342_v15 }
0x1b32   :  { %3523 = vrot.lane.b32.xlu1 %v3475_v61, %s5792_s22  ;;  %5656 = vpow2.f32 %v5362_v5  ;;  %v7355_v61 = vld [vmem:[#allocation4 + $0x110] sm:$0xff] }
0x1b33   :  { %3684 = vmatpush.msra.mxu1 %v7355_v61 }
0x1b35   :  { %3685 = vmatpush.msra.mxu1 %v7361_v38 }
0x1b37   :  { %v5655_v56 = vpop.eup %5654  ;;  %3686 = vmatpush.msra.mxu1 %v7365_v22 }
0x1b38   :  { %3568 = vrot.lane.b32.xlu2 %v5655_v56, %s5789_s19  ;;  %v5657_v9 = vpop.eup %5656 }
0x1b39   :  { %v3536_v60 = vadd.f32 1.0, %v5657_v9  ;;  %3687 = vmatpush.msra.mxu1 %v7371_v58 }
0x1b3b   :  { %5658 = vrcp.f32 %v3536_v60  ;;  %v3548_v17 = vand.u32 2147483648, %v3536_v60  ;;  %vm3542_vm8 = vweird.f32 %v3536_v60  ;;  %v3546_v48 = vand.u32 2147483647, %v3536_v60  ;;  %3688 = vmatpush.msra.mxu1 %v7377_v34 }
0x1b3d   :  { %v3549_v10 = vor.u32 1.1754944e-38, %v3548_v17  ;;  %vm3547_vm11 = vcmp.eq.f32.partialorder %v3546_v48, 8.507059e+37  ;;  %3689 = vmatpush.msra.mxu1 %v7381_v25 }
0x1b3f   :  { %3690 = vmatpush.msra.mxu1 %v7386_v14 }
0x1b41   :  { %v5659_v6 = vpop.eup %5658  ;;  %3691 = vmatpush.msra.mxu1 %v7097_v47  ;;  %v5431_v47 = vld [vmem:[%s7977_s7] ss:$0 sm:$0xff] }
0x1b42   :  { %v3538_v23 = vmul.f32 %v5659_v6, %v3536_v60  ;;  %vm3543_vm4 = vweird.f32 %v5659_v6  ;;  %v3598_v60 = vld [vmem:[%s7979_s9] sm:$0x1] }
0x1b43   :  { %vm3544_vm10 = vmor %vm3542_vm8, %vm3543_vm4  ;;  %3692 = vmatpush.msra.mxu1 %v7106_v53 }
0x1b44   :  { %v3539_v41 = vsub.f32 1.0, %v3538_v23 }
0x1b45   :  { %3693 = vmatpush.msra.mxu1 %v7111_v28 }
0x1b46   :  { %v3540_v31 = vmul.f32 %v5659_v6, %v3539_v41 }
0x1b47   :  { %3694 = vmatpush.msra.mxu1 %v7123_v35 }
0x1b48   :  { %v3541_v36 = vadd.f32 %v5659_v6, %v3540_v31 }
0x1b49   :  { %3695 = vmatpush.msra.mxu1 %v7175_v59 }
0x1b4a   :  { %v3545_v50 = vsel %vm3544_vm10, %v5659_v6, %v3541_v36 }
0x1b4b   :  { %v3550_v63 = vsel %vm3547_vm11, %v3549_v10, %v3545_v50  ;;  %3977 = vmatpush.msrb.mxu1 %v7355_v61 }
0x1b4d   :  { %3978 = vmatpush.msrb.mxu1 %v7361_v38 }
0x1b4f   :  { %3979 = vmatpush.msrb.mxu1 %v7365_v22 }
0x1b51   :  { %3980 = vmatpush.msrb.mxu1 %v7371_v58 }
0x1b53   :  { %3981 = vmatpush.msrb.mxu1 %v7377_v34 }
0x1b55   :  { %3982 = vmatpush.msrb.mxu1 %v7381_v25 }
0x1b57   :  { %3983 = vmatpush.msrb.mxu1 %v7386_v14 }
0x1b6d   :  { %v3520_v1 = vpop.permute.xlu0 %3519 }
0x1b6e   :  { %v3522_v7 = vmul.f32 %v3520_v1, %v3517_v43 }
0x1b92   :  { %v3569_v8 = vpop.permute.xlu2 %3568 }
0x1b93   :  { %v3571_v16 = vmul.f32 %v3569_v8, %v3550_v63 }
0x1b95   :  { %3581 = vrot.lane.b32.xlu2 %v3571_v16, %s5791_s17 }
0x1b9c   :  { %v3472_v45 = vpop.permute.xlu1 %3471 }
0x1b9d   :  { %v3474_v20 = vmul.f32 %v3472_v45, %v3469_v44 }
0x1b9f   :  { %v3480_v21 = vadd.f32 %v3479_v3, %v3474_v20 }
0x1ba1   :  { %3573 = vrot.lane.b32.xlu0 %v3480_v21, %s5792_s22 }
0x1ba4   :  { %v3524_v57 = vpop.permute.xlu1 %3523 }
0x1ba5   :  { %v3526_v26 = vmul.f32 %v3524_v57, %v3502_v29  ;;  %v3636_v29 = vld [vmem:[#allocation4 + $0x60] sm:$0xff] }
0x1ba6   :  { %3671 = vmatpush.msra.mxu0 %v3636_v29 }
0x1ba7   :  { %v3527_v46 = vadd.f32 %v3526_v26, %v3522_v7 }
0x1ba8   :  { %3672 = vmatpush.msra.mxu0 %v3633_v19 }
0x1ba9   :  { %3577 = vrot.lane.b32.xlu1 %v3527_v46, %s5791_s17  ;;  %3746 = vrot.lane.b32.xlu0 %v5431_v47, %s5789_s19 }
0x1baa   :  { %3673 = vmatpush.msra.mxu0 %v3630_v24 }
0x1bac   :  { %3674 = vmatpush.msra.mxu0 %v3627_v27 }
0x1bae   :  { %3675 = vmatpush.msra.mxu0 %v3624_v30 }
0x1bb0   :  { %3957 = vmatpush.msrb.mxu0 %v7353_v55 }
0x1bb2   :  { %3958 = vmatpush.msrb.mxu0 %v7357_v0 }
0x1bb4   :  { %3959 = vmatpush.msrb.mxu0 %v7363_v13 }
0x1bb6   :  { %3960 = vmatpush.msrb.mxu0 %v7369_v54 }
0x1bb8   :  { %3961 = vmatpush.msrb.mxu0 %v7375_v11 }
0x1bba   :  { %3962 = vmatpush.msrb.mxu0 %v3642_v18 }
0x1bbc   :  { %3963 = vmatpush.msrb.mxu0 %v3639_v40 }
0x1bbe   :  { %3964 = vmatpush.msrb.mxu0 %v3636_v29 }
0x1bc0   :  { %3965 = vmatpush.msrb.mxu0 %v3633_v19 }
0x1bc2   :  { %3966 = vmatpush.msrb.mxu0 %v3630_v24 }
0x1bc4   :  { %3967 = vmatpush.msrb.mxu0 %v3627_v27 }
0x1bc6   :  { %3968 = vmatpush.msrb.mxu0 %v3624_v30 }
0x1bef   :  { %v3582_v35 = vpop.permute.xlu2 %3581 }
0x1c13   :  { %v3574_v53 = vpop.permute.xlu0 %3573 }
0x1c1b   :  { %v3578_v28 = vpop.permute.xlu1 %3577  ;;  %v3747_v42 = vpop.permute.xlu0 %3746 }
0x1c1c   :  { %v3584_v59 = vsel %vm402_vm14, %v3574_v53, %v3578_v28 }
0x1c1d   :  { %v7412_v37 = vsel %vm404_vm15, %v3584_v59, %v3582_v35 }
0x1c1e   :  { %v3600_v51 = vrot.slane %v7412_v37, 2 }
0x1c20   :  { %5363 = vmatmul.msk.f32.vlgmr.msrb.gmra.mxu3 %vm203_vm2, %v3600_v51  ;;  %5364 = vmatmul.msk.f32.vlgmr.msra.gmra.mxu0 %vm203_vm2, %v3600_v51 }
0x1c21   :  { %5365 = vmatmul.msk.f32.vlgmr.msra.gmra.mxu1 %vm203_vm2, %v3600_v51  ;;  %5366 = vmatmul.msk.f32.vlgmr.msra.gmra.mxu2 %vm203_vm2, %v3600_v51 }
0x1c22   :  { %4250 = vmatpush.msra.mxu0 %v7353_v55 }
0x1c24   :  { %4251 = vmatpush.msra.mxu0 %v7357_v0 }
0x1c26   :  { %4252 = vmatpush.msra.mxu0 %v7363_v13 }
0x1c28   :  { %4253 = vmatpush.msra.mxu0 %v7369_v54 }
0x1c2a   :  { %4254 = vmatpush.msra.mxu0 %v7375_v11  ;;  %v3768_v11 = vrot.slane %v7412_v37, 7 }
0x1c2c   :  { %4255 = vmatpush.msra.mxu0 %v3642_v18 }
0x1c2e   :  { %4256 = vmatpush.msra.mxu0 %v3639_v40 }
0x1c30   :  { %4257 = vmatpush.msra.mxu0 %v3636_v29 }
0x1c32   :  { %4258 = vmatpush.msra.mxu0 %v3633_v19 }
0x1c34   :  { %4259 = vmatpush.msra.mxu0 %v3630_v24 }
0x1c36   :  { %4260 = vmatpush.msra.mxu0 %v3627_v27 }
0x1c38   :  { %4261 = vmatpush.msra.mxu0 %v3624_v30 }
0x1c9d   :  { %v3677_v62 = vpop.f32.mrf.mxu0 }
0x1c9e   :  { %v3697_v39 = vpop.f32.mrf.mxu1  ;;  %v3749_v33 = vadd.f32 %v3747_v42, %v3677_v62  ;;  %v3721_v17 = vrot.slane %v3677_v62, 5 }
0x1c9f   :  { %v3797_v56 = vadd.f32 %v3743_v49, %v3697_v39  ;;  %v3775_v44 = vrot.slane %v3697_v39, 5 }
0x1ca0   :  { %v3751_v5 = vrot.slane %v3749_v33, 5  ;;  %v3723_v48 = vadd.f32 %v3721_v17, %v7009_v52 }
0x1ca1   :  { %v3799_v9 = vrot.slane %v3797_v56, 5  ;;  %v3777_v3 = vadd.f32 %v3775_v44, %v7003_v32 }
0x1ca2   :  { %3752 = vrot.lane.b32.xlu1 %v3751_v5, %s5789_s19  ;;  %v5367_v50 = vmul.f32 -1.442695, %v3723_v48  ;;  %v3846_v5 = vrot.slane %v7342_v15, 7 }
0x1ca3   :  { %3800 = vrot.lane.b32.xlu2 %v3799_v9, %s5789_s19  ;;  %v3620_v6 = vpop.f32.mrf.mxu3  ;;  %v5368_v21 = vmul.f32 -1.442695, %v3777_v3 }
0x1ca4   :  { %v3621_v23 = vadd.f32 %v3620_v6, %v3598_v60  ;;  %v3717_v41 = vpop.f32.mrf.mxu2 }
0x1ca5   :  { %v3822_v31 = vrot.slane %v3717_v41, 5 }
0x1ca6   :  { %3623 = vst.msk [vmem:[#allocation2 + $0xa] sm:$0x1] %vm442_vm3, %v3621_v23 }
0x1ca7   :  { %v7434_v12 = vadd.f32 %v3822_v31, %v7021_v2 }
0x1ca9   :  { %5660 = vtanh.f32 %v7434_v12  ;;  %v5369_v41 = vmul.f32 -1.442695, %v7434_v12 }
0x1caa   :  { %5662 = vpow2.f32 %v5367_v50 }
0x1caf   :  { %v5661_v36 = vpop.eup %5660 }
0x1cb0   :  { %3850 = vrot.lane.b32.xlu0 %v5661_v36, %s5789_s19  ;;  %v5663_v10 = vpop.eup %5662 }
0x1cb1   :  { %v3727_v63 = vadd.f32 1.0, %v5663_v10 }
0x1cb3   :  { %5664 = vrcp.f32 %v3727_v63  ;;  %v3739_v43 = vand.u32 2147483648, %v3727_v63  ;;  %vm3733_vm13 = vweird.f32 %v3727_v63  ;;  %v3737_v57 = vand.u32 2147483647, %v3727_v63 }
0x1cb4   :  { %5666 = vpow2.f32 %v5368_v21 }
0x1cb5   :  { %v3740_v26 = vor.u32 1.1754944e-38, %v3739_v43  ;;  %vm3738_vm8 = vcmp.eq.f32.partialorder %v3737_v57, 8.507059e+37 }
0x1cb9   :  { %v5665_v8 = vpop.eup %5664 }
0x1cba   :  { %v3729_v16 = vmul.f32 %v5665_v8, %v3727_v63  ;;  %vm3734_vm1 = vweird.f32 %v5665_v8  ;;  %v5667_v13 = vpop.eup %5666 }
0x1cbb   :  { %vm3735_vm4 = vmor %vm3733_vm13, %vm3734_vm1  ;;  %v3781_v54 = vadd.f32 1.0, %v5667_v13 }
0x1cbc   :  { %v3730_v45 = vsub.f32 1.0, %v3729_v16 }
0x1cbd   :  { %5668 = vrcp.f32 %v3781_v54  ;;  %v3793_v47 = vand.u32 2147483648, %v3781_v54  ;;  %vm3787_vm11 = vweird.f32 %v3781_v54  ;;  %v3791_v53 = vand.u32 2147483647, %v3781_v54 }
0x1cbe   :  { %v3731_v20 = vmul.f32 %v5665_v8, %v3730_v45 }
0x1cbf   :  { %v3794_v35 = vor.u32 1.1754944e-38, %v3793_v47  ;;  %vm3792_vm13 = vcmp.eq.f32.partialorder %v3791_v53, 8.507059e+37  ;;  %v7502_v47 = vld [vmem:[%s7978_s8 + $0x38] sm:$0xff] }
0x1cc0   :  { %v3732_v1 = vadd.f32 %v5665_v8, %v3731_v20  ;;  %v7504_v53 = vld [vmem:[#allocation4 + $0xb8] sm:$0xff] }
0x1cc2   :  { %v3736_v7 = vsel %vm3735_vm4, %v5665_v8, %v3732_v1 }
0x1cc3   :  { %v7440_v55 = vsel %vm3738_vm8, %v3740_v26, %v3736_v7  ;;  %v5669_v18 = vpop.eup %5668 }
0x1cc4   :  { %v3783_v40 = vmul.f32 %v5669_v18, %v3781_v54  ;;  %vm3788_vm10 = vweird.f32 %v5669_v18  ;;  %v3762_v21 = vsub.f32 1.0, %v7440_v55 }
0x1cc5   :  { %vm3789_vm1 = vmor %vm3787_vm11, %vm3788_vm10 }
0x1cc6   :  { %v3784_v29 = vsub.f32 1.0, %v3783_v40  ;;  %v7470_v40 = vld [vmem:[#allocation4 + $0x118] sm:$0xff] }
0x1cc7   :  { %3997 = vmatpush.msrb.mxu2 %v7470_v40 }
0x1cc8   :  { %v3785_v27 = vmul.f32 %v5669_v18, %v3784_v29  ;;  %v7479_v29 = vld [vmem:[#allocation4 + $0x100] sm:$0xff] }
0x1cc9   :  { %3998 = vmatpush.msrb.mxu2 %v7479_v29 }
0x1cca   :  { %v3786_v30 = vadd.f32 %v5669_v18, %v3785_v27  ;;  %v7493_v27 = vld [vmem:[%s7978_s8 + $0x40] sm:$0xff] }
0x1ccc   :  { %v3790_v28 = vsel %vm3789_vm1, %v5669_v18, %v3786_v30  ;;  %v7468_v18 = vld [vmem:[%s7978_s8 + $0x58] sm:$0xff]  ;;  %v7495_v30 = vld [vmem:[#allocation4 + $0xd0] sm:$0xff] }
0x1ccd   :  { %v3795_v59 = vsel %vm3792_vm13, %v3794_v35, %v3790_v28  ;;  %3900 = vmatpush.msra.mxu3 %v7468_v18  ;;  %v7511_v28 = vld [vmem:[%s7978_s8 + $0x30] sm:$0xff]  ;;  %v7513_v35 = vld [vmem:[#allocation4 + $0xa0] sm:$0xff] }
0x1cce   :  { %v3848_v9 = vmul.f32 %v3846_v5, %v3795_v59  ;;  %v7555_v5 = vld [vmem:[%s7978_s8 + $0x10] sm:$0xff] }
0x1cfd   :  { %v3801_v46 = vpop.permute.xlu2 %3800 }
0x1cfe   :  { %v3803_v0 = vmul.f32 %v3801_v46, %v7440_v55  ;;  %v3810_v46 = vsub.f32 1.0, %v3795_v59 }
0x1d00   :  { %3805 = vrot.lane.b32.xlu2 %v3803_v0, %s5789_s19 }
0x1d08   :  { %3769 = vrot.lane.b32.xlu2 %v3768_v11, %s5791_s17 }
0x1d14   :  { %v3753_v19 = vpop.permute.xlu1 %3752 }
0x1d15   :  { %v3755_v24 = vmul.f32 %v3753_v19, %v7440_v55  ;;  %v7484_v19 = vld [vmem:[%s7978_s8 + $0x48] sm:$0xff] }
0x1d17   :  { %3757 = vrot.lane.b32.xlu1 %v3755_v24, %s5789_s19  ;;  %v7486_v24 = vld [vmem:[#allocation4 + $0xe8] sm:$0xff] }
0x1d18   :  { %3999 = vmatpush.msrb.mxu2 %v7486_v24 }
0x1d1a   :  { %4000 = vmatpush.msrb.mxu2 %v7495_v30 }
0x1d1c   :  { %4001 = vmatpush.msrb.mxu2 %v7504_v53 }
0x1d1e   :  { %4002 = vmatpush.msrb.mxu2 %v7513_v35 }
0x1d22   :  { %v3851_v37 = vpop.permute.xlu0 %3850 }
0x1d23   :  { %v3853_v51 = vmul.f32 %v3851_v37, %v3795_v59  ;;  %v7524_v37 = vld [vmem:[#allocation4 + $0x88] sm:$0xff] }
0x1d24   :  { %4003 = vmatpush.msrb.mxu2 %v7524_v37 }
0x1d25   :  { %3855 = vrot.lane.b32.xlu0 %v3853_v51, %s5791_s17  ;;  %v7529_v51 = vld [vmem:[%s7978_s8 + $0x20] sm:$0xff] }
0x1d5a   :  { %v3806_v42 = vpop.permute.xlu2 %3805 }
0x1d5b   :  { %v3808_v49 = vadd.f32 %v3806_v42, %v7003_v32  ;;  %v7533_v42 = vld [vmem:[#allocation4 + $0x68] sm:$0xff] }
0x1d5c   :  { %3984 = vmatpush.msrb.mxu1 %v7533_v42 }
0x1d5d   :  { %5670 = vtanh.f32 %v3808_v49  ;;  %v7535_v49 = vld [vmem:[#allocation4 + $0x70] sm:$0xff] }
0x1d5e   :  { %4004 = vmatpush.msrb.mxu2 %v7535_v49 }
0x1d62   :  { %v3770_v10 = vpop.permute.xlu2 %3769 }
0x1d63   :  { %v5671_v62 = vpop.eup %5670  ;;  %v3772_v43 = vmul.f32 %v3770_v10, %v7440_v55  ;;  %v7475_v55 = vld [vmem:[%s7978_s8 + $0x50] sm:$0xff] }
0x1d64   :  { %3812 = vrot.lane.b32.xlu0 %v5671_v62, %s5792_s22  ;;  %3901 = vmatpush.msra.mxu3 %v7475_v55  ;;  %v7541_v62 = vld [vmem:[%s7978_s8 + $0x18] sm:$0xff] }
0x1d66   :  { %3902 = vmatpush.msra.mxu3 %v7484_v19 }
0x1d68   :  { %3903 = vmatpush.msra.mxu3 %v7493_v27 }
0x1d6a   :  { %3904 = vmatpush.msra.mxu3 %v7502_v47 }
0x1d6c   :  { %3905 = vmatpush.msra.mxu3 %v7511_v28 }
0x1d89   :  { %v3758_v39 = vpop.permute.xlu1 %3757 }
0x1d8a   :  { %v3760_v33 = vadd.f32 %v3758_v39, %v7009_v52  ;;  %v7543_v39 = vld [vmem:[#allocation4 + $0x50] sm:$0xff] }
0x1d8b   :  { %3985 = vmatpush.msrb.mxu1 %v7543_v39 }
0x1d8c   :  { %5672 = vtanh.f32 %v3760_v33  ;;  %v7545_v33 = vld [vmem:[#allocation4 + $0x58] sm:$0xff] }
0x1d8d   :  { %4005 = vmatpush.msrb.mxu2 %v7545_v33 }
0x1d92   :  { %v5673_v56 = vpop.eup %5672 }
0x1d93   :  { %3764 = vrot.lane.b32.xlu1 %v5673_v56, %s5792_s22  ;;  %v7549_v56 = vld [vmem:[#allocation4 + $0x38] sm:$0xff] }
0x1d94   :  { %3986 = vmatpush.msrb.mxu1 %v7549_v56 }
0x1d97   :  { %v3856_v60 = vpop.permute.xlu0 %3855 }
0x1d98   :  { %v7454_v6 = vadd.f32 %v3856_v60, %v3848_v9  ;;  %v7557_v9 = vld [vmem:[#allocation4 + $0x40] sm:$0xff] }
0x1d99   :  { %4006 = vmatpush.msrb.mxu2 %v7557_v9  ;;  %v7565_v60 = vld [vmem:[#allocation4 + $0x20] sm:$0xff] }
0x1d9a   :  { %5674 = vtanh.f32 %v7454_v6  ;;  %3987 = vmatpush.msrb.mxu1 %v7565_v60 }
0x1d9b   :  { %3816 = vrot.lane.b32.xlu1 %v3768_v11, %s5792_s22  ;;  %5676 = vpow2.f32 %v5369_v41  ;;  %v7572_v41 = vld [vmem:[%s7978_s8] sm:$0xff] }
0x1da0   :  { %v5675_v23 = vpop.eup %5674 }
0x1da1   :  { %3861 = vrot.lane.b32.xlu2 %v5675_v23, %s5789_s19  ;;  %v5677_v31 = vpop.eup %5676  ;;  %v7567_v23 = vld [vmem:[#allocation4 + $0x28] sm:$0xff] }
0x1da2   :  { %v3829_v36 = vadd.f32 1.0, %v5677_v31  ;;  %4007 = vmatpush.msrb.mxu2 %v7567_v23  ;;  %v7576_v31 = vld [vmem:[#allocation4 + $0x8] sm:$0xff] }
0x1da3   :  { %3988 = vmatpush.msrb.mxu1 %v7576_v31 }
0x1da4   :  { %5678 = vrcp.f32 %v3829_v36  ;;  %v3841_v8 = vand.u32 2147483648, %v3829_v36  ;;  %vm3835_vm8 = vweird.f32 %v3829_v36  ;;  %v3839_v16 = vand.u32 2147483647, %v3829_v36 }
0x1da5   :  { %4270 = vmatpush.msra.mxu1 %v7355_v61 }
0x1da6   :  { %v3842_v45 = vor.u32 1.1754944e-38, %v3841_v8  ;;  %vm3840_vm11 = vcmp.eq.f32.partialorder %v3839_v16, 8.507059e+37  ;;  %v3891_v16 = vld [vmem:[%s7979_s9] sm:$0x1] }
0x1da7   :  { %4271 = vmatpush.msra.mxu1 %v7361_v38 }
0x1da9   :  { %4272 = vmatpush.msra.mxu1 %v7365_v22 }
0x1daa   :  { %v5679_v17 = vpop.eup %5678 }
0x1dab   :  { %v3831_v48 = vmul.f32 %v5679_v17, %v3829_v36  ;;  %vm3836_vm4 = vweird.f32 %v5679_v17  ;;  %v3919_v36 = vld [vmem:[#allocation4 + $0x10] sm:$0xff]  ;;  %4273 = vmatpush.msra.mxu1 %v7371_v58 }
0x1dac   :  { %vm3837_vm10 = vmor %vm3835_vm8, %vm3836_vm4  ;;  %4008 = vmatpush.msrb.mxu2 %v3919_v36 }
0x1dad   :  { %v3832_v15 = vsub.f32 1.0, %v3831_v48  ;;  %4274 = vmatpush.msra.mxu1 %v7377_v34 }
0x1dae   :  { %4290 = vmatpush.msra.mxu2 %v7470_v40 }
0x1daf   :  { %v3833_v50 = vmul.f32 %v5679_v17, %v3832_v15  ;;  %4275 = vmatpush.msra.mxu1 %v7381_v25 }
0x1db0   :  { %4291 = vmatpush.msra.mxu2 %v7479_v29 }
0x1db1   :  { %v3834_v63 = vadd.f32 %v5679_v17, %v3833_v50  ;;  %4276 = vmatpush.msra.mxu1 %v7386_v14 }
0x1db2   :  { %4292 = vmatpush.msra.mxu2 %v7486_v24 }
0x1db3   :  { %v3838_v44 = vsel %vm3837_vm10, %v5679_v17, %v3834_v63  ;;  %4277 = vmatpush.msra.mxu1 %v7533_v42  ;;  %v4036_v17 = vld [vmem:[%s7977_s7] sm:$0x1] }
0x1db4   :  { %v3843_v3 = vsel %vm3840_vm11, %v3842_v45, %v3838_v44  ;;  %4293 = vmatpush.msra.mxu2 %v7495_v30 }
0x1db5   :  { %4278 = vmatpush.msra.mxu1 %v7543_v39 }
0x1db6   :  { %4294 = vmatpush.msra.mxu2 %v7504_v53 }
0x1db7   :  { %4279 = vmatpush.msra.mxu1 %v7549_v56 }
0x1db8   :  { %4295 = vmatpush.msra.mxu2 %v7513_v35 }
0x1db9   :  { %4280 = vmatpush.msra.mxu1 %v7565_v60 }
0x1dba   :  { %4296 = vmatpush.msra.mxu2 %v7524_v37 }
0x1dbb   :  { %4281 = vmatpush.msra.mxu1 %v7576_v31 }
0x1dbc   :  { %4297 = vmatpush.msra.mxu2 %v7535_v49 }
0x1dbe   :  { %4298 = vmatpush.msra.mxu2 %v7545_v33 }
0x1dc0   :  { %4299 = vmatpush.msra.mxu2 %v7557_v9 }
0x1dc2   :  { %4300 = vmatpush.msra.mxu2 %v7567_v23 }
0x1dc4   :  { %4301 = vmatpush.msra.mxu2 %v3919_v36 }
0x1dd6   :  { %v3813_v26 = vpop.permute.xlu0 %3812 }
0x1dd7   :  { %v3815_v13 = vmul.f32 %v3813_v26, %v3810_v46 }
0x1dfb   :  { %v3862_v12 = vpop.permute.xlu2 %3861 }
0x1dfc   :  { %v3864_v20 = vmul.f32 %v3862_v12, %v3843_v3 }
0x1dfe   :  { %3874 = vrot.lane.b32.xlu2 %v3864_v20, %s5791_s17 }
0x1e05   :  { %v3765_v1 = vpop.permute.xlu1 %3764 }
0x1e06   :  { %v3767_v57 = vmul.f32 %v3765_v1, %v3762_v21 }
0x1e08   :  { %v3773_v7 = vadd.f32 %v3772_v43, %v3767_v57 }
0x1e0a   :  { %3866 = vrot.lane.b32.xlu0 %v3773_v7, %s5792_s22 }
0x1e0d   :  { %v3817_v0 = vpop.permute.xlu1 %3816 }
0x1e0e   :  { %v3819_v54 = vmul.f32 %v3817_v0, %v3795_v59  ;;  %v7522_v59 = vld [vmem:[%s7978_s8 + $0x28] sm:$0xff] }
0x1e0f   :  { %3906 = vmatpush.msra.mxu3 %v7522_v59 }
0x1e10   :  { %v3820_v11 = vadd.f32 %v3819_v54, %v3815_v13 }
0x1e11   :  { %3907 = vmatpush.msra.mxu3 %v7529_v51 }
0x1e12   :  { %3870 = vrot.lane.b32.xlu1 %v3820_v11, %s5791_s17 }
0x1e13   :  { %3908 = vmatpush.msra.mxu3 %v7541_v62 }
0x1e15   :  { %3909 = vmatpush.msra.mxu3 %v7555_v5 }
0x1e17   :  { %3910 = vmatpush.msra.mxu3 %v7283_v4  ;;  %v5432_v4 = vld [vmem:[%s7977_s7] ss:$0 sm:$0xff] }
0x1e18   :  { %4039 = vrot.lane.b32.xlu0 %v5432_v4, %s5789_s19 }
0x1e19   :  { %3911 = vmatpush.msra.mxu3 %v7572_v41 }
0x1e1b   :  { %4193 = vmatpush.msrb.mxu3 %v7468_v18 }
0x1e1d   :  { %4194 = vmatpush.msrb.mxu3 %v7475_v55 }
0x1e1f   :  { %4195 = vmatpush.msrb.mxu3 %v7484_v19 }
0x1e21   :  { %4196 = vmatpush.msrb.mxu3 %v7493_v27 }
0x1e23   :  { %4197 = vmatpush.msrb.mxu3 %v7502_v47 }
0x1e25   :  { %4198 = vmatpush.msrb.mxu3 %v7511_v28 }
0x1e27   :  { %4199 = vmatpush.msrb.mxu3 %v7522_v59 }
0x1e29   :  { %4200 = vmatpush.msrb.mxu3 %v7529_v51 }
0x1e2b   :  { %4201 = vmatpush.msrb.mxu3 %v7541_v62 }
0x1e2d   :  { %4202 = vmatpush.msrb.mxu3 %v7555_v5 }
0x1e58   :  { %v3875_v22 = vpop.permute.xlu2 %3874 }
0x1e7c   :  { %v3867_v61 = vpop.permute.xlu0 %3866 }
0x1e84   :  { %v3871_v38 = vpop.permute.xlu1 %3870 }
0x1e85   :  { %v3877_v58 = vsel %vm402_vm14, %v3867_v61, %v3871_v38 }
0x1e86   :  { %v7619_v34 = vsel %vm404_vm15, %v3877_v58, %v3875_v22 }
0x1e87   :  { %v3893_v25 = vrot.slane %v7619_v34, 3  ;;  %v4061_v4 = vrot.slane %v7619_v34, 7 }
0x1e89   :  { %5370 = vmatmul.msk.f32.vlgmr.msra.gmra.mxu3 %vm203_vm2, %v3893_v25  ;;  %5371 = vmatmul.msk.f32.vlgmr.msrb.gmra.mxu0 %vm203_vm2, %v3893_v25 }
0x1e8a   :  { %5372 = vmatmul.msk.f32.vlgmr.msrb.gmra.mxu1 %vm203_vm2, %v3893_v25  ;;  %5373 = vmatmul.msk.f32.vlgmr.msrb.gmra.mxu2 %vm203_vm2, %v3893_v25  ;;  %v4040_v14 = vpop.permute.xlu0 %4039 }
0x1e8b   :  { %4583 = vmatpush.msrb.mxu2 %v7470_v40 }
0x1e8d   :  { %4584 = vmatpush.msrb.mxu2 %v7479_v29 }
0x1e8f   :  { %4585 = vmatpush.msrb.mxu2 %v7486_v24 }
0x1e91   :  { %4586 = vmatpush.msrb.mxu2 %v7495_v30 }
0x1e93   :  { %4587 = vmatpush.msrb.mxu2 %v7504_v53 }
0x1e95   :  { %4588 = vmatpush.msrb.mxu2 %v7513_v35 }
0x1e97   :  { %4589 = vmatpush.msrb.mxu2 %v7524_v37 }
0x1e99   :  { %4590 = vmatpush.msrb.mxu2 %v7535_v49 }
0x1e9b   :  { %4591 = vmatpush.msrb.mxu2 %v7545_v33 }
0x1e9d   :  { %4592 = vmatpush.msrb.mxu2 %v7557_v9 }
0x1e9f   :  { %4593 = vmatpush.msrb.mxu2 %v7567_v23 }
0x1ea1   :  { %4594 = vmatpush.msrb.mxu2 %v3919_v36 }
0x1f06   :  { %v3970_v48 = vpop.f32.mrf.mxu0 }
0x1f07   :  { %v3990_v15 = vpop.f32.mrf.mxu1  ;;  %v4042_v50 = vadd.f32 %v4040_v14, %v3970_v48  ;;  %v4014_v1 = vrot.slane %v3970_v48, 4 }
0x1f08   :  { %v4090_v10 = vadd.f32 %v4036_v17, %v3990_v15  ;;  %v4068_v13 = vrot.slane %v3990_v15, 4 }
0x1f09   :  { %v4044_v63 = vrot.slane %v4042_v50, 4  ;;  %v4016_v43 = vadd.f32 %v4014_v1, %v7009_v52  ;;  %v4139_v1 = vrot.slane %v7454_v6, 7 }
0x1f0a   :  { %v4092_v8 = vrot.slane %v4090_v10, 4  ;;  %v4070_v11 = vadd.f32 %v4068_v13, %v7003_v32 }
0x1f0b   :  { %4045 = vrot.lane.b32.xlu1 %v4044_v63, %s5789_s19  ;;  %v5374_v57 = vmul.f32 -1.442695, %v4016_v43 }
0x1f0c   :  { %4093 = vrot.lane.b32.xlu2 %v4092_v8, %s5789_s19  ;;  %v3913_v44 = vpop.f32.mrf.mxu3  ;;  %v5375_v29 = vmul.f32 -1.442695, %v4070_v11 }
0x1f0d   :  { %v3914_v45 = vadd.f32 %v3913_v44, %v3891_v16  ;;  %v4010_v3 = vpop.f32.mrf.mxu2 }
0x1f0e   :  { %v4115_v12 = vrot.slane %v4010_v3, 4 }
0x1f0f   :  { %3916 = vst.msk [vmem:[#allocation2 + $0xb] sm:$0x1] %vm442_vm3, %v3914_v45 }
0x1f10   :  { %v7647_v20 = vadd.f32 %v4115_v12, %v7021_v2 }
0x1f12   :  { %5680 = vtanh.f32 %v7647_v20 }
0x1f13   :  { %5682 = vpow2.f32 %v5374_v57 }
0x1f18   :  { %v5681_v21 = vpop.eup %5680 }
0x1f19   :  { %4143 = vrot.lane.b32.xlu0 %v5681_v21, %s5789_s19  ;;  %v5683_v7 = vpop.eup %5682 }
0x1f1a   :  { %v4020_v26 = vadd.f32 1.0, %v5683_v7 }
0x1f1c   :  { %5684 = vrcp.f32 %v4020_v26  ;;  %v4032_v30 = vand.u32 2147483648, %v4020_v26  ;;  %vm4026_vm13 = vweird.f32 %v4020_v26  ;;  %v4030_v53 = vand.u32 2147483647, %v4020_v26 }
0x1f1d   :  { %5686 = vpow2.f32 %v5375_v29 }
0x1f1e   :  { %v4033_v37 = vor.u32 1.1754944e-38, %v4032_v30  ;;  %vm4031_vm8 = vcmp.eq.f32.partialorder %v4030_v53, 8.507059e+37 }
0x1f22   :  { %v5685_v46 = vpop.eup %5684 }
0x1f23   :  { %v4022_v0 = vmul.f32 %v5685_v46, %v4020_v26  ;;  %vm4027_vm1 = vweird.f32 %v5685_v46  ;;  %v5687_v23 = vpop.eup %5686 }
0x1f24   :  { %vm4028_vm4 = vmor %vm4026_vm13, %vm4027_vm1  ;;  %v4074_v36 = vadd.f32 1.0, %v5687_v23 }
0x1f25   :  { %v4023_v54 = vsub.f32 1.0, %v4022_v0 }
0x1f26   :  { %5688 = vrcp.f32 %v4074_v36  ;;  %v4086_v48 = vand.u32 2147483648, %v4074_v36  ;;  %vm4080_vm11 = vweird.f32 %v4074_v36  ;;  %v4084_v15 = vand.u32 2147483647, %v4074_v36 }
0x1f27   :  { %v4024_v40 = vmul.f32 %v5685_v46, %v4023_v54 }
0x1f28   :  { %v4087_v34 = vor.u32 1.1754944e-38, %v4086_v48  ;;  %vm4085_vm13 = vcmp.eq.f32.partialorder %v4084_v15, 8.507059e+37  ;;  %v7681_v15 = vld [vmem:[%s7978_s8 + $0x8] sm:$0xff] }
0x1f29   :  { %v4025_v24 = vadd.f32 %v5685_v46, %v4024_v40  ;;  %4203 = vmatpush.msrb.mxu3 %v7681_v15 }
0x1f2b   :  { %v4029_v35 = vsel %vm4028_vm4, %v5685_v46, %v4025_v24  ;;  %v5376_v46 = vmul.f32 -1.442695, %v7647_v20  ;;  %4204 = vmatpush.msrb.mxu3 %v7572_v41 }
0x1f2c   :  { %v7653_v33 = vsel %vm4031_vm8, %v4033_v37, %v4029_v35  ;;  %v5689_v61 = vpop.eup %5688 }
0x1f2d   :  { %v4076_v38 = vmul.f32 %v5689_v61, %v4074_v36  ;;  %vm4081_vm10 = vweird.f32 %v5689_v61  ;;  %v4055_v23 = vsub.f32 1.0, %v7653_v33  ;;  %4486 = vmatpush.msra.mxu3 %v7468_v18 }
0x1f2e   :  { %vm4082_vm1 = vmor %vm4080_vm11, %vm4081_vm10 }
0x1f2f   :  { %v4077_v22 = vsub.f32 1.0, %v4076_v38  ;;  %4487 = vmatpush.msra.mxu3 %v7475_v55 }
0x1f31   :  { %v4078_v14 = vmul.f32 %v5689_v61, %v4077_v22  ;;  %4488 = vmatpush.msra.mxu3 %v7484_v19 }
0x1f33   :  { %v4079_v17 = vadd.f32 %v5689_v61, %v4078_v14  ;;  %4489 = vmatpush.msra.mxu3 %v7493_v27 }
0x1f35   :  { %v4083_v50 = vsel %vm4082_vm1, %v5689_v61, %v4079_v17  ;;  %4490 = vmatpush.msra.mxu3 %v7502_v47 }
0x1f36   :  { %v4088_v10 = vsel %vm4085_vm13, %v4087_v34, %v4083_v50 }
0x1f37   :  { %v4141_v43 = vmul.f32 %v4139_v1, %v4088_v10  ;;  %4491 = vmatpush.msra.mxu3 %v7511_v28 }
0x1f39   :  { %4492 = vmatpush.msra.mxu3 %v7522_v59 }
0x1f3b   :  { %4493 = vmatpush.msra.mxu3 %v7529_v51  ;;  %v4329_v51 = vld [vmem:[%s7977_s7] sm:$0x1] }
0x1f3d   :  { %4494 = vmatpush.msra.mxu3 %v7541_v62 }
0x1f3f   :  { %4495 = vmatpush.msra.mxu3 %v7555_v5 }
0x1f41   :  { %4496 = vmatpush.msra.mxu3 %v7681_v15 }
0x1f43   :  { %4497 = vmatpush.msra.mxu3 %v7572_v41 }
0x1f66   :  { %v4094_v49 = vpop.permute.xlu2 %4093 }
0x1f67   :  { %v4096_v9 = vmul.f32 %v4094_v49, %v7653_v33 }
0x1f69   :  { %4098 = vrot.lane.b32.xlu2 %v4096_v9, %s5789_s19 }
0x1f71   :  { %4062 = vrot.lane.b32.xlu2 %v4061_v4, %s5791_s17 }
0x1f7d   :  { %v4046_v58 = vpop.permute.xlu1 %4045 }
0x1f7e   :  { %v4048_v25 = vmul.f32 %v4046_v58, %v7653_v33  ;;  %v4103_v58 = vsub.f32 1.0, %v4088_v10 }
0x1f80   :  { %4050 = vrot.lane.b32.xlu1 %v4048_v25, %s5789_s19 }
0x1f8b   :  { %v4144_v63 = vpop.permute.xlu0 %4143 }
0x1f8c   :  { %v4146_v8 = vmul.f32 %v4144_v63, %v4088_v10  ;;  %v4184_v63 = vld [vmem:[%s7979_s9] sm:$0x1] }
0x1f8e   :  { %4148 = vrot.lane.b32.xlu0 %v4146_v8, %s5791_s17 }
0x1fc3   :  { %v4099_v16 = vpop.permute.xlu2 %4098 }
0x1fc4   :  { %v4101_v44 = vadd.f32 %v4099_v16, %v7003_v32 }
0x1fc6   :  { %5690 = vtanh.f32 %v4101_v44 }
0x1fcb   :  { %v4063_v29 = vpop.permute.xlu2 %4062 }
0x1fcc   :  { %v5691_v45 = vpop.eup %5690 }
0x1fcd   :  { %4105 = vrot.lane.b32.xlu0 %v5691_v45, %s5792_s22 }
0x1ff2   :  { %v4051_v3 = vpop.permute.xlu1 %4050 }
0x1ff3   :  { %v4053_v12 = vadd.f32 %v4051_v3, %v7009_v52 }
0x1ff5   :  { %5692 = vtanh.f32 %v4053_v12 }
0x1ffb   :  { %v5693_v21 = vpop.eup %5692 }
0x1ffc   :  { %4057 = vrot.lane.b32.xlu1 %v5693_v21, %s5792_s22 }
0x2000   :  { %v4149_v57 = vpop.permute.xlu0 %4148 }
0x2001   :  { %v7667_v7 = vadd.f32 %v4149_v57, %v4141_v43 }
0x2003   :  { %5694 = vtanh.f32 %v7667_v7 }
0x2004   :  { %4109 = vrot.lane.b32.xlu1 %v4061_v4, %s5792_s22  ;;  %5696 = vpow2.f32 %v5376_v46  ;;  %v4065_v4 = vmul.f32 %v4063_v29, %v7653_v33  ;;  %v5433_v33 = vld [vmem:[%s7977_s7] ss:$0 sm:$0xff] }
0x2009   :  { %v5695_v26 = vpop.eup %5694 }
0x200a   :  { %4154 = vrot.lane.b32.xlu2 %v5695_v26, %s5789_s19  ;;  %v5697_v0 = vpop.eup %5696 }
0x200b   :  { %v4122_v13 = vadd.f32 1.0, %v5697_v0 }
0x200d   :  { %5698 = vrcp.f32 %v4122_v13  ;;  %v4134_v30 = vand.u32 2147483648, %v4122_v13  ;;  %vm4128_vm8 = vweird.f32 %v4122_v13  ;;  %v4132_v53 = vand.u32 2147483647, %v4122_v13 }
0x200f   :  { %v4135_v37 = vor.u32 1.1754944e-38, %v4134_v30  ;;  %vm4133_vm11 = vcmp.eq.f32.partialorder %v4132_v53, 8.507059e+37 }
0x2013   :  { %v5699_v54 = vpop.eup %5698 }
0x2014   :  { %v4124_v11 = vmul.f32 %v5699_v54, %v4122_v13  ;;  %vm4129_vm4 = vweird.f32 %v5699_v54 }
0x2015   :  { %vm4130_vm10 = vmor %vm4128_vm8, %vm4129_vm4 }
0x2016   :  { %v4125_v6 = vsub.f32 1.0, %v4124_v11 }
0x2018   :  { %v4126_v40 = vmul.f32 %v5699_v54, %v4125_v6 }
0x201a   :  { %v4127_v24 = vadd.f32 %v5699_v54, %v4126_v40 }
0x201c   :  { %v4131_v35 = vsel %vm4130_vm10, %v5699_v54, %v4127_v24 }
0x201d   :  { %v4136_v49 = vsel %vm4133_vm11, %v4135_v37, %v4131_v35 }
0x203f   :  { %v4106_v22 = vpop.permute.xlu0 %4105 }
0x2040   :  { %v4108_v14 = vmul.f32 %v4106_v22, %v4103_v58 }
0x2064   :  { %v4155_v20 = vpop.permute.xlu2 %4154 }
0x2065   :  { %v4157_v9 = vmul.f32 %v4155_v20, %v4136_v49 }
0x2067   :  { %4167 = vrot.lane.b32.xlu2 %v4157_v9, %s5791_s17 }
0x206e   :  { %v4058_v36 = vpop.permute.xlu1 %4057 }
0x206f   :  { %v4060_v61 = vmul.f32 %v4058_v36, %v4055_v23 }
0x2071   :  { %v4066_v38 = vadd.f32 %v4065_v4, %v4060_v61 }
0x2073   :  { %4159 = vrot.lane.b32.xlu0 %v4066_v38, %s5792_s22 }
0x2076   :  { %v4110_v25 = vpop.permute.xlu1 %4109 }
0x2077   :  { %v4112_v17 = vmul.f32 %v4110_v25, %v4088_v10 }
0x2079   :  { %v4113_v48 = vadd.f32 %v4112_v17, %v4108_v14 }
0x207b   :  { %4163 = vrot.lane.b32.xlu1 %v4113_v48, %s5791_s17  ;;  %4332 = vrot.lane.b32.xlu0 %v5433_v33, %s5789_s19 }
0x20c1   :  { %v4168_v19 = vpop.permute.xlu2 %4167 }
0x20e5   :  { %v4160_v18 = vpop.permute.xlu0 %4159 }
0x20ed   :  { %v4164_v55 = vpop.permute.xlu1 %4163  ;;  %v4333_v59 = vpop.permute.xlu0 %4332 }
0x20ee   :  { %v4170_v27 = vsel %vm402_vm14, %v4160_v18, %v4164_v55 }
0x20ef   :  { %v7703_v47 = vsel %vm404_vm15, %v4170_v27, %v4168_v19 }
0x20f0   :  { %v4186_v28 = vrot.slane %v7703_v47, 4  ;;  %v4354_v36 = vrot.slane %v7703_v47, 7 }
0x20f2   :  { %5377 = vmatmul.msk.f32.vlgmr.msrb.gmra.mxu3 %vm203_vm2, %v4186_v28  ;;  %5378 = vmatmul.msk.f32.vlgmr.msra.gmra.mxu0 %vm203_vm2, %v4186_v28 }
0x20f3   :  { %5379 = vmatmul.msk.f32.vlgmr.msra.gmra.mxu1 %vm203_vm2, %v4186_v28  ;;  %5380 = vmatmul.msk.f32.vlgmr.msra.gmra.mxu2 %vm203_vm2, %v4186_v28 }
0x216f   :  { %v4263_v62 = vpop.f32.mrf.mxu0 }
0x2170   :  { %v4283_v5 = vpop.f32.mrf.mxu1  ;;  %v4335_v41 = vadd.f32 %v4333_v59, %v4263_v62  ;;  %v4307_v21 = vrot.slane %v4263_v62, 3 }
0x2171   :  { %v4383_v50 = vadd.f32 %v4329_v51, %v4283_v5  ;;  %v4361_v13 = vrot.slane %v4283_v5, 3 }
0x2172   :  { %v4337_v34 = vrot.slane %v4335_v41, 3  ;;  %v4309_v1 = vadd.f32 %v4307_v21, %v7009_v52  ;;  %v4432_v41 = vrot.slane %v7667_v7, 7 }
0x2173   :  { %v4385_v10 = vrot.slane %v4383_v50, 3  ;;  %v4363_v11 = vadd.f32 %v4361_v13, %v7003_v32 }
0x2174   :  { %4338 = vrot.lane.b32.xlu1 %v4337_v34, %s5789_s19  ;;  %v5381_v43 = vmul.f32 -1.442695, %v4309_v1 }
0x2175   :  { %4386 = vrot.lane.b32.xlu2 %v4385_v10, %s5789_s19  ;;  %v4206_v8 = vpop.f32.mrf.mxu3  ;;  %v5382_v40 = vmul.f32 -1.442695, %v4363_v11 }
0x2176   :  { %v4207_v16 = vadd.f32 %v4206_v8, %v4184_v63  ;;  %v4303_v44 = vpop.f32.mrf.mxu2 }
0x2177   :  { %v4408_v45 = vrot.slane %v4303_v44, 3 }
0x2178   :  { %4209 = vst.msk [vmem:[#allocation2 + $0xc] sm:$0x1] %vm442_vm3, %v4207_v16 }
0x2179   :  { %v7720_v3 = vadd.f32 %v4408_v45, %v7021_v2 }
0x217b   :  { %5700 = vtanh.f32 %v7720_v3  ;;  %v5383_v8 = vmul.f32 -1.442695, %v7720_v3 }
0x217c   :  { %5702 = vpow2.f32 %v5381_v43 }
0x2181   :  { %v5701_v12 = vpop.eup %5700 }
0x2182   :  { %4436 = vrot.lane.b32.xlu0 %v5701_v12, %s5789_s19  ;;  %v5703_v57 = vpop.eup %5702 }
0x2183   :  { %v4313_v26 = vadd.f32 1.0, %v5703_v57 }
0x2185   :  { %5704 = vrcp.f32 %v4313_v26  ;;  %v4325_v24 = vand.u32 2147483648, %v4313_v26  ;;  %vm4319_vm13 = vweird.f32 %v4313_v26  ;;  %v4323_v30 = vand.u32 2147483647, %v4313_v26 }
0x2186   :  { %5706 = vpow2.f32 %v5382_v40 }
0x2187   :  { %v4326_v35 = vor.u32 1.1754944e-38, %v4325_v24  ;;  %vm4324_vm8 = vcmp.eq.f32.partialorder %v4323_v30, 8.507059e+37 }
0x218b   :  { %v5705_v46 = vpop.eup %5704 }
0x218c   :  { %v4315_v0 = vmul.f32 %v5705_v46, %v4313_v26  ;;  %vm4320_vm1 = vweird.f32 %v5705_v46  ;;  %v5707_v9 = vpop.eup %5706 }
0x218d   :  { %vm4321_vm4 = vmor %vm4319_vm13, %vm4320_vm1  ;;  %v4367_v23 = vadd.f32 1.0, %v5707_v9 }
0x218e   :  { %v4316_v54 = vsub.f32 1.0, %v4315_v0 }
0x218f   :  { %5708 = vrcp.f32 %v4367_v23  ;;  %v4379_v17 = vand.u32 2147483648, %v4367_v23  ;;  %vm4373_vm11 = vweird.f32 %v4367_v23  ;;  %v4377_v48 = vand.u32 2147483647, %v4367_v23 }
0x2190   :  { %v4317_v6 = vmul.f32 %v5705_v46, %v4316_v54 }
0x2191   :  { %v4380_v18 = vor.u32 1.1754944e-38, %v4379_v17  ;;  %vm4378_vm13 = vcmp.eq.f32.partialorder %v4377_v48, 8.507059e+37  ;;  %v4521_v17 = vld [vmem:[#allocation4 + $0x90] sm:$0xff]  ;;  %v4522_v48 = vld [vmem:[#allocation4 + $0x98] sm:$0xff] }
0x2192   :  { %v4318_v29 = vadd.f32 %v5705_v46, %v4317_v6 }
0x2194   :  { %v4322_v53 = vsel %vm4321_vm4, %v5705_v46, %v4318_v29 }
0x2195   :  { %v7726_v49 = vsel %vm4324_vm8, %v4326_v35, %v4322_v53  ;;  %v5709_v4 = vpop.eup %5708 }
0x2196   :  { %v4369_v61 = vmul.f32 %v5709_v4, %v4367_v23  ;;  %vm4374_vm10 = vweird.f32 %v5709_v4  ;;  %v4348_v11 = vsub.f32 1.0, %v7726_v49  ;;  %v4536_v23 = vld [vmem:[#allocation4 + $0x108] sm:$0xff] }
0x2197   :  { %vm4375_vm1 = vmor %vm4373_vm11, %vm4374_vm10  ;;  %4543 = vmatpush.msrb.mxu0 %v4536_v23 }
0x2198   :  { %v4370_v38 = vsub.f32 1.0, %v4369_v61  ;;  %v4534_v61 = vld [vmem:[#allocation4 + $0xf8] sm:$0xff] }
0x219a   :  { %v4371_v25 = vmul.f32 %v5709_v4, %v4370_v38  ;;  %v4530_v38 = vld [vmem:[#allocation4 + $0xd8] sm:$0xff] }
0x219c   :  { %v4372_v14 = vadd.f32 %v5709_v4, %v4371_v25  ;;  %v4524_v25 = vld [vmem:[#allocation4 + $0xa8] sm:$0xff] }
0x219e   :  { %v4376_v33 = vsel %vm4375_vm1, %v5709_v4, %v4372_v14  ;;  %v4533_v4 = vld [vmem:[#allocation4 + $0xf0] sm:$0xff] }
0x219f   :  { %v4381_v55 = vsel %vm4378_vm13, %v4380_v18, %v4376_v33  ;;  %4544 = vmatpush.msrb.mxu0 %v4533_v4  ;;  %v4525_v14 = vld [vmem:[#allocation4 + $0xb0] sm:$0xff]  ;;  %v4518_v33 = vld [vmem:[#allocation4 + $0x78] sm:$0xff]  ;;  %v4519_v18 = vld [vmem:[#allocation4 + $0x80] sm:$0xff] }
0x21a0   :  { %v4434_v50 = vmul.f32 %v4432_v41, %v4381_v55  ;;  %v4396_v53 = vsub.f32 1.0, %v4381_v55 }
0x21a1   :  { %4545 = vmatpush.msrb.mxu0 %v4530_v38 }
0x21cf   :  { %v4387_v37 = vpop.permute.xlu2 %4386 }
0x21d0   :  { %v4389_v20 = vmul.f32 %v4387_v37, %v7726_v49 }
0x21d2   :  { %4391 = vrot.lane.b32.xlu2 %v4389_v20, %s5789_s19 }
0x21da   :  { %4355 = vrot.lane.b32.xlu2 %v4354_v36, %s5791_s17 }
0x21e6   :  { %v4339_v22 = vpop.permute.xlu1 %4338 }
0x21e7   :  { %v4341_v58 = vmul.f32 %v4339_v22, %v7726_v49  ;;  %v4527_v22 = vld [vmem:[#allocation4 + $0xc0] sm:$0xff] }
0x21e8   :  { %4546 = vmatpush.msrb.mxu0 %v4527_v22 }
0x21e9   :  { %4343 = vrot.lane.b32.xlu1 %v4341_v58, %s5789_s19  ;;  %v4528_v58 = vld [vmem:[#allocation4 + $0xc8] sm:$0xff] }
0x21ea   :  { %4547 = vmatpush.msrb.mxu0 %v4524_v25 }
0x21ec   :  { %4548 = vmatpush.msrb.mxu0 %v4521_v17 }
0x21ee   :  { %4549 = vmatpush.msrb.mxu0 %v4518_v33 }
0x21f4   :  { %v4437_v19 = vpop.permute.xlu0 %4436 }
0x21f5   :  { %v4439_v27 = vmul.f32 %v4437_v19, %v4381_v55  ;;  %v4512_v19 = vld [vmem:[#allocation4 + $0x48] sm:$0xff] }
0x21f7   :  { %4441 = vrot.lane.b32.xlu0 %v4439_v27, %s5791_s17  ;;  %v4509_v27 = vld [vmem:[#allocation4 + $0x30] sm:$0xff] }
0x222c   :  { %v4392_v47 = vpop.permute.xlu2 %4391 }
0x222d   :  { %v4394_v28 = vadd.f32 %v4392_v47, %v7003_v32  ;;  %v4506_v47 = vld [vmem:[#allocation4 + $0x18] sm:$0xff] }
0x222f   :  { %5710 = vtanh.f32 %v4394_v28  ;;  %v4503_v28 = vld [vmem:[#allocation4] sm:$0xff] }
0x2234   :  { %v4356_v1 = vpop.permute.xlu2 %4355 }
0x2235   :  { %v5711_v59 = vpop.eup %5710  ;;  %v4358_v40 = vmul.f32 %v4356_v1, %v7726_v49  ;;  %v4531_v49 = vld [vmem:[#allocation4 + $0xe0] sm:$0xff] }
0x2236   :  { %4398 = vrot.lane.b32.xlu0 %v5711_v59, %s5792_s22 }
0x225b   :  { %v4344_v51 = vpop.permute.xlu1 %4343 }
0x225c   :  { %v4346_v62 = vadd.f32 %v4344_v51, %v7009_v52 }
0x225e   :  { %5712 = vtanh.f32 %v4346_v62 }
0x2264   :  { %v5713_v5 = vpop.eup %5712 }
0x2265   :  { %4350 = vrot.lane.b32.xlu1 %v5713_v5, %s5792_s22  ;;  %v4622_v5 = vld [vmem:[%s7977_s7] sm:$0x1] }
0x2269   :  { %v4442_v34 = vpop.permute.xlu0 %4441 }
0x226a   :  { %v7740_v10 = vadd.f32 %v4442_v34, %v4434_v50 }
0x226c   :  { %5714 = vtanh.f32 %v7740_v10 }
0x226d   :  { %4402 = vrot.lane.b32.xlu1 %v4354_v36, %s5792_s22  ;;  %5716 = vpow2.f32 %v5383_v8  ;;  %v4537_v36 = vld [vmem:[#allocation4 + $0x110] sm:$0xff] }
0x226e   :  { %4563 = vmatpush.msrb.mxu1 %v4537_v36 }
0x2270   :  { %4564 = vmatpush.msrb.mxu1 %v4534_v61 }
0x2272   :  { %v5715_v63 = vpop.eup %5714  ;;  %4565 = vmatpush.msrb.mxu1 %v4531_v49 }
0x2273   :  { %4447 = vrot.lane.b32.xlu2 %v5715_v63, %s5789_s19  ;;  %v5717_v16 = vpop.eup %5716 }
0x2274   :  { %v4415_v44 = vadd.f32 1.0, %v5717_v16  ;;  %4566 = vmatpush.msrb.mxu1 %v4528_v58 }
0x2276   :  { %5718 = vrcp.f32 %v4415_v44  ;;  %v4427_v57 = vand.u32 2147483648, %v4415_v44  ;;  %vm4421_vm8 = vweird.f32 %v4415_v44  ;;  %v4425_v26 = vand.u32 2147483647, %v4415_v44  ;;  %4567 = vmatpush.msrb.mxu1 %v4525_v14 }
0x2278   :  { %v4428_v0 = vor.u32 1.1754944e-38, %v4427_v57  ;;  %vm4426_vm11 = vcmp.eq.f32.partialorder %v4425_v26, 8.507059e+37  ;;  %4568 = vmatpush.msrb.mxu1 %v4522_v48 }
0x227a   :  { %4569 = vmatpush.msrb.mxu1 %v4519_v18 }
0x227c   :  { %v5719_v45 = vpop.eup %5718  ;;  %4570 = vmatpush.msrb.mxu1 %v7533_v42  ;;  %v5434_v42 = vld [vmem:[%s7977_s7] ss:$0 sm:$0xff] }
0x227d   :  { %v4417_v12 = vmul.f32 %v5719_v45, %v4415_v44  ;;  %vm4422_vm4 = vweird.f32 %v5719_v45  ;;  %v4477_v44 = vld [vmem:[%s7979_s9] sm:$0x1] }
0x227e   :  { %vm4423_vm10 = vmor %vm4421_vm8, %vm4422_vm4  ;;  %4571 = vmatpush.msrb.mxu1 %v7543_v39 }
0x227f   :  { %v4418_v7 = vsub.f32 1.0, %v4417_v12 }
0x2280   :  { %4572 = vmatpush.msrb.mxu1 %v7549_v56 }
0x2281   :  { %v4419_v21 = vmul.f32 %v5719_v45, %v4418_v7 }
0x2282   :  { %4573 = vmatpush.msrb.mxu1 %v7565_v60 }
0x2283   :  { %v4420_v43 = vadd.f32 %v5719_v45, %v4419_v21 }
0x2284   :  { %4574 = vmatpush.msrb.mxu1 %v7576_v31 }
0x2285   :  { %v4424_v46 = vsel %vm4423_vm10, %v5719_v45, %v4420_v43 }
0x2286   :  { %v4429_v13 = vsel %vm4426_vm11, %v4428_v0, %v4424_v46  ;;  %4856 = vmatpush.msra.mxu1 %v4537_v36 }
0x2288   :  { %4857 = vmatpush.msra.mxu1 %v4534_v61 }
0x228a   :  { %4858 = vmatpush.msra.mxu1 %v4531_v49 }
0x228c   :  { %4859 = vmatpush.msra.mxu1 %v4528_v58 }
0x228e   :  { %4860 = vmatpush.msra.mxu1 %v4525_v14 }
0x2290   :  { %4861 = vmatpush.msra.mxu1 %v4522_v48 }
0x2292   :  { %4862 = vmatpush.msra.mxu1 %v4519_v18 }
0x22a8   :  { %v4399_v30 = vpop.permute.xlu0 %4398 }
0x22a9   :  { %v4401_v37 = vmul.f32 %v4399_v30, %v4396_v53 }
0x22cd   :  { %v4448_v3 = vpop.permute.xlu2 %4447 }
0x22ce   :  { %v4450_v54 = vmul.f32 %v4448_v3, %v4429_v13 }
0x22d0   :  { %4460 = vrot.lane.b32.xlu2 %v4450_v54, %s5791_s17 }
0x22d7   :  { %v4351_v6 = vpop.permute.xlu1 %4350 }
0x22d8   :  { %v4353_v29 = vmul.f32 %v4351_v6, %v4348_v11 }
0x22da   :  { %v4359_v24 = vadd.f32 %v4358_v40, %v4353_v29 }
0x22dc   :  { %4452 = vrot.lane.b32.xlu0 %v4359_v24, %s5792_s22 }
0x22df   :  { %v4403_v35 = vpop.permute.xlu1 %4402 }
0x22e0   :  { %v4405_v20 = vmul.f32 %v4403_v35, %v4381_v55  ;;  %v4515_v55 = vld [vmem:[#allocation4 + $0x60] sm:$0xff] }
0x22e1   :  { %4550 = vmatpush.msrb.mxu0 %v4515_v55 }
0x22e2   :  { %v4406_v9 = vadd.f32 %v4405_v20, %v4401_v37 }
0x22e3   :  { %4551 = vmatpush.msrb.mxu0 %v4512_v19 }
0x22e4   :  { %4456 = vrot.lane.b32.xlu1 %v4406_v9, %s5791_s17  ;;  %4625 = vrot.lane.b32.xlu0 %v5434_v42, %s5789_s19 }
0x22e5   :  { %4552 = vmatpush.msrb.mxu0 %v4509_v27 }
0x22e7   :  { %4553 = vmatpush.msrb.mxu0 %v4506_v47 }
0x22e9   :  { %4554 = vmatpush.msrb.mxu0 %v4503_v28 }
0x22eb   :  { %4836 = vmatpush.msra.mxu0 %v4536_v23 }
0x22ed   :  { %4837 = vmatpush.msra.mxu0 %v4533_v4 }
0x22ef   :  { %4838 = vmatpush.msra.mxu0 %v4530_v38 }
0x22f1   :  { %4839 = vmatpush.msra.mxu0 %v4527_v22 }
0x22f3   :  { %4840 = vmatpush.msra.mxu0 %v4524_v25 }
0x22f5   :  { %4841 = vmatpush.msra.mxu0 %v4521_v17 }
0x22f7   :  { %4842 = vmatpush.msra.mxu0 %v4518_v33 }
0x22f9   :  { %4843 = vmatpush.msra.mxu0 %v4515_v55 }
0x22fb   :  { %4844 = vmatpush.msra.mxu0 %v4512_v19 }
0x22fd   :  { %4845 = vmatpush.msra.mxu0 %v4509_v27 }
0x22ff   :  { %4846 = vmatpush.msra.mxu0 %v4506_v47 }
0x2301   :  { %4847 = vmatpush.msra.mxu0 %v4503_v28 }
0x232a   :  { %v4461_v60 = vpop.permute.xlu2 %4460 }
0x234e   :  { %v4453_v39 = vpop.permute.xlu0 %4452 }
0x2356   :  { %v4457_v56 = vpop.permute.xlu1 %4456  ;;  %v4626_v62 = vpop.permute.xlu0 %4625 }
0x2357   :  { %v4463_v31 = vsel %vm402_vm14, %v4453_v39, %v4457_v56 }
0x2358   :  { %v7762_v59 = vsel %vm404_vm15, %v4463_v31, %v4461_v60 }
0x2359   :  { %v4479_v51 = vrot.slane %v7762_v59, 5  ;;  %v4647_v38 = vrot.slane %v7762_v59, 7 }
0x235b   :  { %5384 = vmatmul.msk.f32.vlgmr.msra.gmra.mxu3 %vm203_vm2, %v4479_v51  ;;  %5385 = vmatmul.msk.f32.vlgmr.msrb.gmra.mxu0 %vm203_vm2, %v4479_v51 }
0x235c   :  { %5386 = vmatmul.msk.f32.vlgmr.msrb.gmra.mxu1 %vm203_vm2, %v4479_v51  ;;  %5387 = vmatmul.msk.f32.vlgmr.msrb.gmra.mxu2 %vm203_vm2, %v4479_v51  ;;  %v4725_v51 = vrot.slane %v7740_v10, 7 }
0x23d8   :  { %v4556_v41 = vpop.f32.mrf.mxu0 }
0x23d9   :  { %v4576_v50 = vpop.f32.mrf.mxu1  ;;  %v4628_v34 = vadd.f32 %v4626_v62, %v4556_v41  ;;  %v4600_v57 = vrot.slane %v4556_v41, 2 }
0x23da   :  { %v4676_v63 = vadd.f32 %v4622_v5, %v4576_v50  ;;  %v4654_v11 = vrot.slane %v4576_v50, 2 }
0x23db   :  { %v4630_v8 = vrot.slane %v4628_v34, 2  ;;  %v4602_v26 = vadd.f32 %v4600_v57, %v7009_v52 }
0x23dc   :  { %v4678_v16 = vrot.slane %v4676_v63, 2  ;;  %v4656_v40 = vadd.f32 %v4654_v11, %v7003_v32 }
0x23dd   :  { %4631 = vrot.lane.b32.xlu1 %v4630_v8, %s5789_s19  ;;  %v5388_v46 = vmul.f32 -1.442695, %v4602_v26 }
0x23de   :  { %4679 = vrot.lane.b32.xlu2 %v4678_v16, %s5789_s19  ;;  %v4499_v45 = vpop.f32.mrf.mxu3  ;;  %v5389_v24 = vmul.f32 -1.442695, %v4656_v40 }
0x23df   :  { %v4500_v12 = vadd.f32 %v4499_v45, %v4477_v44  ;;  %v4596_v7 = vpop.f32.mrf.mxu2 }
0x23e0   :  { %v4701_v21 = vrot.slane %v4596_v7, 2 }
0x23e1   :  { %4502 = vst.msk [vmem:[#allocation2 + $0xd] sm:$0x1] %vm442_vm3, %v4500_v12 }
0x23e2   :  { %v7779_v1 = vadd.f32 %v4701_v21, %v7021_v2 }
0x23e4   :  { %5720 = vtanh.f32 %v7779_v1  ;;  %v5390_v34 = vmul.f32 -1.442695, %v7779_v1 }
0x23e5   :  { %5722 = vpow2.f32 %v5388_v46 }
0x23ea   :  { %v5721_v43 = vpop.eup %5720 }
0x23eb   :  { %4729 = vrot.lane.b32.xlu0 %v5721_v43, %s5789_s19  ;;  %v5723_v0 = vpop.eup %5722 }
0x23ec   :  { %v4606_v13 = vadd.f32 1.0, %v5723_v0 }
0x23ee   :  { %5724 = vrcp.f32 %v4606_v13  ;;  %v4618_v53 = vand.u32 2147483648, %v4606_v13  ;;  %vm4612_vm13 = vweird.f32 %v4606_v13  ;;  %v4616_v35 = vand.u32 2147483647, %v4606_v13 }
0x23ef   :  { %5726 = vpow2.f32 %v5389_v24 }
0x23f0   :  { %v4619_v20 = vor.u32 1.1754944e-38, %v4618_v53  ;;  %vm4617_vm8 = vcmp.eq.f32.partialorder %v4616_v35, 8.507059e+37 }
0x23f4   :  { %v5725_v3 = vpop.eup %5724 }
0x23f5   :  { %v4608_v54 = vmul.f32 %v5725_v3, %v4606_v13  ;;  %vm4613_vm1 = vweird.f32 %v5725_v3  ;;  %v5727_v4 = vpop.eup %5726 }
0x23f6   :  { %vm4614_vm4 = vmor %vm4612_vm13, %vm4613_vm1  ;;  %v4660_v61 = vadd.f32 1.0, %v5727_v4  ;;  %v4825_v4 = vld [vmem:[#allocation4 + $0xe8] sm:$0xff] }
0x23f7   :  { %v4609_v6 = vsub.f32 1.0, %v4608_v54 }
0x23f8   :  { %5728 = vrcp.f32 %v4660_v61  ;;  %v4672_v33 = vand.u32 2147483648, %v4660_v61  ;;  %vm4666_vm11 = vweird.f32 %v4660_v61  ;;  %v4670_v18 = vand.u32 2147483647, %v4660_v61 }
0x23f9   :  { %v4610_v29 = vmul.f32 %v5725_v3, %v4609_v6 }
0x23fa   :  { %v4673_v19 = vor.u32 1.1754944e-38, %v4672_v33  ;;  %vm4671_vm13 = vcmp.eq.f32.partialorder %v4670_v18, 8.507059e+37  ;;  %v4809_v33 = vld [vmem:[#allocation4 + $0x68] sm:$0xff]  ;;  %v4810_v18 = vld [vmem:[#allocation4 + $0x70] sm:$0xff] }
0x23fb   :  { %v4611_v30 = vadd.f32 %v5725_v3, %v4610_v29  ;;  %4863 = vmatpush.msra.mxu1 %v4809_v33 }
0x23fd   :  { %v4615_v37 = vsel %vm4614_vm4, %v5725_v3, %v4611_v30 }
0x23fe   :  { %v7785_v23 = vsel %vm4617_vm8, %v4619_v20, %v4615_v37  ;;  %v5729_v49 = vpop.eup %5728  ;;  %v4769_v37 = vld [vmem:[%s7978_s8 + $0x58] sm:$0xff] }
0x23ff   :  { %v4662_v22 = vmul.f32 %v5729_v49, %v4660_v61  ;;  %vm4667_vm10 = vweird.f32 %v5729_v49  ;;  %v4641_v13 = vsub.f32 1.0, %v7785_v23  ;;  %v4831_v20 = vld [vmem:[#allocation4 + $0x118] sm:$0xff]  ;;  %4779 = vmatpush.msrb.mxu3 %v4769_v37  ;;  %v4766_v61 = vld [vmem:[%s7978_s8 + $0x40] sm:$0xff] }
0x2400   :  { %vm4668_vm1 = vmor %vm4666_vm11, %vm4667_vm10  ;;  %4876 = vmatpush.msra.mxu2 %v4831_v20 }
0x2401   :  { %v4663_v58 = vsub.f32 1.0, %v4662_v22  ;;  %v4819_v22 = vld [vmem:[#allocation4 + $0xb8] sm:$0xff] }
0x2403   :  { %v4664_v17 = vmul.f32 %v5729_v49, %v4663_v58  ;;  %v4764_v58 = vld [vmem:[%s7978_s8 + $0x30] sm:$0xff] }
0x2405   :  { %v4665_v48 = vadd.f32 %v5729_v49, %v4664_v17  ;;  %v4813_v17 = vld [vmem:[#allocation4 + $0x88] sm:$0xff] }
0x2407   :  { %v4669_v55 = vsel %vm4668_vm1, %v5729_v49, %v4665_v48  ;;  %v4765_v49 = vld [vmem:[%s7978_s8 + $0x38] sm:$0xff]  ;;  %v4762_v48 = vld [vmem:[%s7978_s8 + $0x20] sm:$0xff] }
0x2408   :  { %v4674_v27 = vsel %vm4671_vm13, %v4673_v19, %v4669_v55  ;;  %v4761_v55 = vld [vmem:[%s7978_s8 + $0x18] sm:$0xff]  ;;  %v4806_v19 = vld [vmem:[#allocation4 + $0x50] sm:$0xff] }
0x2409   :  { %v4727_v62 = vmul.f32 %v4725_v51, %v4674_v27  ;;  %v4689_v29 = vsub.f32 1.0, %v4674_v27  ;;  %4864 = vmatpush.msra.mxu1 %v4806_v19  ;;  %v5435_v51 = vld [vmem:[%s7977_s7] ss:$0 sm:$0xff] }
0x2438   :  { %v4680_v9 = vpop.permute.xlu2 %4679 }
0x2439   :  { %v4682_v36 = vmul.f32 %v4680_v9, %v7785_v23  ;;  %v4768_v9 = vld [vmem:[%s7978_s8 + $0x50] sm:$0xff] }
0x243a   :  { %4780 = vmatpush.msrb.mxu3 %v4768_v9 }
0x243b   :  { %4684 = vrot.lane.b32.xlu2 %v4682_v36, %s5789_s19  ;;  %v4767_v36 = vld [vmem:[%s7978_s8 + $0x48] sm:$0xff] }
0x243c   :  { %4781 = vmatpush.msrb.mxu3 %v4767_v36 }
0x243e   :  { %4782 = vmatpush.msrb.mxu3 %v4766_v61 }
0x2440   :  { %4783 = vmatpush.msrb.mxu3 %v4765_v49 }
0x2442   :  { %4784 = vmatpush.msrb.mxu3 %v4764_v58 }
0x2443   :  { %4648 = vrot.lane.b32.xlu2 %v4647_v38, %s5791_s17 }
0x244f   :  { %v4632_v25 = vpop.permute.xlu1 %4631 }
0x2450   :  { %v4634_v14 = vmul.f32 %v4632_v25, %v7785_v23  ;;  %v4816_v25 = vld [vmem:[#allocation4 + $0xa0] sm:$0xff] }
0x2452   :  { %4636 = vrot.lane.b32.xlu1 %v4634_v14, %s5789_s19  ;;  %v4763_v14 = vld [vmem:[%s7978_s8 + $0x28] sm:$0xff] }
0x2453   :  { %4785 = vmatpush.msrb.mxu3 %v4763_v14 }
0x2455   :  { %4786 = vmatpush.msrb.mxu3 %v4762_v48 }
0x2457   :  { %4787 = vmatpush.msrb.mxu3 %v4761_v55 }
0x245d   :  { %v4730_v47 = vpop.permute.xlu0 %4729 }
0x245e   :  { %v4732_v28 = vmul.f32 %v4730_v47, %v4674_v27  ;;  %v4803_v47 = vld [vmem:[#allocation4 + $0x38] sm:$0xff] }
0x245f   :  { %4865 = vmatpush.msra.mxu1 %v4803_v47 }
0x2460   :  { %4734 = vrot.lane.b32.xlu0 %v4732_v28, %s5791_s17  ;;  %v4760_v28 = vld [vmem:[%s7978_s8 + $0x10] sm:$0xff] }
0x2461   :  { %4788 = vmatpush.msrb.mxu3 %v4760_v28 }
0x2463   :  { %4789 = vmatpush.msrb.mxu3 %v7681_v15 }
0x2495   :  { %v4685_v42 = vpop.permute.xlu2 %4684 }
0x2496   :  { %v4687_v39 = vadd.f32 %v4685_v42, %v7003_v32  ;;  %v4804_v42 = vld [vmem:[#allocation4 + $0x40] sm:$0xff] }
0x2498   :  { %5730 = vtanh.f32 %v4687_v39  ;;  %v4800_v39 = vld [vmem:[#allocation4 + $0x20] sm:$0xff] }
0x2499   :  { %4866 = vmatpush.msra.mxu1 %v4800_v39 }
0x249d   :  { %v4649_v12 = vpop.permute.xlu2 %4648 }
0x249e   :  { %v5731_v56 = vpop.eup %5730  ;;  %v4651_v54 = vmul.f32 %v4649_v12, %v7785_v23  ;;  %v4828_v23 = vld [vmem:[#allocation4 + $0x100] sm:$0xff] }
0x249f   :  { %4691 = vrot.lane.b32.xlu0 %v5731_v56, %s5792_s22  ;;  %4877 = vmatpush.msra.mxu2 %v4828_v23  ;;  %v4801_v56 = vld [vmem:[#allocation4 + $0x28] sm:$0xff] }
0x24a1   :  { %4878 = vmatpush.msra.mxu2 %v4825_v4 }
0x24c4   :  { %v4637_v60 = vpop.permute.xlu1 %4636 }
0x24c5   :  { %v4639_v31 = vadd.f32 %v4637_v60, %v7009_v52  ;;  %v7844_v60 = vld [vmem:[%s7978_s8] sm:$0xff] }
0x24c6   :  { %4790 = vmatpush.msrb.mxu3 %v7844_v60 }
0x24c7   :  { %5732 = vtanh.f32 %v4639_v31  ;;  %v4797_v31 = vld [vmem:[#allocation4 + $0x8] sm:$0xff] }
0x24c8   :  { %4867 = vmatpush.msra.mxu1 %v4797_v31  ;;  %5072 = vmatpush.msra.mxu3 %v4769_v37 }
0x24ca   :  { %5073 = vmatpush.msra.mxu3 %v4768_v9 }
0x24cc   :  { %5074 = vmatpush.msra.mxu3 %v4767_v36 }
0x24cd   :  { %v5733_v59 = vpop.eup %5732 }
0x24ce   :  { %4643 = vrot.lane.b32.xlu1 %v5733_v59, %s5792_s22  ;;  %v4798_v59 = vld [vmem:[#allocation4 + $0x10] sm:$0xff]  ;;  %5075 = vmatpush.msra.mxu3 %v4766_v61 }
0x24d0   :  { %5076 = vmatpush.msra.mxu3 %v4765_v49 }
0x24d2   :  { %v4735_v5 = vpop.permute.xlu0 %4734  ;;  %5077 = vmatpush.msra.mxu3 %v4764_v58 }
0x24d3   :  { %v7799_v41 = vadd.f32 %v4735_v5, %v4727_v62 }
0x24d4   :  { %5078 = vmatpush.msra.mxu3 %v4763_v14 }
0x24d5   :  { %5734 = vtanh.f32 %v7799_v41 }
0x24d6   :  { %4695 = vrot.lane.b32.xlu1 %v4647_v38, %s5792_s22  ;;  %5736 = vpow2.f32 %v5390_v34  ;;  %v4822_v38 = vld [vmem:[#allocation4 + $0xd0] sm:$0xff]  ;;  %5079 = vmatpush.msra.mxu3 %v4762_v48 }
0x24d7   :  { %4879 = vmatpush.msra.mxu2 %v4822_v38 }
0x24d8   :  { %5080 = vmatpush.msra.mxu3 %v4761_v55 }
0x24d9   :  { %4880 = vmatpush.msra.mxu2 %v4819_v22 }
0x24da   :  { %5081 = vmatpush.msra.mxu3 %v4760_v28 }
0x24db   :  { %v5735_v50 = vpop.eup %5734  ;;  %4881 = vmatpush.msra.mxu2 %v4816_v25 }
0x24dc   :  { %4740 = vrot.lane.b32.xlu2 %v5735_v50, %s5789_s19  ;;  %v5737_v63 = vpop.eup %5736 }
0x24dd   :  { %v4708_v8 = vadd.f32 1.0, %v5737_v63  ;;  %4882 = vmatpush.msra.mxu2 %v4813_v17 }
0x24df   :  { %5738 = vrcp.f32 %v4708_v8  ;;  %v4720_v21 = vand.u32 2147483648, %v4708_v8  ;;  %vm4714_vm8 = vweird.f32 %v4708_v8  ;;  %v4718_v43 = vand.u32 2147483647, %v4708_v8  ;;  %4883 = vmatpush.msra.mxu2 %v4810_v18 }
0x24e1   :  { %v4721_v26 = vor.u32 1.1754944e-38, %v4720_v21  ;;  %vm4719_vm11 = vcmp.eq.f32.partialorder %v4718_v43, 8.507059e+37  ;;  %v4770_v43 = vld [vmem:[%s7979_s9] sm:$0x1] }
0x24e5   :  { %v5739_v16 = vpop.eup %5738 }
0x24e6   :  { %v4710_v44 = vmul.f32 %v5739_v16, %v4708_v8  ;;  %vm4715_vm4 = vweird.f32 %v5739_v16 }
0x24e7   :  { %vm4716_vm10 = vmor %vm4714_vm8, %vm4715_vm4 }
0x24e8   :  { %v4711_v10 = vsub.f32 1.0, %v4710_v44 }
0x24ea   :  { %v4712_v45 = vmul.f32 %v5739_v16, %v4711_v10 }
0x24ec   :  { %v4713_v7 = vadd.f32 %v5739_v16, %v4712_v45 }
0x24ee   :  { %v4717_v57 = vsel %vm4716_vm10, %v5739_v16, %v4713_v7  ;;  %v4915_v16 = vld [vmem:[%s7977_s7] sm:$0x1] }
0x24ef   :  { %v4722_v46 = vsel %vm4719_vm11, %v4721_v26, %v4717_v57 }
0x2511   :  { %v4692_v40 = vpop.permute.xlu0 %4691 }
0x2512   :  { %v4694_v30 = vmul.f32 %v4692_v40, %v4689_v29  ;;  %v5399_v29 = vld [vmem:[%s7996_s5 + $0x8] sm:$0xff] }
0x2513   :  { %5110 = vmatpush.msrb.mxu0 %v5399_v29 }
0x2536   :  { %v4741_v1 = vpop.permute.xlu2 %4740 }
0x2537   :  { %v4743_v0 = vmul.f32 %v4741_v1, %v4722_v46 }
0x2539   :  { %4753 = vrot.lane.b32.xlu2 %v4743_v0, %s5791_s17 }
0x2540   :  { %v4644_v3 = vpop.permute.xlu1 %4643 }
0x2541   :  { %v4646_v11 = vmul.f32 %v4644_v3, %v4641_v13 }
0x2543   :  { %v4652_v6 = vadd.f32 %v4651_v54, %v4646_v11 }
0x2545   :  { %4745 = vrot.lane.b32.xlu0 %v4652_v6, %s5792_s22 }
0x2548   :  { %v4696_v24 = vpop.permute.xlu1 %4695 }
0x2549   :  { %v4698_v53 = vmul.f32 %v4696_v24, %v4674_v27  ;;  %v4807_v27 = vld [vmem:[#allocation4 + $0x58] sm:$0xff] }
0x254a   :  { %4884 = vmatpush.msra.mxu2 %v4807_v27 }
0x254b   :  { %v4699_v35 = vadd.f32 %v4698_v53, %v4694_v30 }
0x254c   :  { %4885 = vmatpush.msra.mxu2 %v4804_v42 }
0x254d   :  { %4749 = vrot.lane.b32.xlu1 %v4699_v35, %s5791_s17  ;;  %4918 = vrot.lane.b32.xlu0 %v5435_v51, %s5789_s19 }
0x254e   :  { %4886 = vmatpush.msra.mxu2 %v4801_v56 }
0x2550   :  { %4887 = vmatpush.msra.mxu2 %v4798_v59 }
0x2593   :  { %v4754_v5 = vpop.permute.xlu2 %4753 }
0x25b7   :  { %v4746_v15 = vpop.permute.xlu0 %4745 }
0x25bf   :  { %v4750_v62 = vpop.permute.xlu1 %4749  ;;  %v4919_v8 = vpop.permute.xlu0 %4918 }
0x25c0   :  { %v4756_v50 = vsel %vm402_vm14, %v4746_v15, %v4750_v62  ;;  %v5115_v15 = vld [vmem:[%s7980_s10] sm:$0xf] }
0x25c1   :  { %v7853_v34 = vsel %vm404_vm15, %v4756_v50, %v4754_v5  ;;  %5401 = vmatpush.msk.msrb.mxu1 %vm2530_vm5, %v5115_v15 }
0x25c2   :  { %v4772_v63 = vrot.slane %v7853_v34, 6  ;;  %v4940_v17 = vrot.slane %v7853_v34, 7 }
0x25c4   :  { %5391 = vmatmul.msk.f32.vlgmr.msrb.gmra.mxu3 %vm203_vm2, %v4772_v63  ;;  %5392 = vmatmul.msk.f32.vlgmr.msra.gmra.mxu0 %vm203_vm2, %v4772_v63 }
0x25c5   :  { %5393 = vmatmul.msk.f32.vlgmr.msra.gmra.mxu1 %vm203_vm2, %v4772_v63  ;;  %5394 = vmatmul.msk.f32.vlgmr.msra.gmra.mxu2 %vm203_vm2, %v4772_v63 }
0x2641   :  { %v4849_v44 = vpop.f32.mrf.mxu0 }
0x2642   :  { %v4869_v10 = vpop.f32.mrf.mxu1  ;;  %v4921_v45 = vadd.f32 %v4919_v8, %v4849_v44  ;;  %v4893_v3 = vrot.slane %v4849_v44, 1  ;;  %v5018_v44 = vrot.slane %v7799_v41, 7 }
0x2643   :  { %v4969_v12 = vadd.f32 %v4915_v16, %v4869_v10  ;;  %v4947_v53 = vrot.slane %v4869_v10, 1 }
0x2644   :  { %v4923_v7 = vrot.slane %v4921_v45, 1  ;;  %v4895_v54 = vadd.f32 %v4893_v3, %v7009_v52 }
0x2645   :  { %v4971_v21 = vrot.slane %v4969_v12, 1  ;;  %v4949_v37 = vadd.f32 %v4947_v53, %v7003_v32 }
0x2646   :  { %4924 = vrot.lane.b32.xlu1 %v4923_v7, %s5789_s19  ;;  %v5395_v11 = vmul.f32 -1.442695, %v4895_v54 }
0x2647   :  { %4972 = vrot.lane.b32.xlu2 %v4971_v21, %s5789_s19  ;;  %v4792_v57 = vpop.f32.mrf.mxu3  ;;  %v5396_v9 = vmul.f32 -1.442695, %v4949_v37 }
0x2648   :  { %v4793_v26 = vadd.f32 %v4792_v57, %v4770_v43  ;;  %v4889_v46 = vpop.f32.mrf.mxu2  ;;  %v5436_v43 = vld [vmem:[%s7981_s11] ss:$0 sm:$0xff] }
0x2649   :  { %v4994_v1 = vrot.slane %v4889_v46, 1 }
0x264a   :  { %4795 = vst.msk [vmem:[#allocation2 + $0xe] sm:$0x1] %vm442_vm3, %v4793_v26 }
0x264b   :  { %v7870_v0 = vadd.f32 %v4994_v1, %v7021_v2  ;;  %v5091_v2 = vld [vmem:[%s7997_s24] sm:$0xff] }
0x264c   :  { %5400 = vmatmul.msk.f32.vlgmr.msrb.gmra.mxu0 %vm2497_vm6, %v5091_v2 }
0x264d   :  { %5740 = vtanh.f32 %v7870_v0  ;;  %v5397_v7 = vmul.f32 -1.442695, %v7870_v0 }
0x264e   :  { %5742 = vpow2.f32 %v5395_v11 }
0x2653   :  { %v5741_v13 = vpop.eup %5740 }
0x2654   :  { %5022 = vrot.lane.b32.xlu0 %v5741_v13, %s5789_s19  ;;  %v5743_v6 = vpop.eup %5742  ;;  %v5147_v13 = vld [vmem:[%s7973_s3] sm:$0xff] }
0x2655   :  { %v4899_v40 = vadd.f32 1.0, %v5743_v6 }
0x2657   :  { %5744 = vrcp.f32 %v4899_v40  ;;  %v4911_v36 = vand.u32 2147483648, %v4899_v40  ;;  %vm4905_vm13 = vweird.f32 %v4899_v40  ;;  %v4909_v4 = vand.u32 2147483647, %v4899_v40 }
0x2658   :  { %5746 = vpow2.f32 %v5396_v9 }
0x2659   :  { %v4912_v38 = vor.u32 1.1754944e-38, %v4911_v36  ;;  %vm4910_vm8 = vcmp.eq.f32.partialorder %v4909_v4, 8.507059e+37 }
0x265d   :  { %v5745_v24 = vpop.eup %5744 }
0x265e   :  { %v4901_v30 = vmul.f32 %v5745_v24, %v4899_v40  ;;  %vm4906_vm1 = vweird.f32 %v5745_v24  ;;  %v5747_v25 = vpop.eup %5746 }
0x265f   :  { %vm4907_vm4 = vmor %vm4905_vm13, %vm4906_vm1  ;;  %v4953_v14 = vadd.f32 1.0, %v5747_v25  ;;  %v5052_v25 = vld [vmem:[%s7978_s8 + $0x8] sm:$0xff] }
0x2660   :  { %v4902_v35 = vsub.f32 1.0, %v4901_v30  ;;  %5082 = vmatpush.msra.mxu3 %v5052_v25 }
0x2661   :  { %5748 = vrcp.f32 %v4953_v14  ;;  %v4965_v28 = vand.u32 2147483648, %v4953_v14  ;;  %vm4959_vm11 = vweird.f32 %v4953_v14  ;;  %v4963_v42 = vand.u32 2147483647, %v4953_v14 }
0x2662   :  { %v4903_v20 = vmul.f32 %v5745_v24, %v4902_v35  ;;  %5083 = vmatpush.msra.mxu3 %v7844_v60  ;;  %v5063_v60 = vld [vmem:[%s7979_s9] sm:$0x1] }
0x2663   :  { %v4966_v56 = vor.u32 1.1754944e-38, %v4965_v28  ;;  %vm4964_vm13 = vcmp.eq.f32.partialorder %v4963_v42, 8.507059e+37  ;;  %v5437_v42 = vld [vmem:[%s7983_s13] ss:$0 sm:$0xff] }
0x2664   :  { %v4904_v23 = vadd.f32 %v5745_v24, %v4903_v20 }
0x2666   :  { %v4908_v61 = vsel %vm4907_vm4, %v5745_v24, %v4904_v23 }
0x2667   :  { %v7883_v22 = vsel %vm4910_vm8, %v4912_v38, %v4908_v61  ;;  %v5749_v48 = vpop.eup %5748 }
0x2668   :  { %v4955_v33 = vmul.f32 %v5749_v48, %v4953_v14  ;;  %vm4960_vm10 = vweird.f32 %v5749_v48  ;;  %v4934_v35 = vsub.f32 1.0, %v7883_v22  ;;  %v5171_v14 = vld [vmem:[%s7982_s12] sm:$0xff] }
0x2669   :  { %vm4961_vm1 = vmor %vm4959_vm11, %vm4960_vm10 }
0x266a   :  { %v4956_v18 = vsub.f32 1.0, %v4955_v33 }
0x266c   :  { %v4957_v27 = vmul.f32 %v5749_v48, %v4956_v18 }
0x266e   :  { %v4958_v47 = vadd.f32 %v5749_v48, %v4957_v27 }
0x2670   :  { %v4962_v39 = vsel %vm4961_vm1, %v5749_v48, %v4958_v47 }
0x2671   :  { %v7891_v31 = vsel %vm4964_vm13, %v4966_v56, %v4962_v39 }
0x2672   :  { %v5020_v10 = vmul.f32 %v5018_v44, %v7891_v31  ;;  %v4982_v4 = vsub.f32 1.0, %v7891_v31  ;;  %v5439_v44 = vld [vmem:[#allocation3] ss:$0 sm:$0xff] }
0x26a1   :  { %v4973_v49 = vpop.permute.xlu2 %4972 }
0x26a2   :  { %v4975_v58 = vmul.f32 %v4973_v49, %v7883_v22 }
0x26a4   :  { %4977 = vrot.lane.b32.xlu2 %v4975_v58, %s5789_s19 }
0x26ac   :  { %4941 = vrot.lane.b32.xlu2 %v4940_v17, %s5791_s17 }
0x26b8   :  { %v4925_v55 = vpop.permute.xlu1 %4924 }
0x26b9   :  { %v4927_v19 = vmul.f32 %v4925_v55, %v7883_v22 }
0x26bb   :  { %4929 = vrot.lane.b32.xlu1 %v4927_v19, %s5789_s19 }
0x26c6   :  { %v5023_v59 = vpop.permute.xlu0 %5022 }
0x26c7   :  { %v5025_v51 = vmul.f32 %v5023_v59, %v7891_v31  ;;  %v5238_v59 = vld [vmem:[%s7986_s16 + $0x18] sm:$0xff] }
0x26c8   :  { %5258 = vmatpush.msra.mxu1 %v5238_v59 }
0x26c9   :  { %5027 = vrot.lane.b32.xlu0 %v5025_v51, %s5791_s17  ;;  %v5112_v50 = vpop.f32.mrf.mxu0  ;;  %v5237_v51 = vld [vmem:[%s7986_s16 + $0x10] sm:$0xff] }
0x26ca   :  { %5402 = vmatmul.msk.f32.vlgmr.msrb.gmra.mxu1 %vm2526_vm7, %v5112_v50  ;;  %v5235_v50 = vld [vmem:[%s7986_s16] sm:$0xff] }
0x26cb   :  { %5259 = vmatpush.msra.mxu1 %v5237_v51 }
0x26fe   :  { %v4978_v62 = vpop.permute.xlu2 %4977 }
0x26ff   :  { %v4980_v5 = vadd.f32 %v4978_v62, %v7003_v32 }
0x2701   :  { %5750 = vtanh.f32 %v4980_v5  ;;  %v5236_v5 = vld [vmem:[%s7986_s16 + $0x8] sm:$0xff] }
0x2702   :  { %5260 = vmatpush.msra.mxu1 %v5236_v5 }
0x2704   :  { %5261 = vmatpush.msra.mxu1 %v5235_v50 }
0x2706   :  { %v4942_v54 = vpop.permute.xlu2 %4941 }
0x2707   :  { %v5751_v34 = vpop.eup %5750  ;;  %v4944_v20 = vmul.f32 %v4942_v54, %v7883_v22  ;;  %v5172_v22 = vld [vmem:[%s7982_s12 + $0x8] sm:$0xff] }
0x2708   :  { %4984 = vrot.lane.b32.xlu0 %v5751_v34, %s5792_s22  ;;  %5194 = vmatpush.msrb.mxu3 %v5172_v22  ;;  %v5438_v34 = vld [vmem:[%s7985_s15] ss:$0 sm:$0xff] }
0x270a   :  { %5195 = vmatpush.msrb.mxu3 %v5171_v14 }
0x272d   :  { %v4930_v63 = vpop.permute.xlu1 %4929 }
0x272e   :  { %v4932_v8 = vadd.f32 %v4930_v63, %v7009_v52 }
0x2730   :  { %5752 = vtanh.f32 %v4932_v8 }
0x2736   :  { %v5753_v16 = vpop.eup %5752 }
0x2737   :  { %4936 = vrot.lane.b32.xlu1 %v5753_v16, %s5792_s22 }
0x273b   :  { %v5028_v45 = vpop.permute.xlu0 %5027 }
0x273c   :  { %v5030_v32 = vadd.f32 %v5028_v45, %v5020_v10 }
0x273e   :  { %5754 = vtanh.f32 %v5030_v32 }
0x273f   :  { %4988 = vrot.lane.b32.xlu1 %v4940_v17, %s5792_s22  ;;  %5756 = vpow2.f32 %v5397_v7 }
0x2744   :  { %v5755_v12 = vpop.eup %5754 }
0x2745   :  { %5033 = vrot.lane.b32.xlu2 %v5755_v12, %s5789_s19  ;;  %v5757_v52 = vpop.eup %5756 }
0x2746   :  { %v5001_v21 = vadd.f32 1.0, %v5757_v52 }
0x2747   :  { %v5143_v41 = vpop.f32.mrf.mxu1 }
0x2748   :  { %5758 = vrcp.f32 %v5001_v21  ;;  %v5144_v57 = vadd.f32 %v5436_v43, %v5143_v41  ;;  %v5013_v6 = vand.u32 2147483648, %v5001_v21  ;;  %vm5007_vm7 = vweird.f32 %v5001_v21 }
0x2749   :  { %v5011_v40 = vand.u32 2147483647, %v5001_v21 }
0x274a   :  { %v5146_v26 = vmax.f32 %v5144_v57, 0.0  ;;  %v5014_v2 = vor.u32 1.1754944e-38, %v5013_v6 }
0x274b   :  { %vm5012_vm8 = vcmp.eq.f32.partialorder %v5011_v40, 8.507059e+37 }
0x274c   :  { %5166 = vmatpush.msrb.mxu2 %v5146_v26 }
0x274d   :  { %5403 = vmatmul.msk.f32.vlgmr.msrb.gmra.mxu2 %vm2497_vm6, %v5147_v13 }
0x274e   :  { %v5759_v46 = vpop.eup %5758 }
0x274f   :  { %v5003_v1 = vmul.f32 %v5759_v46, %v5001_v21  ;;  %vm5008_vm5 = vweird.f32 %v5759_v46 }
0x2750   :  { %vm5009_vm4 = vmor %vm5007_vm7, %vm5008_vm5 }
0x2751   :  { %v5004_v0 = vsub.f32 1.0, %v5003_v1 }
0x2753   :  { %v5005_v3 = vmul.f32 %v5759_v46, %v5004_v0 }
0x2755   :  { %v5006_v11 = vadd.f32 %v5759_v46, %v5005_v3 }
0x2757   :  { %v5010_v29 = vsel %vm5009_vm4, %v5759_v46, %v5006_v11 }
0x2758   :  { %v5015_v24 = vsel %vm5012_vm8, %v5014_v2, %v5010_v29 }
0x277a   :  { %v4985_v36 = vpop.permute.xlu0 %4984 }
0x277b   :  { %v4987_v38 = vmul.f32 %v4985_v36, %v4982_v4 }
0x279f   :  { %v5034_v30 = vpop.permute.xlu2 %5033 }
0x27a0   :  { %v5036_v53 = vmul.f32 %v5034_v30, %v5015_v24 }
0x27a2   :  { %5046 = vrot.lane.b32.xlu2 %v5036_v53, %s5791_s17 }
0x27a9   :  { %v4937_v37 = vpop.permute.xlu1 %4936 }
0x27aa   :  { %v4939_v9 = vmul.f32 %v4937_v37, %v4934_v35 }
0x27ac   :  { %v4945_v23 = vadd.f32 %v4944_v20, %v4939_v9 }
0x27ae   :  { %5038 = vrot.lane.b32.xlu0 %v4945_v23, %s5792_s22 }
0x27b1   :  { %v4989_v61 = vpop.permute.xlu1 %4988 }
0x27b2   :  { %v4991_v49 = vmul.f32 %v4989_v61, %v7891_v31  ;;  %v5206_v31 = vld [vmem:[%s7984_s14] sm:$0xff] }
0x27b3   :  { %5229 = vmatpush.msra.mxu0 %v5206_v31 }
0x27b4   :  { %v4992_v58 = vadd.f32 %v4991_v49, %v4987_v38 }
0x27b6   :  { %5042 = vrot.lane.b32.xlu1 %v4992_v58, %s5791_s17 }
0x27d0   :  { %v5168_v27 = vpop.f32.mrf.mxu2 }
0x27fc   :  { %v5047_v33 = vpop.permute.xlu2 %5046 }
0x2820   :  { %v5039_v17 = vpop.permute.xlu0 %5038 }
0x2828   :  { %v5043_v48 = vpop.permute.xlu1 %5042 }
0x2829   :  { %v5049_v18 = vsel %vm402_vm14, %v5039_v17, %v5043_v48 }
0x282a   :  { %v5050_v55 = vsel %vm404_vm15, %v5049_v18, %v5047_v33 }
0x282b   :  { %v5065_v19 = vrot.slane %v5050_v55, 7 }
0x282d   :  { %5398 = vmatmul.msk.f32.vlgmr.msra.gmra.mxu3 %vm203_vm2, %v5065_v19 }
0x2835   :  { %5404 = vmatmul.msk.f32.vlgmr.msrb.gmra.mxu3 %vm2585_vm12, %v5168_v27 }
0x28b0   :  { %v5085_v47 = vpop.f32.mrf.mxu3 }
0x28b1   :  { %v5086_v28 = vadd.f32 %v5085_v47, %v5063_v60 }
0x28b3   :  { %5088 = vst.msk [vmem:[#allocation2 + $0xf] sm:$0x1] %vm442_vm3, %v5086_v28 }
0x28b8   :  { %v5197_v39 = vpop.f32.mrf.mxu3 }
0x28b9   :  { %v5198_v56 = vadd.f32 %v5437_v42, %v5197_v39 }
0x28bb   :  { %5201 = vrot.lane.b32.xlu0 %v5198_v56, %s5793_s4 }
0x292d   :  { %v5202_v15 = vpop.permute.xlu0 %5201 }
0x292e   :  { %5204 = vst.msk [vmem:[#allocation2 + $0x8] sm:$0xff] %vm2613_vm0, %v5202_v15 }
0x2935   :  { %v5205_v62 = vld [vmem:[#allocation2 + $0x8] sm:$0xff] }
0x2936   :  { %5405 = vmatmul.msk.f32.vlgmr.msra.gmra.mxu0 %vm2497_vm6, %v5205_v62 }
0x29b3   :  { %v5231_v63 = vpop.f32.mrf.mxu0 }
0x29b4   :  { %v5232_v8 = vadd.f32 %v5438_v34, %v5231_v63 }
0x29b6   :  { %v5234_v16 = vmax.f32 %v5232_v8, 0.0 }
0x29b8   :  { %5406 = vmatmul.msk.f32.vlgmr.msra.gmra.mxu1 %vm402_vm14, %v5234_v16 }
0x2a35   :  { %v5263_v10 = vpop.f32.mrf.mxu1 }
0x2a36   :  { %v5264_v45 = vadd.f32 %v5439_v44, %v5263_v10 }
0x2a38   :  { %5407 = vst.msk [vmem:[%s7988_s18 + $0x8] sm:$0xff] %vm2676_vm9, %v5264_v45 }
0x2a39   :  { %5272 = vsyncpa [#allocation5], 1 }

</bundles_post_ra>
